<compile_context>
chip_gen: v7x
topology: tpu7x:2x2x1
jax: 0.10.0
libtpu: 0.0.40
codegen_flags: <defaults>
</compile_context>

<pallas_src>
import functools
import math

import jax
import jax.numpy as jnp
from jax.experimental import pallas as pl
from jax.experimental.pallas import tpu as pltpu


BN_EPS = 1e-5


# ------------------------------ small helpers -------------------------------

def _round_up(x, m):
    return (x + m - 1) // m * m


def _pick_row_tile(m, pref):
    """Largest 'nice' row tile (multiple of 8) dividing m; falls back to m."""
    for t in (pref, 1024, 512, 256, 128, 64, 32, 16, 8):
        if t <= m and m % t == 0:
            return t
    return m


# ------------------------- conv GEMM (+ BN statistics) ----------------------

def _conv_gemm_kernel(x_ref, w_ref, y_ref, sum_ref, ssq_ref, acc_ref, *, n_k):
    i = pl.program_id(0)
    k = pl.program_id(1)

    @pl.when(k == 0)
    def _():
        acc_ref[...] = jnp.zeros_like(acc_ref)

    acc_ref[...] += jnp.dot(x_ref[...], w_ref[...],
                            preferred_element_type=jnp.float32)

    # Channel-stat accumulators are resident across the whole grid; zero them
    # exactly once (first M tile, last K step comes right after).
    @pl.when(jnp.logical_and(k == n_k - 1, i == 0))
    def _():
        sum_ref[...] = jnp.zeros_like(sum_ref)
        ssq_ref[...] = jnp.zeros_like(ssq_ref)

    @pl.when(k == n_k - 1)
    def _():
        acc = acc_ref[...]
        y_ref[...] = acc
        sum_ref[...] += jnp.sum(acc, axis=0, keepdims=True)
        ssq_ref[...] += jnp.sum(acc * acc, axis=0, keepdims=True)


def pallas_conv_gemm(patches, wmat, *, tm_pref=512, tk_pref=512):
    """y = patches @ wmat  (bf16 x bf16, f32 accumulation) + per-channel stats.

    patches: (M, K) bf16, wmat: (K, N) bf16.
    Returns y (M, N) f32, ch_sum (N,) f32, ch_sumsq (N,) f32.
    """
    M, K = patches.shape
    K2, N = wmat.shape
    assert K == K2

    # M tiling: pad at most 7 zero rows (zero rows contribute nothing to the
    # BN statistics since the conv has no bias), never a "whole matrix" block.
    Mp = _round_up(M, 8)
    if Mp != M:
        patches = jnp.pad(patches, ((0, Mp - M), (0, 0)))
    tm = _pick_row_tile(Mp, tm_pref)

    # K reduction axis: only tiled when K is large (toy shapes use one slab).
    if K > 1024:
        tk = tk_pref
        Kp = _round_up(K, tk)
        patches = jnp.pad(patches, ((0, 0), (0, Kp - K)))
        wmat = jnp.pad(wmat, ((0, Kp - K), (0, 0)))
    else:
        tk, Kp = K, K
    n_k = Kp // tk
    grid = (Mp // tm, n_k)

    y, s, ssq = pl.pallas_call(
        functools.partial(_conv_gemm_kernel, n_k=n_k),
        out_shape=(
            jax.ShapeDtypeStruct((Mp, N), jnp.float32),
            jax.ShapeDtypeStruct((1, N), jnp.float32),
            jax.ShapeDtypeStruct((1, N), jnp.float32),
        ),
        grid_spec=pltpu.PrefetchScalarGridSpec(
            num_scalar_prefetch=0,
            grid=grid,
            in_specs=[
                pl.BlockSpec((tm, tk), lambda i, k: (i, k)),
                pl.BlockSpec((tk, N), lambda i, k: (k, 0)),
            ],
            out_specs=[
                pl.BlockSpec((tm, N), lambda i, k: (i, 0)),
                pl.BlockSpec((1, N), lambda i, k: (0, 0)),
                pl.BlockSpec((1, N), lambda i, k: (0, 0)),
            ],
            scratch_shapes=[pltpu.VMEM((tm, N), jnp.float32)],
        ),
        compiler_params=pltpu.CompilerParams(
            # Both axes "arbitrary": the stat outputs accumulate across the
            # M axis (resident outputs), so M cannot be marked parallel.
            dimension_semantics=("arbitrary", "arbitrary")),
    )(patches, wmat)
    if Mp != M:
        y = y[:M]
    return y, s[0], ssq[0]


# --------------------- fused BN-apply / ReLU / residual ---------------------

def _bn_apply_kernel(x_ref, s_ref, b_ref, o_ref, *, relu):
    y = x_ref[...].astype(jnp.float32) * s_ref[...] + b_ref[...]
    if relu:
        y = jnp.maximum(y, 0.0)
    o_ref[...] = y.astype(o_ref.dtype)


def _bn_apply_res_kernel(x_ref, s_ref, b_ref, r_ref, o_ref):
    y = (x_ref[...].astype(jnp.float32) * s_ref[...] + b_ref[...]
         + r_ref[...].astype(jnp.float32))
    o_ref[...] = jnp.maximum(y, 0.0).astype(o_ref.dtype)


def pallas_bn_act(y_flat, ch_sum, ch_ssq, gamma, beta, *, relu=True,
                  residual_flat=None, out_dtype=jnp.bfloat16, row_pref=1024):
    """BatchNorm (batch statistics) + optional residual add + optional ReLU.

    y_flat: (M, C) f32 conv output; stats come fused out of the conv GEMM.
    """
    M, C = y_flat.shape
    mean = ch_sum / M
    var = jnp.maximum(ch_ssq / M - mean * mean, 0.0)
    scale = gamma * jax.lax.rsqrt(var + BN_EPS)
    shift = beta - mean * scale

    # Lane-dense packed view: (M, C) row-major == (M*C/128, 128) row-major.
    packed = (M * C) % 128 == 0 and 128 % C == 0
    if packed:
        g = 128 // C
        Mp, L = (M * C) // 128, 128
        x2 = y_flat.reshape(Mp, L)
        s2 = jnp.tile(scale, g).reshape(1, L)
        b2 = jnp.tile(shift, g).reshape(1, L)
        r2 = None if residual_flat is None else residual_flat.reshape(Mp, L)
    else:
        Mp, L = M, C
        x2 = y_flat
        s2 = scale.reshape(1, L)
        b2 = shift.reshape(1, L)
        r2 = residual_flat

    tm = _pick_row_tile(Mp, row_pref)
    grid = (Mp // tm,)
    row_spec = pl.BlockSpec((tm, L), lambda i: (i, 0))
    vec_spec = pl.BlockSpec((1, L), lambda i: (0, 0))

    if r2 is None:
        kernel = functools.partial(_bn_apply_kernel, relu=relu)
        in_specs = [row_spec, vec_spec, vec_spec]
        args = (x2, s2, b2)
    else:
        assert relu
        kernel = _bn_apply_res_kernel
        in_specs = [row_spec, vec_spec, vec_spec, row_spec]
        args = (x2, s2, b2, r2)

    out = pl.pallas_call(
        kernel,
        out_shape=jax.ShapeDtypeStruct((Mp, L), out_dtype),
        grid_spec=pltpu.PrefetchScalarGridSpec(
            num_scalar_prefetch=0,
            grid=grid,
            in_specs=in_specs,
            out_specs=row_spec,
        ),
        compiler_params=pltpu.CompilerParams(
            dimension_semantics=("parallel",)),
    )(*args)
    return out.reshape(M, C)


# -------------------------------- max pool ----------------------------------

def _maxpool_kernel(x_ref, o_ref):
    x = x_ref[...].astype(jnp.float32)
    o_ref[...] = jnp.max(x, axis=1).astype(o_ref.dtype)


def pallas_maxpool(pool_patches, out_dtype=jnp.bfloat16, row_pref=1024):
    """pool_patches: (M, k*k, C) tap-major -> (M, C) max over the window."""
    M, KK, C = pool_patches.shape
    tm = _pick_row_tile(M, row_pref)
    grid = (M // tm,)
    return pl.pallas_call(
        _maxpool_kernel,
        out_shape=jax.ShapeDtypeStruct((M, C), out_dtype),
        grid_spec=pltpu.PrefetchScalarGridSpec(
            num_scalar_prefetch=0,
            grid=grid,
            in_specs=[pl.BlockSpec((tm, KK, C), lambda i: (i, 0, 0))],
            out_specs=pl.BlockSpec((tm, C), lambda i: (i, 0)),
        ),
        compiler_params=pltpu.CompilerParams(
            dimension_semantics=("parallel",)),
    )(pool_patches)


# --------------- fused head: avgpool + flatten + trans + fc -----------------

def _head_kernel(x_ref, w1_ref, b1_ref, w2_ref, b2_ref, o_ref):
    pooled = jnp.mean(x_ref[...].astype(jnp.float32), axis=1)        # (tb, C)
    h = jnp.dot(pooled, w1_ref[...],
                preferred_element_type=jnp.float32) + b1_ref[...]
    o_ref[...] = jnp.dot(h, w2_ref[...],
                         preferred_element_type=jnp.float32) + b2_ref[...]


def pallas_head(x_nhwc, w1, b1, w2, b2, num_class):
    """AdaptiveAvgPool2d((1,1)) + Flatten + trans_layer + fc, fused."""
    Nb, H, W, C = x_nhwc.shape
    x3 = x_nhwc.reshape(Nb, H * W, C)
    H1 = w1.shape[1]
    Np = _round_up(num_class, 128)          # lane-dense fc output, slice after
    w2p = jnp.pad(w2, ((0, 0), (0, Np - num_class)))
    b2p = jnp.pad(b2, (0, Np - num_class))
    tb = _pick_row_tile(Nb, 256)
    grid = (Nb // tb,)
    out = pl.pallas_call(
        _head_kernel,
        out_shape=jax.ShapeDtypeStruct((Nb, Np), jnp.float32),
        grid_spec=pltpu.PrefetchScalarGridSpec(
            num_scalar_prefetch=0,
            grid=grid,
            in_specs=[
                pl.BlockSpec((tb, H * W, C), lambda i: (i, 0, 0)),
                pl.BlockSpec((C, H1), lambda i: (0, 0)),
                pl.BlockSpec((1, H1), lambda i: (0, 0)),
                pl.BlockSpec((H1, Np), lambda i: (0, 0)),
                pl.BlockSpec((1, Np), lambda i: (0, 0)),
            ],
            out_specs=pl.BlockSpec((tb, Np), lambda i: (i, 0)),
        ),
        compiler_params=pltpu.CompilerParams(
            dimension_semantics=("parallel",)),
    )(x3, w1, b1.reshape(1, H1), w2p, b2p.reshape(1, Np))
    return out[:, :num_class]


# ------------------------------- host glue ----------------------------------

def _im2col_nhwc(x, kh, kw, stride, pad, pad_value=0.0):
    """Tap-major patches: (N*Ho*Wo, kh*kw*C), channels fastest within a tap."""
    N, H, W, C = x.shape
    xp = jnp.pad(x, ((0, 0), (pad, pad), (pad, pad), (0, 0)),
                 constant_values=pad_value)
    Ho = (H + 2 * pad - kh) // stride + 1
    Wo = (W + 2 * pad - kw) // stride + 1
    taps = []
    for i in range(kh):
        for j in range(kw):
            taps.append(xp[:, i:i + (Ho - 1) * stride + 1:stride,
                           j:j + (Wo - 1) * stride + 1:stride, :])
    cols = jnp.concatenate(taps, axis=-1)            # (N, Ho, Wo, kh*kw*C)
    return cols.reshape(N * Ho * Wo, kh * kw * C), Ho, Wo


def _pool_patches_nhwc(x, k, stride, pad, pad_value):
    """(M, k*k, C) tap-major window tensor for max-pooling."""
    N, H, W, C = x.shape
    xp = jnp.pad(x, ((0, 0), (pad, pad), (pad, pad), (0, 0)),
                 constant_values=pad_value)
    Ho = (H + 2 * pad - k) // stride + 1
    Wo = (W + 2 * pad - k) // stride + 1
    taps = []
    for i in range(k):
        for j in range(k):
            taps.append(xp[:, i:i + (Ho - 1) * stride + 1:stride,
                           j:j + (Wo - 1) * stride + 1:stride, :])
    cols = jnp.stack(taps, axis=3)                   # (N, Ho, Wo, k*k, C)
    return cols.reshape(N * Ho * Wo, k * k, C), Ho, Wo


def conv_bn(x_nhwc, w, gamma, beta, *, stride, pad, relu=True, residual=None):
    """Conv2d (no bias, bf16 MXU path) + BatchNorm(batch stats) [+res] [+ReLU]."""
    N = x_nhwc.shape[0]
    Cout, Cin, kh, kw = w.shape
    patches, Ho, Wo = _im2col_nhwc(x_nhwc.astype(jnp.bfloat16),
                                   kh, kw, stride, pad)
    wmat = (w.transpose(2, 3, 1, 0)
             .reshape(kh * kw * Cin, Cout).astype(jnp.bfloat16))
    y, ch_sum, ch_ssq = pallas_conv_gemm(patches, wmat)
    res_flat = None if residual is None else residual.reshape(-1, Cout)
    out = pallas_bn_act(y, ch_sum, ch_ssq, gamma, beta,
                        relu=relu, residual_flat=res_flat)
    return out.reshape(N, Ho, Wo, Cout)


# ------------------------------ ResNet model ---------------------------------

def basic_block(x, p, stride):
    y = conv_bn(x, p["conv1_w"], p["bn1_g"], p["bn1_b"],
                stride=stride, pad=1, relu=True)
    if "down_w" in p:
        identity = conv_bn(x, p["down_w"], p["down_g"], p["down_b"],
                           stride=stride, pad=0, relu=False)
    else:
        identity = x
    # bn2 + residual add + ReLU fused in one elementwise pass.
    return conv_bn(y, p["conv2_w"], p["bn2_g"], p["bn2_b"],
                   stride=1, pad=1, relu=True, residual=identity)


def resnet_forward(x_nchw, params):
    # PyTorch hands us NCHW; convert once to NHWC bf16 (channels on lanes).
    x = jnp.transpose(x_nchw, (0, 2, 3, 1)).astype(jnp.bfloat16)
    # ---- resnet_layer (backbone minus fc) ----
    x = conv_bn(x, params["conv1_w"], params["bn1_g"], params["bn1_b"],
                stride=2, pad=3, relu=True)
    N, H, W, C = x.shape
    patches, Ho, Wo = _pool_patches_nhwc(x, 3, 2, 1, pad_value=-1e30)
    x = pallas_maxpool(patches).reshape(N, Ho, Wo, C)
    for layer, stride in zip(params["layers"], (1, 2, 2, 2)):
        for bi, blk in enumerate(layer):
            x = basic_block(x, blk, stride if bi == 0 else 1)
    # ---- avgpool + Flatten + trans_layer + fc (fused head) ----
    return pallas_head(x, params["trans_w"], params["trans_b"],
                       params["fc_w"], params["fc_b"],
                       num_class=params["fc_b"].shape[0])


def init_params(key, num_class, in_ch=3, base=8, blocks=(1, 1, 1, 1)):
    keys = iter(jax.random.split(key, 128))

    def conv_w(cout, cin, k):
        fan_in = cin * k * k
        return (jax.random.normal(next(keys), (cout, cin, k, k), jnp.float32)
                / math.sqrt(fan_in))

    def lin(cin, cout):
        w = (jax.random.normal(next(keys), (cin, cout), jnp.float32)
             / math.sqrt(cin))
        b = jnp.zeros((cout,), jnp.float32)
        return w, b

    chans = [base, base * 2, base * 4, base * 8]
    params = {
        "conv1_w": conv_w(base, in_ch, 7),
        "bn1_g": jnp.ones((base,), jnp.float32),
        "bn1_b": jnp.zeros((base,), jnp.float32),
        "layers": [],
    }
    in_c = base
    for li, (out_c, nblk) in enumerate(zip(chans, blocks)):
        layer = []
        for bi in range(nblk):
            stride = (1, 2, 2, 2)[li] if bi == 0 else 1
            blk = {
                "conv1_w": conv_w(out_c, in_c, 3),
                "bn1_g": jnp.ones((out_c,), jnp.float32),
                "bn1_b": jnp.zeros((out_c,), jnp.float32),
                "conv2_w": conv_w(out_c, out_c, 3),
                "bn2_g": jnp.ones((out_c,), jnp.float32),
                "bn2_b": jnp.zeros((out_c,), jnp.float32),
            }
            if stride != 1 or in_c != out_c:
                blk["down_w"] = conv_w(out_c, in_c, 1)
                blk["down_g"] = jnp.ones((out_c,), jnp.float32)
                blk["down_b"] = jnp.zeros((out_c,), jnp.float32)
            layer.append(blk)
            in_c = out_c
        params["layers"].append(layer)

    params["trans_w"], params["trans_b"] = lin(chans[-1], 256)   # trans_layer
    params["fc_w"], params["fc_b"] = lin(256, num_class)         # fc
    return params


if __name__ == "__main__":
    key = jax.random.PRNGKey(0)
    k_param, k_x = jax.random.split(key)

    num_class = 10
    params = init_params(k_param, num_class)
    x = jax.random.normal(k_x, (2, 3, 32, 32), jnp.float32)   # NCHW, like PyTorch

    fwd = jax.jit(resnet_forward)
    out = fwd(x, params)
    out = jax.block_until_ready(out)
    assert out.shape == (2, num_class), out.shape
    assert bool(jnp.all(jnp.isfinite(out)))
    print("KERNEL_OK")
</pallas_src>

<mosaic_0001>
module attributes {stable_mosaic.version = 11 : i64} {
  func.func @_conv_gemm_kernel(%arg0: i32, %arg1: i32, %arg2: memref<512x147xbf16, #tpu.memory_space<vmem>>, %arg3: memref<147x8xbf16, #tpu.memory_space<vmem>>, %arg4: memref<512x8xf32, #tpu.memory_space<vmem>>, %arg5: memref<1x8xf32, #tpu.memory_space<vmem>>, %arg6: memref<1x8xf32, #tpu.memory_space<vmem>>, %arg7: memref<512x8xf32, #tpu.memory_space<vmem>>) attributes {dimension_semantics = [#tpu.dimension_semantics<arbitrary>, #tpu.dimension_semantics<arbitrary>], iteration_bounds = array<i64: 1, 1>, scalar_prefetch = 0 : i64, scratch_operands = 1 : i64, tpu.core_type = #tpu.core_type<tc>, window_params = [{transform_indices = @transform_0, window_bounds = array<i64: 512, 147>}, {transform_indices = @transform_1, window_bounds = array<i64: 147, 8>}, {transform_indices = @transform_2, window_bounds = array<i64: 512, 8>}, {pipeline_mode = #tpu.pipeline_mode<synchronous>, transform_indices = @transform_3, window_bounds = array<i64: 1, 8>}, {pipeline_mode = #tpu.pipeline_mode<synchronous>, transform_indices = @transform_4, window_bounds = array<i64: 1, 8>}]} {
    %c0_i32 = arith.constant 0 : i32
    %0 = arith.cmpi eq, %arg1, %c0_i32 : i32
    %1 = arith.extui %0 : i1 to i32
    %c0_i32_0 = arith.constant 0 : i32
    %2 = arith.cmpi ne, %1, %c0_i32_0 : i32
    scf.if %2 {
      %cst_13 = arith.constant 0.000000e+00 : f32
      %17 = vector.broadcast %cst_13 : f32 to vector<512x8xf32>
      %c0_14 = arith.constant 0 : index
      %c0_15 = arith.constant 0 : index
      %18 = vector.load %arg7[%c0_14, %c0_15] : memref<512x8xf32, #tpu.memory_space<vmem>>, vector<512x8xf32>
      tpu.vector_store %arg7[%c0_14, %c0_15], %17 {strides = array<i32>} : memref<512x8xf32, #tpu.memory_space<vmem>>, vector<512x8xf32>,
    } else {
    }
    %c0 = arith.constant 0 : index
    %c0_1 = arith.constant 0 : index
    %3 = vector.load %arg7[%c0, %c0_1] : memref<512x8xf32, #tpu.memory_space<vmem>>, vector<512x8xf32>
    %c0_2 = arith.constant 0 : index
    %c0_3 = arith.constant 0 : index
    %4 = vector.load %arg2[%c0_2, %c0_3] : memref<512x147xbf16, #tpu.memory_space<vmem>>, vector<512x147xbf16>
    %c0_4 = arith.constant 0 : index
    %c0_5 = arith.constant 0 : index
    %5 = vector.load %arg3[%c0_4, %c0_5] : memref<147x8xbf16, #tpu.memory_space<vmem>>, vector<147x8xbf16>
    %cst = arith.constant dense<0.000000e+00> : vector<512x8xf32>
    %6 = tpu.matmul %4, %5, %cst {dimension_numbers = #tpu.dot_dimension_numbers<[1], [0], [0], [1], [0, 0, 1, 1], [], []>} : vector<512x147xbf16>, vector<147x8xbf16>, vector<512x8xf32> -> vector<512x8xf32>
    %7 = arith.addf %3, %6 : vector<512x8xf32>
    %c0_6 = arith.constant 0 : index
    %c0_7 = arith.constant 0 : index
    %8 = vector.load %arg7[%c0_6, %c0_7] : memref<512x8xf32, #tpu.memory_space<vmem>>, vector<512x8xf32>
    tpu.vector_store %arg7[%c0_6, %c0_7], %7 {strides = array<i32>} : memref<512x8xf32, #tpu.memory_space<vmem>>, vector<512x8xf32>,
    %c0_i32_8 = arith.constant 0 : i32
    %9 = arith.cmpi eq, %arg1, %c0_i32_8 : i32
    %c0_i32_9 = arith.constant 0 : i32
    %10 = arith.cmpi eq, %arg0, %c0_i32_9 : i32
    %11 = arith.andi %9, %10 : i1
    %12 = arith.extui %11 : i1 to i32
    %c0_i32_10 = arith.constant 0 : i32
    %13 = arith.cmpi ne, %12, %c0_i32_10 : i32
    scf.if %13 {
      %cst_13 = arith.constant 0.000000e+00 : f32
      %17 = vector.broadcast %cst_13 : f32 to vector<1x8xf32>
      %c0_14 = arith.constant 0 : index
      %c0_15 = arith.constant 0 : index
      %18 = vector.load %arg5[%c0_14, %c0_15] : memref<1x8xf32, #tpu.memory_space<vmem>>, vector<1x8xf32>
      tpu.vector_store %arg5[%c0_14, %c0_15], %17 {strides = array<i32>} : memref<1x8xf32, #tpu.memory_space<vmem>>, vector<1x8xf32>,
      %cst_16 = arith.constant 0.000000e+00 : f32
      %19 = vector.broadcast %cst_16 : f32 to vector<1x8xf32>
      %c0_17 = arith.constant 0 : index
      %c0_18 = arith.constant 0 : index
      %20 = vector.load %arg6[%c0_17, %c0_18] : memref<1x8xf32, #tpu.memory_space<vmem>>, vector<1x8xf32>
      tpu.vector_store %arg6[%c0_17, %c0_18], %19 {strides = array<i32>} : memref<1x8xf32, #tpu.memory_space<vmem>>, vector<1x8xf32>,
    } else {
    }
    %c0_i32_11 = arith.constant 0 : i32
    %14 = arith.cmpi eq, %arg1, %c0_i32_11 : i32
    %15 = arith.extui %14 : i1 to i32
    %c0_i32_12 = arith.constant 0 : i32
    %16 = arith.cmpi ne, %15, %c0_i32_12 : i32
    scf.if %16 {
      %c0_13 = arith.constant 0 : index
      %c0_14 = arith.constant 0 : index
      %17 = vector.load %arg7[%c0_13, %c0_14] : memref<512x8xf32, #tpu.memory_space<vmem>>, vector<512x8xf32>
      %c0_15 = arith.constant 0 : index
      %c0_16 = arith.constant 0 : index
      %18 = vector.load %arg4[%c0_15, %c0_16] : memref<512x8xf32, #tpu.memory_space<vmem>>, vector<512x8xf32>
      tpu.vector_store %arg4[%c0_15, %c0_16], %17 {strides = array<i32>} : memref<512x8xf32, #tpu.memory_space<vmem>>, vector<512x8xf32>,
      %c0_17 = arith.constant 0 : index
      %c0_18 = arith.constant 0 : index
      %19 = vector.load %arg5[%c0_17, %c0_18] : memref<1x8xf32, #tpu.memory_space<vmem>>, vector<1x8xf32>
      %cst_19 = arith.constant dense<0.000000e+00> : vector<8xf32>
      %20 = vector.multi_reduction <add>, %17, %cst_19 [0] : vector<512x8xf32> to vector<8xf32>
      %21 = vector.shape_cast %20 : vector<8xf32> to vector<1x8xf32>
      %22 = arith.addf %19, %21 : vector<1x8xf32>
      %c0_20 = arith.constant 0 : index
      %c0_21 = arith.constant 0 : index
      %23 = vector.load %arg5[%c0_20, %c0_21] : memref<1x8xf32, #tpu.memory_space<vmem>>, vector<1x8xf32>
      tpu.vector_store %arg5[%c0_20, %c0_21], %22 {strides = array<i32>} : memref<1x8xf32, #tpu.memory_space<vmem>>, vector<1x8xf32>,
      %c0_22 = arith.constant 0 : index
      %c0_23 = arith.constant 0 : index
      %24 = vector.load %arg6[%c0_22, %c0_23] : memref<1x8xf32, #tpu.memory_space<vmem>>, vector<1x8xf32>
      %25 = arith.mulf %17, %17 : vector<512x8xf32>
      %cst_24 = arith.constant dense<0.000000e+00> : vector<8xf32>
      %26 = vector.multi_reduction <add>, %25, %cst_24 [0] : vector<512x8xf32> to vector<8xf32>
      %27 = vector.shape_cast %26 : vector<8xf32> to vector<1x8xf32>
      %28 = arith.addf %24, %27 : vector<1x8xf32>
      %c0_25 = arith.constant 0 : index
      %c0_26 = arith.constant 0 : index
      %29 = vector.load %arg6[%c0_25, %c0_26] : memref<1x8xf32, #tpu.memory_space<vmem>>, vector<1x8xf32>
      tpu.vector_store %arg6[%c0_25, %c0_26], %28 {strides = array<i32>} : memref<1x8xf32, #tpu.memory_space<vmem>>, vector<1x8xf32>,
    } else {
    }
    return
  }
  func.func @transform_0(%arg0: i32, %arg1: i32) -> (i32, i32) {
    %c0_i32 = arith.constant 0 : i32
    return %arg0, %arg1 : i32, i32
  }
  func.func @transform_1(%arg0: i32, %arg1: i32) -> (i32, i32) {
    %c0_i32 = arith.constant 0 : i32
    %c0_i32_0 = arith.constant 0 : i32
    return %arg1, %c0_i32 : i32, i32
  }
  func.func @transform_2(%arg0: i32, %arg1: i32) -> (i32, i32) {
    %c0_i32 = arith.constant 0 : i32
    %c0_i32_0 = arith.constant 0 : i32
    return %arg0, %c0_i32 : i32, i32
  }
  func.func @transform_3(%arg0: i32, %arg1: i32) -> (i32, i32) {
    %c0_i32 = arith.constant 0 : i32
    %c0_i32_0 = arith.constant 0 : i32
    %c0_i32_1 = arith.constant 0 : i32
    return %c0_i32, %c0_i32_0 : i32, i32
  }
  func.func @transform_4(%arg0: i32, %arg1: i32) -> (i32, i32) {
    %c0_i32 = arith.constant 0 : i32
    %c0_i32_0 = arith.constant 0 : i32
    %c0_i32_1 = arith.constant 0 : i32
    return %c0_i32, %c0_i32_0 : i32, i32
  }
}

module attributes {stable_mosaic.version = 11 : i64} {
  func.func @_bn_apply_kernel(%arg0: i32, %arg1: memref<32x128xf32, #tpu.memory_space<vmem>>, %arg2: memref<1x128xf32, #tpu.memory_space<vmem>>, %arg3: memref<1x128xf32, #tpu.memory_space<vmem>>, %arg4: memref<32x128xbf16, #tpu.memory_space<vmem>>) attributes {dimension_semantics = [#tpu.dimension_semantics<parallel>], iteration_bounds = array<i64: 1>, scalar_prefetch = 0 : i64, scratch_operands = 0 : i64, tpu.core_type = #tpu.core_type<tc>, window_params = [{transform_indices = @transform_0, window_bounds = array<i64: 32, 128>}, {pipeline_mode = #tpu.pipeline_mode<synchronous>, transform_indices = @transform_1, window_bounds = array<i64: 1, 128>}, {pipeline_mode = #tpu.pipeline_mode<synchronous>, transform_indices = @transform_2, window_bounds = array<i64: 1, 128>}, {transform_indices = @transform_3, window_bounds = array<i64: 32, 128>}]} {
    %c0 = arith.constant 0 : index
    %c0_0 = arith.constant 0 : index
    %0 = vector.load %arg1[%c0, %c0_0] : memref<32x128xf32, #tpu.memory_space<vmem>>, vector<32x128xf32>
    %c0_1 = arith.constant 0 : index
    %c0_2 = arith.constant 0 : index
    %1 = vector.load %arg2[%c0_1, %c0_2] : memref<1x128xf32, #tpu.memory_space<vmem>>, vector<1x128xf32>
    %2 = vector.broadcast %1 : vector<1x128xf32> to vector<32x128xf32>
    %3 = arith.mulf %0, %2 : vector<32x128xf32>
    %c0_3 = arith.constant 0 : index
    %c0_4 = arith.constant 0 : index
    %4 = vector.load %arg3[%c0_3, %c0_4] : memref<1x128xf32, #tpu.memory_space<vmem>>, vector<1x128xf32>
    %5 = vector.broadcast %4 : vector<1x128xf32> to vector<32x128xf32>
    %6 = arith.addf %3, %5 : vector<32x128xf32>
    %cst = arith.constant 0.000000e+00 : f32
    %7 = vector.broadcast %cst : f32 to vector<32x128xf32>
    %8 = arith.maximumf %6, %7 : vector<32x128xf32>
    %9 = arith.truncf %8 : vector<32x128xf32> to vector<32x128xbf16>
    %c0_5 = arith.constant 0 : index
    %c0_6 = arith.constant 0 : index
    %10 = vector.load %arg4[%c0_5, %c0_6] : memref<32x128xbf16, #tpu.memory_space<vmem>>, vector<32x128xbf16>
    tpu.vector_store %arg4[%c0_5, %c0_6], %9 {strides = array<i32>} : memref<32x128xbf16, #tpu.memory_space<vmem>>, vector<32x128xbf16>,
    return
  }
  func.func @transform_0(%arg0: i32) -> (i32, i32) {
    %c0_i32 = arith.constant 0 : i32
    %c0_i32_0 = arith.constant 0 : i32
    return %arg0, %c0_i32 : i32, i32
  }
  func.func @transform_1(%arg0: i32) -> (i32, i32) {
    %c0_i32 = arith.constant 0 : i32
    %c0_i32_0 = arith.constant 0 : i32
    %c0_i32_1 = arith.constant 0 : i32
    return %c0_i32, %c0_i32_0 : i32, i32
  }
  func.func @transform_2(%arg0: i32) -> (i32, i32) {
    %c0_i32 = arith.constant 0 : i32
    %c0_i32_0 = arith.constant 0 : i32
    %c0_i32_1 = arith.constant 0 : i32
    return %c0_i32, %c0_i32_0 : i32, i32
  }
  func.func @transform_3(%arg0: i32) -> (i32, i32) {
    %c0_i32 = arith.constant 0 : i32
    %c0_i32_0 = arith.constant 0 : i32
    return %arg0, %c0_i32 : i32, i32
  }
}

module attributes {stable_mosaic.version = 11 : i64} {
  func.func @_maxpool_kernel(%arg0: i32, %arg1: memref<128x9x8xbf16, #tpu.memory_space<vmem>>, %arg2: memref<128x8xbf16, #tpu.memory_space<vmem>>) attributes {dimension_semantics = [#tpu.dimension_semantics<parallel>], iteration_bounds = array<i64: 1>, scalar_prefetch = 0 : i64, scratch_operands = 0 : i64, tpu.core_type = #tpu.core_type<tc>, window_params = [{transform_indices = @transform_0, window_bounds = array<i64: 128, 9, 8>}, {transform_indices = @transform_1, window_bounds = array<i64: 128, 8>}]} {
    %c0 = arith.constant 0 : index
    %c0_0 = arith.constant 0 : index
    %c0_1 = arith.constant 0 : index
    %0 = vector.load %arg1[%c0, %c0_0, %c0_1] : memref<128x9x8xbf16, #tpu.memory_space<vmem>>, vector<128x9x8xbf16>
    %1 = arith.extf %0 : vector<128x9x8xbf16> to vector<128x9x8xf32>
    %cst = arith.constant dense<0xFF800000> : vector<128x8xf32>
    %2 = vector.multi_reduction <maximumf>, %1, %cst [1] : vector<128x9x8xf32> to vector<128x8xf32>
    %3 = arith.truncf %2 : vector<128x8xf32> to vector<128x8xbf16>
    %c0_2 = arith.constant 0 : index
    %c0_3 = arith.constant 0 : index
    %4 = vector.load %arg2[%c0_2, %c0_3] : memref<128x8xbf16, #tpu.memory_space<vmem>>, vector<128x8xbf16>
    tpu.vector_store %arg2[%c0_2, %c0_3], %3 {strides = array<i32>} : memref<128x8xbf16, #tpu.memory_space<vmem>>, vector<128x8xbf16>,
    return
  }
  func.func @transform_0(%arg0: i32) -> (i32, i32, i32) {
    %c0_i32 = arith.constant 0 : i32
    %c0_i32_0 = arith.constant 0 : i32
    %c0_i32_1 = arith.constant 0 : i32
    return %arg0, %c0_i32, %c0_i32_0 : i32, i32, i32
  }
  func.func @transform_1(%arg0: i32) -> (i32, i32) {
    %c0_i32 = arith.constant 0 : i32
    %c0_i32_0 = arith.constant 0 : i32
    return %arg0, %c0_i32 : i32, i32
  }
}

module attributes {stable_mosaic.version = 11 : i64} {
  func.func @_conv_gemm_kernel(%arg0: i32, %arg1: i32, %arg2: memref<128x72xbf16, #tpu.memory_space<vmem>>, %arg3: memref<72x8xbf16, #tpu.memory_space<vmem>>, %arg4: memref<128x8xf32, #tpu.memory_space<vmem>>, %arg5: memref<1x8xf32, #tpu.memory_space<vmem>>, %arg6: memref<1x8xf32, #tpu.memory_space<vmem>>, %arg7: memref<128x8xf32, #tpu.memory_space<vmem>>) attributes {dimension_semantics = [#tpu.dimension_semantics<arbitrary>, #tpu.dimension_semantics<arbitrary>], iteration_bounds = array<i64: 1, 1>, scalar_prefetch = 0 : i64, scratch_operands = 1 : i64, tpu.core_type = #tpu.core_type<tc>, window_params = [{transform_indices = @transform_0, window_bounds = array<i64: 128, 72>}, {transform_indices = @transform_1, window_bounds = array<i64: 72, 8>}, {transform_indices = @transform_2, window_bounds = array<i64: 128, 8>}, {pipeline_mode = #tpu.pipeline_mode<synchronous>, transform_indices = @transform_3, window_bounds = array<i64: 1, 8>}, {pipeline_mode = #tpu.pipeline_mode<synchronous>, transform_indices = @transform_4, window_bounds = array<i64: 1, 8>}]} {
    %c0_i32 = arith.constant 0 : i32
    %0 = arith.cmpi eq, %arg1, %c0_i32 : i32
    %1 = arith.extui %0 : i1 to i32
    %c0_i32_0 = arith.constant 0 : i32
    %2 = arith.cmpi ne, %1, %c0_i32_0 : i32
    scf.if %2 {
      %cst_13 = arith.constant 0.000000e+00 : f32
      %17 = vector.broadcast %cst_13 : f32 to vector<128x8xf32>
      %c0_14 = arith.constant 0 : index
      %c0_15 = arith.constant 0 : index
      %18 = vector.load %arg7[%c0_14, %c0_15] : memref<128x8xf32, #tpu.memory_space<vmem>>, vector<128x8xf32>
      tpu.vector_store %arg7[%c0_14, %c0_15], %17 {strides = array<i32>} : memref<128x8xf32, #tpu.memory_space<vmem>>, vector<128x8xf32>,
    } else {
    }
    %c0 = arith.constant 0 : index
    %c0_1 = arith.constant 0 : index
    %3 = vector.load %arg7[%c0, %c0_1] : memref<128x8xf32, #tpu.memory_space<vmem>>, vector<128x8xf32>
    %c0_2 = arith.constant 0 : index
    %c0_3 = arith.constant 0 : index
    %4 = vector.load %arg2[%c0_2, %c0_3] : memref<128x72xbf16, #tpu.memory_space<vmem>>, vector<128x72xbf16>
    %c0_4 = arith.constant 0 : index
    %c0_5 = arith.constant 0 : index
    %5 = vector.load %arg3[%c0_4, %c0_5] : memref<72x8xbf16, #tpu.memory_space<vmem>>, vector<72x8xbf16>
    %cst = arith.constant dense<0.000000e+00> : vector<128x8xf32>
    %6 = tpu.matmul %4, %5, %cst {dimension_numbers = #tpu.dot_dimension_numbers<[1], [0], [0], [1], [0, 0, 1, 1], [], []>} : vector<128x72xbf16>, vector<72x8xbf16>, vector<128x8xf32> -> vector<128x8xf32>
    %7 = arith.addf %3, %6 : vector<128x8xf32>
    %c0_6 = arith.constant 0 : index
    %c0_7 = arith.constant 0 : index
    %8 = vector.load %arg7[%c0_6, %c0_7] : memref<128x8xf32, #tpu.memory_space<vmem>>, vector<128x8xf32>
    tpu.vector_store %arg7[%c0_6, %c0_7], %7 {strides = array<i32>} : memref<128x8xf32, #tpu.memory_space<vmem>>, vector<128x8xf32>,
    %c0_i32_8 = arith.constant 0 : i32
    %9 = arith.cmpi eq, %arg1, %c0_i32_8 : i32
    %c0_i32_9 = arith.constant 0 : i32
    %10 = arith.cmpi eq, %arg0, %c0_i32_9 : i32
    %11 = arith.andi %9, %10 : i1
    %12 = arith.extui %11 : i1 to i32
    %c0_i32_10 = arith.constant 0 : i32
    %13 = arith.cmpi ne, %12, %c0_i32_10 : i32
    scf.if %13 {
      %cst_13 = arith.constant 0.000000e+00 : f32
      %17 = vector.broadcast %cst_13 : f32 to vector<1x8xf32>
      %c0_14 = arith.constant 0 : index
      %c0_15 = arith.constant 0 : index
      %18 = vector.load %arg5[%c0_14, %c0_15] : memref<1x8xf32, #tpu.memory_space<vmem>>, vector<1x8xf32>
      tpu.vector_store %arg5[%c0_14, %c0_15], %17 {strides = array<i32>} : memref<1x8xf32, #tpu.memory_space<vmem>>, vector<1x8xf32>,
      %cst_16 = arith.constant 0.000000e+00 : f32
      %19 = vector.broadcast %cst_16 : f32 to vector<1x8xf32>
      %c0_17 = arith.constant 0 : index
      %c0_18 = arith.constant 0 : index
      %20 = vector.load %arg6[%c0_17, %c0_18] : memref<1x8xf32, #tpu.memory_space<vmem>>, vector<1x8xf32>
      tpu.vector_store %arg6[%c0_17, %c0_18], %19 {strides = array<i32>} : memref<1x8xf32, #tpu.memory_space<vmem>>, vector<1x8xf32>,
    } else {
    }
    %c0_i32_11 = arith.constant 0 : i32
    %14 = arith.cmpi eq, %arg1, %c0_i32_11 : i32
    %15 = arith.extui %14 : i1 to i32
    %c0_i32_12 = arith.constant 0 : i32
    %16 = arith.cmpi ne, %15, %c0_i32_12 : i32
    scf.if %16 {
      %c0_13 = arith.constant 0 : index
      %c0_14 = arith.constant 0 : index
      %17 = vector.load %arg7[%c0_13, %c0_14] : memref<128x8xf32, #tpu.memory_space<vmem>>, vector<128x8xf32>
      %c0_15 = arith.constant 0 : index
      %c0_16 = arith.constant 0 : index
      %18 = vector.load %arg4[%c0_15, %c0_16] : memref<128x8xf32, #tpu.memory_space<vmem>>, vector<128x8xf32>
      tpu.vector_store %arg4[%c0_15, %c0_16], %17 {strides = array<i32>} : memref<128x8xf32, #tpu.memory_space<vmem>>, vector<128x8xf32>,
      %c0_17 = arith.constant 0 : index
      %c0_18 = arith.constant 0 : index
      %19 = vector.load %arg5[%c0_17, %c0_18] : memref<1x8xf32, #tpu.memory_space<vmem>>, vector<1x8xf32>
      %cst_19 = arith.constant dense<0.000000e+00> : vector<8xf32>
      %20 = vector.multi_reduction <add>, %17, %cst_19 [0] : vector<128x8xf32> to vector<8xf32>
      %21 = vector.shape_cast %20 : vector<8xf32> to vector<1x8xf32>
      %22 = arith.addf %19, %21 : vector<1x8xf32>
      %c0_20 = arith.constant 0 : index
      %c0_21 = arith.constant 0 : index
      %23 = vector.load %arg5[%c0_20, %c0_21] : memref<1x8xf32, #tpu.memory_space<vmem>>, vector<1x8xf32>
      tpu.vector_store %arg5[%c0_20, %c0_21], %22 {strides = array<i32>} : memref<1x8xf32, #tpu.memory_space<vmem>>, vector<1x8xf32>,
      %c0_22 = arith.constant 0 : index
      %c0_23 = arith.constant 0 : index
      %24 = vector.load %arg6[%c0_22, %c0_23] : memref<1x8xf32, #tpu.memory_space<vmem>>, vector<1x8xf32>
      %25 = arith.mulf %17, %17 : vector<128x8xf32>
      %cst_24 = arith.constant dense<0.000000e+00> : vector<8xf32>
      %26 = vector.multi_reduction <add>, %25, %cst_24 [0] : vector<128x8xf32> to vector<8xf32>
      %27 = vector.shape_cast %26 : vector<8xf32> to vector<1x8xf32>
      %28 = arith.addf %24, %27 : vector<1x8xf32>
      %c0_25 = arith.constant 0 : index
      %c0_26 = arith.constant 0 : index
      %29 = vector.load %arg6[%c0_25, %c0_26] : memref<1x8xf32, #tpu.memory_space<vmem>>, vector<1x8xf32>
      tpu.vector_store %arg6[%c0_25, %c0_26], %28 {strides = array<i32>} : memref<1x8xf32, #tpu.memory_space<vmem>>, vector<1x8xf32>,
    } else {
    }
    return
  }
  func.func @transform_0(%arg0: i32, %arg1: i32) -> (i32, i32) {
    %c0_i32 = arith.constant 0 : i32
    return %arg0, %arg1 : i32, i32
  }
  func.func @transform_1(%arg0: i32, %arg1: i32) -> (i32, i32) {
    %c0_i32 = arith.constant 0 : i32
    %c0_i32_0 = arith.constant 0 : i32
    return %arg1, %c0_i32 : i32, i32
  }
  func.func @transform_2(%arg0: i32, %arg1: i32) -> (i32, i32) {
    %c0_i32 = arith.constant 0 : i32
    %c0_i32_0 = arith.constant 0 : i32
    return %arg0, %c0_i32 : i32, i32
  }
  func.func @transform_3(%arg0: i32, %arg1: i32) -> (i32, i32) {
    %c0_i32 = arith.constant 0 : i32
    %c0_i32_0 = arith.constant 0 : i32
    %c0_i32_1 = arith.constant 0 : i32
    return %c0_i32, %c0_i32_0 : i32, i32
  }
  func.func @transform_4(%arg0: i32, %arg1: i32) -> (i32, i32) {
    %c0_i32 = arith.constant 0 : i32
    %c0_i32_0 = arith.constant 0 : i32
    %c0_i32_1 = arith.constant 0 : i32
    return %c0_i32, %c0_i32_0 : i32, i32
  }
}

module attributes {stable_mosaic.version = 11 : i64} {
  func.func @_bn_apply_kernel(%arg0: i32, %arg1: memref<8x128xf32, #tpu.memory_space<vmem>>, %arg2: memref<1x128xf32, #tpu.memory_space<vmem>>, %arg3: memref<1x128xf32, #tpu.memory_space<vmem>>, %arg4: memref<8x128xbf16, #tpu.memory_space<vmem>>) attributes {dimension_semantics = [#tpu.dimension_semantics<parallel>], iteration_bounds = array<i64: 1>, scalar_prefetch = 0 : i64, scratch_operands = 0 : i64, tpu.core_type = #tpu.core_type<tc>, window_params = [{transform_indices = @transform_0, window_bounds = array<i64: 8, 128>}, {pipeline_mode = #tpu.pipeline_mode<synchronous>, transform_indices = @transform_1, window_bounds = array<i64: 1, 128>}, {pipeline_mode = #tpu.pipeline_mode<synchronous>, transform_indices = @transform_2, window_bounds = array<i64: 1, 128>}, {transform_indices = @transform_3, window_bounds = array<i64: 8, 128>}]} {
    %c0 = arith.constant 0 : index
    %c0_0 = arith.constant 0 : index
    %0 = vector.load %arg1[%c0, %c0_0] : memref<8x128xf32, #tpu.memory_space<vmem>>, vector<8x128xf32>
    %c0_1 = arith.constant 0 : index
    %c0_2 = arith.constant 0 : index
    %1 = vector.load %arg2[%c0_1, %c0_2] : memref<1x128xf32, #tpu.memory_space<vmem>>, vector<1x128xf32>
    %2 = vector.broadcast %1 : vector<1x128xf32> to vector<8x128xf32>
    %3 = arith.mulf %0, %2 : vector<8x128xf32>
    %c0_3 = arith.constant 0 : index
    %c0_4 = arith.constant 0 : index
    %4 = vector.load %arg3[%c0_3, %c0_4] : memref<1x128xf32, #tpu.memory_space<vmem>>, vector<1x128xf32>
    %5 = vector.broadcast %4 : vector<1x128xf32> to vector<8x128xf32>
    %6 = arith.addf %3, %5 : vector<8x128xf32>
    %cst = arith.constant 0.000000e+00 : f32
    %7 = vector.broadcast %cst : f32 to vector<8x128xf32>
    %8 = arith.maximumf %6, %7 : vector<8x128xf32>
    %9 = arith.truncf %8 : vector<8x128xf32> to vector<8x128xbf16>
    %c0_5 = arith.constant 0 : index
    %c0_6 = arith.constant 0 : index
    %10 = vector.load %arg4[%c0_5, %c0_6] : memref<8x128xbf16, #tpu.memory_space<vmem>>, vector<8x128xbf16>
    tpu.vector_store %arg4[%c0_5, %c0_6], %9 {strides = array<i32>} : memref<8x128xbf16, #tpu.memory_space<vmem>>, vector<8x128xbf16>,
    return
  }
  func.func @transform_0(%arg0: i32) -> (i32, i32) {
    %c0_i32 = arith.constant 0 : i32
    %c0_i32_0 = arith.constant 0 : i32
    return %arg0, %c0_i32 : i32, i32
  }
  func.func @transform_1(%arg0: i32) -> (i32, i32) {
    %c0_i32 = arith.constant 0 : i32
    %c0_i32_0 = arith.constant 0 : i32
    %c0_i32_1 = arith.constant 0 : i32
    return %c0_i32, %c0_i32_0 : i32, i32
  }
  func.func @transform_2(%arg0: i32) -> (i32, i32) {
    %c0_i32 = arith.constant 0 : i32
    %c0_i32_0 = arith.constant 0 : i32
    %c0_i32_1 = arith.constant 0 : i32
    return %c0_i32, %c0_i32_0 : i32, i32
  }
  func.func @transform_3(%arg0: i32) -> (i32, i32) {
    %c0_i32 = arith.constant 0 : i32
    %c0_i32_0 = arith.constant 0 : i32
    return %arg0, %c0_i32 : i32, i32
  }
}

module attributes {stable_mosaic.version = 11 : i64} {
  func.func @_conv_gemm_kernel(%arg0: i32, %arg1: i32, %arg2: memref<32x8xbf16, #tpu.memory_space<vmem>>, %arg3: memref<8x16xbf16, #tpu.memory_space<vmem>>, %arg4: memref<32x16xf32, #tpu.memory_space<vmem>>, %arg5: memref<1x16xf32, #tpu.memory_space<vmem>>, %arg6: memref<1x16xf32, #tpu.memory_space<vmem>>, %arg7: memref<32x16xf32, #tpu.memory_space<vmem>>) attributes {dimension_semantics = [#tpu.dimension_semantics<arbitrary>, #tpu.dimension_semantics<arbitrary>], iteration_bounds = array<i64: 1, 1>, scalar_prefetch = 0 : i64, scratch_operands = 1 : i64, tpu.core_type = #tpu.core_type<tc>, window_params = [{transform_indices = @transform_0, window_bounds = array<i64: 32, 8>}, {transform_indices = @transform_1, window_bounds = array<i64: 8, 16>}, {transform_indices = @transform_2, window_bounds = array<i64: 32, 16>}, {pipeline_mode = #tpu.pipeline_mode<synchronous>, transform_indices = @transform_3, window_bounds = array<i64: 1, 16>}, {pipeline_mode = #tpu.pipeline_mode<synchronous>, transform_indices = @transform_4, window_bounds = array<i64: 1, 16>}]} {
    %c0_i32 = arith.constant 0 : i32
    %0 = arith.cmpi eq, %arg1, %c0_i32 : i32
    %1 = arith.extui %0 : i1 to i32
    %c0_i32_0 = arith.constant 0 : i32
    %2 = arith.cmpi ne, %1, %c0_i32_0 : i32
    scf.if %2 {
      %cst_13 = arith.constant 0.000000e+00 : f32
      %17 = vector.broadcast %cst_13 : f32 to vector<32x16xf32>
      %c0_14 = arith.constant 0 : index
      %c0_15 = arith.constant 0 : index
      %18 = vector.load %arg7[%c0_14, %c0_15] : memref<32x16xf32, #tpu.memory_space<vmem>>, vector<32x16xf32>
      tpu.vector_store %arg7[%c0_14, %c0_15], %17 {strides = array<i32>} : memref<32x16xf32, #tpu.memory_space<vmem>>, vector<32x16xf32>,
    } else {
    }
    %c0 = arith.constant 0 : index
    %c0_1 = arith.constant 0 : index
    %3 = vector.load %arg7[%c0, %c0_1] : memref<32x16xf32, #tpu.memory_space<vmem>>, vector<32x16xf32>
    %c0_2 = arith.constant 0 : index
    %c0_3 = arith.constant 0 : index
    %4 = vector.load %arg2[%c0_2, %c0_3] : memref<32x8xbf16, #tpu.memory_space<vmem>>, vector<32x8xbf16>
    %c0_4 = arith.constant 0 : index
    %c0_5 = arith.constant 0 : index
    %5 = vector.load %arg3[%c0_4, %c0_5] : memref<8x16xbf16, #tpu.memory_space<vmem>>, vector<8x16xbf16>
    %cst = arith.constant dense<0.000000e+00> : vector<32x16xf32>
    %6 = tpu.matmul %4, %5, %cst {dimension_numbers = #tpu.dot_dimension_numbers<[1], [0], [0], [1], [0, 0, 1, 1], [], []>} : vector<32x8xbf16>, vector<8x16xbf16>, vector<32x16xf32> -> vector<32x16xf32>
    %7 = arith.addf %3, %6 : vector<32x16xf32>
    %c0_6 = arith.constant 0 : index
    %c0_7 = arith.constant 0 : index
    %8 = vector.load %arg7[%c0_6, %c0_7] : memref<32x16xf32, #tpu.memory_space<vmem>>, vector<32x16xf32>
    tpu.vector_store %arg7[%c0_6, %c0_7], %7 {strides = array<i32>} : memref<32x16xf32, #tpu.memory_space<vmem>>, vector<32x16xf32>,
    %c0_i32_8 = arith.constant 0 : i32
    %9 = arith.cmpi eq, %arg1, %c0_i32_8 : i32
    %c0_i32_9 = arith.constant 0 : i32
    %10 = arith.cmpi eq, %arg0, %c0_i32_9 : i32
    %11 = arith.andi %9, %10 : i1
    %12 = arith.extui %11 : i1 to i32
    %c0_i32_10 = arith.constant 0 : i32
    %13 = arith.cmpi ne, %12, %c0_i32_10 : i32
    scf.if %13 {
      %cst_13 = arith.constant 0.000000e+00 : f32
      %17 = vector.broadcast %cst_13 : f32 to vector<1x16xf32>
      %c0_14 = arith.constant 0 : index
      %c0_15 = arith.constant 0 : index
      %18 = vector.load %arg5[%c0_14, %c0_15] : memref<1x16xf32, #tpu.memory_space<vmem>>, vector<1x16xf32>
      tpu.vector_store %arg5[%c0_14, %c0_15], %17 {strides = array<i32>} : memref<1x16xf32, #tpu.memory_space<vmem>>, vector<1x16xf32>,
      %cst_16 = arith.constant 0.000000e+00 : f32
      %19 = vector.broadcast %cst_16 : f32 to vector<1x16xf32>
      %c0_17 = arith.constant 0 : index
      %c0_18 = arith.constant 0 : index
      %20 = vector.load %arg6[%c0_17, %c0_18] : memref<1x16xf32, #tpu.memory_space<vmem>>, vector<1x16xf32>
      tpu.vector_store %arg6[%c0_17, %c0_18], %19 {strides = array<i32>} : memref<1x16xf32, #tpu.memory_space<vmem>>, vector<1x16xf32>,
    } else {
    }
    %c0_i32_11 = arith.constant 0 : i32
    %14 = arith.cmpi eq, %arg1, %c0_i32_11 : i32
    %15 = arith.extui %14 : i1 to i32
    %c0_i32_12 = arith.constant 0 : i32
    %16 = arith.cmpi ne, %15, %c0_i32_12 : i32
    scf.if %16 {
      %c0_13 = arith.constant 0 : index
      %c0_14 = arith.constant 0 : index
      %17 = vector.load %arg7[%c0_13, %c0_14] : memref<32x16xf32, #tpu.memory_space<vmem>>, vector<32x16xf32>
      %c0_15 = arith.constant 0 : index
      %c0_16 = arith.constant 0 : index
      %18 = vector.load %arg4[%c0_15, %c0_16] : memref<32x16xf32, #tpu.memory_space<vmem>>, vector<32x16xf32>
      tpu.vector_store %arg4[%c0_15, %c0_16], %17 {strides = array<i32>} : memref<32x16xf32, #tpu.memory_space<vmem>>, vector<32x16xf32>,
      %c0_17 = arith.constant 0 : index
      %c0_18 = arith.constant 0 : index
      %19 = vector.load %arg5[%c0_17, %c0_18] : memref<1x16xf32, #tpu.memory_space<vmem>>, vector<1x16xf32>
      %cst_19 = arith.constant dense<0.000000e+00> : vector<16xf32>
      %20 = vector.multi_reduction <add>, %17, %cst_19 [0] : vector<32x16xf32> to vector<16xf32>
      %21 = vector.shape_cast %20 : vector<16xf32> to vector<1x16xf32>
      %22 = arith.addf %19, %21 : vector<1x16xf32>
      %c0_20 = arith.constant 0 : index
      %c0_21 = arith.constant 0 : index
      %23 = vector.load %arg5[%c0_20, %c0_21] : memref<1x16xf32, #tpu.memory_space<vmem>>, vector<1x16xf32>
      tpu.vector_store %arg5[%c0_20, %c0_21], %22 {strides = array<i32>} : memref<1x16xf32, #tpu.memory_space<vmem>>, vector<1x16xf32>,
      %c0_22 = arith.constant 0 : index
      %c0_23 = arith.constant 0 : index
      %24 = vector.load %arg6[%c0_22, %c0_23] : memref<1x16xf32, #tpu.memory_space<vmem>>, vector<1x16xf32>
      %25 = arith.mulf %17, %17 : vector<32x16xf32>
      %cst_24 = arith.constant dense<0.000000e+00> : vector<16xf32>
      %26 = vector.multi_reduction <add>, %25, %cst_24 [0] : vector<32x16xf32> to vector<16xf32>
      %27 = vector.shape_cast %26 : vector<16xf32> to vector<1x16xf32>
      %28 = arith.addf %24, %27 : vector<1x16xf32>
      %c0_25 = arith.constant 0 : index
      %c0_26 = arith.constant 0 : index
      %29 = vector.load %arg6[%c0_25, %c0_26] : memref<1x16xf32, #tpu.memory_space<vmem>>, vector<1x16xf32>
      tpu.vector_store %arg6[%c0_25, %c0_26], %28 {strides = array<i32>} : memref<1x16xf32, #tpu.memory_space<vmem>>, vector<1x16xf32>,
    } else {
    }
    return
  }
  func.func @transform_0(%arg0: i32, %arg1: i32) -> (i32, i32) {
    %c0_i32 = arith.constant 0 : i32
    return %arg0, %arg1 : i32, i32
  }
  func.func @transform_1(%arg0: i32, %arg1: i32) -> (i32, i32) {
    %c0_i32 = arith.constant 0 : i32
    %c0_i32_0 = arith.constant 0 : i32
    return %arg1, %c0_i32 : i32, i32
  }
  func.func @transform_2(%arg0: i32, %arg1: i32) -> (i32, i32) {
    %c0_i32 = arith.constant 0 : i32
    %c0_i32_0 = arith.constant 0 : i32
    return %arg0, %c0_i32 : i32, i32
  }
  func.func @transform_3(%arg0: i32, %arg1: i32) -> (i32, i32) {
    %c0_i32 = arith.constant 0 : i32
    %c0_i32_0 = arith.constant 0 : i32
    %c0_i32_1 = arith.constant 0 : i32
    return %c0_i32, %c0_i32_0 : i32, i32
  }
  func.func @transform_4(%arg0: i32, %arg1: i32) -> (i32, i32) {
    %c0_i32 = arith.constant 0 : i32
    %c0_i32_0 = arith.constant 0 : i32
    %c0_i32_1 = arith.constant 0 : i32
    return %c0_i32, %c0_i32_0 : i32, i32
  }
}

module attributes {stable_mosaic.version = 11 : i64} {
  func.func @_bn_apply_res_kernel(%arg0: i32, %arg1: memref<8x128xf32, #tpu.memory_space<vmem>>, %arg2: memref<1x128xf32, #tpu.memory_space<vmem>>, %arg3: memref<1x128xf32, #tpu.memory_space<vmem>>, %arg4: memref<8x128xbf16, #tpu.memory_space<vmem>>, %arg5: memref<8x128xbf16, #tpu.memory_space<vmem>>) attributes {dimension_semantics = [#tpu.dimension_semantics<parallel>], iteration_bounds = array<i64: 1>, scalar_prefetch = 0 : i64, scratch_operands = 0 : i64, tpu.core_type = #tpu.core_type<tc>, window_params = [{transform_indices = @transform_0, window_bounds = array<i64: 8, 128>}, {pipeline_mode = #tpu.pipeline_mode<synchronous>, transform_indices = @transform_1, window_bounds = array<i64: 1, 128>}, {pipeline_mode = #tpu.pipeline_mode<synchronous>, transform_indices = @transform_2, window_bounds = array<i64: 1, 128>}, {transform_indices = @transform_3, window_bounds = array<i64: 8, 128>}, {transform_indices = @transform_4, window_bounds = array<i64: 8, 128>}]} {
    %c0 = arith.constant 0 : index
    %c0_0 = arith.constant 0 : index
    %0 = vector.load %arg1[%c0, %c0_0] : memref<8x128xf32, #tpu.memory_space<vmem>>, vector<8x128xf32>
    %c0_1 = arith.constant 0 : index
    %c0_2 = arith.constant 0 : index
    %1 = vector.load %arg2[%c0_1, %c0_2] : memref<1x128xf32, #tpu.memory_space<vmem>>, vector<1x128xf32>
    %2 = vector.broadcast %1 : vector<1x128xf32> to vector<8x128xf32>
    %3 = arith.mulf %0, %2 : vector<8x128xf32>
    %c0_3 = arith.constant 0 : index
    %c0_4 = arith.constant 0 : index
    %4 = vector.load %arg3[%c0_3, %c0_4] : memref<1x128xf32, #tpu.memory_space<vmem>>, vector<1x128xf32>
    %5 = vector.broadcast %4 : vector<1x128xf32> to vector<8x128xf32>
    %6 = arith.addf %3, %5 : vector<8x128xf32>
    %c0_5 = arith.constant 0 : index
    %c0_6 = arith.constant 0 : index
    %7 = vector.load %arg4[%c0_5, %c0_6] : memref<8x128xbf16, #tpu.memory_space<vmem>>, vector<8x128xbf16>
    %8 = arith.extf %7 : vector<8x128xbf16> to vector<8x128xf32>
    %9 = arith.addf %6, %8 : vector<8x128xf32>
    %cst = arith.constant 0.000000e+00 : f32
    %10 = vector.broadcast %cst : f32 to vector<8x128xf32>
    %11 = arith.maximumf %9, %10 : vector<8x128xf32>
    %12 = arith.truncf %11 : vector<8x128xf32> to vector<8x128xbf16>
    %c0_7 = arith.constant 0 : index
    %c0_8 = arith.constant 0 : index
    %13 = vector.load %arg5[%c0_7, %c0_8] : memref<8x128xbf16, #tpu.memory_space<vmem>>, vector<8x128xbf16>
    tpu.vector_store %arg5[%c0_7, %c0_8], %12 {strides = array<i32>} : memref<8x128xbf16, #tpu.memory_space<vmem>>, vector<8x128xbf16>,
    return
  }
  func.func @transform_0(%arg0: i32) -> (i32, i32) {
    %c0_i32 = arith.constant 0 : i32
    %c0_i32_0 = arith.constant 0 : i32
    return %arg0, %c0_i32 : i32, i32
  }
  func.func @transform_1(%arg0: i32) -> (i32, i32) {
    %c0_i32 = arith.constant 0 : i32
    %c0_i32_0 = arith.constant 0 : i32
    %c0_i32_1 = arith.constant 0 : i32
    return %c0_i32, %c0_i32_0 : i32, i32
  }
  func.func @transform_2(%arg0: i32) -> (i32, i32) {
    %c0_i32 = arith.constant 0 : i32
    %c0_i32_0 = arith.constant 0 : i32
    %c0_i32_1 = arith.constant 0 : i32
    return %c0_i32, %c0_i32_0 : i32, i32
  }
  func.func @transform_3(%arg0: i32) -> (i32, i32) {
    %c0_i32 = arith.constant 0 : i32
    %c0_i32_0 = arith.constant 0 : i32
    return %arg0, %c0_i32 : i32, i32
  }
  func.func @transform_4(%arg0: i32) -> (i32, i32) {
    %c0_i32 = arith.constant 0 : i32
    %c0_i32_0 = arith.constant 0 : i32
    return %arg0, %c0_i32 : i32, i32
  }
}

module attributes {stable_mosaic.version = 11 : i64} {
  func.func @_bn_apply_kernel(%arg0: i32, %arg1: memref<4x128xf32, #tpu.memory_space<vmem>>, %arg2: memref<1x128xf32, #tpu.memory_space<vmem>>, %arg3: memref<1x128xf32, #tpu.memory_space<vmem>>, %arg4: memref<4x128xbf16, #tpu.memory_space<vmem>>) attributes {dimension_semantics = [#tpu.dimension_semantics<parallel>], iteration_bounds = array<i64: 1>, scalar_prefetch = 0 : i64, scratch_operands = 0 : i64, tpu.core_type = #tpu.core_type<tc>, window_params = [{transform_indices = @transform_0, window_bounds = array<i64: 4, 128>}, {pipeline_mode = #tpu.pipeline_mode<synchronous>, transform_indices = @transform_1, window_bounds = array<i64: 1, 128>}, {pipeline_mode = #tpu.pipeline_mode<synchronous>, transform_indices = @transform_2, window_bounds = array<i64: 1, 128>}, {transform_indices = @transform_3, window_bounds = array<i64: 4, 128>}]} {
    %c0 = arith.constant 0 : index
    %c0_0 = arith.constant 0 : index
    %0 = vector.load %arg1[%c0, %c0_0] : memref<4x128xf32, #tpu.memory_space<vmem>>, vector<4x128xf32>
    %c0_1 = arith.constant 0 : index
    %c0_2 = arith.constant 0 : index
    %1 = vector.load %arg2[%c0_1, %c0_2] : memref<1x128xf32, #tpu.memory_space<vmem>>, vector<1x128xf32>
    %2 = vector.broadcast %1 : vector<1x128xf32> to vector<4x128xf32>
    %3 = arith.mulf %0, %2 : vector<4x128xf32>
    %c0_3 = arith.constant 0 : index
    %c0_4 = arith.constant 0 : index
    %4 = vector.load %arg3[%c0_3, %c0_4] : memref<1x128xf32, #tpu.memory_space<vmem>>, vector<1x128xf32>
    %5 = vector.broadcast %4 : vector<1x128xf32> to vector<4x128xf32>
    %6 = arith.addf %3, %5 : vector<4x128xf32>
    %7 = arith.truncf %6 : vector<4x128xf32> to vector<4x128xbf16>
    %c0_5 = arith.constant 0 : index
    %c0_6 = arith.constant 0 : index
    %8 = vector.load %arg4[%c0_5, %c0_6] : memref<4x128xbf16, #tpu.memory_space<vmem>>, vector<4x128xbf16>
    tpu.vector_store %arg4[%c0_5, %c0_6], %7 {strides = array<i32>} : memref<4x128xbf16, #tpu.memory_space<vmem>>, vector<4x128xbf16>,
    return
  }
  func.func @transform_0(%arg0: i32) -> (i32, i32) {
    %c0_i32 = arith.constant 0 : i32
    %c0_i32_0 = arith.constant 0 : i32
    return %arg0, %c0_i32 : i32, i32
  }
  func.func @transform_1(%arg0: i32) -> (i32, i32) {
    %c0_i32 = arith.constant 0 : i32
    %c0_i32_0 = arith.constant 0 : i32
    %c0_i32_1 = arith.constant 0 : i32
    return %c0_i32, %c0_i32_0 : i32, i32
  }
  func.func @transform_2(%arg0: i32) -> (i32, i32) {
    %c0_i32 = arith.constant 0 : i32
    %c0_i32_0 = arith.constant 0 : i32
    %c0_i32_1 = arith.constant 0 : i32
    return %c0_i32, %c0_i32_0 : i32, i32
  }
  func.func @transform_3(%arg0: i32) -> (i32, i32) {
    %c0_i32 = arith.constant 0 : i32
    %c0_i32_0 = arith.constant 0 : i32
    return %arg0, %c0_i32 : i32, i32
  }
}

module attributes {stable_mosaic.version = 11 : i64} {
  func.func @_bn_apply_kernel(%arg0: i32, %arg1: memref<4x128xf32, #tpu.memory_space<vmem>>, %arg2: memref<1x128xf32, #tpu.memory_space<vmem>>, %arg3: memref<1x128xf32, #tpu.memory_space<vmem>>, %arg4: memref<4x128xbf16, #tpu.memory_space<vmem>>) attributes {dimension_semantics = [#tpu.dimension_semantics<parallel>], iteration_bounds = array<i64: 1>, scalar_prefetch = 0 : i64, scratch_operands = 0 : i64, tpu.core_type = #tpu.core_type<tc>, window_params = [{transform_indices = @transform_0, window_bounds = array<i64: 4, 128>}, {pipeline_mode = #tpu.pipeline_mode<synchronous>, transform_indices = @transform_1, window_bounds = array<i64: 1, 128>}, {pipeline_mode = #tpu.pipeline_mode<synchronous>, transform_indices = @transform_2, window_bounds = array<i64: 1, 128>}, {transform_indices = @transform_3, window_bounds = array<i64: 4, 128>}]} {
    %c0 = arith.constant 0 : index
    %c0_0 = arith.constant 0 : index
    %0 = vector.load %arg1[%c0, %c0_0] : memref<4x128xf32, #tpu.memory_space<vmem>>, vector<4x128xf32>
    %c0_1 = arith.constant 0 : index
    %c0_2 = arith.constant 0 : index
    %1 = vector.load %arg2[%c0_1, %c0_2] : memref<1x128xf32, #tpu.memory_space<vmem>>, vector<1x128xf32>
    %2 = vector.broadcast %1 : vector<1x128xf32> to vector<4x128xf32>
    %3 = arith.mulf %0, %2 : vector<4x128xf32>
    %c0_3 = arith.constant 0 : index
    %c0_4 = arith.constant 0 : index
    %4 = vector.load %arg3[%c0_3, %c0_4] : memref<1x128xf32, #tpu.memory_space<vmem>>, vector<1x128xf32>
    %5 = vector.broadcast %4 : vector<1x128xf32> to vector<4x128xf32>
    %6 = arith.addf %3, %5 : vector<4x128xf32>
    %cst = arith.constant 0.000000e+00 : f32
    %7 = vector.broadcast %cst : f32 to vector<4x128xf32>
    %8 = arith.maximumf %6, %7 : vector<4x128xf32>
    %9 = arith.truncf %8 : vector<4x128xf32> to vector<4x128xbf16>
    %c0_5 = arith.constant 0 : index
    %c0_6 = arith.constant 0 : index
    %10 = vector.load %arg4[%c0_5, %c0_6] : memref<4x128xbf16, #tpu.memory_space<vmem>>, vector<4x128xbf16>
    tpu.vector_store %arg4[%c0_5, %c0_6], %9 {strides = array<i32>} : memref<4x128xbf16, #tpu.memory_space<vmem>>, vector<4x128xbf16>,
    return
  }
  func.func @transform_0(%arg0: i32) -> (i32, i32) {
    %c0_i32 = arith.constant 0 : i32
    %c0_i32_0 = arith.constant 0 : i32
    return %arg0, %c0_i32 : i32, i32
  }
  func.func @transform_1(%arg0: i32) -> (i32, i32) {
    %c0_i32 = arith.constant 0 : i32
    %c0_i32_0 = arith.constant 0 : i32
    %c0_i32_1 = arith.constant 0 : i32
    return %c0_i32, %c0_i32_0 : i32, i32
  }
  func.func @transform_2(%arg0: i32) -> (i32, i32) {
    %c0_i32 = arith.constant 0 : i32
    %c0_i32_0 = arith.constant 0 : i32
    %c0_i32_1 = arith.constant 0 : i32
    return %c0_i32, %c0_i32_0 : i32, i32
  }
  func.func @transform_3(%arg0: i32) -> (i32, i32) {
    %c0_i32 = arith.constant 0 : i32
    %c0_i32_0 = arith.constant 0 : i32
    return %arg0, %c0_i32 : i32, i32
  }
}

module attributes {stable_mosaic.version = 11 : i64} {
  func.func @_conv_gemm_kernel(%arg0: i32, %arg1: i32, %arg2: memref<32x72xbf16, #tpu.memory_space<vmem>>, %arg3: memref<72x16xbf16, #tpu.memory_space<vmem>>, %arg4: memref<32x16xf32, #tpu.memory_space<vmem>>, %arg5: memref<1x16xf32, #tpu.memory_space<vmem>>, %arg6: memref<1x16xf32, #tpu.memory_space<vmem>>, %arg7: memref<32x16xf32, #tpu.memory_space<vmem>>) attributes {dimension_semantics = [#tpu.dimension_semantics<arbitrary>, #tpu.dimension_semantics<arbitrary>], iteration_bounds = array<i64: 1, 1>, scalar_prefetch = 0 : i64, scratch_operands = 1 : i64, tpu.core_type = #tpu.core_type<tc>, window_params = [{transform_indices = @transform_0, window_bounds = array<i64: 32, 72>}, {transform_indices = @transform_1, window_bounds = array<i64: 72, 16>}, {transform_indices = @transform_2, window_bounds = array<i64: 32, 16>}, {pipeline_mode = #tpu.pipeline_mode<synchronous>, transform_indices = @transform_3, window_bounds = array<i64: 1, 16>}, {pipeline_mode = #tpu.pipeline_mode<synchronous>, transform_indices = @transform_4, window_bounds = array<i64: 1, 16>}]} {
    %c0_i32 = arith.constant 0 : i32
    %0 = arith.cmpi eq, %arg1, %c0_i32 : i32
    %1 = arith.extui %0 : i1 to i32
    %c0_i32_0 = arith.constant 0 : i32
    %2 = arith.cmpi ne, %1, %c0_i32_0 : i32
    scf.if %2 {
      %cst_13 = arith.constant 0.000000e+00 : f32
      %17 = vector.broadcast %cst_13 : f32 to vector<32x16xf32>
      %c0_14 = arith.constant 0 : index
      %c0_15 = arith.constant 0 : index
      %18 = vector.load %arg7[%c0_14, %c0_15] : memref<32x16xf32, #tpu.memory_space<vmem>>, vector<32x16xf32>
      tpu.vector_store %arg7[%c0_14, %c0_15], %17 {strides = array<i32>} : memref<32x16xf32, #tpu.memory_space<vmem>>, vector<32x16xf32>,
    } else {
    }
    %c0 = arith.constant 0 : index
    %c0_1 = arith.constant 0 : index
    %3 = vector.load %arg7[%c0, %c0_1] : memref<32x16xf32, #tpu.memory_space<vmem>>, vector<32x16xf32>
    %c0_2 = arith.constant 0 : index
    %c0_3 = arith.constant 0 : index
    %4 = vector.load %arg2[%c0_2, %c0_3] : memref<32x72xbf16, #tpu.memory_space<vmem>>, vector<32x72xbf16>
    %c0_4 = arith.constant 0 : index
    %c0_5 = arith.constant 0 : index
    %5 = vector.load %arg3[%c0_4, %c0_5] : memref<72x16xbf16, #tpu.memory_space<vmem>>, vector<72x16xbf16>
    %cst = arith.constant dense<0.000000e+00> : vector<32x16xf32>
    %6 = tpu.matmul %4, %5, %cst {dimension_numbers = #tpu.dot_dimension_numbers<[1], [0], [0], [1], [0, 0, 1, 1], [], []>} : vector<32x72xbf16>, vector<72x16xbf16>, vector<32x16xf32> -> vector<32x16xf32>
    %7 = arith.addf %3, %6 : vector<32x16xf32>
    %c0_6 = arith.constant 0 : index
    %c0_7 = arith.constant 0 : index
    %8 = vector.load %arg7[%c0_6, %c0_7] : memref<32x16xf32, #tpu.memory_space<vmem>>, vector<32x16xf32>
    tpu.vector_store %arg7[%c0_6, %c0_7], %7 {strides = array<i32>} : memref<32x16xf32, #tpu.memory_space<vmem>>, vector<32x16xf32>,
    %c0_i32_8 = arith.constant 0 : i32
    %9 = arith.cmpi eq, %arg1, %c0_i32_8 : i32
    %c0_i32_9 = arith.constant 0 : i32
    %10 = arith.cmpi eq, %arg0, %c0_i32_9 : i32
    %11 = arith.andi %9, %10 : i1
    %12 = arith.extui %11 : i1 to i32
    %c0_i32_10 = arith.constant 0 : i32
    %13 = arith.cmpi ne, %12, %c0_i32_10 : i32
    scf.if %13 {
      %cst_13 = arith.constant 0.000000e+00 : f32
      %17 = vector.broadcast %cst_13 : f32 to vector<1x16xf32>
      %c0_14 = arith.constant 0 : index
      %c0_15 = arith.constant 0 : index
      %18 = vector.load %arg5[%c0_14, %c0_15] : memref<1x16xf32, #tpu.memory_space<vmem>>, vector<1x16xf32>
      tpu.vector_store %arg5[%c0_14, %c0_15], %17 {strides = array<i32>} : memref<1x16xf32, #tpu.memory_space<vmem>>, vector<1x16xf32>,
      %cst_16 = arith.constant 0.000000e+00 : f32
      %19 = vector.broadcast %cst_16 : f32 to vector<1x16xf32>
      %c0_17 = arith.constant 0 : index
      %c0_18 = arith.constant 0 : index
      %20 = vector.load %arg6[%c0_17, %c0_18] : memref<1x16xf32, #tpu.memory_space<vmem>>, vector<1x16xf32>
      tpu.vector_store %arg6[%c0_17, %c0_18], %19 {strides = array<i32>} : memref<1x16xf32, #tpu.memory_space<vmem>>, vector<1x16xf32>,
    } else {
    }
    %c0_i32_11 = arith.constant 0 : i32
    %14 = arith.cmpi eq, %arg1, %c0_i32_11 : i32
    %15 = arith.extui %14 : i1 to i32
    %c0_i32_12 = arith.constant 0 : i32
    %16 = arith.cmpi ne, %15, %c0_i32_12 : i32
    scf.if %16 {
      %c0_13 = arith.constant 0 : index
      %c0_14 = arith.constant 0 : index
      %17 = vector.load %arg7[%c0_13, %c0_14] : memref<32x16xf32, #tpu.memory_space<vmem>>, vector<32x16xf32>
      %c0_15 = arith.constant 0 : index
      %c0_16 = arith.constant 0 : index
      %18 = vector.load %arg4[%c0_15, %c0_16] : memref<32x16xf32, #tpu.memory_space<vmem>>, vector<32x16xf32>
      tpu.vector_store %arg4[%c0_15, %c0_16], %17 {strides = array<i32>} : memref<32x16xf32, #tpu.memory_space<vmem>>, vector<32x16xf32>,
      %c0_17 = arith.constant 0 : index
      %c0_18 = arith.constant 0 : index
      %19 = vector.load %arg5[%c0_17, %c0_18] : memref<1x16xf32, #tpu.memory_space<vmem>>, vector<1x16xf32>
      %cst_19 = arith.constant dense<0.000000e+00> : vector<16xf32>
      %20 = vector.multi_reduction <add>, %17, %cst_19 [0] : vector<32x16xf32> to vector<16xf32>
      %21 = vector.shape_cast %20 : vector<16xf32> to vector<1x16xf32>
      %22 = arith.addf %19, %21 : vector<1x16xf32>
      %c0_20 = arith.constant 0 : index
      %c0_21 = arith.constant 0 : index
      %23 = vector.load %arg5[%c0_20, %c0_21] : memref<1x16xf32, #tpu.memory_space<vmem>>, vector<1x16xf32>
      tpu.vector_store %arg5[%c0_20, %c0_21], %22 {strides = array<i32>} : memref<1x16xf32, #tpu.memory_space<vmem>>, vector<1x16xf32>,
      %c0_22 = arith.constant 0 : index
      %c0_23 = arith.constant 0 : index
      %24 = vector.load %arg6[%c0_22, %c0_23] : memref<1x16xf32, #tpu.memory_space<vmem>>, vector<1x16xf32>
      %25 = arith.mulf %17, %17 : vector<32x16xf32>
      %cst_24 = arith.constant dense<0.000000e+00> : vector<16xf32>
      %26 = vector.multi_reduction <add>, %25, %cst_24 [0] : vector<32x16xf32> to vector<16xf32>
      %27 = vector.shape_cast %26 : vector<16xf32> to vector<1x16xf32>
      %28 = arith.addf %24, %27 : vector<1x16xf32>
      %c0_25 = arith.constant 0 : index
      %c0_26 = arith.constant 0 : index
      %29 = vector.load %arg6[%c0_25, %c0_26] : memref<1x16xf32, #tpu.memory_space<vmem>>, vector<1x16xf32>
      tpu.vector_store %arg6[%c0_25, %c0_26], %28 {strides = array<i32>} : memref<1x16xf32, #tpu.memory_space<vmem>>, vector<1x16xf32>,
    } else {
    }
    return
  }
  func.func @transform_0(%arg0: i32, %arg1: i32) -> (i32, i32) {
    %c0_i32 = arith.constant 0 : i32
    return %arg0, %arg1 : i32, i32
  }
  func.func @transform_1(%arg0: i32, %arg1: i32) -> (i32, i32) {
    %c0_i32 = arith.constant 0 : i32
    %c0_i32_0 = arith.constant 0 : i32
    return %arg1, %c0_i32 : i32, i32
  }
  func.func @transform_2(%arg0: i32, %arg1: i32) -> (i32, i32) {
    %c0_i32 = arith.constant 0 : i32
    %c0_i32_0 = arith.constant 0 : i32
    return %arg0, %c0_i32 : i32, i32
  }
  func.func @transform_3(%arg0: i32, %arg1: i32) -> (i32, i32) {
    %c0_i32 = arith.constant 0 : i32
    %c0_i32_0 = arith.constant 0 : i32
    %c0_i32_1 = arith.constant 0 : i32
    return %c0_i32, %c0_i32_0 : i32, i32
  }
  func.func @transform_4(%arg0: i32, %arg1: i32) -> (i32, i32) {
    %c0_i32 = arith.constant 0 : i32
    %c0_i32_0 = arith.constant 0 : i32
    %c0_i32_1 = arith.constant 0 : i32
    return %c0_i32, %c0_i32_0 : i32, i32
  }
}

module attributes {stable_mosaic.version = 11 : i64} {
  func.func @_conv_gemm_kernel(%arg0: i32, %arg1: i32, %arg2: memref<32x144xbf16, #tpu.memory_space<vmem>>, %arg3: memref<144x16xbf16, #tpu.memory_space<vmem>>, %arg4: memref<32x16xf32, #tpu.memory_space<vmem>>, %arg5: memref<1x16xf32, #tpu.memory_space<vmem>>, %arg6: memref<1x16xf32, #tpu.memory_space<vmem>>, %arg7: memref<32x16xf32, #tpu.memory_space<vmem>>) attributes {dimension_semantics = [#tpu.dimension_semantics<arbitrary>, #tpu.dimension_semantics<arbitrary>], iteration_bounds = array<i64: 1, 1>, scalar_prefetch = 0 : i64, scratch_operands = 1 : i64, tpu.core_type = #tpu.core_type<tc>, window_params = [{transform_indices = @transform_0, window_bounds = array<i64: 32, 144>}, {transform_indices = @transform_1, window_bounds = array<i64: 144, 16>}, {transform_indices = @transform_2, window_bounds = array<i64: 32, 16>}, {pipeline_mode = #tpu.pipeline_mode<synchronous>, transform_indices = @transform_3, window_bounds = array<i64: 1, 16>}, {pipeline_mode = #tpu.pipeline_mode<synchronous>, transform_indices = @transform_4, window_bounds = array<i64: 1, 16>}]} {
    %c0_i32 = arith.constant 0 : i32
    %0 = arith.cmpi eq, %arg1, %c0_i32 : i32
    %1 = arith.extui %0 : i1 to i32
    %c0_i32_0 = arith.constant 0 : i32
    %2 = arith.cmpi ne, %1, %c0_i32_0 : i32
    scf.if %2 {
      %cst_13 = arith.constant 0.000000e+00 : f32
      %17 = vector.broadcast %cst_13 : f32 to vector<32x16xf32>
      %c0_14 = arith.constant 0 : index
      %c0_15 = arith.constant 0 : index
      %18 = vector.load %arg7[%c0_14, %c0_15] : memref<32x16xf32, #tpu.memory_space<vmem>>, vector<32x16xf32>
      tpu.vector_store %arg7[%c0_14, %c0_15], %17 {strides = array<i32>} : memref<32x16xf32, #tpu.memory_space<vmem>>, vector<32x16xf32>,
    } else {
    }
    %c0 = arith.constant 0 : index
    %c0_1 = arith.constant 0 : index
    %3 = vector.load %arg7[%c0, %c0_1] : memref<32x16xf32, #tpu.memory_space<vmem>>, vector<32x16xf32>
    %c0_2 = arith.constant 0 : index
    %c0_3 = arith.constant 0 : index
    %4 = vector.load %arg2[%c0_2, %c0_3] : memref<32x144xbf16, #tpu.memory_space<vmem>>, vector<32x144xbf16>
    %c0_4 = arith.constant 0 : index
    %c0_5 = arith.constant 0 : index
    %5 = vector.load %arg3[%c0_4, %c0_5] : memref<144x16xbf16, #tpu.memory_space<vmem>>, vector<144x16xbf16>
    %cst = arith.constant dense<0.000000e+00> : vector<32x16xf32>
    %6 = tpu.matmul %4, %5, %cst {dimension_numbers = #tpu.dot_dimension_numbers<[1], [0], [0], [1], [0, 0, 1, 1], [], []>} : vector<32x144xbf16>, vector<144x16xbf16>, vector<32x16xf32> -> vector<32x16xf32>
    %7 = arith.addf %3, %6 : vector<32x16xf32>
    %c0_6 = arith.constant 0 : index
    %c0_7 = arith.constant 0 : index
    %8 = vector.load %arg7[%c0_6, %c0_7] : memref<32x16xf32, #tpu.memory_space<vmem>>, vector<32x16xf32>
    tpu.vector_store %arg7[%c0_6, %c0_7], %7 {strides = array<i32>} : memref<32x16xf32, #tpu.memory_space<vmem>>, vector<32x16xf32>,
    %c0_i32_8 = arith.constant 0 : i32
    %9 = arith.cmpi eq, %arg1, %c0_i32_8 : i32
    %c0_i32_9 = arith.constant 0 : i32
    %10 = arith.cmpi eq, %arg0, %c0_i32_9 : i32
    %11 = arith.andi %9, %10 : i1
    %12 = arith.extui %11 : i1 to i32
    %c0_i32_10 = arith.constant 0 : i32
    %13 = arith.cmpi ne, %12, %c0_i32_10 : i32
    scf.if %13 {
      %cst_13 = arith.constant 0.000000e+00 : f32
      %17 = vector.broadcast %cst_13 : f32 to vector<1x16xf32>
      %c0_14 = arith.constant 0 : index
      %c0_15 = arith.constant 0 : index
      %18 = vector.load %arg5[%c0_14, %c0_15] : memref<1x16xf32, #tpu.memory_space<vmem>>, vector<1x16xf32>
      tpu.vector_store %arg5[%c0_14, %c0_15], %17 {strides = array<i32>} : memref<1x16xf32, #tpu.memory_space<vmem>>, vector<1x16xf32>,
      %cst_16 = arith.constant 0.000000e+00 : f32
      %19 = vector.broadcast %cst_16 : f32 to vector<1x16xf32>
      %c0_17 = arith.constant 0 : index
      %c0_18 = arith.constant 0 : index
      %20 = vector.load %arg6[%c0_17, %c0_18] : memref<1x16xf32, #tpu.memory_space<vmem>>, vector<1x16xf32>
      tpu.vector_store %arg6[%c0_17, %c0_18], %19 {strides = array<i32>} : memref<1x16xf32, #tpu.memory_space<vmem>>, vector<1x16xf32>,
    } else {
    }
    %c0_i32_11 = arith.constant 0 : i32
    %14 = arith.cmpi eq, %arg1, %c0_i32_11 : i32
    %15 = arith.extui %14 : i1 to i32
    %c0_i32_12 = arith.constant 0 : i32
    %16 = arith.cmpi ne, %15, %c0_i32_12 : i32
    scf.if %16 {
      %c0_13 = arith.constant 0 : index
      %c0_14 = arith.constant 0 : index
      %17 = vector.load %arg7[%c0_13, %c0_14] : memref<32x16xf32, #tpu.memory_space<vmem>>, vector<32x16xf32>
      %c0_15 = arith.constant 0 : index
      %c0_16 = arith.constant 0 : index
      %18 = vector.load %arg4[%c0_15, %c0_16] : memref<32x16xf32, #tpu.memory_space<vmem>>, vector<32x16xf32>
      tpu.vector_store %arg4[%c0_15, %c0_16], %17 {strides = array<i32>} : memref<32x16xf32, #tpu.memory_space<vmem>>, vector<32x16xf32>,
      %c0_17 = arith.constant 0 : index
      %c0_18 = arith.constant 0 : index
      %19 = vector.load %arg5[%c0_17, %c0_18] : memref<1x16xf32, #tpu.memory_space<vmem>>, vector<1x16xf32>
      %cst_19 = arith.constant dense<0.000000e+00> : vector<16xf32>
      %20 = vector.multi_reduction <add>, %17, %cst_19 [0] : vector<32x16xf32> to vector<16xf32>
      %21 = vector.shape_cast %20 : vector<16xf32> to vector<1x16xf32>
      %22 = arith.addf %19, %21 : vector<1x16xf32>
      %c0_20 = arith.constant 0 : index
      %c0_21 = arith.constant 0 : index
      %23 = vector.load %arg5[%c0_20, %c0_21] : memref<1x16xf32, #tpu.memory_space<vmem>>, vector<1x16xf32>
      tpu.vector_store %arg5[%c0_20, %c0_21], %22 {strides = array<i32>} : memref<1x16xf32, #tpu.memory_space<vmem>>, vector<1x16xf32>,
      %c0_22 = arith.constant 0 : index
      %c0_23 = arith.constant 0 : index
      %24 = vector.load %arg6[%c0_22, %c0_23] : memref<1x16xf32, #tpu.memory_space<vmem>>, vector<1x16xf32>
      %25 = arith.mulf %17, %17 : vector<32x16xf32>
      %cst_24 = arith.constant dense<0.000000e+00> : vector<16xf32>
      %26 = vector.multi_reduction <add>, %25, %cst_24 [0] : vector<32x16xf32> to vector<16xf32>
      %27 = vector.shape_cast %26 : vector<16xf32> to vector<1x16xf32>
      %28 = arith.addf %24, %27 : vector<1x16xf32>
      %c0_25 = arith.constant 0 : index
      %c0_26 = arith.constant 0 : index
      %29 = vector.load %arg6[%c0_25, %c0_26] : memref<1x16xf32, #tpu.memory_space<vmem>>, vector<1x16xf32>
      tpu.vector_store %arg6[%c0_25, %c0_26], %28 {strides = array<i32>} : memref<1x16xf32, #tpu.memory_space<vmem>>, vector<1x16xf32>,
    } else {
    }
    return
  }
  func.func @transform_0(%arg0: i32, %arg1: i32) -> (i32, i32) {
    %c0_i32 = arith.constant 0 : i32
    return %arg0, %arg1 : i32, i32
  }
  func.func @transform_1(%arg0: i32, %arg1: i32) -> (i32, i32) {
    %c0_i32 = arith.constant 0 : i32
    %c0_i32_0 = arith.constant 0 : i32
    return %arg1, %c0_i32 : i32, i32
  }
  func.func @transform_2(%arg0: i32, %arg1: i32) -> (i32, i32) {
    %c0_i32 = arith.constant 0 : i32
    %c0_i32_0 = arith.constant 0 : i32
    return %arg0, %c0_i32 : i32, i32
  }
  func.func @transform_3(%arg0: i32, %arg1: i32) -> (i32, i32) {
    %c0_i32 = arith.constant 0 : i32
    %c0_i32_0 = arith.constant 0 : i32
    %c0_i32_1 = arith.constant 0 : i32
    return %c0_i32, %c0_i32_0 : i32, i32
  }
  func.func @transform_4(%arg0: i32, %arg1: i32) -> (i32, i32) {
    %c0_i32 = arith.constant 0 : i32
    %c0_i32_0 = arith.constant 0 : i32
    %c0_i32_1 = arith.constant 0 : i32
    return %c0_i32, %c0_i32_0 : i32, i32
  }
}

module attributes {stable_mosaic.version = 11 : i64} {
  func.func @_bn_apply_res_kernel(%arg0: i32, %arg1: memref<4x128xf32, #tpu.memory_space<vmem>>, %arg2: memref<1x128xf32, #tpu.memory_space<vmem>>, %arg3: memref<1x128xf32, #tpu.memory_space<vmem>>, %arg4: memref<4x128xbf16, #tpu.memory_space<vmem>>, %arg5: memref<4x128xbf16, #tpu.memory_space<vmem>>) attributes {dimension_semantics = [#tpu.dimension_semantics<parallel>], iteration_bounds = array<i64: 1>, scalar_prefetch = 0 : i64, scratch_operands = 0 : i64, tpu.core_type = #tpu.core_type<tc>, window_params = [{transform_indices = @transform_0, window_bounds = array<i64: 4, 128>}, {pipeline_mode = #tpu.pipeline_mode<synchronous>, transform_indices = @transform_1, window_bounds = array<i64: 1, 128>}, {pipeline_mode = #tpu.pipeline_mode<synchronous>, transform_indices = @transform_2, window_bounds = array<i64: 1, 128>}, {transform_indices = @transform_3, window_bounds = array<i64: 4, 128>}, {transform_indices = @transform_4, window_bounds = array<i64: 4, 128>}]} {
    %c0 = arith.constant 0 : index
    %c0_0 = arith.constant 0 : index
    %0 = vector.load %arg1[%c0, %c0_0] : memref<4x128xf32, #tpu.memory_space<vmem>>, vector<4x128xf32>
    %c0_1 = arith.constant 0 : index
    %c0_2 = arith.constant 0 : index
    %1 = vector.load %arg2[%c0_1, %c0_2] : memref<1x128xf32, #tpu.memory_space<vmem>>, vector<1x128xf32>
    %2 = vector.broadcast %1 : vector<1x128xf32> to vector<4x128xf32>
    %3 = arith.mulf %0, %2 : vector<4x128xf32>
    %c0_3 = arith.constant 0 : index
    %c0_4 = arith.constant 0 : index
    %4 = vector.load %arg3[%c0_3, %c0_4] : memref<1x128xf32, #tpu.memory_space<vmem>>, vector<1x128xf32>
    %5 = vector.broadcast %4 : vector<1x128xf32> to vector<4x128xf32>
    %6 = arith.addf %3, %5 : vector<4x128xf32>
    %c0_5 = arith.constant 0 : index
    %c0_6 = arith.constant 0 : index
    %7 = vector.load %arg4[%c0_5, %c0_6] : memref<4x128xbf16, #tpu.memory_space<vmem>>, vector<4x128xbf16>
    %8 = arith.extf %7 : vector<4x128xbf16> to vector<4x128xf32>
    %9 = arith.addf %6, %8 : vector<4x128xf32>
    %cst = arith.constant 0.000000e+00 : f32
    %10 = vector.broadcast %cst : f32 to vector<4x128xf32>
    %11 = arith.maximumf %9, %10 : vector<4x128xf32>
    %12 = arith.truncf %11 : vector<4x128xf32> to vector<4x128xbf16>
    %c0_7 = arith.constant 0 : index
    %c0_8 = arith.constant 0 : index
    %13 = vector.load %arg5[%c0_7, %c0_8] : memref<4x128xbf16, #tpu.memory_space<vmem>>, vector<4x128xbf16>
    tpu.vector_store %arg5[%c0_7, %c0_8], %12 {strides = array<i32>} : memref<4x128xbf16, #tpu.memory_space<vmem>>, vector<4x128xbf16>,
    return
  }
  func.func @transform_0(%arg0: i32) -> (i32, i32) {
    %c0_i32 = arith.constant 0 : i32
    %c0_i32_0 = arith.constant 0 : i32
    return %arg0, %c0_i32 : i32, i32
  }
  func.func @transform_1(%arg0: i32) -> (i32, i32) {
    %c0_i32 = arith.constant 0 : i32
    %c0_i32_0 = arith.constant 0 : i32
    %c0_i32_1 = arith.constant 0 : i32
    return %c0_i32, %c0_i32_0 : i32, i32
  }
  func.func @transform_2(%arg0: i32) -> (i32, i32) {
    %c0_i32 = arith.constant 0 : i32
    %c0_i32_0 = arith.constant 0 : i32
    %c0_i32_1 = arith.constant 0 : i32
    return %c0_i32, %c0_i32_0 : i32, i32
  }
  func.func @transform_3(%arg0: i32) -> (i32, i32) {
    %c0_i32 = arith.constant 0 : i32
    %c0_i32_0 = arith.constant 0 : i32
    return %arg0, %c0_i32 : i32, i32
  }
  func.func @transform_4(%arg0: i32) -> (i32, i32) {
    %c0_i32 = arith.constant 0 : i32
    %c0_i32_0 = arith.constant 0 : i32
    return %arg0, %c0_i32 : i32, i32
  }
}

module attributes {stable_mosaic.version = 11 : i64} {
  func.func @_conv_gemm_kernel(%arg0: i32, %arg1: i32, %arg2: memref<8x16xbf16, #tpu.memory_space<vmem>>, %arg3: memref<16x32xbf16, #tpu.memory_space<vmem>>, %arg4: memref<8x32xf32, #tpu.memory_space<vmem>>, %arg5: memref<1x32xf32, #tpu.memory_space<vmem>>, %arg6: memref<1x32xf32, #tpu.memory_space<vmem>>, %arg7: memref<8x32xf32, #tpu.memory_space<vmem>>) attributes {dimension_semantics = [#tpu.dimension_semantics<arbitrary>, #tpu.dimension_semantics<arbitrary>], iteration_bounds = array<i64: 1, 1>, scalar_prefetch = 0 : i64, scratch_operands = 1 : i64, tpu.core_type = #tpu.core_type<tc>, window_params = [{transform_indices = @transform_0, window_bounds = array<i64: 8, 16>}, {transform_indices = @transform_1, window_bounds = array<i64: 16, 32>}, {transform_indices = @transform_2, window_bounds = array<i64: 8, 32>}, {pipeline_mode = #tpu.pipeline_mode<synchronous>, transform_indices = @transform_3, window_bounds = array<i64: 1, 32>}, {pipeline_mode = #tpu.pipeline_mode<synchronous>, transform_indices = @transform_4, window_bounds = array<i64: 1, 32>}]} {
    %c0_i32 = arith.constant 0 : i32
    %0 = arith.cmpi eq, %arg1, %c0_i32 : i32
    %1 = arith.extui %0 : i1 to i32
    %c0_i32_0 = arith.constant 0 : i32
    %2 = arith.cmpi ne, %1, %c0_i32_0 : i32
    scf.if %2 {
      %cst_13 = arith.constant 0.000000e+00 : f32
      %17 = vector.broadcast %cst_13 : f32 to vector<8x32xf32>
      %c0_14 = arith.constant 0 : index
      %c0_15 = arith.constant 0 : index
      %18 = vector.load %arg7[%c0_14, %c0_15] : memref<8x32xf32, #tpu.memory_space<vmem>>, vector<8x32xf32>
      tpu.vector_store %arg7[%c0_14, %c0_15], %17 {strides = array<i32>} : memref<8x32xf32, #tpu.memory_space<vmem>>, vector<8x32xf32>,
    } else {
    }
    %c0 = arith.constant 0 : index
    %c0_1 = arith.constant 0 : index
    %3 = vector.load %arg7[%c0, %c0_1] : memref<8x32xf32, #tpu.memory_space<vmem>>, vector<8x32xf32>
    %c0_2 = arith.constant 0 : index
    %c0_3 = arith.constant 0 : index
    %4 = vector.load %arg2[%c0_2, %c0_3] : memref<8x16xbf16, #tpu.memory_space<vmem>>, vector<8x16xbf16>
    %c0_4 = arith.constant 0 : index
    %c0_5 = arith.constant 0 : index
    %5 = vector.load %arg3[%c0_4, %c0_5] : memref<16x32xbf16, #tpu.memory_space<vmem>>, vector<16x32xbf16>
    %cst = arith.constant dense<0.000000e+00> : vector<8x32xf32>
    %6 = tpu.matmul %4, %5, %cst {dimension_numbers = #tpu.dot_dimension_numbers<[1], [0], [0], [1], [0, 0, 1, 1], [], []>} : vector<8x16xbf16>, vector<16x32xbf16>, vector<8x32xf32> -> vector<8x32xf32>
    %7 = arith.addf %3, %6 : vector<8x32xf32>
    %c0_6 = arith.constant 0 : index
    %c0_7 = arith.constant 0 : index
    %8 = vector.load %arg7[%c0_6, %c0_7] : memref<8x32xf32, #tpu.memory_space<vmem>>, vector<8x32xf32>
    tpu.vector_store %arg7[%c0_6, %c0_7], %7 {strides = array<i32>} : memref<8x32xf32, #tpu.memory_space<vmem>>, vector<8x32xf32>,
    %c0_i32_8 = arith.constant 0 : i32
    %9 = arith.cmpi eq, %arg1, %c0_i32_8 : i32
    %c0_i32_9 = arith.constant 0 : i32
    %10 = arith.cmpi eq, %arg0, %c0_i32_9 : i32
    %11 = arith.andi %9, %10 : i1
    %12 = arith.extui %11 : i1 to i32
    %c0_i32_10 = arith.constant 0 : i32
    %13 = arith.cmpi ne, %12, %c0_i32_10 : i32
    scf.if %13 {
      %cst_13 = arith.constant 0.000000e+00 : f32
      %17 = vector.broadcast %cst_13 : f32 to vector<1x32xf32>
      %c0_14 = arith.constant 0 : index
      %c0_15 = arith.constant 0 : index
      %18 = vector.load %arg5[%c0_14, %c0_15] : memref<1x32xf32, #tpu.memory_space<vmem>>, vector<1x32xf32>
      tpu.vector_store %arg5[%c0_14, %c0_15], %17 {strides = array<i32>} : memref<1x32xf32, #tpu.memory_space<vmem>>, vector<1x32xf32>,
      %cst_16 = arith.constant 0.000000e+00 : f32
      %19 = vector.broadcast %cst_16 : f32 to vector<1x32xf32>
      %c0_17 = arith.constant 0 : index
      %c0_18 = arith.constant 0 : index
      %20 = vector.load %arg6[%c0_17, %c0_18] : memref<1x32xf32, #tpu.memory_space<vmem>>, vector<1x32xf32>
      tpu.vector_store %arg6[%c0_17, %c0_18], %19 {strides = array<i32>} : memref<1x32xf32, #tpu.memory_space<vmem>>, vector<1x32xf32>,
    } else {
    }
    %c0_i32_11 = arith.constant 0 : i32
    %14 = arith.cmpi eq, %arg1, %c0_i32_11 : i32
    %15 = arith.extui %14 : i1 to i32
    %c0_i32_12 = arith.constant 0 : i32
    %16 = arith.cmpi ne, %15, %c0_i32_12 : i32
    scf.if %16 {
      %c0_13 = arith.constant 0 : index
      %c0_14 = arith.constant 0 : index
      %17 = vector.load %arg7[%c0_13, %c0_14] : memref<8x32xf32, #tpu.memory_space<vmem>>, vector<8x32xf32>
      %c0_15 = arith.constant 0 : index
      %c0_16 = arith.constant 0 : index
      %18 = vector.load %arg4[%c0_15, %c0_16] : memref<8x32xf32, #tpu.memory_space<vmem>>, vector<8x32xf32>
      tpu.vector_store %arg4[%c0_15, %c0_16], %17 {strides = array<i32>} : memref<8x32xf32, #tpu.memory_space<vmem>>, vector<8x32xf32>,
      %c0_17 = arith.constant 0 : index
      %c0_18 = arith.constant 0 : index
      %19 = vector.load %arg5[%c0_17, %c0_18] : memref<1x32xf32, #tpu.memory_space<vmem>>, vector<1x32xf32>
      %cst_19 = arith.constant dense<0.000000e+00> : vector<32xf32>
      %20 = vector.multi_reduction <add>, %17, %cst_19 [0] : vector<8x32xf32> to vector<32xf32>
      %21 = vector.shape_cast %20 : vector<32xf32> to vector<1x32xf32>
      %22 = arith.addf %19, %21 : vector<1x32xf32>
      %c0_20 = arith.constant 0 : index
      %c0_21 = arith.constant 0 : index
      %23 = vector.load %arg5[%c0_20, %c0_21] : memref<1x32xf32, #tpu.memory_space<vmem>>, vector<1x32xf32>
      tpu.vector_store %arg5[%c0_20, %c0_21], %22 {strides = array<i32>} : memref<1x32xf32, #tpu.memory_space<vmem>>, vector<1x32xf32>,
      %c0_22 = arith.constant 0 : index
      %c0_23 = arith.constant 0 : index
      %24 = vector.load %arg6[%c0_22, %c0_23] : memref<1x32xf32, #tpu.memory_space<vmem>>, vector<1x32xf32>
      %25 = arith.mulf %17, %17 : vector<8x32xf32>
      %cst_24 = arith.constant dense<0.000000e+00> : vector<32xf32>
      %26 = vector.multi_reduction <add>, %25, %cst_24 [0] : vector<8x32xf32> to vector<32xf32>
      %27 = vector.shape_cast %26 : vector<32xf32> to vector<1x32xf32>
      %28 = arith.addf %24, %27 : vector<1x32xf32>
      %c0_25 = arith.constant 0 : index
      %c0_26 = arith.constant 0 : index
      %29 = vector.load %arg6[%c0_25, %c0_26] : memref<1x32xf32, #tpu.memory_space<vmem>>, vector<1x32xf32>
      tpu.vector_store %arg6[%c0_25, %c0_26], %28 {strides = array<i32>} : memref<1x32xf32, #tpu.memory_space<vmem>>, vector<1x32xf32>,
    } else {
    }
    return
  }
  func.func @transform_0(%arg0: i32, %arg1: i32) -> (i32, i32) {
    %c0_i32 = arith.constant 0 : i32
    return %arg0, %arg1 : i32, i32
  }
  func.func @transform_1(%arg0: i32, %arg1: i32) -> (i32, i32) {
    %c0_i32 = arith.constant 0 : i32
    %c0_i32_0 = arith.constant 0 : i32
    return %arg1, %c0_i32 : i32, i32
  }
  func.func @transform_2(%arg0: i32, %arg1: i32) -> (i32, i32) {
    %c0_i32 = arith.constant 0 : i32
    %c0_i32_0 = arith.constant 0 : i32
    return %arg0, %c0_i32 : i32, i32
  }
  func.func @transform_3(%arg0: i32, %arg1: i32) -> (i32, i32) {
    %c0_i32 = arith.constant 0 : i32
    %c0_i32_0 = arith.constant 0 : i32
    %c0_i32_1 = arith.constant 0 : i32
    return %c0_i32, %c0_i32_0 : i32, i32
  }
  func.func @transform_4(%arg0: i32, %arg1: i32) -> (i32, i32) {
    %c0_i32 = arith.constant 0 : i32
    %c0_i32_0 = arith.constant 0 : i32
    %c0_i32_1 = arith.constant 0 : i32
    return %c0_i32, %c0_i32_0 : i32, i32
  }
}

module attributes {stable_mosaic.version = 11 : i64} {
  func.func @_bn_apply_kernel(%arg0: i32, %arg1: memref<2x128xf32, #tpu.memory_space<vmem>>, %arg2: memref<1x128xf32, #tpu.memory_space<vmem>>, %arg3: memref<1x128xf32, #tpu.memory_space<vmem>>, %arg4: memref<2x128xbf16, #tpu.memory_space<vmem>>) attributes {dimension_semantics = [#tpu.dimension_semantics<parallel>], iteration_bounds = array<i64: 1>, scalar_prefetch = 0 : i64, scratch_operands = 0 : i64, tpu.core_type = #tpu.core_type<tc>, window_params = [{transform_indices = @transform_0, window_bounds = array<i64: 2, 128>}, {pipeline_mode = #tpu.pipeline_mode<synchronous>, transform_indices = @transform_1, window_bounds = array<i64: 1, 128>}, {pipeline_mode = #tpu.pipeline_mode<synchronous>, transform_indices = @transform_2, window_bounds = array<i64: 1, 128>}, {transform_indices = @transform_3, window_bounds = array<i64: 2, 128>}]} {
    %c0 = arith.constant 0 : index
    %c0_0 = arith.constant 0 : index
    %0 = vector.load %arg1[%c0, %c0_0] : memref<2x128xf32, #tpu.memory_space<vmem>>, vector<2x128xf32>
    %c0_1 = arith.constant 0 : index
    %c0_2 = arith.constant 0 : index
    %1 = vector.load %arg2[%c0_1, %c0_2] : memref<1x128xf32, #tpu.memory_space<vmem>>, vector<1x128xf32>
    %2 = vector.broadcast %1 : vector<1x128xf32> to vector<2x128xf32>
    %3 = arith.mulf %0, %2 : vector<2x128xf32>
    %c0_3 = arith.constant 0 : index
    %c0_4 = arith.constant 0 : index
    %4 = vector.load %arg3[%c0_3, %c0_4] : memref<1x128xf32, #tpu.memory_space<vmem>>, vector<1x128xf32>
    %5 = vector.broadcast %4 : vector<1x128xf32> to vector<2x128xf32>
    %6 = arith.addf %3, %5 : vector<2x128xf32>
    %7 = arith.truncf %6 : vector<2x128xf32> to vector<2x128xbf16>
    %c0_5 = arith.constant 0 : index
    %c0_6 = arith.constant 0 : index
    %8 = vector.load %arg4[%c0_5, %c0_6] : memref<2x128xbf16, #tpu.memory_space<vmem>>, vector<2x128xbf16>
    tpu.vector_store %arg4[%c0_5, %c0_6], %7 {strides = array<i32>} : memref<2x128xbf16, #tpu.memory_space<vmem>>, vector<2x128xbf16>,
    return
  }
  func.func @transform_0(%arg0: i32) -> (i32, i32) {
    %c0_i32 = arith.constant 0 : i32
    %c0_i32_0 = arith.constant 0 : i32
    return %arg0, %c0_i32 : i32, i32
  }
  func.func @transform_1(%arg0: i32) -> (i32, i32) {
    %c0_i32 = arith.constant 0 : i32
    %c0_i32_0 = arith.constant 0 : i32
    %c0_i32_1 = arith.constant 0 : i32
    return %c0_i32, %c0_i32_0 : i32, i32
  }
  func.func @transform_2(%arg0: i32) -> (i32, i32) {
    %c0_i32 = arith.constant 0 : i32
    %c0_i32_0 = arith.constant 0 : i32
    %c0_i32_1 = arith.constant 0 : i32
    return %c0_i32, %c0_i32_0 : i32, i32
  }
  func.func @transform_3(%arg0: i32) -> (i32, i32) {
    %c0_i32 = arith.constant 0 : i32
    %c0_i32_0 = arith.constant 0 : i32
    return %arg0, %c0_i32 : i32, i32
  }
}

module attributes {stable_mosaic.version = 11 : i64} {
  func.func @_bn_apply_kernel(%arg0: i32, %arg1: memref<2x128xf32, #tpu.memory_space<vmem>>, %arg2: memref<1x128xf32, #tpu.memory_space<vmem>>, %arg3: memref<1x128xf32, #tpu.memory_space<vmem>>, %arg4: memref<2x128xbf16, #tpu.memory_space<vmem>>) attributes {dimension_semantics = [#tpu.dimension_semantics<parallel>], iteration_bounds = array<i64: 1>, scalar_prefetch = 0 : i64, scratch_operands = 0 : i64, tpu.core_type = #tpu.core_type<tc>, window_params = [{transform_indices = @transform_0, window_bounds = array<i64: 2, 128>}, {pipeline_mode = #tpu.pipeline_mode<synchronous>, transform_indices = @transform_1, window_bounds = array<i64: 1, 128>}, {pipeline_mode = #tpu.pipeline_mode<synchronous>, transform_indices = @transform_2, window_bounds = array<i64: 1, 128>}, {transform_indices = @transform_3, window_bounds = array<i64: 2, 128>}]} {
    %c0 = arith.constant 0 : index
    %c0_0 = arith.constant 0 : index
    %0 = vector.load %arg1[%c0, %c0_0] : memref<2x128xf32, #tpu.memory_space<vmem>>, vector<2x128xf32>
    %c0_1 = arith.constant 0 : index
    %c0_2 = arith.constant 0 : index
    %1 = vector.load %arg2[%c0_1, %c0_2] : memref<1x128xf32, #tpu.memory_space<vmem>>, vector<1x128xf32>
    %2 = vector.broadcast %1 : vector<1x128xf32> to vector<2x128xf32>
    %3 = arith.mulf %0, %2 : vector<2x128xf32>
    %c0_3 = arith.constant 0 : index
    %c0_4 = arith.constant 0 : index
    %4 = vector.load %arg3[%c0_3, %c0_4] : memref<1x128xf32, #tpu.memory_space<vmem>>, vector<1x128xf32>
    %5 = vector.broadcast %4 : vector<1x128xf32> to vector<2x128xf32>
    %6 = arith.addf %3, %5 : vector<2x128xf32>
    %cst = arith.constant 0.000000e+00 : f32
    %7 = vector.broadcast %cst : f32 to vector<2x128xf32>
    %8 = arith.maximumf %6, %7 : vector<2x128xf32>
    %9 = arith.truncf %8 : vector<2x128xf32> to vector<2x128xbf16>
    %c0_5 = arith.constant 0 : index
    %c0_6 = arith.constant 0 : index
    %10 = vector.load %arg4[%c0_5, %c0_6] : memref<2x128xbf16, #tpu.memory_space<vmem>>, vector<2x128xbf16>
    tpu.vector_store %arg4[%c0_5, %c0_6], %9 {strides = array<i32>} : memref<2x128xbf16, #tpu.memory_space<vmem>>, vector<2x128xbf16>,
    return
  }
  func.func @transform_0(%arg0: i32) -> (i32, i32) {
    %c0_i32 = arith.constant 0 : i32
    %c0_i32_0 = arith.constant 0 : i32
    return %arg0, %c0_i32 : i32, i32
  }
  func.func @transform_1(%arg0: i32) -> (i32, i32) {
    %c0_i32 = arith.constant 0 : i32
    %c0_i32_0 = arith.constant 0 : i32
    %c0_i32_1 = arith.constant 0 : i32
    return %c0_i32, %c0_i32_0 : i32, i32
  }
  func.func @transform_2(%arg0: i32) -> (i32, i32) {
    %c0_i32 = arith.constant 0 : i32
    %c0_i32_0 = arith.constant 0 : i32
    %c0_i32_1 = arith.constant 0 : i32
    return %c0_i32, %c0_i32_0 : i32, i32
  }
  func.func @transform_3(%arg0: i32) -> (i32, i32) {
    %c0_i32 = arith.constant 0 : i32
    %c0_i32_0 = arith.constant 0 : i32
    return %arg0, %c0_i32 : i32, i32
  }
}

module attributes {stable_mosaic.version = 11 : i64} {
  func.func @_conv_gemm_kernel(%arg0: i32, %arg1: i32, %arg2: memref<8x144xbf16, #tpu.memory_space<vmem>>, %arg3: memref<144x32xbf16, #tpu.memory_space<vmem>>, %arg4: memref<8x32xf32, #tpu.memory_space<vmem>>, %arg5: memref<1x32xf32, #tpu.memory_space<vmem>>, %arg6: memref<1x32xf32, #tpu.memory_space<vmem>>, %arg7: memref<8x32xf32, #tpu.memory_space<vmem>>) attributes {dimension_semantics = [#tpu.dimension_semantics<arbitrary>, #tpu.dimension_semantics<arbitrary>], iteration_bounds = array<i64: 1, 1>, scalar_prefetch = 0 : i64, scratch_operands = 1 : i64, tpu.core_type = #tpu.core_type<tc>, window_params = [{transform_indices = @transform_0, window_bounds = array<i64: 8, 144>}, {transform_indices = @transform_1, window_bounds = array<i64: 144, 32>}, {transform_indices = @transform_2, window_bounds = array<i64: 8, 32>}, {pipeline_mode = #tpu.pipeline_mode<synchronous>, transform_indices = @transform_3, window_bounds = array<i64: 1, 32>}, {pipeline_mode = #tpu.pipeline_mode<synchronous>, transform_indices = @transform_4, window_bounds = array<i64: 1, 32>}]} {
    %c0_i32 = arith.constant 0 : i32
    %0 = arith.cmpi eq, %arg1, %c0_i32 : i32
    %1 = arith.extui %0 : i1 to i32
    %c0_i32_0 = arith.constant 0 : i32
    %2 = arith.cmpi ne, %1, %c0_i32_0 : i32
    scf.if %2 {
      %cst_13 = arith.constant 0.000000e+00 : f32
      %17 = vector.broadcast %cst_13 : f32 to vector<8x32xf32>
      %c0_14 = arith.constant 0 : index
      %c0_15 = arith.constant 0 : index
      %18 = vector.load %arg7[%c0_14, %c0_15] : memref<8x32xf32, #tpu.memory_space<vmem>>, vector<8x32xf32>
      tpu.vector_store %arg7[%c0_14, %c0_15], %17 {strides = array<i32>} : memref<8x32xf32, #tpu.memory_space<vmem>>, vector<8x32xf32>,
    } else {
    }
    %c0 = arith.constant 0 : index
    %c0_1 = arith.constant 0 : index
    %3 = vector.load %arg7[%c0, %c0_1] : memref<8x32xf32, #tpu.memory_space<vmem>>, vector<8x32xf32>
    %c0_2 = arith.constant 0 : index
    %c0_3 = arith.constant 0 : index
    %4 = vector.load %arg2[%c0_2, %c0_3] : memref<8x144xbf16, #tpu.memory_space<vmem>>, vector<8x144xbf16>
    %c0_4 = arith.constant 0 : index
    %c0_5 = arith.constant 0 : index
    %5 = vector.load %arg3[%c0_4, %c0_5] : memref<144x32xbf16, #tpu.memory_space<vmem>>, vector<144x32xbf16>
    %cst = arith.constant dense<0.000000e+00> : vector<8x32xf32>
    %6 = tpu.matmul %4, %5, %cst {dimension_numbers = #tpu.dot_dimension_numbers<[1], [0], [0], [1], [0, 0, 1, 1], [], []>} : vector<8x144xbf16>, vector<144x32xbf16>, vector<8x32xf32> -> vector<8x32xf32>
    %7 = arith.addf %3, %6 : vector<8x32xf32>
    %c0_6 = arith.constant 0 : index
    %c0_7 = arith.constant 0 : index
    %8 = vector.load %arg7[%c0_6, %c0_7] : memref<8x32xf32, #tpu.memory_space<vmem>>, vector<8x32xf32>
    tpu.vector_store %arg7[%c0_6, %c0_7], %7 {strides = array<i32>} : memref<8x32xf32, #tpu.memory_space<vmem>>, vector<8x32xf32>,
    %c0_i32_8 = arith.constant 0 : i32
    %9 = arith.cmpi eq, %arg1, %c0_i32_8 : i32
    %c0_i32_9 = arith.constant 0 : i32
    %10 = arith.cmpi eq, %arg0, %c0_i32_9 : i32
    %11 = arith.andi %9, %10 : i1
    %12 = arith.extui %11 : i1 to i32
    %c0_i32_10 = arith.constant 0 : i32
    %13 = arith.cmpi ne, %12, %c0_i32_10 : i32
    scf.if %13 {
      %cst_13 = arith.constant 0.000000e+00 : f32
      %17 = vector.broadcast %cst_13 : f32 to vector<1x32xf32>
      %c0_14 = arith.constant 0 : index
      %c0_15 = arith.constant 0 : index
      %18 = vector.load %arg5[%c0_14, %c0_15] : memref<1x32xf32, #tpu.memory_space<vmem>>, vector<1x32xf32>
      tpu.vector_store %arg5[%c0_14, %c0_15], %17 {strides = array<i32>} : memref<1x32xf32, #tpu.memory_space<vmem>>, vector<1x32xf32>,
      %cst_16 = arith.constant 0.000000e+00 : f32
      %19 = vector.broadcast %cst_16 : f32 to vector<1x32xf32>
      %c0_17 = arith.constant 0 : index
      %c0_18 = arith.constant 0 : index
      %20 = vector.load %arg6[%c0_17, %c0_18] : memref<1x32xf32, #tpu.memory_space<vmem>>, vector<1x32xf32>
      tpu.vector_store %arg6[%c0_17, %c0_18], %19 {strides = array<i32>} : memref<1x32xf32, #tpu.memory_space<vmem>>, vector<1x32xf32>,
    } else {
    }
    %c0_i32_11 = arith.constant 0 : i32
    %14 = arith.cmpi eq, %arg1, %c0_i32_11 : i32
    %15 = arith.extui %14 : i1 to i32
    %c0_i32_12 = arith.constant 0 : i32
    %16 = arith.cmpi ne, %15, %c0_i32_12 : i32
    scf.if %16 {
      %c0_13 = arith.constant 0 : index
      %c0_14 = arith.constant 0 : index
      %17 = vector.load %arg7[%c0_13, %c0_14] : memref<8x32xf32, #tpu.memory_space<vmem>>, vector<8x32xf32>
      %c0_15 = arith.constant 0 : index
      %c0_16 = arith.constant 0 : index
      %18 = vector.load %arg4[%c0_15, %c0_16] : memref<8x32xf32, #tpu.memory_space<vmem>>, vector<8x32xf32>
      tpu.vector_store %arg4[%c0_15, %c0_16], %17 {strides = array<i32>} : memref<8x32xf32, #tpu.memory_space<vmem>>, vector<8x32xf32>,
      %c0_17 = arith.constant 0 : index
      %c0_18 = arith.constant 0 : index
      %19 = vector.load %arg5[%c0_17, %c0_18] : memref<1x32xf32, #tpu.memory_space<vmem>>, vector<1x32xf32>
      %cst_19 = arith.constant dense<0.000000e+00> : vector<32xf32>
      %20 = vector.multi_reduction <add>, %17, %cst_19 [0] : vector<8x32xf32> to vector<32xf32>
      %21 = vector.shape_cast %20 : vector<32xf32> to vector<1x32xf32>
      %22 = arith.addf %19, %21 : vector<1x32xf32>
      %c0_20 = arith.constant 0 : index
      %c0_21 = arith.constant 0 : index
      %23 = vector.load %arg5[%c0_20, %c0_21] : memref<1x32xf32, #tpu.memory_space<vmem>>, vector<1x32xf32>
      tpu.vector_store %arg5[%c0_20, %c0_21], %22 {strides = array<i32>} : memref<1x32xf32, #tpu.memory_space<vmem>>, vector<1x32xf32>,
      %c0_22 = arith.constant 0 : index
      %c0_23 = arith.constant 0 : index
      %24 = vector.load %arg6[%c0_22, %c0_23] : memref<1x32xf32, #tpu.memory_space<vmem>>, vector<1x32xf32>
      %25 = arith.mulf %17, %17 : vector<8x32xf32>
      %cst_24 = arith.constant dense<0.000000e+00> : vector<32xf32>
      %26 = vector.multi_reduction <add>, %25, %cst_24 [0] : vector<8x32xf32> to vector<32xf32>
      %27 = vector.shape_cast %26 : vector<32xf32> to vector<1x32xf32>
      %28 = arith.addf %24, %27 : vector<1x32xf32>
      %c0_25 = arith.constant 0 : index
      %c0_26 = arith.constant 0 : index
      %29 = vector.load %arg6[%c0_25, %c0_26] : memref<1x32xf32, #tpu.memory_space<vmem>>, vector<1x32xf32>
      tpu.vector_store %arg6[%c0_25, %c0_26], %28 {strides = array<i32>} : memref<1x32xf32, #tpu.memory_space<vmem>>, vector<1x32xf32>,
    } else {
    }
    return
  }
  func.func @transform_0(%arg0: i32, %arg1: i32) -> (i32, i32) {
    %c0_i32 = arith.constant 0 : i32
    return %arg0, %arg1 : i32, i32
  }
  func.func @transform_1(%arg0: i32, %arg1: i32) -> (i32, i32) {
    %c0_i32 = arith.constant 0 : i32
    %c0_i32_0 = arith.constant 0 : i32
    return %arg1, %c0_i32 : i32, i32
  }
  func.func @transform_2(%arg0: i32, %arg1: i32) -> (i32, i32) {
    %c0_i32 = arith.constant 0 : i32
    %c0_i32_0 = arith.constant 0 : i32
    return %arg0, %c0_i32 : i32, i32
  }
  func.func @transform_3(%arg0: i32, %arg1: i32) -> (i32, i32) {
    %c0_i32 = arith.constant 0 : i32
    %c0_i32_0 = arith.constant 0 : i32
    %c0_i32_1 = arith.constant 0 : i32
    return %c0_i32, %c0_i32_0 : i32, i32
  }
  func.func @transform_4(%arg0: i32, %arg1: i32) -> (i32, i32) {
    %c0_i32 = arith.constant 0 : i32
    %c0_i32_0 = arith.constant 0 : i32
    %c0_i32_1 = arith.constant 0 : i32
    return %c0_i32, %c0_i32_0 : i32, i32
  }
}

module attributes {stable_mosaic.version = 11 : i64} {
  func.func @_conv_gemm_kernel(%arg0: i32, %arg1: i32, %arg2: memref<8x288xbf16, #tpu.memory_space<vmem>>, %arg3: memref<288x32xbf16, #tpu.memory_space<vmem>>, %arg4: memref<8x32xf32, #tpu.memory_space<vmem>>, %arg5: memref<1x32xf32, #tpu.memory_space<vmem>>, %arg6: memref<1x32xf32, #tpu.memory_space<vmem>>, %arg7: memref<8x32xf32, #tpu.memory_space<vmem>>) attributes {dimension_semantics = [#tpu.dimension_semantics<arbitrary>, #tpu.dimension_semantics<arbitrary>], iteration_bounds = array<i64: 1, 1>, scalar_prefetch = 0 : i64, scratch_operands = 1 : i64, tpu.core_type = #tpu.core_type<tc>, window_params = [{transform_indices = @transform_0, window_bounds = array<i64: 8, 288>}, {transform_indices = @transform_1, window_bounds = array<i64: 288, 32>}, {transform_indices = @transform_2, window_bounds = array<i64: 8, 32>}, {pipeline_mode = #tpu.pipeline_mode<synchronous>, transform_indices = @transform_3, window_bounds = array<i64: 1, 32>}, {pipeline_mode = #tpu.pipeline_mode<synchronous>, transform_indices = @transform_4, window_bounds = array<i64: 1, 32>}]} {
    %c0_i32 = arith.constant 0 : i32
    %0 = arith.cmpi eq, %arg1, %c0_i32 : i32
    %1 = arith.extui %0 : i1 to i32
    %c0_i32_0 = arith.constant 0 : i32
    %2 = arith.cmpi ne, %1, %c0_i32_0 : i32
    scf.if %2 {
      %cst_13 = arith.constant 0.000000e+00 : f32
      %17 = vector.broadcast %cst_13 : f32 to vector<8x32xf32>
      %c0_14 = arith.constant 0 : index
      %c0_15 = arith.constant 0 : index
      %18 = vector.load %arg7[%c0_14, %c0_15] : memref<8x32xf32, #tpu.memory_space<vmem>>, vector<8x32xf32>
      tpu.vector_store %arg7[%c0_14, %c0_15], %17 {strides = array<i32>} : memref<8x32xf32, #tpu.memory_space<vmem>>, vector<8x32xf32>,
    } else {
    }
    %c0 = arith.constant 0 : index
    %c0_1 = arith.constant 0 : index
    %3 = vector.load %arg7[%c0, %c0_1] : memref<8x32xf32, #tpu.memory_space<vmem>>, vector<8x32xf32>
    %c0_2 = arith.constant 0 : index
    %c0_3 = arith.constant 0 : index
    %4 = vector.load %arg2[%c0_2, %c0_3] : memref<8x288xbf16, #tpu.memory_space<vmem>>, vector<8x288xbf16>
    %c0_4 = arith.constant 0 : index
    %c0_5 = arith.constant 0 : index
    %5 = vector.load %arg3[%c0_4, %c0_5] : memref<288x32xbf16, #tpu.memory_space<vmem>>, vector<288x32xbf16>
    %cst = arith.constant dense<0.000000e+00> : vector<8x32xf32>
    %6 = tpu.matmul %4, %5, %cst {dimension_numbers = #tpu.dot_dimension_numbers<[1], [0], [0], [1], [0, 0, 1, 1], [], []>} : vector<8x288xbf16>, vector<288x32xbf16>, vector<8x32xf32> -> vector<8x32xf32>
    %7 = arith.addf %3, %6 : vector<8x32xf32>
    %c0_6 = arith.constant 0 : index
    %c0_7 = arith.constant 0 : index
    %8 = vector.load %arg7[%c0_6, %c0_7] : memref<8x32xf32, #tpu.memory_space<vmem>>, vector<8x32xf32>
    tpu.vector_store %arg7[%c0_6, %c0_7], %7 {strides = array<i32>} : memref<8x32xf32, #tpu.memory_space<vmem>>, vector<8x32xf32>,
    %c0_i32_8 = arith.constant 0 : i32
    %9 = arith.cmpi eq, %arg1, %c0_i32_8 : i32
    %c0_i32_9 = arith.constant 0 : i32
    %10 = arith.cmpi eq, %arg0, %c0_i32_9 : i32
    %11 = arith.andi %9, %10 : i1
    %12 = arith.extui %11 : i1 to i32
    %c0_i32_10 = arith.constant 0 : i32
    %13 = arith.cmpi ne, %12, %c0_i32_10 : i32
    scf.if %13 {
      %cst_13 = arith.constant 0.000000e+00 : f32
      %17 = vector.broadcast %cst_13 : f32 to vector<1x32xf32>
      %c0_14 = arith.constant 0 : index
      %c0_15 = arith.constant 0 : index
      %18 = vector.load %arg5[%c0_14, %c0_15] : memref<1x32xf32, #tpu.memory_space<vmem>>, vector<1x32xf32>
      tpu.vector_store %arg5[%c0_14, %c0_15], %17 {strides = array<i32>} : memref<1x32xf32, #tpu.memory_space<vmem>>, vector<1x32xf32>,
      %cst_16 = arith.constant 0.000000e+00 : f32
      %19 = vector.broadcast %cst_16 : f32 to vector<1x32xf32>
      %c0_17 = arith.constant 0 : index
      %c0_18 = arith.constant 0 : index
      %20 = vector.load %arg6[%c0_17, %c0_18] : memref<1x32xf32, #tpu.memory_space<vmem>>, vector<1x32xf32>
      tpu.vector_store %arg6[%c0_17, %c0_18], %19 {strides = array<i32>} : memref<1x32xf32, #tpu.memory_space<vmem>>, vector<1x32xf32>,
    } else {
    }
    %c0_i32_11 = arith.constant 0 : i32
    %14 = arith.cmpi eq, %arg1, %c0_i32_11 : i32
    %15 = arith.extui %14 : i1 to i32
    %c0_i32_12 = arith.constant 0 : i32
    %16 = arith.cmpi ne, %15, %c0_i32_12 : i32
    scf.if %16 {
      %c0_13 = arith.constant 0 : index
      %c0_14 = arith.constant 0 : index
      %17 = vector.load %arg7[%c0_13, %c0_14] : memref<8x32xf32, #tpu.memory_space<vmem>>, vector<8x32xf32>
      %c0_15 = arith.constant 0 : index
      %c0_16 = arith.constant 0 : index
      %18 = vector.load %arg4[%c0_15, %c0_16] : memref<8x32xf32, #tpu.memory_space<vmem>>, vector<8x32xf32>
      tpu.vector_store %arg4[%c0_15, %c0_16], %17 {strides = array<i32>} : memref<8x32xf32, #tpu.memory_space<vmem>>, vector<8x32xf32>,
      %c0_17 = arith.constant 0 : index
      %c0_18 = arith.constant 0 : index
      %19 = vector.load %arg5[%c0_17, %c0_18] : memref<1x32xf32, #tpu.memory_space<vmem>>, vector<1x32xf32>
      %cst_19 = arith.constant dense<0.000000e+00> : vector<32xf32>
      %20 = vector.multi_reduction <add>, %17, %cst_19 [0] : vector<8x32xf32> to vector<32xf32>
      %21 = vector.shape_cast %20 : vector<32xf32> to vector<1x32xf32>
      %22 = arith.addf %19, %21 : vector<1x32xf32>
      %c0_20 = arith.constant 0 : index
      %c0_21 = arith.constant 0 : index
      %23 = vector.load %arg5[%c0_20, %c0_21] : memref<1x32xf32, #tpu.memory_space<vmem>>, vector<1x32xf32>
      tpu.vector_store %arg5[%c0_20, %c0_21], %22 {strides = array<i32>} : memref<1x32xf32, #tpu.memory_space<vmem>>, vector<1x32xf32>,
      %c0_22 = arith.constant 0 : index
      %c0_23 = arith.constant 0 : index
      %24 = vector.load %arg6[%c0_22, %c0_23] : memref<1x32xf32, #tpu.memory_space<vmem>>, vector<1x32xf32>
      %25 = arith.mulf %17, %17 : vector<8x32xf32>
      %cst_24 = arith.constant dense<0.000000e+00> : vector<32xf32>
      %26 = vector.multi_reduction <add>, %25, %cst_24 [0] : vector<8x32xf32> to vector<32xf32>
      %27 = vector.shape_cast %26 : vector<32xf32> to vector<1x32xf32>
      %28 = arith.addf %24, %27 : vector<1x32xf32>
      %c0_25 = arith.constant 0 : index
      %c0_26 = arith.constant 0 : index
      %29 = vector.load %arg6[%c0_25, %c0_26] : memref<1x32xf32, #tpu.memory_space<vmem>>, vector<1x32xf32>
      tpu.vector_store %arg6[%c0_25, %c0_26], %28 {strides = array<i32>} : memref<1x32xf32, #tpu.memory_space<vmem>>, vector<1x32xf32>,
    } else {
    }
    return
  }
  func.func @transform_0(%arg0: i32, %arg1: i32) -> (i32, i32) {
    %c0_i32 = arith.constant 0 : i32
    return %arg0, %arg1 : i32, i32
  }
  func.func @transform_1(%arg0: i32, %arg1: i32) -> (i32, i32) {
    %c0_i32 = arith.constant 0 : i32
    %c0_i32_0 = arith.constant 0 : i32
    return %arg1, %c0_i32 : i32, i32
  }
  func.func @transform_2(%arg0: i32, %arg1: i32) -> (i32, i32) {
    %c0_i32 = arith.constant 0 : i32
    %c0_i32_0 = arith.constant 0 : i32
    return %arg0, %c0_i32 : i32, i32
  }
  func.func @transform_3(%arg0: i32, %arg1: i32) -> (i32, i32) {
    %c0_i32 = arith.constant 0 : i32
    %c0_i32_0 = arith.constant 0 : i32
    %c0_i32_1 = arith.constant 0 : i32
    return %c0_i32, %c0_i32_0 : i32, i32
  }
  func.func @transform_4(%arg0: i32, %arg1: i32) -> (i32, i32) {
    %c0_i32 = arith.constant 0 : i32
    %c0_i32_0 = arith.constant 0 : i32
    %c0_i32_1 = arith.constant 0 : i32
    return %c0_i32, %c0_i32_0 : i32, i32
  }
}

module attributes {stable_mosaic.version = 11 : i64} {
  func.func @_bn_apply_res_kernel(%arg0: i32, %arg1: memref<2x128xf32, #tpu.memory_space<vmem>>, %arg2: memref<1x128xf32, #tpu.memory_space<vmem>>, %arg3: memref<1x128xf32, #tpu.memory_space<vmem>>, %arg4: memref<2x128xbf16, #tpu.memory_space<vmem>>, %arg5: memref<2x128xbf16, #tpu.memory_space<vmem>>) attributes {dimension_semantics = [#tpu.dimension_semantics<parallel>], iteration_bounds = array<i64: 1>, scalar_prefetch = 0 : i64, scratch_operands = 0 : i64, tpu.core_type = #tpu.core_type<tc>, window_params = [{transform_indices = @transform_0, window_bounds = array<i64: 2, 128>}, {pipeline_mode = #tpu.pipeline_mode<synchronous>, transform_indices = @transform_1, window_bounds = array<i64: 1, 128>}, {pipeline_mode = #tpu.pipeline_mode<synchronous>, transform_indices = @transform_2, window_bounds = array<i64: 1, 128>}, {transform_indices = @transform_3, window_bounds = array<i64: 2, 128>}, {transform_indices = @transform_4, window_bounds = array<i64: 2, 128>}]} {
    %c0 = arith.constant 0 : index
    %c0_0 = arith.constant 0 : index
    %0 = vector.load %arg1[%c0, %c0_0] : memref<2x128xf32, #tpu.memory_space<vmem>>, vector<2x128xf32>
    %c0_1 = arith.constant 0 : index
    %c0_2 = arith.constant 0 : index
    %1 = vector.load %arg2[%c0_1, %c0_2] : memref<1x128xf32, #tpu.memory_space<vmem>>, vector<1x128xf32>
    %2 = vector.broadcast %1 : vector<1x128xf32> to vector<2x128xf32>
    %3 = arith.mulf %0, %2 : vector<2x128xf32>
    %c0_3 = arith.constant 0 : index
    %c0_4 = arith.constant 0 : index
    %4 = vector.load %arg3[%c0_3, %c0_4] : memref<1x128xf32, #tpu.memory_space<vmem>>, vector<1x128xf32>
    %5 = vector.broadcast %4 : vector<1x128xf32> to vector<2x128xf32>
    %6 = arith.addf %3, %5 : vector<2x128xf32>
    %c0_5 = arith.constant 0 : index
    %c0_6 = arith.constant 0 : index
    %7 = vector.load %arg4[%c0_5, %c0_6] : memref<2x128xbf16, #tpu.memory_space<vmem>>, vector<2x128xbf16>
    %8 = arith.extf %7 : vector<2x128xbf16> to vector<2x128xf32>
    %9 = arith.addf %6, %8 : vector<2x128xf32>
    %cst = arith.constant 0.000000e+00 : f32
    %10 = vector.broadcast %cst : f32 to vector<2x128xf32>
    %11 = arith.maximumf %9, %10 : vector<2x128xf32>
    %12 = arith.truncf %11 : vector<2x128xf32> to vector<2x128xbf16>
    %c0_7 = arith.constant 0 : index
    %c0_8 = arith.constant 0 : index
    %13 = vector.load %arg5[%c0_7, %c0_8] : memref<2x128xbf16, #tpu.memory_space<vmem>>, vector<2x128xbf16>
    tpu.vector_store %arg5[%c0_7, %c0_8], %12 {strides = array<i32>} : memref<2x128xbf16, #tpu.memory_space<vmem>>, vector<2x128xbf16>,
    return
  }
  func.func @transform_0(%arg0: i32) -> (i32, i32) {
    %c0_i32 = arith.constant 0 : i32
    %c0_i32_0 = arith.constant 0 : i32
    return %arg0, %c0_i32 : i32, i32
  }
  func.func @transform_1(%arg0: i32) -> (i32, i32) {
    %c0_i32 = arith.constant 0 : i32
    %c0_i32_0 = arith.constant 0 : i32
    %c0_i32_1 = arith.constant 0 : i32
    return %c0_i32, %c0_i32_0 : i32, i32
  }
  func.func @transform_2(%arg0: i32) -> (i32, i32) {
    %c0_i32 = arith.constant 0 : i32
    %c0_i32_0 = arith.constant 0 : i32
    %c0_i32_1 = arith.constant 0 : i32
    return %c0_i32, %c0_i32_0 : i32, i32
  }
  func.func @transform_3(%arg0: i32) -> (i32, i32) {
    %c0_i32 = arith.constant 0 : i32
    %c0_i32_0 = arith.constant 0 : i32
    return %arg0, %c0_i32 : i32, i32
  }
  func.func @transform_4(%arg0: i32) -> (i32, i32) {
    %c0_i32 = arith.constant 0 : i32
    %c0_i32_0 = arith.constant 0 : i32
    return %arg0, %c0_i32 : i32, i32
  }
}

module attributes {stable_mosaic.version = 11 : i64} {
  func.func @_conv_gemm_kernel(%arg0: i32, %arg1: i32, %arg2: memref<8x32xbf16, #tpu.memory_space<vmem>>, %arg3: memref<32x64xbf16, #tpu.memory_space<vmem>>, %arg4: memref<8x64xf32, #tpu.memory_space<vmem>>, %arg5: memref<1x64xf32, #tpu.memory_space<vmem>>, %arg6: memref<1x64xf32, #tpu.memory_space<vmem>>, %arg7: memref<8x64xf32, #tpu.memory_space<vmem>>) attributes {dimension_semantics = [#tpu.dimension_semantics<arbitrary>, #tpu.dimension_semantics<arbitrary>], iteration_bounds = array<i64: 1, 1>, scalar_prefetch = 0 : i64, scratch_operands = 1 : i64, tpu.core_type = #tpu.core_type<tc>, window_params = [{transform_indices = @transform_0, window_bounds = array<i64: 8, 32>}, {transform_indices = @transform_1, window_bounds = array<i64: 32, 64>}, {transform_indices = @transform_2, window_bounds = array<i64: 8, 64>}, {pipeline_mode = #tpu.pipeline_mode<synchronous>, transform_indices = @transform_3, window_bounds = array<i64: 1, 64>}, {pipeline_mode = #tpu.pipeline_mode<synchronous>, transform_indices = @transform_4, window_bounds = array<i64: 1, 64>}]} {
    %c0_i32 = arith.constant 0 : i32
    %0 = arith.cmpi eq, %arg1, %c0_i32 : i32
    %1 = arith.extui %0 : i1 to i32
    %c0_i32_0 = arith.constant 0 : i32
    %2 = arith.cmpi ne, %1, %c0_i32_0 : i32
    scf.if %2 {
      %cst_13 = arith.constant 0.000000e+00 : f32
      %17 = vector.broadcast %cst_13 : f32 to vector<8x64xf32>
      %c0_14 = arith.constant 0 : index
      %c0_15 = arith.constant 0 : index
      %18 = vector.load %arg7[%c0_14, %c0_15] : memref<8x64xf32, #tpu.memory_space<vmem>>, vector<8x64xf32>
      tpu.vector_store %arg7[%c0_14, %c0_15], %17 {strides = array<i32>} : memref<8x64xf32, #tpu.memory_space<vmem>>, vector<8x64xf32>,
    } else {
    }
    %c0 = arith.constant 0 : index
    %c0_1 = arith.constant 0 : index
    %3 = vector.load %arg7[%c0, %c0_1] : memref<8x64xf32, #tpu.memory_space<vmem>>, vector<8x64xf32>
    %c0_2 = arith.constant 0 : index
    %c0_3 = arith.constant 0 : index
    %4 = vector.load %arg2[%c0_2, %c0_3] : memref<8x32xbf16, #tpu.memory_space<vmem>>, vector<8x32xbf16>
    %c0_4 = arith.constant 0 : index
    %c0_5 = arith.constant 0 : index
    %5 = vector.load %arg3[%c0_4, %c0_5] : memref<32x64xbf16, #tpu.memory_space<vmem>>, vector<32x64xbf16>
    %cst = arith.constant dense<0.000000e+00> : vector<8x64xf32>
    %6 = tpu.matmul %4, %5, %cst {dimension_numbers = #tpu.dot_dimension_numbers<[1], [0], [0], [1], [0, 0, 1, 1], [], []>} : vector<8x32xbf16>, vector<32x64xbf16>, vector<8x64xf32> -> vector<8x64xf32>
    %7 = arith.addf %3, %6 : vector<8x64xf32>
    %c0_6 = arith.constant 0 : index
    %c0_7 = arith.constant 0 : index
    %8 = vector.load %arg7[%c0_6, %c0_7] : memref<8x64xf32, #tpu.memory_space<vmem>>, vector<8x64xf32>
    tpu.vector_store %arg7[%c0_6, %c0_7], %7 {strides = array<i32>} : memref<8x64xf32, #tpu.memory_space<vmem>>, vector<8x64xf32>,
    %c0_i32_8 = arith.constant 0 : i32
    %9 = arith.cmpi eq, %arg1, %c0_i32_8 : i32
    %c0_i32_9 = arith.constant 0 : i32
    %10 = arith.cmpi eq, %arg0, %c0_i32_9 : i32
    %11 = arith.andi %9, %10 : i1
    %12 = arith.extui %11 : i1 to i32
    %c0_i32_10 = arith.constant 0 : i32
    %13 = arith.cmpi ne, %12, %c0_i32_10 : i32
    scf.if %13 {
      %cst_13 = arith.constant 0.000000e+00 : f32
      %17 = vector.broadcast %cst_13 : f32 to vector<1x64xf32>
      %c0_14 = arith.constant 0 : index
      %c0_15 = arith.constant 0 : index
      %18 = vector.load %arg5[%c0_14, %c0_15] : memref<1x64xf32, #tpu.memory_space<vmem>>, vector<1x64xf32>
      tpu.vector_store %arg5[%c0_14, %c0_15], %17 {strides = array<i32>} : memref<1x64xf32, #tpu.memory_space<vmem>>, vector<1x64xf32>,
      %cst_16 = arith.constant 0.000000e+00 : f32
      %19 = vector.broadcast %cst_16 : f32 to vector<1x64xf32>
      %c0_17 = arith.constant 0 : index
      %c0_18 = arith.constant 0 : index
      %20 = vector.load %arg6[%c0_17, %c0_18] : memref<1x64xf32, #tpu.memory_space<vmem>>, vector<1x64xf32>
      tpu.vector_store %arg6[%c0_17, %c0_18], %19 {strides = array<i32>} : memref<1x64xf32, #tpu.memory_space<vmem>>, vector<1x64xf32>,
    } else {
    }
    %c0_i32_11 = arith.constant 0 : i32
    %14 = arith.cmpi eq, %arg1, %c0_i32_11 : i32
    %15 = arith.extui %14 : i1 to i32
    %c0_i32_12 = arith.constant 0 : i32
    %16 = arith.cmpi ne, %15, %c0_i32_12 : i32
    scf.if %16 {
      %c0_13 = arith.constant 0 : index
      %c0_14 = arith.constant 0 : index
      %17 = vector.load %arg7[%c0_13, %c0_14] : memref<8x64xf32, #tpu.memory_space<vmem>>, vector<8x64xf32>
      %c0_15 = arith.constant 0 : index
      %c0_16 = arith.constant 0 : index
      %18 = vector.load %arg4[%c0_15, %c0_16] : memref<8x64xf32, #tpu.memory_space<vmem>>, vector<8x64xf32>
      tpu.vector_store %arg4[%c0_15, %c0_16], %17 {strides = array<i32>} : memref<8x64xf32, #tpu.memory_space<vmem>>, vector<8x64xf32>,
      %c0_17 = arith.constant 0 : index
      %c0_18 = arith.constant 0 : index
      %19 = vector.load %arg5[%c0_17, %c0_18] : memref<1x64xf32, #tpu.memory_space<vmem>>, vector<1x64xf32>
      %cst_19 = arith.constant dense<0.000000e+00> : vector<64xf32>
      %20 = vector.multi_reduction <add>, %17, %cst_19 [0] : vector<8x64xf32> to vector<64xf32>
      %21 = vector.shape_cast %20 : vector<64xf32> to vector<1x64xf32>
      %22 = arith.addf %19, %21 : vector<1x64xf32>
      %c0_20 = arith.constant 0 : index
      %c0_21 = arith.constant 0 : index
      %23 = vector.load %arg5[%c0_20, %c0_21] : memref<1x64xf32, #tpu.memory_space<vmem>>, vector<1x64xf32>
      tpu.vector_store %arg5[%c0_20, %c0_21], %22 {strides = array<i32>} : memref<1x64xf32, #tpu.memory_space<vmem>>, vector<1x64xf32>,
      %c0_22 = arith.constant 0 : index
      %c0_23 = arith.constant 0 : index
      %24 = vector.load %arg6[%c0_22, %c0_23] : memref<1x64xf32, #tpu.memory_space<vmem>>, vector<1x64xf32>
      %25 = arith.mulf %17, %17 : vector<8x64xf32>
      %cst_24 = arith.constant dense<0.000000e+00> : vector<64xf32>
      %26 = vector.multi_reduction <add>, %25, %cst_24 [0] : vector<8x64xf32> to vector<64xf32>
      %27 = vector.shape_cast %26 : vector<64xf32> to vector<1x64xf32>
      %28 = arith.addf %24, %27 : vector<1x64xf32>
      %c0_25 = arith.constant 0 : index
      %c0_26 = arith.constant 0 : index
      %29 = vector.load %arg6[%c0_25, %c0_26] : memref<1x64xf32, #tpu.memory_space<vmem>>, vector<1x64xf32>
      tpu.vector_store %arg6[%c0_25, %c0_26], %28 {strides = array<i32>} : memref<1x64xf32, #tpu.memory_space<vmem>>, vector<1x64xf32>,
    } else {
    }
    return
  }
  func.func @transform_0(%arg0: i32, %arg1: i32) -> (i32, i32) {
    %c0_i32 = arith.constant 0 : i32
    return %arg0, %arg1 : i32, i32
  }
  func.func @transform_1(%arg0: i32, %arg1: i32) -> (i32, i32) {
    %c0_i32 = arith.constant 0 : i32
    %c0_i32_0 = arith.constant 0 : i32
    return %arg1, %c0_i32 : i32, i32
  }
  func.func @transform_2(%arg0: i32, %arg1: i32) -> (i32, i32) {
    %c0_i32 = arith.constant 0 : i32
    %c0_i32_0 = arith.constant 0 : i32
    return %arg0, %c0_i32 : i32, i32
  }
  func.func @transform_3(%arg0: i32, %arg1: i32) -> (i32, i32) {
    %c0_i32 = arith.constant 0 : i32
    %c0_i32_0 = arith.constant 0 : i32
    %c0_i32_1 = arith.constant 0 : i32
    return %c0_i32, %c0_i32_0 : i32, i32
  }
  func.func @transform_4(%arg0: i32, %arg1: i32) -> (i32, i32) {
    %c0_i32 = arith.constant 0 : i32
    %c0_i32_0 = arith.constant 0 : i32
    %c0_i32_1 = arith.constant 0 : i32
    return %c0_i32, %c0_i32_0 : i32, i32
  }
}

module attributes {stable_mosaic.version = 11 : i64} {
  func.func @_bn_apply_kernel(%arg0: i32, %arg1: memref<1x128xf32, #tpu.memory_space<vmem>>, %arg2: memref<1x128xf32, #tpu.memory_space<vmem>>, %arg3: memref<1x128xf32, #tpu.memory_space<vmem>>, %arg4: memref<1x128xbf16, #tpu.memory_space<vmem>>) attributes {dimension_semantics = [#tpu.dimension_semantics<parallel>], iteration_bounds = array<i64: 1>, scalar_prefetch = 0 : i64, scratch_operands = 0 : i64, tpu.core_type = #tpu.core_type<tc>, window_params = [{transform_indices = @transform_0, window_bounds = array<i64: 1, 128>}, {pipeline_mode = #tpu.pipeline_mode<synchronous>, transform_indices = @transform_1, window_bounds = array<i64: 1, 128>}, {pipeline_mode = #tpu.pipeline_mode<synchronous>, transform_indices = @transform_2, window_bounds = array<i64: 1, 128>}, {transform_indices = @transform_3, window_bounds = array<i64: 1, 128>}]} {
    %c0 = arith.constant 0 : index
    %c0_0 = arith.constant 0 : index
    %0 = vector.load %arg1[%c0, %c0_0] : memref<1x128xf32, #tpu.memory_space<vmem>>, vector<1x128xf32>
    %c0_1 = arith.constant 0 : index
    %c0_2 = arith.constant 0 : index
    %1 = vector.load %arg2[%c0_1, %c0_2] : memref<1x128xf32, #tpu.memory_space<vmem>>, vector<1x128xf32>
    %2 = arith.mulf %0, %1 : vector<1x128xf32>
    %c0_3 = arith.constant 0 : index
    %c0_4 = arith.constant 0 : index
    %3 = vector.load %arg3[%c0_3, %c0_4] : memref<1x128xf32, #tpu.memory_space<vmem>>, vector<1x128xf32>
    %4 = arith.addf %2, %3 : vector<1x128xf32>
    %5 = arith.truncf %4 : vector<1x128xf32> to vector<1x128xbf16>
    %c0_5 = arith.constant 0 : index
    %c0_6 = arith.constant 0 : index
    %6 = vector.load %arg4[%c0_5, %c0_6] : memref<1x128xbf16, #tpu.memory_space<vmem>>, vector<1x128xbf16>
    tpu.vector_store %arg4[%c0_5, %c0_6], %5 {strides = array<i32>} : memref<1x128xbf16, #tpu.memory_space<vmem>>, vector<1x128xbf16>,
    return
  }
  func.func @transform_0(%arg0: i32) -> (i32, i32) {
    %c0_i32 = arith.constant 0 : i32
    %c0_i32_0 = arith.constant 0 : i32
    return %arg0, %c0_i32 : i32, i32
  }
  func.func @transform_1(%arg0: i32) -> (i32, i32) {
    %c0_i32 = arith.constant 0 : i32
    %c0_i32_0 = arith.constant 0 : i32
    %c0_i32_1 = arith.constant 0 : i32
    return %c0_i32, %c0_i32_0 : i32, i32
  }
  func.func @transform_2(%arg0: i32) -> (i32, i32) {
    %c0_i32 = arith.constant 0 : i32
    %c0_i32_0 = arith.constant 0 : i32
    %c0_i32_1 = arith.constant 0 : i32
    return %c0_i32, %c0_i32_0 : i32, i32
  }
  func.func @transform_3(%arg0: i32) -> (i32, i32) {
    %c0_i32 = arith.constant 0 : i32
    %c0_i32_0 = arith.constant 0 : i32
    return %arg0, %c0_i32 : i32, i32
  }
}

module attributes {stable_mosaic.version = 11 : i64} {
  func.func @_conv_gemm_kernel(%arg0: i32, %arg1: i32, %arg2: memref<8x288xbf16, #tpu.memory_space<vmem>>, %arg3: memref<288x64xbf16, #tpu.memory_space<vmem>>, %arg4: memref<8x64xf32, #tpu.memory_space<vmem>>, %arg5: memref<1x64xf32, #tpu.memory_space<vmem>>, %arg6: memref<1x64xf32, #tpu.memory_space<vmem>>, %arg7: memref<8x64xf32, #tpu.memory_space<vmem>>) attributes {dimension_semantics = [#tpu.dimension_semantics<arbitrary>, #tpu.dimension_semantics<arbitrary>], iteration_bounds = array<i64: 1, 1>, scalar_prefetch = 0 : i64, scratch_operands = 1 : i64, tpu.core_type = #tpu.core_type<tc>, window_params = [{transform_indices = @transform_0, window_bounds = array<i64: 8, 288>}, {transform_indices = @transform_1, window_bounds = array<i64: 288, 64>}, {transform_indices = @transform_2, window_bounds = array<i64: 8, 64>}, {pipeline_mode = #tpu.pipeline_mode<synchronous>, transform_indices = @transform_3, window_bounds = array<i64: 1, 64>}, {pipeline_mode = #tpu.pipeline_mode<synchronous>, transform_indices = @transform_4, window_bounds = array<i64: 1, 64>}]} {
    %c0_i32 = arith.constant 0 : i32
    %0 = arith.cmpi eq, %arg1, %c0_i32 : i32
    %1 = arith.extui %0 : i1 to i32
    %c0_i32_0 = arith.constant 0 : i32
    %2 = arith.cmpi ne, %1, %c0_i32_0 : i32
    scf.if %2 {
      %cst_13 = arith.constant 0.000000e+00 : f32
      %17 = vector.broadcast %cst_13 : f32 to vector<8x64xf32>
      %c0_14 = arith.constant 0 : index
      %c0_15 = arith.constant 0 : index
      %18 = vector.load %arg7[%c0_14, %c0_15] : memref<8x64xf32, #tpu.memory_space<vmem>>, vector<8x64xf32>
      tpu.vector_store %arg7[%c0_14, %c0_15], %17 {strides = array<i32>} : memref<8x64xf32, #tpu.memory_space<vmem>>, vector<8x64xf32>,
    } else {
    }
    %c0 = arith.constant 0 : index
    %c0_1 = arith.constant 0 : index
    %3 = vector.load %arg7[%c0, %c0_1] : memref<8x64xf32, #tpu.memory_space<vmem>>, vector<8x64xf32>
    %c0_2 = arith.constant 0 : index
    %c0_3 = arith.constant 0 : index
    %4 = vector.load %arg2[%c0_2, %c0_3] : memref<8x288xbf16, #tpu.memory_space<vmem>>, vector<8x288xbf16>
    %c0_4 = arith.constant 0 : index
    %c0_5 = arith.constant 0 : index
    %5 = vector.load %arg3[%c0_4, %c0_5] : memref<288x64xbf16, #tpu.memory_space<vmem>>, vector<288x64xbf16>
    %cst = arith.constant dense<0.000000e+00> : vector<8x64xf32>
    %6 = tpu.matmul %4, %5, %cst {dimension_numbers = #tpu.dot_dimension_numbers<[1], [0], [0], [1], [0, 0, 1, 1], [], []>} : vector<8x288xbf16>, vector<288x64xbf16>, vector<8x64xf32> -> vector<8x64xf32>
    %7 = arith.addf %3, %6 : vector<8x64xf32>
    %c0_6 = arith.constant 0 : index
    %c0_7 = arith.constant 0 : index
    %8 = vector.load %arg7[%c0_6, %c0_7] : memref<8x64xf32, #tpu.memory_space<vmem>>, vector<8x64xf32>
    tpu.vector_store %arg7[%c0_6, %c0_7], %7 {strides = array<i32>} : memref<8x64xf32, #tpu.memory_space<vmem>>, vector<8x64xf32>,
    %c0_i32_8 = arith.constant 0 : i32
    %9 = arith.cmpi eq, %arg1, %c0_i32_8 : i32
    %c0_i32_9 = arith.constant 0 : i32
    %10 = arith.cmpi eq, %arg0, %c0_i32_9 : i32
    %11 = arith.andi %9, %10 : i1
    %12 = arith.extui %11 : i1 to i32
    %c0_i32_10 = arith.constant 0 : i32
    %13 = arith.cmpi ne, %12, %c0_i32_10 : i32
    scf.if %13 {
      %cst_13 = arith.constant 0.000000e+00 : f32
      %17 = vector.broadcast %cst_13 : f32 to vector<1x64xf32>
      %c0_14 = arith.constant 0 : index
      %c0_15 = arith.constant 0 : index
      %18 = vector.load %arg5[%c0_14, %c0_15] : memref<1x64xf32, #tpu.memory_space<vmem>>, vector<1x64xf32>
      tpu.vector_store %arg5[%c0_14, %c0_15], %17 {strides = array<i32>} : memref<1x64xf32, #tpu.memory_space<vmem>>, vector<1x64xf32>,
      %cst_16 = arith.constant 0.000000e+00 : f32
      %19 = vector.broadcast %cst_16 : f32 to vector<1x64xf32>
      %c0_17 = arith.constant 0 : index
      %c0_18 = arith.constant 0 : index
      %20 = vector.load %arg6[%c0_17, %c0_18] : memref<1x64xf32, #tpu.memory_space<vmem>>, vector<1x64xf32>
      tpu.vector_store %arg6[%c0_17, %c0_18], %19 {strides = array<i32>} : memref<1x64xf32, #tpu.memory_space<vmem>>, vector<1x64xf32>,
    } else {
    }
    %c0_i32_11 = arith.constant 0 : i32
    %14 = arith.cmpi eq, %arg1, %c0_i32_11 : i32
    %15 = arith.extui %14 : i1 to i32
    %c0_i32_12 = arith.constant 0 : i32
    %16 = arith.cmpi ne, %15, %c0_i32_12 : i32
    scf.if %16 {
      %c0_13 = arith.constant 0 : index
      %c0_14 = arith.constant 0 : index
      %17 = vector.load %arg7[%c0_13, %c0_14] : memref<8x64xf32, #tpu.memory_space<vmem>>, vector<8x64xf32>
      %c0_15 = arith.constant 0 : index
      %c0_16 = arith.constant 0 : index
      %18 = vector.load %arg4[%c0_15, %c0_16] : memref<8x64xf32, #tpu.memory_space<vmem>>, vector<8x64xf32>
      tpu.vector_store %arg4[%c0_15, %c0_16], %17 {strides = array<i32>} : memref<8x64xf32, #tpu.memory_space<vmem>>, vector<8x64xf32>,
      %c0_17 = arith.constant 0 : index
      %c0_18 = arith.constant 0 : index
      %19 = vector.load %arg5[%c0_17, %c0_18] : memref<1x64xf32, #tpu.memory_space<vmem>>, vector<1x64xf32>
      %cst_19 = arith.constant dense<0.000000e+00> : vector<64xf32>
      %20 = vector.multi_reduction <add>, %17, %cst_19 [0] : vector<8x64xf32> to vector<64xf32>
      %21 = vector.shape_cast %20 : vector<64xf32> to vector<1x64xf32>
      %22 = arith.addf %19, %21 : vector<1x64xf32>
      %c0_20 = arith.constant 0 : index
      %c0_21 = arith.constant 0 : index
      %23 = vector.load %arg5[%c0_20, %c0_21] : memref<1x64xf32, #tpu.memory_space<vmem>>, vector<1x64xf32>
      tpu.vector_store %arg5[%c0_20, %c0_21], %22 {strides = array<i32>} : memref<1x64xf32, #tpu.memory_space<vmem>>, vector<1x64xf32>,
      %c0_22 = arith.constant 0 : index
      %c0_23 = arith.constant 0 : index
      %24 = vector.load %arg6[%c0_22, %c0_23] : memref<1x64xf32, #tpu.memory_space<vmem>>, vector<1x64xf32>
      %25 = arith.mulf %17, %17 : vector<8x64xf32>
      %cst_24 = arith.constant dense<0.000000e+00> : vector<64xf32>
      %26 = vector.multi_reduction <add>, %25, %cst_24 [0] : vector<8x64xf32> to vector<64xf32>
      %27 = vector.shape_cast %26 : vector<64xf32> to vector<1x64xf32>
      %28 = arith.addf %24, %27 : vector<1x64xf32>
      %c0_25 = arith.constant 0 : index
      %c0_26 = arith.constant 0 : index
      %29 = vector.load %arg6[%c0_25, %c0_26] : memref<1x64xf32, #tpu.memory_space<vmem>>, vector<1x64xf32>
      tpu.vector_store %arg6[%c0_25, %c0_26], %28 {strides = array<i32>} : memref<1x64xf32, #tpu.memory_space<vmem>>, vector<1x64xf32>,
    } else {
    }
    return
  }
  func.func @transform_0(%arg0: i32, %arg1: i32) -> (i32, i32) {
    %c0_i32 = arith.constant 0 : i32
    return %arg0, %arg1 : i32, i32
  }
  func.func @transform_1(%arg0: i32, %arg1: i32) -> (i32, i32) {
    %c0_i32 = arith.constant 0 : i32
    %c0_i32_0 = arith.constant 0 : i32
    return %arg1, %c0_i32 : i32, i32
  }
  func.func @transform_2(%arg0: i32, %arg1: i32) -> (i32, i32) {
    %c0_i32 = arith.constant 0 : i32
    %c0_i32_0 = arith.constant 0 : i32
    return %arg0, %c0_i32 : i32, i32
  }
  func.func @transform_3(%arg0: i32, %arg1: i32) -> (i32, i32) {
    %c0_i32 = arith.constant 0 : i32
    %c0_i32_0 = arith.constant 0 : i32
    %c0_i32_1 = arith.constant 0 : i32
    return %c0_i32, %c0_i32_0 : i32, i32
  }
  func.func @transform_4(%arg0: i32, %arg1: i32) -> (i32, i32) {
    %c0_i32 = arith.constant 0 : i32
    %c0_i32_0 = arith.constant 0 : i32
    %c0_i32_1 = arith.constant 0 : i32
    return %c0_i32, %c0_i32_0 : i32, i32
  }
}

module attributes {stable_mosaic.version = 11 : i64} {
  func.func @_bn_apply_kernel(%arg0: i32, %arg1: memref<1x128xf32, #tpu.memory_space<vmem>>, %arg2: memref<1x128xf32, #tpu.memory_space<vmem>>, %arg3: memref<1x128xf32, #tpu.memory_space<vmem>>, %arg4: memref<1x128xbf16, #tpu.memory_space<vmem>>) attributes {dimension_semantics = [#tpu.dimension_semantics<parallel>], iteration_bounds = array<i64: 1>, scalar_prefetch = 0 : i64, scratch_operands = 0 : i64, tpu.core_type = #tpu.core_type<tc>, window_params = [{transform_indices = @transform_0, window_bounds = array<i64: 1, 128>}, {pipeline_mode = #tpu.pipeline_mode<synchronous>, transform_indices = @transform_1, window_bounds = array<i64: 1, 128>}, {pipeline_mode = #tpu.pipeline_mode<synchronous>, transform_indices = @transform_2, window_bounds = array<i64: 1, 128>}, {transform_indices = @transform_3, window_bounds = array<i64: 1, 128>}]} {
    %c0 = arith.constant 0 : index
    %c0_0 = arith.constant 0 : index
    %0 = vector.load %arg1[%c0, %c0_0] : memref<1x128xf32, #tpu.memory_space<vmem>>, vector<1x128xf32>
    %c0_1 = arith.constant 0 : index
    %c0_2 = arith.constant 0 : index
    %1 = vector.load %arg2[%c0_1, %c0_2] : memref<1x128xf32, #tpu.memory_space<vmem>>, vector<1x128xf32>
    %2 = arith.mulf %0, %1 : vector<1x128xf32>
    %c0_3 = arith.constant 0 : index
    %c0_4 = arith.constant 0 : index
    %3 = vector.load %arg3[%c0_3, %c0_4] : memref<1x128xf32, #tpu.memory_space<vmem>>, vector<1x128xf32>
    %4 = arith.addf %2, %3 : vector<1x128xf32>
    %cst = arith.constant 0.000000e+00 : f32
    %5 = vector.broadcast %cst : f32 to vector<1x128xf32>
    %6 = arith.maximumf %4, %5 : vector<1x128xf32>
    %7 = arith.truncf %6 : vector<1x128xf32> to vector<1x128xbf16>
    %c0_5 = arith.constant 0 : index
    %c0_6 = arith.constant 0 : index
    %8 = vector.load %arg4[%c0_5, %c0_6] : memref<1x128xbf16, #tpu.memory_space<vmem>>, vector<1x128xbf16>
    tpu.vector_store %arg4[%c0_5, %c0_6], %7 {strides = array<i32>} : memref<1x128xbf16, #tpu.memory_space<vmem>>, vector<1x128xbf16>,
    return
  }
  func.func @transform_0(%arg0: i32) -> (i32, i32) {
    %c0_i32 = arith.constant 0 : i32
    %c0_i32_0 = arith.constant 0 : i32
    return %arg0, %c0_i32 : i32, i32
  }
  func.func @transform_1(%arg0: i32) -> (i32, i32) {
    %c0_i32 = arith.constant 0 : i32
    %c0_i32_0 = arith.constant 0 : i32
    %c0_i32_1 = arith.constant 0 : i32
    return %c0_i32, %c0_i32_0 : i32, i32
  }
  func.func @transform_2(%arg0: i32) -> (i32, i32) {
    %c0_i32 = arith.constant 0 : i32
    %c0_i32_0 = arith.constant 0 : i32
    %c0_i32_1 = arith.constant 0 : i32
    return %c0_i32, %c0_i32_0 : i32, i32
  }
  func.func @transform_3(%arg0: i32) -> (i32, i32) {
    %c0_i32 = arith.constant 0 : i32
    %c0_i32_0 = arith.constant 0 : i32
    return %arg0, %c0_i32 : i32, i32
  }
}

module attributes {stable_mosaic.version = 11 : i64} {
  func.func @_conv_gemm_kernel(%arg0: i32, %arg1: i32, %arg2: memref<8x576xbf16, #tpu.memory_space<vmem>>, %arg3: memref<576x64xbf16, #tpu.memory_space<vmem>>, %arg4: memref<8x64xf32, #tpu.memory_space<vmem>>, %arg5: memref<1x64xf32, #tpu.memory_space<vmem>>, %arg6: memref<1x64xf32, #tpu.memory_space<vmem>>, %arg7: memref<8x64xf32, #tpu.memory_space<vmem>>) attributes {dimension_semantics = [#tpu.dimension_semantics<arbitrary>, #tpu.dimension_semantics<arbitrary>], iteration_bounds = array<i64: 1, 1>, scalar_prefetch = 0 : i64, scratch_operands = 1 : i64, tpu.core_type = #tpu.core_type<tc>, window_params = [{transform_indices = @transform_0, window_bounds = array<i64: 8, 576>}, {transform_indices = @transform_1, window_bounds = array<i64: 576, 64>}, {transform_indices = @transform_2, window_bounds = array<i64: 8, 64>}, {pipeline_mode = #tpu.pipeline_mode<synchronous>, transform_indices = @transform_3, window_bounds = array<i64: 1, 64>}, {pipeline_mode = #tpu.pipeline_mode<synchronous>, transform_indices = @transform_4, window_bounds = array<i64: 1, 64>}]} {
    %c0_i32 = arith.constant 0 : i32
    %0 = arith.cmpi eq, %arg1, %c0_i32 : i32
    %1 = arith.extui %0 : i1 to i32
    %c0_i32_0 = arith.constant 0 : i32
    %2 = arith.cmpi ne, %1, %c0_i32_0 : i32
    scf.if %2 {
      %cst_13 = arith.constant 0.000000e+00 : f32
      %17 = vector.broadcast %cst_13 : f32 to vector<8x64xf32>
      %c0_14 = arith.constant 0 : index
      %c0_15 = arith.constant 0 : index
      %18 = vector.load %arg7[%c0_14, %c0_15] : memref<8x64xf32, #tpu.memory_space<vmem>>, vector<8x64xf32>
      tpu.vector_store %arg7[%c0_14, %c0_15], %17 {strides = array<i32>} : memref<8x64xf32, #tpu.memory_space<vmem>>, vector<8x64xf32>,
    } else {
    }
    %c0 = arith.constant 0 : index
    %c0_1 = arith.constant 0 : index
    %3 = vector.load %arg7[%c0, %c0_1] : memref<8x64xf32, #tpu.memory_space<vmem>>, vector<8x64xf32>
    %c0_2 = arith.constant 0 : index
    %c0_3 = arith.constant 0 : index
    %4 = vector.load %arg2[%c0_2, %c0_3] : memref<8x576xbf16, #tpu.memory_space<vmem>>, vector<8x576xbf16>
    %c0_4 = arith.constant 0 : index
    %c0_5 = arith.constant 0 : index
    %5 = vector.load %arg3[%c0_4, %c0_5] : memref<576x64xbf16, #tpu.memory_space<vmem>>, vector<576x64xbf16>
    %cst = arith.constant dense<0.000000e+00> : vector<8x64xf32>
    %6 = tpu.matmul %4, %5, %cst {dimension_numbers = #tpu.dot_dimension_numbers<[1], [0], [0], [1], [0, 0, 1, 1], [], []>} : vector<8x576xbf16>, vector<576x64xbf16>, vector<8x64xf32> -> vector<8x64xf32>
    %7 = arith.addf %3, %6 : vector<8x64xf32>
    %c0_6 = arith.constant 0 : index
    %c0_7 = arith.constant 0 : index
    %8 = vector.load %arg7[%c0_6, %c0_7] : memref<8x64xf32, #tpu.memory_space<vmem>>, vector<8x64xf32>
    tpu.vector_store %arg7[%c0_6, %c0_7], %7 {strides = array<i32>} : memref<8x64xf32, #tpu.memory_space<vmem>>, vector<8x64xf32>,
    %c0_i32_8 = arith.constant 0 : i32
    %9 = arith.cmpi eq, %arg1, %c0_i32_8 : i32
    %c0_i32_9 = arith.constant 0 : i32
    %10 = arith.cmpi eq, %arg0, %c0_i32_9 : i32
    %11 = arith.andi %9, %10 : i1
    %12 = arith.extui %11 : i1 to i32
    %c0_i32_10 = arith.constant 0 : i32
    %13 = arith.cmpi ne, %12, %c0_i32_10 : i32
    scf.if %13 {
      %cst_13 = arith.constant 0.000000e+00 : f32
      %17 = vector.broadcast %cst_13 : f32 to vector<1x64xf32>
      %c0_14 = arith.constant 0 : index
      %c0_15 = arith.constant 0 : index
      %18 = vector.load %arg5[%c0_14, %c0_15] : memref<1x64xf32, #tpu.memory_space<vmem>>, vector<1x64xf32>
      tpu.vector_store %arg5[%c0_14, %c0_15], %17 {strides = array<i32>} : memref<1x64xf32, #tpu.memory_space<vmem>>, vector<1x64xf32>,
      %cst_16 = arith.constant 0.000000e+00 : f32
      %19 = vector.broadcast %cst_16 : f32 to vector<1x64xf32>
      %c0_17 = arith.constant 0 : index
      %c0_18 = arith.constant 0 : index
      %20 = vector.load %arg6[%c0_17, %c0_18] : memref<1x64xf32, #tpu.memory_space<vmem>>, vector<1x64xf32>
      tpu.vector_store %arg6[%c0_17, %c0_18], %19 {strides = array<i32>} : memref<1x64xf32, #tpu.memory_space<vmem>>, vector<1x64xf32>,
    } else {
    }
    %c0_i32_11 = arith.constant 0 : i32
    %14 = arith.cmpi eq, %arg1, %c0_i32_11 : i32
    %15 = arith.extui %14 : i1 to i32
    %c0_i32_12 = arith.constant 0 : i32
    %16 = arith.cmpi ne, %15, %c0_i32_12 : i32
    scf.if %16 {
      %c0_13 = arith.constant 0 : index
      %c0_14 = arith.constant 0 : index
      %17 = vector.load %arg7[%c0_13, %c0_14] : memref<8x64xf32, #tpu.memory_space<vmem>>, vector<8x64xf32>
      %c0_15 = arith.constant 0 : index
      %c0_16 = arith.constant 0 : index
      %18 = vector.load %arg4[%c0_15, %c0_16] : memref<8x64xf32, #tpu.memory_space<vmem>>, vector<8x64xf32>
      tpu.vector_store %arg4[%c0_15, %c0_16], %17 {strides = array<i32>} : memref<8x64xf32, #tpu.memory_space<vmem>>, vector<8x64xf32>,
      %c0_17 = arith.constant 0 : index
      %c0_18 = arith.constant 0 : index
      %19 = vector.load %arg5[%c0_17, %c0_18] : memref<1x64xf32, #tpu.memory_space<vmem>>, vector<1x64xf32>
      %cst_19 = arith.constant dense<0.000000e+00> : vector<64xf32>
      %20 = vector.multi_reduction <add>, %17, %cst_19 [0] : vector<8x64xf32> to vector<64xf32>
      %21 = vector.shape_cast %20 : vector<64xf32> to vector<1x64xf32>
      %22 = arith.addf %19, %21 : vector<1x64xf32>
      %c0_20 = arith.constant 0 : index
      %c0_21 = arith.constant 0 : index
      %23 = vector.load %arg5[%c0_20, %c0_21] : memref<1x64xf32, #tpu.memory_space<vmem>>, vector<1x64xf32>
      tpu.vector_store %arg5[%c0_20, %c0_21], %22 {strides = array<i32>} : memref<1x64xf32, #tpu.memory_space<vmem>>, vector<1x64xf32>,
      %c0_22 = arith.constant 0 : index
      %c0_23 = arith.constant 0 : index
      %24 = vector.load %arg6[%c0_22, %c0_23] : memref<1x64xf32, #tpu.memory_space<vmem>>, vector<1x64xf32>
      %25 = arith.mulf %17, %17 : vector<8x64xf32>
      %cst_24 = arith.constant dense<0.000000e+00> : vector<64xf32>
      %26 = vector.multi_reduction <add>, %25, %cst_24 [0] : vector<8x64xf32> to vector<64xf32>
      %27 = vector.shape_cast %26 : vector<64xf32> to vector<1x64xf32>
      %28 = arith.addf %24, %27 : vector<1x64xf32>
      %c0_25 = arith.constant 0 : index
      %c0_26 = arith.constant 0 : index
      %29 = vector.load %arg6[%c0_25, %c0_26] : memref<1x64xf32, #tpu.memory_space<vmem>>, vector<1x64xf32>
      tpu.vector_store %arg6[%c0_25, %c0_26], %28 {strides = array<i32>} : memref<1x64xf32, #tpu.memory_space<vmem>>, vector<1x64xf32>,
    } else {
    }
    return
  }
  func.func @transform_0(%arg0: i32, %arg1: i32) -> (i32, i32) {
    %c0_i32 = arith.constant 0 : i32
    return %arg0, %arg1 : i32, i32
  }
  func.func @transform_1(%arg0: i32, %arg1: i32) -> (i32, i32) {
    %c0_i32 = arith.constant 0 : i32
    %c0_i32_0 = arith.constant 0 : i32
    return %arg1, %c0_i32 : i32, i32
  }
  func.func @transform_2(%arg0: i32, %arg1: i32) -> (i32, i32) {
    %c0_i32 = arith.constant 0 : i32
    %c0_i32_0 = arith.constant 0 : i32
    return %arg0, %c0_i32 : i32, i32
  }
  func.func @transform_3(%arg0: i32, %arg1: i32) -> (i32, i32) {
    %c0_i32 = arith.constant 0 : i32
    %c0_i32_0 = arith.constant 0 : i32
    %c0_i32_1 = arith.constant 0 : i32
    return %c0_i32, %c0_i32_0 : i32, i32
  }
  func.func @transform_4(%arg0: i32, %arg1: i32) -> (i32, i32) {
    %c0_i32 = arith.constant 0 : i32
    %c0_i32_0 = arith.constant 0 : i32
    %c0_i32_1 = arith.constant 0 : i32
    return %c0_i32, %c0_i32_0 : i32, i32
  }
}

module attributes {stable_mosaic.version = 11 : i64} {
  func.func @_bn_apply_res_kernel(%arg0: i32, %arg1: memref<1x128xf32, #tpu.memory_space<vmem>>, %arg2: memref<1x128xf32, #tpu.memory_space<vmem>>, %arg3: memref<1x128xf32, #tpu.memory_space<vmem>>, %arg4: memref<1x128xbf16, #tpu.memory_space<vmem>>, %arg5: memref<1x128xbf16, #tpu.memory_space<vmem>>) attributes {dimension_semantics = [#tpu.dimension_semantics<parallel>], iteration_bounds = array<i64: 1>, scalar_prefetch = 0 : i64, scratch_operands = 0 : i64, tpu.core_type = #tpu.core_type<tc>, window_params = [{transform_indices = @transform_0, window_bounds = array<i64: 1, 128>}, {pipeline_mode = #tpu.pipeline_mode<synchronous>, transform_indices = @transform_1, window_bounds = array<i64: 1, 128>}, {pipeline_mode = #tpu.pipeline_mode<synchronous>, transform_indices = @transform_2, window_bounds = array<i64: 1, 128>}, {transform_indices = @transform_3, window_bounds = array<i64: 1, 128>}, {transform_indices = @transform_4, window_bounds = array<i64: 1, 128>}]} {
    %c0 = arith.constant 0 : index
    %c0_0 = arith.constant 0 : index
    %0 = vector.load %arg1[%c0, %c0_0] : memref<1x128xf32, #tpu.memory_space<vmem>>, vector<1x128xf32>
    %c0_1 = arith.constant 0 : index
    %c0_2 = arith.constant 0 : index
    %1 = vector.load %arg2[%c0_1, %c0_2] : memref<1x128xf32, #tpu.memory_space<vmem>>, vector<1x128xf32>
    %2 = arith.mulf %0, %1 : vector<1x128xf32>
    %c0_3 = arith.constant 0 : index
    %c0_4 = arith.constant 0 : index
    %3 = vector.load %arg3[%c0_3, %c0_4] : memref<1x128xf32, #tpu.memory_space<vmem>>, vector<1x128xf32>
    %4 = arith.addf %2, %3 : vector<1x128xf32>
    %c0_5 = arith.constant 0 : index
    %c0_6 = arith.constant 0 : index
    %5 = vector.load %arg4[%c0_5, %c0_6] : memref<1x128xbf16, #tpu.memory_space<vmem>>, vector<1x128xbf16>
    %6 = arith.extf %5 : vector<1x128xbf16> to vector<1x128xf32>
    %7 = arith.addf %4, %6 : vector<1x128xf32>
    %cst = arith.constant 0.000000e+00 : f32
    %8 = vector.broadcast %cst : f32 to vector<1x128xf32>
    %9 = arith.maximumf %7, %8 : vector<1x128xf32>
    %10 = arith.truncf %9 : vector<1x128xf32> to vector<1x128xbf16>
    %c0_7 = arith.constant 0 : index
    %c0_8 = arith.constant 0 : index
    %11 = vector.load %arg5[%c0_7, %c0_8] : memref<1x128xbf16, #tpu.memory_space<vmem>>, vector<1x128xbf16>
    tpu.vector_store %arg5[%c0_7, %c0_8], %10 {strides = array<i32>} : memref<1x128xbf16, #tpu.memory_space<vmem>>, vector<1x128xbf16>,
    return
  }
  func.func @transform_0(%arg0: i32) -> (i32, i32) {
    %c0_i32 = arith.constant 0 : i32
    %c0_i32_0 = arith.constant 0 : i32
    return %arg0, %c0_i32 : i32, i32
  }
  func.func @transform_1(%arg0: i32) -> (i32, i32) {
    %c0_i32 = arith.constant 0 : i32
    %c0_i32_0 = arith.constant 0 : i32
    %c0_i32_1 = arith.constant 0 : i32
    return %c0_i32, %c0_i32_0 : i32, i32
  }
  func.func @transform_2(%arg0: i32) -> (i32, i32) {
    %c0_i32 = arith.constant 0 : i32
    %c0_i32_0 = arith.constant 0 : i32
    %c0_i32_1 = arith.constant 0 : i32
    return %c0_i32, %c0_i32_0 : i32, i32
  }
  func.func @transform_3(%arg0: i32) -> (i32, i32) {
    %c0_i32 = arith.constant 0 : i32
    %c0_i32_0 = arith.constant 0 : i32
    return %arg0, %c0_i32 : i32, i32
  }
  func.func @transform_4(%arg0: i32) -> (i32, i32) {
    %c0_i32 = arith.constant 0 : i32
    %c0_i32_0 = arith.constant 0 : i32
    return %arg0, %c0_i32 : i32, i32
  }
}

module attributes {stable_mosaic.version = 11 : i64} {
  func.func @_head_kernel(%arg0: i32, %arg1: memref<2x1x64xbf16, #tpu.memory_space<vmem>>, %arg2: memref<64x256xf32, #tpu.memory_space<vmem>>, %arg3: memref<1x256xf32, #tpu.memory_space<vmem>>, %arg4: memref<256x128xf32, #tpu.memory_space<vmem>>, %arg5: memref<1x128xf32, #tpu.memory_space<vmem>>, %arg6: memref<2x128xf32, #tpu.memory_space<vmem>>) attributes {dimension_semantics = [#tpu.dimension_semantics<parallel>], iteration_bounds = array<i64: 1>, scalar_prefetch = 0 : i64, scratch_operands = 0 : i64, tpu.core_type = #tpu.core_type<tc>, window_params = [{transform_indices = @transform_0, window_bounds = array<i64: 2, 1, 64>}, {pipeline_mode = #tpu.pipeline_mode<synchronous>, transform_indices = @transform_1, window_bounds = array<i64: 64, 256>}, {pipeline_mode = #tpu.pipeline_mode<synchronous>, transform_indices = @transform_2, window_bounds = array<i64: 1, 256>}, {pipeline_mode = #tpu.pipeline_mode<synchronous>, transform_indices = @transform_3, window_bounds = array<i64: 256, 128>}, {pipeline_mode = #tpu.pipeline_mode<synchronous>, transform_indices = @transform_4, window_bounds = array<i64: 1, 128>}, {transform_indices = @transform_5, window_bounds = array<i64: 2, 128>}]} {
    %c0 = arith.constant 0 : index
    %c0_0 = arith.constant 0 : index
    %c0_1 = arith.constant 0 : index
    %0 = vector.load %arg1[%c0, %c0_0, %c0_1] : memref<2x1x64xbf16, #tpu.memory_space<vmem>>, vector<2x1x64xbf16>
    %1 = arith.extf %0 : vector<2x1x64xbf16> to vector<2x1x64xf32>
    %cst = arith.constant dense<0.000000e+00> : vector<2x64xf32>
    %2 = vector.multi_reduction <add>, %1, %cst [1] : vector<2x1x64xf32> to vector<2x64xf32>
    %cst_2 = arith.constant 1.000000e+00 : f32
    %3 = vector.broadcast %cst_2 : f32 to vector<2x64xf32>
    %4 = arith.divf %2, %3 : vector<2x64xf32>
    %c0_3 = arith.constant 0 : index
    %c0_4 = arith.constant 0 : index
    %5 = vector.load %arg2[%c0_3, %c0_4] : memref<64x256xf32, #tpu.memory_space<vmem>>, vector<64x256xf32>
    %cst_5 = arith.constant dense<0.000000e+00> : vector<2x256xf32>
    %6 = tpu.matmul %4, %5, %cst_5 {dimension_numbers = #tpu.dot_dimension_numbers<[1], [0], [0], [1], [0, 0, 1, 1], [], []>} : vector<2x64xf32>, vector<64x256xf32>, vector<2x256xf32> -> vector<2x256xf32>
    %c0_6 = arith.constant 0 : index
    %c0_7 = arith.constant 0 : index
    %7 = vector.load %arg3[%c0_6, %c0_7] : memref<1x256xf32, #tpu.memory_space<vmem>>, vector<1x256xf32>
    %8 = vector.broadcast %7 : vector<1x256xf32> to vector<2x256xf32>
    %9 = arith.addf %6, %8 : vector<2x256xf32>
    %c0_8 = arith.constant 0 : index
    %c0_9 = arith.constant 0 : index
    %10 = vector.load %arg4[%c0_8, %c0_9] : memref<256x128xf32, #tpu.memory_space<vmem>>, vector<256x128xf32>
    %cst_10 = arith.constant dense<0.000000e+00> : vector<2x128xf32>
    %11 = tpu.matmul %9, %10, %cst_10 {dimension_numbers = #tpu.dot_dimension_numbers<[1], [0], [0], [1], [0, 0, 1, 1], [], []>} : vector<2x256xf32>, vector<256x128xf32>, vector<2x128xf32> -> vector<2x128xf32>
    %c0_11 = arith.constant 0 : index
    %c0_12 = arith.constant 0 : index
    %12 = vector.load %arg5[%c0_11, %c0_12] : memref<1x128xf32, #tpu.memory_space<vmem>>, vector<1x128xf32>
    %13 = vector.broadcast %12 : vector<1x128xf32> to vector<2x128xf32>
    %14 = arith.addf %11, %13 : vector<2x128xf32>
    %c0_13 = arith.constant 0 : index
    %c0_14 = arith.constant 0 : index
    %15 = vector.load %arg6[%c0_13, %c0_14] : memref<2x128xf32, #tpu.memory_space<vmem>>, vector<2x128xf32>
    tpu.vector_store %arg6[%c0_13, %c0_14], %14 {strides = array<i32>} : memref<2x128xf32, #tpu.memory_space<vmem>>, vector<2x128xf32>,
    return
  }
  func.func @transform_0(%arg0: i32) -> (i32, i32, i32) {
    %c0_i32 = arith.constant 0 : i32
    %c0_i32_0 = arith.constant 0 : i32
    %c0_i32_1 = arith.constant 0 : i32
    return %arg0, %c0_i32, %c0_i32_0 : i32, i32, i32
  }
  func.func @transform_1(%arg0: i32) -> (i32, i32) {
    %c0_i32 = arith.constant 0 : i32
    %c0_i32_0 = arith.constant 0 : i32
    %c0_i32_1 = arith.constant 0 : i32
    return %c0_i32, %c0_i32_0 : i32, i32
  }
  func.func @transform_2(%arg0: i32) -> (i32, i32) {
    %c0_i32 = arith.constant 0 : i32
    %c0_i32_0 = arith.constant 0 : i32
    %c0_i32_1 = arith.constant 0 : i32
    return %c0_i32, %c0_i32_0 : i32, i32
  }
  func.func @transform_3(%arg0: i32) -> (i32, i32) {
    %c0_i32 = arith.constant 0 : i32
    %c0_i32_0 = arith.constant 0 : i32
    %c0_i32_1 = arith.constant 0 : i32
    return %c0_i32, %c0_i32_0 : i32, i32
  }
  func.func @transform_4(%arg0: i32) -> (i32, i32) {
    %c0_i32 = arith.constant 0 : i32
    %c0_i32_0 = arith.constant 0 : i32
    %c0_i32_1 = arith.constant 0 : i32
    return %c0_i32, %c0_i32_0 : i32, i32
  }
  func.func @transform_5(%arg0: i32) -> (i32, i32) {
    %c0_i32 = arith.constant 0 : i32
    %c0_i32_0 = arith.constant 0 : i32
    return %arg0, %c0_i32 : i32, i32
  }
}

</mosaic_0001>

<bundles_post_ra>
// kernel: tile.123
= control target key start
LH: loop header
LB: loop body
LE: loop exit
PB: predicated region body
PF: predicated region fallthrough
CT: control target
= control target key end

     0   :  { %s28_s0 = inlined_call_operand.vmem [shape: f32[8], index: 0, kind: input, shape index: {}]   ;;  %s29_s1 = inlined_call_operand.vmem [shape: f32[16,8], index: 1, kind: output, shape index: {}]  }
   0x1   :  { %v4_v0 = vld [vmem:[%s28_s0] ss:$0 sm:$0xff] }
   0x2   :  { %5 = vst [vmem:[%s29_s1] sm:$0xff] %v4_v0  ;;  %8 = vst [vmem:[%s29_s1 + $0x8] sm:$0xff] %v4_v0 }

// kernel: tile.124
= control target key start
LH: loop header
LB: loop body
LE: loop exit
PB: predicated region body
PF: predicated region fallthrough
CT: control target
= control target key end

     0   :  { %s131_s10 = smov 120   ;;  %s132_s11 = smov 104   ;;  %vm3_vm0 = vcmask 64512   ;;  %vm9_vm1 = vcmask 1048512   ;;  %vm15_vm2 = vcmask 982912   ;;  %vm21_vm3 = vcmask 917312   ;;  %s207_s0 = inlined_call_operand.vmem [shape: f32[16,8], index: 0, kind: input, shape index: {}]   ;;  %s208_s1 = inlined_call_operand.vmem [shape: f32[1,128], index: 1, kind: output, shape index: {}]  }
   0x1   :  { %v101_v0 = vld [vmem:[%s207_s0 + $0xf] sm:$0x1]   ;;  %v103_v1 = vld [vmem:[%s207_s0 + $0xd] sm:$0x1]   ;;  %v102_v2 = vld [vmem:[%s207_s0 + $0xe] sm:$0x1]  }
   0x2   :  { %7 = vrot.lane.b32.xlu0 %v101_v0, %s131_s10  ;;  %19 = vrot.lane.b32.xlu1 %v103_v1, %s132_s11  ;;  %v104_v3 = vld [vmem:[%s207_s0 + $0xc] sm:$0x1]   ;;  %s133_s16 = smov 112   ;;  %s134_s17 = smov 96   ;;  %v105_v4 = vld [vmem:[%s207_s0 + $0xb] sm:$0x1]  }
   0x3   :  { %v106_v5 = vld [vmem:[%s207_s0 + $0xa] sm:$0x1]   ;;  %v2_v6 = vld [vmem:[%s207_s0] sm:$0x1]   ;;  %s135_s24 = smov 88   ;;  %s136_s25 = smov 80  }
   0x4   :  { %4 = vst.msk [vmem:[#allocation0] sm:$0x1] %vm3_vm0, %v2_v6   ;;  %v107_v7 = vld [vmem:[%s207_s0 + $0x9] sm:$0x1]   ;;  %v108_v8 = vld [vmem:[%s207_s0 + $0x8] sm:$0x1]  }
   0x5   :  { %s137_s30 = smov 72   ;;  %s138_s2 = smov 64   ;;  %v109_v9 = vld [vmem:[%s207_s0 + $0x7] sm:$0x1]   ;;  %v110_v10 = vld [vmem:[%s207_s0 + $0x6] sm:$0x1]  }
   0x6   :  { %13 = vrot.lane.b32.xlu0 %v102_v2, %s133_s16  ;;  %25 = vrot.lane.b32.xlu1 %v104_v3, %s134_s17  ;;  %s139_s7 = smov 56   ;;  %s140_s8 = smov 48   ;;  %v111_v11 = vld [vmem:[%s207_s0 + $0x5] sm:$0x1]   ;;  %v112_v12 = vld [vmem:[%s207_s0 + $0x4] sm:$0x1]  }
   0x7   :  { %s141_s13 = smov 40   ;;  %s142_s14 = smov 32   ;;  %v113_v13 = vld [vmem:[%s207_s0 + $0x3] sm:$0x1]   ;;  %v114_v14 = vld [vmem:[%s207_s0 + $0x2] sm:$0x1]  }
   0x8   :  { %s143_s19 = smov 24   ;;  %s144_s20 = smov 16   ;;  %v115_v15 = vld [vmem:[%s207_s0 + $0x1] sm:$0x1]   ;;  %vm27_vm4 = vcmask 851712   ;;  %vm33_vm5 = vcmask 786112  }
   0x9   :  { %s145_s0 = smov 8   ;;  %vm39_vm6 = vcmask 720512   ;;  %vm45_vm7 = vcmask 654912   ;;  %vm51_vm8 = vcmask 589312   ;;  %vm57_vm9 = vcmask 523712  }
   0xa   :  { %31 = vrot.lane.b32.xlu0 %v105_v4, %s135_s24  ;;  %37 = vrot.lane.b32.xlu1 %v106_v5, %s136_s25  ;;  %vm63_vm10 = vcmask 458112   ;;  %vm69_vm11 = vcmask 392512   ;;  %vm75_vm12 = vcmask 326912   ;;  %vm81_vm13 = vcmask 261312  }
   0xb   :  { %vm87_vm14 = vcmask 195712   ;;  %vm93_vm15 = vcmask 130112  }
   0xe   :  { %43 = vrot.lane.b32.xlu0 %v107_v7, %s137_s30  ;;  %49 = vrot.lane.b32.xlu1 %v108_v8, %s138_s2 }
  0x12   :  { %55 = vrot.lane.b32.xlu0 %v109_v9, %s139_s7  ;;  %61 = vrot.lane.b32.xlu1 %v110_v10, %s140_s8 }
  0x16   :  { %67 = vrot.lane.b32.xlu0 %v111_v11, %s141_s13  ;;  %73 = vrot.lane.b32.xlu1 %v112_v12, %s142_s14 }
  0x1a   :  { %79 = vrot.lane.b32.xlu0 %v113_v13, %s143_s19  ;;  %85 = vrot.lane.b32.xlu1 %v114_v14, %s144_s20 }
  0x1e   :  { %91 = vrot.lane.b32.xlu0 %v115_v15, %s145_s0 }
  0x74   :  { %v8_v16 = vpop.permute.xlu0 %7   ;;  %v20_v17 = vpop.permute.xlu1 %19  }
  0x75   :  { %10 = vst.msk [vmem:[#allocation0] sm:$0x1] %vm9_vm1, %v8_v16  }
  0x78   :  { %v14_v18 = vpop.permute.xlu0 %13   ;;  %v26_v19 = vpop.permute.xlu1 %25  }
  0x79   :  { %16 = vst.msk [vmem:[#allocation0] sm:$0x1] %vm15_vm2, %v14_v18  }
  0x7a   :  { %22 = vst.msk [vmem:[#allocation0] sm:$0x1] %vm21_vm3, %v20_v17  }
  0x7b   :  { %28 = vst.msk [vmem:[#allocation0] sm:$0x1] %vm27_vm4, %v26_v19  }
  0x7c   :  { %v32_v20 = vpop.permute.xlu0 %31   ;;  %v38_v21 = vpop.permute.xlu1 %37  }
  0x7d   :  { %34 = vst.msk [vmem:[#allocation0] sm:$0x1] %vm33_vm5, %v32_v20  }
  0x7e   :  { %40 = vst.msk [vmem:[#allocation0] sm:$0x1] %vm39_vm6, %v38_v21  }
  0x80   :  { %v44_v22 = vpop.permute.xlu0 %43   ;;  %v50_v23 = vpop.permute.xlu1 %49  }
  0x81   :  { %46 = vst.msk [vmem:[#allocation0] sm:$0x1] %vm45_vm7, %v44_v22  }
  0x82   :  { %52 = vst.msk [vmem:[#allocation0] sm:$0x1] %vm51_vm8, %v50_v23  }
  0x84   :  { %v56_v24 = vpop.permute.xlu0 %55   ;;  %v62_v25 = vpop.permute.xlu1 %61  }
  0x85   :  { %58 = vst.msk [vmem:[#allocation0] sm:$0x1] %vm57_vm9, %v56_v24  }
  0x86   :  { %64 = vst.msk [vmem:[#allocation0] sm:$0x1] %vm63_vm10, %v62_v25  }
  0x88   :  { %v68_v26 = vpop.permute.xlu0 %67   ;;  %v74_v27 = vpop.permute.xlu1 %73  }
  0x89   :  { %70 = vst.msk [vmem:[#allocation0] sm:$0x1] %vm69_vm11, %v68_v26  }
  0x8a   :  { %76 = vst.msk [vmem:[#allocation0] sm:$0x1] %vm75_vm12, %v74_v27  }
  0x8c   :  { %v80_v28 = vpop.permute.xlu0 %79   ;;  %v86_v29 = vpop.permute.xlu1 %85  }
  0x8d   :  { %82 = vst.msk [vmem:[#allocation0] sm:$0x1] %vm81_vm13, %v80_v28  }
  0x8e   :  { %88 = vst.msk [vmem:[#allocation0] sm:$0x1] %vm87_vm14, %v86_v29  }
  0x90   :  { %v92_v30 = vpop.permute.xlu0 %91  }
  0x91   :  { %94 = vst.msk [vmem:[#allocation0] sm:$0x1] %vm93_vm15, %v92_v30  }
  0x98   :  { %v98_v31 = vld [vmem:[#allocation0] sm:$0x1] }
  0x99   :  { %100 = vst [vmem:[%s208_s1] sm:$0x1] %v98_v31 }

// kernel: resnet_forward.27
= control target key start
LH: loop header
LB: loop body
LE: loop exit
PB: predicated region body
PF: predicated region fallthrough
CT: control target
= control target key end

     0   :  { %s133_s0 = inlined_call_operand.vmem [shape: f32[32,128], index: 0, kind: input, shape index: {}]   ;;  %s134_s1 = inlined_call_operand.vmem [shape: f32[1,128], index: 1, kind: input, shape index: {}]   ;;  %s135_s2 = inlined_call_operand.vmem [shape: f32[1,128], index: 2, kind: input, shape index: {}]   ;;  %s136_s3 = inlined_call_operand.vmem [shape: bf16[32,128], index: 3, kind: output, shape index: {}]  }
   0x1   :  { %v14_v0 = vld [vmem:[%s133_s0] sm:$0xff]  ;;  %v15_v1 = vld [vmem:[%s133_s0 + $0x8] sm:$0xff]  ;;  %v16_v6 = vld [vmem:[%s133_s0 + $0x10] sm:$0xff] }
   0x2   :  { %v68_v2 = vld [vmem:[%s134_s1] ss:$0 sm:$0xff]  ;;  %v17_v7 = vld [vmem:[%s133_s0 + $0x18] sm:$0xff] }
   0x3   :  { %v25_v3 = vmul.f32 %v68_v2, %v14_v0  ;;  %v26_v4 = vmul.f32 %v68_v2, %v15_v1  ;;  %v69_v5 = vld [vmem:[%s135_s2] ss:$0 sm:$0xff]  ;;  %v27_v8 = vmul.f32 %v68_v2, %v16_v6  ;;  %v28_v9 = vmul.f32 %v68_v2, %v17_v7 }
   0x5   :  { %v36_v10 = vadd.f32 %v69_v5, %v25_v3  ;;  %v37_v11 = vadd.f32 %v69_v5, %v26_v4  ;;  %v38_v12 = vadd.f32 %v69_v5, %v27_v8  ;;  %v39_v13 = vadd.f32 %v69_v5, %v28_v9 }
   0x7   :  { %v40_v14 = vmax.f32 %v36_v10, 0.0  ;;  %v41_v15 = vmax.f32 %v37_v11, 0.0  ;;  %v42_v16 = vmax.f32 %v38_v12, 0.0  ;;  %v43_v17 = vmax.f32 %v39_v13, 0.0 }
   0x9   :  { %v81_v18 = vpack.c.bf16 %v41_v15, %v40_v14  ;;  %v86_v19 = vpack.c.bf16 %v43_v17, %v42_v16 }
   0xb   :  { %82 = vst [vmem:[%s136_s3] sm:$0xff] %v81_v18   ;;  %88 = vst [vmem:[%s136_s3 + $0x8] sm:$0xff] %v86_v19  }

// kernel: resnet_forward.26
= control target key start
LH: loop header
LB: loop body
LE: loop exit
PB: predicated region body
PF: predicated region fallthrough
CT: control target
= control target key end

     0   :  { %v1821_v0 = vmov 0   ;;  %vm576_vm0 = vcmask 154624   ;;  %vm673_vm1 = vcmask 1040384   ;;  %vm674_vm2 = vcmask 1041408   ;;  %s3007_s1 = inlined_call_operand.vmem [shape: bf16[147,8], index: 1, kind: input, shape index: {}]   ;;  %s3008_s0 = inlined_call_operand.vmem [shape: bf16[512,147], index: 0, kind: input, shape index: {}]   ;;  %s3009_s2 = inlined_call_operand.vmem [shape: f32[512,8], index: 2, kind: output, shape index: {0}]   ;;  %s3010_s3 = inlined_call_operand.vmem [shape: f32[1,8], index: 3, kind: output, shape index: {1}]   ;;  %s3011_s4 = inlined_call_operand.vmem [shape: f32[1,8], index: 4, kind: output, shape index: {2}]  }
   0x1   :  { %680 = vmatprep.subr.bf16.mxu0 %v1821_v0  ;;  %v1715_v1 = vld [vmem:[%s3007_s1] sm:$0xff]   ;;  %1692 = vmatprep.subr.bf16.mxu1 %v1821_v0  ;;  %v1716_v2 = vld [vmem:[%s3007_s1 + $0x8] sm:$0xff]   ;;  %v1717_v3 = vld [vmem:[%s3007_s1 + $0x10] sm:$0xff]   ;;  %v1822_v11 = vmov 65535   ;;  %vm19_vm3 = vcmask 64512   ;;  %v1823_v17 = vmov 0.0  }
   0x2   :  { %681 = vmatpush1.bf16.msra.mxu0 %v1715_v1  ;;  %1702 = vmatpush1.bf16.msra.mxu1 %v1715_v1  ;;  %v1718_v4 = vld [vmem:[%s3007_s1 + $0x18] sm:$0xff]   ;;  %v1727_v5 = vld [vmem:[%s3008_s0 + $0x4] ss:$8 sps:$4 sm:$0xff]   ;;  %v1721_v9 = vld [vmem:[%s3007_s1 + $0x30] sm:$0xff]   ;;  %v675_v12 = vsel %vm673_vm1, 4294967295, %v1822_v11  ;;  %20 = vst.msk [vmem:[#allocation2] sm:$0xff] %vm19_vm3, %v1823_v17 }
   0x3   :  { %682 = vmatprep.subr.bf16.mxu0 %v1821_v0  ;;  %1693 = vmatprep.subr.bf16.mxu1 %v1821_v0  ;;  %v1719_v6 = vld [vmem:[%s3007_s1 + $0x20] sm:$0xff]   ;;  %v1720_v7 = vld [vmem:[%s3007_s1 + $0x28] sm:$0xff]   ;;  %v1722_v10 = vld [vmem:[%s3007_s1 + $0x38] sm:$0xff]   ;;  %v676_v15 = vsel %vm674_vm2, %v675_v12, 0  ;;  %21 = vst.msk [vmem:[#allocation2 + $0x8] sm:$0xff] %vm19_vm3, %v1823_v17  ;;  %vm1103_vm4 = vcmask 57344  }
   0x4   :  { %1660 = vmatprep.mubr.msk.bf16.mxu0 %vm576_vm0, %v1727_v5  ;;  %v1751_v8 = vld [vmem:[%s3008_s0 + $0x104] ss:$8 sps:$4 sm:$0xff]   ;;  %v1724_v14 = vld [vmem:[%s3007_s1 + $0x48] ss:$0 sps:$4 sm:$0x33]   ;;  %22 = vst.msk [vmem:[#allocation2 + $0x10] sm:$0xff] %vm19_vm3, %v1823_v17 }
   0x5   :  { %1676 = vmatprep.mubr.msk.bf16.mxu1 %vm576_vm0, %v1751_v8  ;;  %v1723_v13 = vld [vmem:[%s3007_s1 + $0x40] sm:$0xff]   ;;  %v1887_v16 = vand.u32 %v1724_v14, %v676_v15  ;;  %23 = vst.msk [vmem:[#allocation2 + $0x18] sm:$0xff] %vm19_vm3, %v1823_v17  ;;  %24 = vst.msk [vmem:[#allocation2 + $0x20] sm:$0xff] %vm19_vm3, %v1823_v17  ;;  %v1728_v20 = vld [vmem:[%s3008_s0 + $0x14] ss:$8 sps:$4 sm:$0xff]  }
   0x6   :  { %683 = vmatpush1.bf16.msra.mxu0 %v1716_v2  ;;  %1703 = vmatpush1.bf16.msra.mxu1 %v1716_v2  ;;  %25 = vst.msk [vmem:[#allocation2 + $0x28] sm:$0xff] %vm19_vm3, %v1823_v17  ;;  %26 = vst.msk [vmem:[#allocation2 + $0x30] sm:$0xff] %vm19_vm3, %v1823_v17  ;;  %v1725_v18 = vld [vmem:[%s3008_s0] ss:$8 sps:$4 sm:$0xff]   ;;  %v1755_v21 = vld [vmem:[%s3008_s0 + $0x114] ss:$8 sps:$4 sm:$0xff]  }
   0x7   :  { %684 = vmatprep.subr.bf16.mxu0 %v1821_v0  ;;  %1694 = vmatprep.subr.bf16.mxu1 %v1821_v0  ;;  %27 = vst.msk [vmem:[#allocation2 + $0x38] sm:$0xff] %vm19_vm3, %v1823_v17  ;;  %28 = vst.msk [vmem:[#allocation2 + $0x40] sm:$0xff] %vm19_vm3, %v1823_v17  ;;  %v1749_v19 = vld [vmem:[%s3008_s0 + $0x100] ss:$8 sps:$4 sm:$0xff]   ;;  %v1730_v22 = vld [vmem:[%s3008_s0 + $0x10] ss:$8 sps:$4 sm:$0xff]  }
   0x8   :  { %29 = vst.msk [vmem:[#allocation2 + $0x48] sm:$0xff] %vm19_vm3, %v1823_v17  ;;  %30 = vst.msk [vmem:[#allocation2 + $0x50] sm:$0xff] %vm19_vm3, %v1823_v17  ;;  %v1757_v23 = vld [vmem:[%s3008_s0 + $0x110] ss:$8 sps:$4 sm:$0xff]   ;;  %v1731_v24 = vld [vmem:[%s3008_s0 + $0x24] ss:$8 sps:$4 sm:$0xff]  }
   0x9   :  { %31 = vst.msk [vmem:[#allocation2 + $0x58] sm:$0xff] %vm19_vm3, %v1823_v17  ;;  %32 = vst.msk [vmem:[#allocation2 + $0x60] sm:$0xff] %vm19_vm3, %v1823_v17  ;;  %v1761_v25 = vld [vmem:[%s3008_s0 + $0x124] ss:$8 sps:$4 sm:$0xff]   ;;  %v1733_v26 = vld [vmem:[%s3008_s0 + $0x20] ss:$8 sps:$4 sm:$0xff]  }
   0xa   :  { %685 = vmatpush1.bf16.msra.mxu0 %v1717_v3  ;;  %1704 = vmatpush1.bf16.msra.mxu1 %v1717_v3  ;;  %33 = vst.msk [vmem:[#allocation2 + $0x68] sm:$0xff] %vm19_vm3, %v1823_v17  ;;  %34 = vst.msk [vmem:[#allocation2 + $0x70] sm:$0xff] %vm19_vm3, %v1823_v17  ;;  %v1763_v27 = vld [vmem:[%s3008_s0 + $0x120] ss:$8 sps:$4 sm:$0xff]   ;;  %v1734_v28 = vld [vmem:[%s3008_s0 + $0x34] ss:$8 sps:$4 sm:$0xff]  }
   0xb   :  { %686 = vmatprep.subr.bf16.mxu0 %v1821_v0  ;;  %1695 = vmatprep.subr.bf16.mxu1 %v1821_v0  ;;  %35 = vst.msk [vmem:[#allocation2 + $0x78] sm:$0xff] %vm19_vm3, %v1823_v17  ;;  %36 = vst.msk [vmem:[#allocation2 + $0x80] sm:$0xff] %vm19_vm3, %v1823_v17  ;;  %v1767_v29 = vld [vmem:[%s3008_s0 + $0x134] ss:$8 sps:$4 sm:$0xff]   ;;  %v1736_v30 = vld [vmem:[%s3008_s0 + $0x30] ss:$8 sps:$4 sm:$0xff]  }
   0xc   :  { %37 = vst.msk [vmem:[#allocation2 + $0x88] sm:$0xff] %vm19_vm3, %v1823_v17  ;;  %38 = vst.msk [vmem:[#allocation2 + $0x90] sm:$0xff] %vm19_vm3, %v1823_v17  ;;  %v1769_v31 = vld [vmem:[%s3008_s0 + $0x130] ss:$8 sps:$4 sm:$0xff]   ;;  %v1737_v32 = vld [vmem:[%s3008_s0 + $0x44] ss:$8 sps:$4 sm:$0xff]  }
   0xd   :  { %39 = vst.msk [vmem:[#allocation2 + $0x98] sm:$0xff] %vm19_vm3, %v1823_v17  ;;  %40 = vst.msk [vmem:[#allocation2 + $0xa0] sm:$0xff] %vm19_vm3, %v1823_v17  ;;  %v1773_v33 = vld [vmem:[%s3008_s0 + $0x144] ss:$8 sps:$4 sm:$0xff]   ;;  %v1739_v34 = vld [vmem:[%s3008_s0 + $0x40] ss:$8 sps:$4 sm:$0xff]  }
   0xe   :  { %687 = vmatpush1.bf16.msra.mxu0 %v1718_v4  ;;  %1705 = vmatpush1.bf16.msra.mxu1 %v1718_v4  ;;  %41 = vst.msk [vmem:[#allocation2 + $0xa8] sm:$0xff] %vm19_vm3, %v1823_v17  ;;  %42 = vst.msk [vmem:[#allocation2 + $0xb0] sm:$0xff] %vm19_vm3, %v1823_v17  ;;  %v1775_v35 = vld [vmem:[%s3008_s0 + $0x140] ss:$8 sps:$4 sm:$0xff]   ;;  %v1740_v36 = vld [vmem:[%s3008_s0 + $0x54] ss:$8 sps:$4 sm:$0xff]  }
   0xf   :  { %688 = vmatprep.subr.bf16.mxu0 %v1821_v0  ;;  %1696 = vmatprep.subr.bf16.mxu1 %v1821_v0  ;;  %43 = vst.msk [vmem:[#allocation2 + $0xb8] sm:$0xff] %vm19_vm3, %v1823_v17  ;;  %44 = vst.msk [vmem:[#allocation2 + $0xc0] sm:$0xff] %vm19_vm3, %v1823_v17  ;;  %v1779_v37 = vld [vmem:[%s3008_s0 + $0x154] ss:$8 sps:$4 sm:$0xff]   ;;  %v1742_v38 = vld [vmem:[%s3008_s0 + $0x50] ss:$8 sps:$4 sm:$0xff]  }
  0x10   :  { %45 = vst.msk [vmem:[#allocation2 + $0xc8] sm:$0xff] %vm19_vm3, %v1823_v17  ;;  %46 = vst.msk [vmem:[#allocation2 + $0xd0] sm:$0xff] %vm19_vm3, %v1823_v17  ;;  %v1781_v39 = vld [vmem:[%s3008_s0 + $0x150] ss:$8 sps:$4 sm:$0xff]   ;;  %v1743_v40 = vld [vmem:[%s3008_s0 + $0x64] ss:$8 sps:$4 sm:$0xff]  }
  0x11   :  { %47 = vst.msk [vmem:[#allocation2 + $0xd8] sm:$0xff] %vm19_vm3, %v1823_v17  ;;  %48 = vst.msk [vmem:[#allocation2 + $0xe0] sm:$0xff] %vm19_vm3, %v1823_v17  ;;  %v1785_v41 = vld [vmem:[%s3008_s0 + $0x164] ss:$8 sps:$4 sm:$0xff]   ;;  %v1745_v42 = vld [vmem:[%s3008_s0 + $0x60] ss:$8 sps:$4 sm:$0xff]  }
  0x12   :  { %689 = vmatpush1.bf16.msra.mxu0 %v1719_v6  ;;  %1706 = vmatpush1.bf16.msra.mxu1 %v1719_v6  ;;  %49 = vst.msk [vmem:[#allocation2 + $0xe8] sm:$0xff] %vm19_vm3, %v1823_v17  ;;  %50 = vst.msk [vmem:[#allocation2 + $0xf0] sm:$0xff] %vm19_vm3, %v1823_v17  ;;  %v1787_v43 = vld [vmem:[%s3008_s0 + $0x160] ss:$8 sps:$4 sm:$0xff]   ;;  %v1746_v44 = vld [vmem:[%s3008_s0 + $0x74] ss:$8 sps:$4 sm:$0xff]  }
  0x13   :  { %690 = vmatprep.subr.bf16.mxu0 %v1821_v0  ;;  %1697 = vmatprep.subr.bf16.mxu1 %v1821_v0  ;;  %51 = vst.msk [vmem:[#allocation2 + $0xf8] sm:$0xff] %vm19_vm3, %v1823_v17  ;;  %52 = vst.msk [vmem:[#allocation2 + $0x100] sm:$0xff] %vm19_vm3, %v1823_v17  ;;  %v1791_v45 = vld [vmem:[%s3008_s0 + $0x174] ss:$8 sps:$4 sm:$0xff]   ;;  %v1748_v46 = vld [vmem:[%s3008_s0 + $0x70] ss:$8 sps:$4 sm:$0xff]  }
  0x14   :  { %53 = vst.msk [vmem:[#allocation2 + $0x108] sm:$0xff] %vm19_vm3, %v1823_v17  ;;  %54 = vst.msk [vmem:[#allocation2 + $0x110] sm:$0xff] %vm19_vm3, %v1823_v17  ;;  %v1793_v47 = vld [vmem:[%s3008_s0 + $0x170] ss:$8 sps:$4 sm:$0xff]   ;;  %v1752_v48 = vld [vmem:[%s3008_s0 + $0x84] ss:$8 sps:$4 sm:$0xff]  }
  0x15   :  { %55 = vst.msk [vmem:[#allocation2 + $0x118] sm:$0xff] %vm19_vm3, %v1823_v17  ;;  %56 = vst.msk [vmem:[#allocation2 + $0x120] sm:$0xff] %vm19_vm3, %v1823_v17  ;;  %v1797_v49 = vld [vmem:[%s3008_s0 + $0x184] ss:$8 sps:$4 sm:$0xff]   ;;  %v1754_v50 = vld [vmem:[%s3008_s0 + $0x80] ss:$8 sps:$4 sm:$0xff]  }
  0x16   :  { %691 = vmatpush1.bf16.msra.mxu0 %v1720_v7  ;;  %1707 = vmatpush1.bf16.msra.mxu1 %v1720_v7  ;;  %57 = vst.msk [vmem:[#allocation2 + $0x128] sm:$0xff] %vm19_vm3, %v1823_v17  ;;  %58 = vst.msk [vmem:[#allocation2 + $0x130] sm:$0xff] %vm19_vm3, %v1823_v17  ;;  %v1799_v51 = vld [vmem:[%s3008_s0 + $0x180] ss:$8 sps:$4 sm:$0xff]   ;;  %v1758_v52 = vld [vmem:[%s3008_s0 + $0x94] ss:$8 sps:$4 sm:$0xff]  }
  0x17   :  { %692 = vmatprep.subr.bf16.mxu0 %v1821_v0  ;;  %1698 = vmatprep.subr.bf16.mxu1 %v1821_v0  ;;  %59 = vst.msk [vmem:[#allocation2 + $0x138] sm:$0xff] %vm19_vm3, %v1823_v17  ;;  %60 = vst.msk [vmem:[#allocation2 + $0x140] sm:$0xff] %vm19_vm3, %v1823_v17  ;;  %v1800_v53 = vld [vmem:[%s3008_s0 + $0x194] ss:$8 sps:$4 sm:$0xff]   ;;  %v1760_v54 = vld [vmem:[%s3008_s0 + $0x90] ss:$8 sps:$4 sm:$0xff]  }
  0x18   :  { %61 = vst.msk [vmem:[#allocation2 + $0x148] sm:$0xff] %vm19_vm3, %v1823_v17  ;;  %62 = vst.msk [vmem:[#allocation2 + $0x150] sm:$0xff] %vm19_vm3, %v1823_v17  ;;  %v1802_v55 = vld [vmem:[%s3008_s0 + $0x190] ss:$8 sps:$4 sm:$0xff]   ;;  %v1764_v56 = vld [vmem:[%s3008_s0 + $0xa4] ss:$8 sps:$4 sm:$0xff]  }
  0x19   :  { %63 = vst.msk [vmem:[#allocation2 + $0x158] sm:$0xff] %vm19_vm3, %v1823_v17  ;;  %64 = vst.msk [vmem:[#allocation2 + $0x160] sm:$0xff] %vm19_vm3, %v1823_v17  ;;  %v1803_v57 = vld [vmem:[%s3008_s0 + $0x1a4] ss:$8 sps:$4 sm:$0xff]   ;;  %v1766_v58 = vld [vmem:[%s3008_s0 + $0xa0] ss:$8 sps:$4 sm:$0xff]  }
  0x1a   :  { %693 = vmatpush1.bf16.msra.mxu0 %v1721_v9  ;;  %1708 = vmatpush1.bf16.msra.mxu1 %v1721_v9  ;;  %65 = vst.msk [vmem:[#allocation2 + $0x168] sm:$0xff] %vm19_vm3, %v1823_v17  ;;  %66 = vst.msk [vmem:[#allocation2 + $0x170] sm:$0xff] %vm19_vm3, %v1823_v17  ;;  %v1805_v59 = vld [vmem:[%s3008_s0 + $0x1a0] ss:$8 sps:$4 sm:$0xff]   ;;  %v1770_v60 = vld [vmem:[%s3008_s0 + $0xb4] ss:$8 sps:$4 sm:$0xff]  }
  0x1b   :  { %694 = vmatprep.subr.bf16.mxu0 %v1821_v0  ;;  %1699 = vmatprep.subr.bf16.mxu1 %v1821_v0  ;;  %67 = vst.msk [vmem:[#allocation2 + $0x178] sm:$0xff] %vm19_vm3, %v1823_v17  ;;  %68 = vst.msk [vmem:[#allocation2 + $0x180] sm:$0xff] %vm19_vm3, %v1823_v17  ;;  %v1806_v61 = vld [vmem:[%s3008_s0 + $0x1b4] ss:$8 sps:$4 sm:$0xff]   ;;  %v1772_v62 = vld [vmem:[%s3008_s0 + $0xb0] ss:$8 sps:$4 sm:$0xff]  }
  0x1c   :  { %69 = vst.msk [vmem:[#allocation2 + $0x188] sm:$0xff] %vm19_vm3, %v1823_v17  ;;  %70 = vst.msk [vmem:[#allocation2 + $0x190] sm:$0xff] %vm19_vm3, %v1823_v17  ;;  %v1808_v63 = vld [vmem:[%s3008_s0 + $0x1b0] ss:$8 sps:$4 sm:$0xff]   ;;  %v1809_v1 = vld [vmem:[%s3008_s0 + $0x1c4] ss:$8 sps:$4 sm:$0xff]  }
  0x1d   :  { %71 = vst.msk [vmem:[#allocation2 + $0x198] sm:$0xff] %vm19_vm3, %v1823_v17  ;;  %72 = vst.msk [vmem:[#allocation2 + $0x1a0] sm:$0xff] %vm19_vm3, %v1823_v17  ;;  %v1778_v2 = vld [vmem:[%s3008_s0 + $0xc0] ss:$8 sps:$4 sm:$0xff]   ;;  %v1782_v4 = vld [vmem:[%s3008_s0 + $0xd4] ss:$8 sps:$4 sm:$0xff]  }
  0x1e   :  { %695 = vmatpush1.bf16.msra.mxu0 %v1722_v10  ;;  %1709 = vmatpush1.bf16.msra.mxu1 %v1722_v10  ;;  %73 = vst.msk [vmem:[#allocation2 + $0x1a8] sm:$0xff] %vm19_vm3, %v1823_v17  ;;  %74 = vst.msk [vmem:[#allocation2 + $0x1b0] sm:$0xff] %vm19_vm3, %v1823_v17  ;;  %v1811_v3 = vld [vmem:[%s3008_s0 + $0x1c0] ss:$8 sps:$4 sm:$0xff]   ;;  %v1812_v5 = vld [vmem:[%s3008_s0 + $0x1d4] ss:$8 sps:$4 sm:$0xff]  }
  0x1f   :  { %696 = vmatprep.subr.bf16.mxu0 %v1821_v0  ;;  %1700 = vmatprep.subr.bf16.mxu1 %v1821_v0  ;;  %75 = vst.msk [vmem:[#allocation2 + $0x1b8] sm:$0xff] %vm19_vm3, %v1823_v17  ;;  %76 = vst.msk [vmem:[#allocation2 + $0x1c0] sm:$0xff] %vm19_vm3, %v1823_v17  ;;  %v1784_v6 = vld [vmem:[%s3008_s0 + $0xd0] ss:$8 sps:$4 sm:$0xff]   ;;  %v1788_v8 = vld [vmem:[%s3008_s0 + $0xe4] ss:$8 sps:$4 sm:$0xff]  }
  0x20   :  { %77 = vst.msk [vmem:[#allocation2 + $0x1c8] sm:$0xff] %vm19_vm3, %v1823_v17  ;;  %78 = vst.msk [vmem:[#allocation2 + $0x1d0] sm:$0xff] %vm19_vm3, %v1823_v17  ;;  %v1814_v7 = vld [vmem:[%s3008_s0 + $0x1d0] ss:$8 sps:$4 sm:$0xff]   ;;  %v1815_v9 = vld [vmem:[%s3008_s0 + $0x1e4] ss:$8 sps:$4 sm:$0xff]  }
  0x21   :  { %79 = vst.msk [vmem:[#allocation2 + $0x1d8] sm:$0xff] %vm19_vm3, %v1823_v17  ;;  %80 = vst.msk [vmem:[#allocation2 + $0x1e0] sm:$0xff] %vm19_vm3, %v1823_v17  ;;  %v1790_v10 = vld [vmem:[%s3008_s0 + $0xe0] ss:$8 sps:$4 sm:$0xff]   ;;  %v1794_v12 = vld [vmem:[%s3008_s0 + $0xf4] ss:$8 sps:$4 sm:$0xff]  }
  0x22   :  { %697 = vmatpush1.bf16.msra.mxu0 %v1723_v13  ;;  %1710 = vmatpush1.bf16.msra.mxu1 %v1723_v13  ;;  %81 = vst.msk [vmem:[#allocation2 + $0x1e8] sm:$0xff] %vm19_vm3, %v1823_v17  ;;  %82 = vst.msk [vmem:[#allocation2 + $0x1f0] sm:$0xff] %vm19_vm3, %v1823_v17  ;;  %v1817_v11 = vld [vmem:[%s3008_s0 + $0x1e0] ss:$8 sps:$4 sm:$0xff]   ;;  %v1818_v13 = vld [vmem:[%s3008_s0 + $0x1f4] ss:$8 sps:$4 sm:$0xff]  }
  0x23   :  { %698 = vmatprep.subr.bf16.mxu0 %v1821_v0  ;;  %1701 = vmatprep.subr.bf16.mxu1 %v1821_v0  ;;  %83 = vst.msk [vmem:[#allocation2 + $0x1f8] sm:$0xff] %vm19_vm3, %v1823_v17  ;;  %v1776_v0 = vld [vmem:[%s3008_s0 + $0xc4] ss:$8 sps:$4 sm:$0xff]   ;;  %v1796_v14 = vld [vmem:[%s3008_s0 + $0xf0] ss:$8 sps:$4 sm:$0xff]  }
  0x24   :  { %v1820_v15 = vld [vmem:[%s3008_s0 + $0x1f0] ss:$8 sps:$4 sm:$0xff]   ;;  %1104 = vst.msk [vmem:[%s3010_s3] sm:$0x1] %vm1103_vm4, %v1823_v17  ;;  %1105 = vst.msk [vmem:[%s3011_s4] sm:$0x1] %vm1103_vm4, %v1823_v17 }
  0x26   :  { %699 = vmatpush1.bf16.msra.mxu0 %v1887_v16  ;;  %1711 = vmatpush1.bf16.msra.mxu1 %v1887_v16  ;;  %v84_v16 = vld [vmem:[#allocation2] sm:$0xff] }
  0x29   :  { %713 = vmatmul.mubr.bf16.vlgmr.msra.gmra.mrb[0].mxu0 %v1725_v18  ;;  %841 = vmatmul.mubr.bf16.vlgmr.msra.gmra.mrb[0].mxu1 %v1749_v19  ;;  %v116_v18 = vld [vmem:[#allocation2 + $0x100] sm:$0xff] }
  0x2a   :  { %1661 = vmatprep.mubr.msk.bf16.mxu0 %vm576_vm0, %v1728_v20  ;;  %1677 = vmatprep.mubr.msk.bf16.mxu1 %vm576_vm0, %v1755_v21  ;;  %v85_v20 = vld [vmem:[#allocation2 + $0x8] sm:$0xff] }
  0x31   :  { %721 = vmatmul.mubr.bf16.gmra.mrb[4].mxu0 %v1730_v22  ;;  %849 = vmatmul.mubr.bf16.gmra.mrb[4].mxu1 %v1757_v23  ;;  %v117_v22 = vld [vmem:[#allocation2 + $0x108] sm:$0xff] }
  0x32   :  { %1662 = vmatprep.mubr.msk.bf16.mxu0 %vm576_vm0, %v1731_v24  ;;  %1678 = vmatprep.mubr.msk.bf16.mxu1 %vm576_vm0, %v1761_v25 }
  0x39   :  { %729 = vmatmul.mubr.bf16.gmra.mrb[8].mxu0 %v1733_v26  ;;  %857 = vmatmul.mubr.bf16.gmra.mrb[8].mxu1 %v1763_v27 }
  0x3a   :  { %1663 = vmatprep.mubr.msk.bf16.mxu0 %vm576_vm0, %v1734_v28  ;;  %1679 = vmatprep.mubr.msk.bf16.mxu1 %vm576_vm0, %v1767_v29 }
  0x41   :  { %737 = vmatmul.mubr.bf16.gmra.mrb[12].mxu0 %v1736_v30  ;;  %865 = vmatmul.mubr.bf16.gmra.mrb[12].mxu1 %v1769_v31 }
  0x42   :  { %1664 = vmatprep.mubr.msk.bf16.mxu0 %vm576_vm0, %v1737_v32  ;;  %1680 = vmatprep.mubr.msk.bf16.mxu1 %vm576_vm0, %v1773_v33  ;;  %v86_v33 = vld [vmem:[#allocation2 + $0x10] sm:$0xff] }
  0x49   :  { %745 = vmatmul.mubr.bf16.gmra.mrb[16].mxu0 %v1739_v34  ;;  %873 = vmatmul.mubr.bf16.gmra.mrb[16].mxu1 %v1775_v35  ;;  %v118_v34 = vld [vmem:[#allocation2 + $0x110] sm:$0xff] }
  0x4a   :  { %1665 = vmatprep.mubr.msk.bf16.mxu0 %vm576_vm0, %v1740_v36  ;;  %1681 = vmatprep.mubr.msk.bf16.mxu1 %vm576_vm0, %v1779_v37  ;;  %v87_v36 = vld [vmem:[#allocation2 + $0x18] sm:$0xff] }
  0x51   :  { %753 = vmatmul.mubr.bf16.gmra.mrb[20].mxu0 %v1742_v38  ;;  %881 = vmatmul.mubr.bf16.gmra.mrb[20].mxu1 %v1781_v39 }
  0x52   :  { %1666 = vmatprep.mubr.msk.bf16.mxu0 %vm576_vm0, %v1743_v40  ;;  %1682 = vmatprep.mubr.msk.bf16.mxu1 %vm576_vm0, %v1785_v41 }
  0x59   :  { %761 = vmatmul.mubr.bf16.gmra.mrb[24].mxu0 %v1745_v42  ;;  %889 = vmatmul.mubr.bf16.gmra.mrb[24].mxu1 %v1787_v43  ;;  %v119_v42 = vld [vmem:[#allocation2 + $0x118] sm:$0xff] }
  0x5a   :  { %1667 = vmatprep.mubr.msk.bf16.mxu0 %vm576_vm0, %v1746_v44  ;;  %1683 = vmatprep.mubr.msk.bf16.mxu1 %vm576_vm0, %v1791_v45 }
  0x61   :  { %769 = vmatmul.mubr.bf16.gmra.mrb[28].mxu0 %v1748_v46  ;;  %897 = vmatmul.mubr.bf16.gmra.mrb[28].mxu1 %v1793_v47 }
  0x62   :  { %1668 = vmatprep.mubr.msk.bf16.mxu0 %vm576_vm0, %v1752_v48  ;;  %1684 = vmatprep.mubr.msk.bf16.mxu1 %vm576_vm0, %v1797_v49 }
  0x69   :  { %777 = vmatmul.mubr.bf16.gmra.mrb[32].mxu0 %v1754_v50  ;;  %905 = vmatmul.mubr.bf16.gmra.mrb[32].mxu1 %v1799_v51 }
  0x6a   :  { %1669 = vmatprep.mubr.msk.bf16.mxu0 %vm576_vm0, %v1758_v52  ;;  %1685 = vmatprep.mubr.msk.bf16.mxu1 %vm576_vm0, %v1800_v53  ;;  %v88_v53 = vld [vmem:[#allocation2 + $0x20] sm:$0xff] }
  0x71   :  { %785 = vmatmul.mubr.bf16.gmra.mrb[36].mxu0 %v1760_v54  ;;  %913 = vmatmul.mubr.bf16.gmra.mrb[36].mxu1 %v1802_v55  ;;  %v120_v54 = vld [vmem:[#allocation2 + $0x120] sm:$0xff] }
  0x72   :  { %1670 = vmatprep.mubr.msk.bf16.mxu0 %vm576_vm0, %v1764_v56  ;;  %1686 = vmatprep.mubr.msk.bf16.mxu1 %vm576_vm0, %v1803_v57  ;;  %v89_v56 = vld [vmem:[#allocation2 + $0x28] sm:$0xff] }
  0x79   :  { %793 = vmatmul.mubr.bf16.gmra.mrb[40].mxu0 %v1766_v58  ;;  %921 = vmatmul.mubr.bf16.gmra.mrb[40].mxu1 %v1805_v59 }
  0x7a   :  { %1671 = vmatprep.mubr.msk.bf16.mxu0 %vm576_vm0, %v1770_v60  ;;  %1687 = vmatprep.mubr.msk.bf16.mxu1 %vm576_vm0, %v1806_v61 }
  0x81   :  { %801 = vmatmul.mubr.bf16.gmra.mrb[44].mxu0 %v1772_v62  ;;  %929 = vmatmul.mubr.bf16.gmra.mrb[44].mxu1 %v1808_v63  ;;  %v121_v62 = vld [vmem:[#allocation2 + $0x128] sm:$0xff] }
  0x82   :  { %1672 = vmatprep.mubr.msk.bf16.mxu0 %vm576_vm0, %v1776_v0  ;;  %1688 = vmatprep.mubr.msk.bf16.mxu1 %vm576_vm0, %v1809_v1 }
  0x89   :  { %809 = vmatmul.mubr.bf16.gmra.mrb[48].mxu0 %v1778_v2  ;;  %937 = vmatmul.mubr.bf16.gmra.mrb[48].mxu1 %v1811_v3 }
  0x8a   :  { %1673 = vmatprep.mubr.msk.bf16.mxu0 %vm576_vm0, %v1782_v4  ;;  %1689 = vmatprep.mubr.msk.bf16.mxu1 %vm576_vm0, %v1812_v5 }
  0x91   :  { %817 = vmatmul.mubr.bf16.gmra.mrb[52].mxu0 %v1784_v6  ;;  %945 = vmatmul.mubr.bf16.gmra.mrb[52].mxu1 %v1814_v7 }
  0x92   :  { %1674 = vmatprep.mubr.msk.bf16.mxu0 %vm576_vm0, %v1788_v8  ;;  %1690 = vmatprep.mubr.msk.bf16.mxu1 %vm576_vm0, %v1815_v9  ;;  %v90_v9 = vld [vmem:[#allocation2 + $0x30] sm:$0xff] }
  0x99   :  { %825 = vmatmul.mubr.bf16.gmra.mrb[56].mxu0 %v1790_v10  ;;  %953 = vmatmul.mubr.bf16.gmra.mrb[56].mxu1 %v1817_v11  ;;  %v122_v10 = vld [vmem:[#allocation2 + $0x130] sm:$0xff] }
  0x9a   :  { %1675 = vmatprep.mubr.msk.bf16.mxu0 %vm576_vm0, %v1794_v12  ;;  %1691 = vmatprep.mubr.msk.bf16.mxu1 %vm576_vm0, %v1818_v13  ;;  %v91_v12 = vld [vmem:[#allocation2 + $0x38] sm:$0xff] }
  0xa1   :  { %833 = vmatmul.mubr.bf16.gmra.mrb[60].mxu0 %v1796_v14  ;;  %961 = vmatmul.mubr.bf16.gmra.mrb[60].mxu1 %v1820_v15 }
  0xfc   :  { %v714_v19 = vpop.f32.mrb[0].mxu0  ;;  %v842_v21 = vpop.f32.mrb[0].mxu1 }
  0xfd   :  { %v969_v23 = vadd.f32 %v714_v19, %v84_v16  ;;  %v716_v24 = vpop.f32.mrb[1].mxu0  ;;  %v1001_v25 = vadd.f32 %v842_v21, %v116_v18  ;;  %v844_v26 = vpop.f32.mrb[1].mxu1  ;;  %v123_v19 = vld [vmem:[#allocation2 + $0x138] sm:$0xff] }
  0xfe   :  { %v717_v27 = vpop.f32.mrb[2].mxu0  ;;  %v845_v28 = vpop.f32.mrb[2].mxu1 }
  0xff   :  { %1034 = vst.msk [vmem:[#allocation2] sm:$0xff] %vm19_vm3, %v969_v23  ;;  %v970_v29 = vadd.f32 %v717_v27, %v85_v20  ;;  %v719_v30 = vpop.f32.mrb[3].mxu0  ;;  %1066 = vst.msk [vmem:[#allocation2 + $0x100] sm:$0xff] %vm19_vm3, %v1001_v25  ;;  %v1002_v31 = vadd.f32 %v845_v28, %v117_v22  ;;  %v847_v32 = vpop.f32.mrb[3].mxu1 }
 0x100   :  { %v92_v30 = vld [vmem:[#allocation2 + $0x40] sm:$0xff] }
 0x101   :  { %1035 = vst.msk [vmem:[#allocation2 + $0x8] sm:$0xff] %vm19_vm3, %v970_v29  ;;  %1067 = vst.msk [vmem:[#allocation2 + $0x108] sm:$0xff] %vm19_vm3, %v1002_v31  ;;  %v124_v31 = vld [vmem:[#allocation2 + $0x140] sm:$0xff] }
 0x104   :  { %v722_v35 = vpop.f32.mrb[4].mxu0  ;;  %v850_v37 = vpop.f32.mrb[4].mxu1 }
 0x105   :  { %v971_v38 = vadd.f32 %v722_v35, %v86_v33  ;;  %v724_v39 = vpop.f32.mrb[5].mxu0  ;;  %v1003_v40 = vadd.f32 %v850_v37, %v118_v34  ;;  %v852_v41 = vpop.f32.mrb[5].mxu1  ;;  %v93_v33 = vld [vmem:[#allocation2 + $0x48] sm:$0xff] }
 0x106   :  { %v2239_v43 = vld [vmem:[#allocation2] sm:$0xff]  ;;  %v725_v44 = vpop.f32.mrb[6].mxu0  ;;  %v853_v46 = vpop.f32.mrb[6].mxu1  ;;  %v125_v39 = vld [vmem:[#allocation2 + $0x148] sm:$0xff] }
 0x107   :  { %v2241_v45 = vld [vmem:[#allocation2 + $0x100] sm:$0xff]  ;;  %1173 = vst.msk [vmem:[%s3009_s2] sm:$0xff] %vm19_vm3, %v2239_v43  ;;  %1036 = vst.msk [vmem:[#allocation2 + $0x10] sm:$0xff] %vm19_vm3, %v971_v38  ;;  %v972_v47 = vadd.f32 %v725_v44, %v87_v36  ;;  %v727_v48 = vpop.f32.mrb[7].mxu0  ;;  %v855_v49 = vpop.f32.mrb[7].mxu1  ;;  %v1004_v52 = vadd.f32 %v853_v46, %v119_v42 }
 0x108   :  { %1205 = vst.msk [vmem:[%s3009_s2 + $0x100] sm:$0xff] %vm19_vm3, %v2241_v45  ;;  %1068 = vst.msk [vmem:[#allocation2 + $0x110] sm:$0xff] %vm19_vm3, %v1003_v40  ;;  %v2255_v50 = vld [vmem:[#allocation2 + $0x8] sm:$0xff] }
 0x109   :  { %v2257_v51 = vld [vmem:[#allocation2 + $0x108] sm:$0xff]  ;;  %1174 = vst.msk [vmem:[%s3009_s2 + $0x8] sm:$0xff] %vm19_vm3, %v2255_v50  ;;  %1037 = vst.msk [vmem:[#allocation2 + $0x18] sm:$0xff] %vm19_vm3, %v972_v47 }
 0x10a   :  { %1206 = vst.msk [vmem:[%s3009_s2 + $0x108] sm:$0xff] %vm19_vm3, %v2257_v51  ;;  %1069 = vst.msk [vmem:[#allocation2 + $0x118] sm:$0xff] %vm19_vm3, %v1004_v52 }
 0x10c   :  { %v730_v55 = vpop.f32.mrb[8].mxu0  ;;  %v858_v57 = vpop.f32.mrb[8].mxu1 }
 0x10d   :  { %v973_v58 = vadd.f32 %v730_v55, %v88_v53  ;;  %v732_v59 = vpop.f32.mrb[9].mxu0  ;;  %v1005_v60 = vadd.f32 %v858_v57, %v120_v54  ;;  %v860_v61 = vpop.f32.mrb[9].mxu1  ;;  %v94_v54 = vld [vmem:[#allocation2 + $0x50] sm:$0xff]  ;;  %v95_v57 = vld [vmem:[#allocation2 + $0x58] sm:$0xff] }
 0x10e   :  { %v2271_v63 = vld [vmem:[#allocation2 + $0x10] sm:$0xff]  ;;  %v733_v0 = vpop.f32.mrb[10].mxu0  ;;  %v861_v2 = vpop.f32.mrb[10].mxu1  ;;  %v1376_v59 = vmul.f32 %v2255_v50, %v2255_v50 }
 0x10f   :  { %v2273_v1 = vld [vmem:[#allocation2 + $0x110] sm:$0xff]  ;;  %1175 = vst.msk [vmem:[%s3009_s2 + $0x10] sm:$0xff] %vm19_vm3, %v2271_v63  ;;  %1038 = vst.msk [vmem:[#allocation2 + $0x20] sm:$0xff] %vm19_vm3, %v973_v58  ;;  %v974_v3 = vadd.f32 %v733_v0, %v89_v56  ;;  %v735_v4 = vpop.f32.mrb[11].mxu0  ;;  %v863_v5 = vpop.f32.mrb[11].mxu1  ;;  %v1006_v7 = vadd.f32 %v861_v2, %v121_v62  ;;  %v127_v2 = vld [vmem:[#allocation2 + $0x158] sm:$0xff] }
 0x110   :  { %1207 = vst.msk [vmem:[%s3009_s2 + $0x110] sm:$0xff] %vm19_vm3, %v2273_v1  ;;  %1070 = vst.msk [vmem:[#allocation2 + $0x120] sm:$0xff] %vm19_vm3, %v1005_v60  ;;  %v2287_v6 = vld [vmem:[#allocation2 + $0x18] sm:$0xff]  ;;  %v126_v55 = vld [vmem:[#allocation2 + $0x150] sm:$0xff] }
 0x111   :  { %1176 = vst.msk [vmem:[%s3009_s2 + $0x18] sm:$0xff] %vm19_vm3, %v2287_v6  ;;  %1039 = vst.msk [vmem:[#allocation2 + $0x28] sm:$0xff] %vm19_vm3, %v974_v3  ;;  %v2295_v8 = vld [vmem:[#allocation2 + $0x118] sm:$0xff] }
 0x112   :  { %1208 = vst.msk [vmem:[%s3009_s2 + $0x118] sm:$0xff] %vm19_vm3, %v2295_v8  ;;  %1071 = vst.msk [vmem:[#allocation2 + $0x128] sm:$0xff] %vm19_vm3, %v1006_v7 }
 0x114   :  { %v738_v11 = vpop.f32.mrb[12].mxu0  ;;  %v866_v13 = vpop.f32.mrb[12].mxu1 }
 0x115   :  { %v975_v14 = vadd.f32 %v738_v11, %v90_v9  ;;  %v740_v15 = vpop.f32.mrb[13].mxu0  ;;  %v1007_v16 = vadd.f32 %v866_v13, %v122_v10  ;;  %v868_v18 = vpop.f32.mrb[13].mxu1  ;;  %v1375_v9 = vmul.f32 %v2239_v43, %v2239_v43  ;;  %v1239_v10 = vsel %vm19_vm3, %v2255_v50, 0.0 }
 0x116   :  { %v2303_v20 = vld [vmem:[#allocation2 + $0x20] sm:$0xff]  ;;  %v741_v21 = vpop.f32.mrb[14].mxu0  ;;  %v869_v23 = vpop.f32.mrb[14].mxu1  ;;  %v1377_v11 = vmul.f32 %v2271_v63, %v2271_v63  ;;  %v1440_v18 = vsel %vm19_vm3, %v1376_v59, 0.0 }
 0x117   :  { %v2305_v22 = vld [vmem:[#allocation2 + $0x120] sm:$0xff]  ;;  %1177 = vst.msk [vmem:[%s3009_s2 + $0x20] sm:$0xff] %vm19_vm3, %v2303_v20  ;;  %1040 = vst.msk [vmem:[#allocation2 + $0x30] sm:$0xff] %vm19_vm3, %v975_v14  ;;  %v976_v24 = vadd.f32 %v741_v21, %v91_v12  ;;  %v743_v25 = vpop.f32.mrb[15].mxu0  ;;  %v871_v26 = vpop.f32.mrb[15].mxu1  ;;  %v1008_v28 = vadd.f32 %v869_v23, %v123_v19  ;;  %v1241_v19 = vsel %vm19_vm3, %v2271_v63, 0.0 }
 0x118   :  { %1209 = vst.msk [vmem:[%s3009_s2 + $0x120] sm:$0xff] %vm19_vm3, %v2305_v22  ;;  %1072 = vst.msk [vmem:[#allocation2 + $0x130] sm:$0xff] %vm19_vm3, %v1007_v16  ;;  %v2319_v27 = vld [vmem:[#allocation2 + $0x28] sm:$0xff]  ;;  %v1238_v16 = vsel %vm19_vm3, %v2239_v43, 0.0  ;;  %v128_v43 = vld [vmem:[#allocation2 + $0x160] sm:$0xff]  ;;  %v1439_v63 = vsel %vm19_vm3, %v1375_v9, 0.0  ;;  %v1378_v26 = vmul.f32 %v2287_v6, %v2287_v6 }
 0x119   :  { %1178 = vst.msk [vmem:[%s3009_s2 + $0x28] sm:$0xff] %vm19_vm3, %v2319_v27  ;;  %1041 = vst.msk [vmem:[#allocation2 + $0x38] sm:$0xff] %vm19_vm3, %v976_v24  ;;  %v2327_v29 = vld [vmem:[#allocation2 + $0x128] sm:$0xff]  ;;  %v1240_v23 = vadd.f32 %v1239_v10, %v1238_v16  ;;  %v96_v24 = vld [vmem:[#allocation2 + $0x60] sm:$0xff]  ;;  %v1442_v25 = vsel %vm19_vm3, %v1377_v11, 0.0  ;;  %v1247_v9 = vsel %vm19_vm3, %v2319_v27, 0.0 }
 0x11a   :  { %1210 = vst.msk [vmem:[%s3009_s2 + $0x128] sm:$0xff] %vm19_vm3, %v2327_v29  ;;  %1073 = vst.msk [vmem:[#allocation2 + $0x138] sm:$0xff] %vm19_vm3, %v1008_v28  ;;  %v1441_v28 = vadd.f32 %v1440_v18, %v1439_v63 }
 0x11c   :  { %v746_v32 = vpop.f32.mrb[16].mxu0  ;;  %v874_v34 = vpop.f32.mrb[16].mxu1 }
 0x11d   :  { %v977_v35 = vadd.f32 %v746_v32, %v92_v30  ;;  %v748_v36 = vpop.f32.mrb[17].mxu0  ;;  %v1009_v37 = vadd.f32 %v874_v34, %v124_v31  ;;  %v876_v38 = vpop.f32.mrb[17].mxu1  ;;  %v1242_v30 = vadd.f32 %v1241_v19, %v1240_v23  ;;  %v97_v32 = vld [vmem:[#allocation2 + $0x68] sm:$0xff]  ;;  %v1243_v34 = vsel %vm19_vm3, %v2287_v6, 0.0 }
 0x11e   :  { %v2335_v40 = vld [vmem:[#allocation2 + $0x30] sm:$0xff]  ;;  %v749_v41 = vpop.f32.mrb[18].mxu0  ;;  %v877_v44 = vpop.f32.mrb[18].mxu1  ;;  %v1245_v6 = vsel %vm19_vm3, %v2303_v20, 0.0 }
 0x11f   :  { %v2337_v42 = vld [vmem:[#allocation2 + $0x130] sm:$0xff]  ;;  %1179 = vst.msk [vmem:[%s3009_s2 + $0x30] sm:$0xff] %vm19_vm3, %v2335_v40  ;;  %1042 = vst.msk [vmem:[#allocation2 + $0x40] sm:$0xff] %vm19_vm3, %v977_v35  ;;  %v978_v46 = vadd.f32 %v749_v41, %v93_v33  ;;  %v751_v47 = vpop.f32.mrb[19].mxu0  ;;  %v879_v48 = vpop.f32.mrb[19].mxu1  ;;  %v1010_v52 = vadd.f32 %v877_v44, %v125_v39  ;;  %v1379_v35 = vmul.f32 %v2303_v20, %v2303_v20  ;;  %v129_v41 = vld [vmem:[#allocation2 + $0x168] sm:$0xff] }
 0x120   :  { %1211 = vst.msk [vmem:[%s3009_s2 + $0x130] sm:$0xff] %vm19_vm3, %v2337_v42  ;;  %1074 = vst.msk [vmem:[#allocation2 + $0x140] sm:$0xff] %vm19_vm3, %v1009_v37  ;;  %v2351_v49 = vld [vmem:[#allocation2 + $0x38] sm:$0xff]  ;;  %v1443_v44 = vadd.f32 %v1442_v25, %v1441_v28  ;;  %v1244_v20 = vadd.f32 %v1243_v34, %v1242_v30  ;;  %v1381_v10 = vmul.f32 %v2335_v40, %v2335_v40  ;;  %v1249_v16 = vsel %vm19_vm3, %v2335_v40, 0.0 }
 0x121   :  { %1180 = vst.msk [vmem:[%s3009_s2 + $0x38] sm:$0xff] %vm19_vm3, %v2351_v49  ;;  %1043 = vst.msk [vmem:[#allocation2 + $0x48] sm:$0xff] %vm19_vm3, %v978_v46  ;;  %v2359_v53 = vld [vmem:[#allocation2 + $0x138] sm:$0xff] }
 0x122   :  { %1212 = vst.msk [vmem:[%s3009_s2 + $0x138] sm:$0xff] %vm19_vm3, %v2359_v53  ;;  %1075 = vst.msk [vmem:[#allocation2 + $0x148] sm:$0xff] %vm19_vm3, %v1010_v52  ;;  %v1450_v30 = vsel %vm19_vm3, %v1381_v10, 0.0 }
 0x124   :  { %v754_v56 = vpop.f32.mrb[20].mxu0  ;;  %v882_v58 = vpop.f32.mrb[20].mxu1 }
 0x125   :  { %v979_v60 = vadd.f32 %v754_v56, %v94_v54  ;;  %v756_v61 = vpop.f32.mrb[21].mxu0  ;;  %v1011_v62 = vadd.f32 %v882_v58, %v126_v55  ;;  %v884_v0 = vpop.f32.mrb[21].mxu1  ;;  %v1444_v54 = vsel %vm19_vm3, %v1378_v26, 0.0 }
 0x126   :  { %v2369_v3 = vld [vmem:[#allocation2 + $0x40] sm:$0xff]  ;;  %v757_v4 = vpop.f32.mrb[22].mxu0  ;;  %v885_v7 = vpop.f32.mrb[22].mxu1  ;;  %v1380_v61 = vmul.f32 %v2319_v27, %v2319_v27  ;;  %v1445_v0 = vadd.f32 %v1444_v54, %v1443_v44 }
 0x127   :  { %v2371_v5 = vld [vmem:[#allocation2 + $0x140] sm:$0xff]  ;;  %1181 = vst.msk [vmem:[%s3009_s2 + $0x40] sm:$0xff] %vm19_vm3, %v2369_v3  ;;  %1044 = vst.msk [vmem:[#allocation2 + $0x50] sm:$0xff] %vm19_vm3, %v979_v60  ;;  %v980_v12 = vadd.f32 %v757_v4, %v95_v57  ;;  %v759_v13 = vpop.f32.mrb[23].mxu0  ;;  %v887_v50 = vpop.f32.mrb[23].mxu1  ;;  %v1012_v15 = vadd.f32 %v885_v7, %v127_v2  ;;  %v1446_v60 = vsel %vm19_vm3, %v1379_v35, 0.0  ;;  %v1246_v2 = vadd.f32 %v1245_v6, %v1244_v20 }
 0x128   :  { %1213 = vst.msk [vmem:[%s3009_s2 + $0x140] sm:$0xff] %vm19_vm3, %v2371_v5  ;;  %1076 = vst.msk [vmem:[#allocation2 + $0x150] sm:$0xff] %vm19_vm3, %v1011_v62  ;;  %v2391_v14 = vld [vmem:[#allocation2 + $0x48] sm:$0xff]  ;;  %v98_v4 = vld [vmem:[#allocation2 + $0x70] sm:$0xff]  ;;  %v1447_v11 = vadd.f32 %v1446_v60, %v1445_v0  ;;  %v1253_v54 = vsel %vm19_vm3, %v2369_v3, 0.0 }
 0x129   :  { %1182 = vst.msk [vmem:[%s3009_s2 + $0x48] sm:$0xff] %vm19_vm3, %v2391_v14  ;;  %1045 = vst.msk [vmem:[#allocation2 + $0x58] sm:$0xff] %vm19_vm3, %v980_v12  ;;  %v2404_v21 = vld [vmem:[#allocation2 + $0x148] sm:$0xff]  ;;  %v130_v7 = vld [vmem:[#allocation2 + $0x170] sm:$0xff]  ;;  %v1248_v63 = vadd.f32 %v1247_v9, %v1246_v2 }
 0x12a   :  { %1214 = vst.msk [vmem:[%s3009_s2 + $0x148] sm:$0xff] %vm19_vm3, %v2404_v21  ;;  %1077 = vst.msk [vmem:[#allocation2 + $0x158] sm:$0xff] %vm19_vm3, %v1012_v15  ;;  %v99_v13 = vld [vmem:[#allocation2 + $0x78] sm:$0xff]  ;;  %v1448_v15 = vsel %vm19_vm3, %v1380_v61, 0.0 }
 0x12b   :  { %v1449_v34 = vadd.f32 %v1448_v15, %v1447_v11  ;;  %v1250_v35 = vadd.f32 %v1249_v16, %v1248_v63 }
 0x12c   :  { %v762_v31 = vpop.f32.mrb[24].mxu0  ;;  %v890_v33 = vpop.f32.mrb[24].mxu1 }
 0x12d   :  { %v981_v36 = vadd.f32 %v762_v31, %v96_v24  ;;  %v764_v37 = vpop.f32.mrb[25].mxu0  ;;  %v1013_v38 = vadd.f32 %v890_v33, %v128_v43  ;;  %v892_v39 = vpop.f32.mrb[25].mxu1  ;;  %v131_v43 = vld [vmem:[#allocation2 + $0x178] sm:$0xff]  ;;  %v1382_v31 = vmul.f32 %v2351_v49, %v2351_v49  ;;  %v1451_v44 = vadd.f32 %v1450_v30, %v1449_v34 }
 0x12e   :  { %v2420_v46 = vld [vmem:[#allocation2 + $0x50] sm:$0xff]  ;;  %v765_v47 = vpop.f32.mrb[26].mxu0  ;;  %v893_v52 = vpop.f32.mrb[26].mxu1  ;;  %v1383_v39 = vmul.f32 %v2369_v3, %v2369_v3  ;;  %v103_v34 = vld [vmem:[#allocation2 + $0x98] sm:$0xff] }
 0x12f   :  { %v2422_v48 = vld [vmem:[#allocation2 + $0x150] sm:$0xff]  ;;  %1183 = vst.msk [vmem:[%s3009_s2 + $0x50] sm:$0xff] %vm19_vm3, %v2420_v46  ;;  %1046 = vst.msk [vmem:[#allocation2 + $0x60] sm:$0xff] %vm19_vm3, %v981_v36  ;;  %v982_v55 = vadd.f32 %v765_v47, %v97_v32  ;;  %v767_v56 = vpop.f32.mrb[27].mxu0  ;;  %v895_v57 = vpop.f32.mrb[27].mxu1  ;;  %v1014_v59 = vadd.f32 %v893_v52, %v129_v41  ;;  %v100_v47 = vld [vmem:[#allocation2 + $0x80] sm:$0xff] }
 0x130   :  { %1215 = vst.msk [vmem:[%s3009_s2 + $0x150] sm:$0xff] %vm19_vm3, %v2422_v48  ;;  %1078 = vst.msk [vmem:[#allocation2 + $0x160] sm:$0xff] %vm19_vm3, %v1013_v38  ;;  %v2439_v58 = vld [vmem:[#allocation2 + $0x58] sm:$0xff]  ;;  %v1251_v38 = vsel %vm19_vm3, %v2351_v49, 0.0  ;;  %v132_v49 = vld [vmem:[#allocation2 + $0x180] sm:$0xff]  ;;  %v1452_v52 = vsel %vm19_vm3, %v1382_v31, 0.0 }
 0x131   :  { %1184 = vst.msk [vmem:[%s3009_s2 + $0x58] sm:$0xff] %vm19_vm3, %v2439_v58  ;;  %1047 = vst.msk [vmem:[#allocation2 + $0x68] sm:$0xff] %vm19_vm3, %v982_v55  ;;  %v2450_v62 = vld [vmem:[#allocation2 + $0x158] sm:$0xff]  ;;  %v1252_v6 = vadd.f32 %v1251_v38, %v1250_v35  ;;  %v101_v56 = vld [vmem:[#allocation2 + $0x88] sm:$0xff]  ;;  %v1454_v20 = vsel %vm19_vm3, %v1383_v39, 0.0  ;;  %v1386_v31 = vmul.f32 %v2439_v58, %v2439_v58 }
 0x132   :  { %1216 = vst.msk [vmem:[%s3009_s2 + $0x158] sm:$0xff] %vm19_vm3, %v2450_v62  ;;  %1079 = vst.msk [vmem:[#allocation2 + $0x168] sm:$0xff] %vm19_vm3, %v1014_v59  ;;  %v1384_v59 = vmul.f32 %v2391_v14, %v2391_v14 }
 0x133   :  { %v1254_v9 = vadd.f32 %v1253_v54, %v1252_v6  ;;  %v1460_v17 = vsel %vm19_vm3, %v1386_v31, 0.0  ;;  %v137_v31 = vld [vmem:[#allocation2 + $0x1a8] sm:$0xff] }
 0x134   :  { %v770_v12 = vpop.f32.mrb[28].mxu0  ;;  %v898_v50 = vpop.f32.mrb[28].mxu1 }
 0x135   :  { %v983_v18 = vadd.f32 %v770_v12, %v98_v4  ;;  %v772_v19 = vpop.f32.mrb[29].mxu0  ;;  %v1015_v23 = vadd.f32 %v898_v50, %v130_v7  ;;  %v900_v24 = vpop.f32.mrb[29].mxu1  ;;  %v133_v4 = vld [vmem:[#allocation2 + $0x188] sm:$0xff]  ;;  %v1453_v7 = vadd.f32 %v1452_v52, %v1451_v44  ;;  %v1385_v50 = vmul.f32 %v2420_v46, %v2420_v46  ;;  %v135_v52 = vld [vmem:[#allocation2 + $0x198] sm:$0xff] }
 0x136   :  { %v2465_v25 = vld [vmem:[#allocation2 + $0x60] sm:$0xff]  ;;  %v773_v27 = vpop.f32.mrb[30].mxu0  ;;  %v901_v28 = vpop.f32.mrb[30].mxu1  ;;  %v1456_v24 = vsel %vm19_vm3, %v1384_v59, 0.0 }
 0x137   :  { %v2467_v26 = vld [vmem:[#allocation2 + $0x160] sm:$0xff]  ;;  %1185 = vst.msk [vmem:[%s3009_s2 + $0x60] sm:$0xff] %vm19_vm3, %v2465_v25  ;;  %1048 = vst.msk [vmem:[#allocation2 + $0x70] sm:$0xff] %vm19_vm3, %v983_v18  ;;  %v984_v40 = vadd.f32 %v773_v27, %v99_v13  ;;  %v775_v32 = vpop.f32.mrb[31].mxu0  ;;  %v903_v33 = vpop.f32.mrb[31].mxu1  ;;  %v1016_v37 = vadd.f32 %v901_v28, %v131_v43  ;;  %v1255_v13 = vsel %vm19_vm3, %v2391_v14, 0.0  ;;  %v1455_v18 = vadd.f32 %v1454_v20, %v1453_v7 }
 0x138   :  { %1217 = vst.msk [vmem:[%s3009_s2 + $0x160] sm:$0xff] %vm19_vm3, %v2467_v26  ;;  %1080 = vst.msk [vmem:[#allocation2 + $0x170] sm:$0xff] %vm19_vm3, %v1015_v23  ;;  %v2484_v36 = vld [vmem:[#allocation2 + $0x68] sm:$0xff]  ;;  %v1257_v43 = vsel %vm19_vm3, %v2420_v46, 0.0  ;;  %v1256_v27 = vadd.f32 %v1255_v13, %v1254_v9  ;;  %v102_v28 = vld [vmem:[#allocation2 + $0x90] sm:$0xff]  ;;  %v1458_v30 = vsel %vm19_vm3, %v1385_v50, 0.0  ;;  %v1387_v38 = vmul.f32 %v2465_v25, %v2465_v25 }
 0x139   :  { %1186 = vst.msk [vmem:[%s3009_s2 + $0x68] sm:$0xff] %vm19_vm3, %v2484_v36  ;;  %1049 = vst.msk [vmem:[#allocation2 + $0x78] sm:$0xff] %vm19_vm3, %v984_v40  ;;  %v2496_v41 = vld [vmem:[#allocation2 + $0x168] sm:$0xff]  ;;  %v134_v46 = vld [vmem:[#allocation2 + $0x190] sm:$0xff]  ;;  %v1457_v40 = vadd.f32 %v1456_v24, %v1455_v18  ;;  %v1263_v50 = vsel %vm19_vm3, %v2484_v36, 0.0 }
 0x13a   :  { %1218 = vst.msk [vmem:[%s3009_s2 + $0x168] sm:$0xff] %vm19_vm3, %v2496_v41  ;;  %1081 = vst.msk [vmem:[#allocation2 + $0x178] sm:$0xff] %vm19_vm3, %v1016_v37  ;;  %v1258_v32 = vadd.f32 %v1257_v43, %v1256_v27  ;;  %v1259_v37 = vsel %vm19_vm3, %v2439_v58, 0.0  ;;  %v1261_v58 = vsel %vm19_vm3, %v2465_v25, 0.0  ;;  %v136_v13 = vld [vmem:[#allocation2 + $0x1a0] sm:$0xff]  ;;  %v105_v18 = vld [vmem:[#allocation2 + $0xa8] sm:$0xff] }
 0x13b   :  { %v1459_v54 = vadd.f32 %v1458_v30, %v1457_v40 }
 0x13c   :  { %v778_v55 = vpop.f32.mrb[32].mxu0  ;;  %v906_v57 = vpop.f32.mrb[32].mxu1  ;;  %v1260_v25 = vadd.f32 %v1259_v37, %v1258_v32 }
 0x13d   :  { %v985_v60 = vadd.f32 %v778_v55, %v100_v47  ;;  %v780_v61 = vpop.f32.mrb[33].mxu0  ;;  %v1017_v0 = vadd.f32 %v906_v57, %v132_v49  ;;  %v908_v2 = vpop.f32.mrb[33].mxu1  ;;  %v1461_v9 = vadd.f32 %v1460_v17, %v1459_v54 }
 0x13e   :  { %v2510_v10 = vld [vmem:[#allocation2 + $0x70] sm:$0xff]  ;;  %v781_v11 = vpop.f32.mrb[34].mxu0  ;;  %v909_v12 = vpop.f32.mrb[34].mxu1  ;;  %v1462_v2 = vsel %vm19_vm3, %v1387_v38, 0.0 }
 0x13f   :  { %v2512_v3 = vld [vmem:[#allocation2 + $0x170] sm:$0xff]  ;;  %1187 = vst.msk [vmem:[%s3009_s2 + $0x70] sm:$0xff] %vm19_vm3, %v2510_v10  ;;  %1050 = vst.msk [vmem:[#allocation2 + $0x80] sm:$0xff] %vm19_vm3, %v985_v60  ;;  %v986_v15 = vadd.f32 %v781_v11, %v101_v56  ;;  %v783_v16 = vpop.f32.mrb[35].mxu0  ;;  %v911_v14 = vpop.f32.mrb[35].mxu1  ;;  %v1018_v23 = vadd.f32 %v909_v12, %v133_v4  ;;  %v1388_v4 = vmul.f32 %v2484_v36, %v2484_v36  ;;  %v104_v12 = vld [vmem:[#allocation2 + $0xa0] sm:$0xff] }
 0x140   :  { %1219 = vst.msk [vmem:[%s3009_s2 + $0x170] sm:$0xff] %vm19_vm3, %v2512_v3  ;;  %1082 = vst.msk [vmem:[#allocation2 + $0x180] sm:$0xff] %vm19_vm3, %v1017_v0  ;;  %v2530_v19 = vld [vmem:[#allocation2 + $0x78] sm:$0xff]  ;;  %v1262_v11 = vadd.f32 %v1261_v58, %v1260_v25  ;;  %v1463_v16 = vadd.f32 %v1462_v2, %v1461_v9  ;;  %v1265_v43 = vsel %vm19_vm3, %v2510_v10, 0.0  ;;  %v106_v58 = vld [vmem:[#allocation2 + $0xb0] sm:$0xff] }
 0x141   :  { %1188 = vst.msk [vmem:[%s3009_s2 + $0x78] sm:$0xff] %vm19_vm3, %v2530_v19  ;;  %1051 = vst.msk [vmem:[#allocation2 + $0x88] sm:$0xff] %vm19_vm3, %v986_v15  ;;  %v2541_v63 = vld [vmem:[#allocation2 + $0x178] sm:$0xff]  ;;  %v1389_v15 = vmul.f32 %v2510_v10, %v2510_v10  ;;  %v1464_v24 = vsel %vm19_vm3, %v1388_v4, 0.0  ;;  %v1390_v37 = vmul.f32 %v2530_v19, %v2530_v19  ;;  %v1267_v54 = vsel %vm19_vm3, %v2530_v19, 0.0  ;;  %v138_v19 = vld [vmem:[#allocation2 + $0x1b0] sm:$0xff] }
 0x142   :  { %1220 = vst.msk [vmem:[%s3009_s2 + $0x178] sm:$0xff] %vm19_vm3, %v2541_v63  ;;  %1083 = vst.msk [vmem:[#allocation2 + $0x188] sm:$0xff] %vm19_vm3, %v1018_v23  ;;  %v1264_v40 = vadd.f32 %v1263_v50, %v1262_v11 }
 0x144   :  { %v786_v33 = vpop.f32.mrb[36].mxu0  ;;  %v914_v35 = vpop.f32.mrb[36].mxu1 }
 0x145   :  { %v987_v39 = vadd.f32 %v786_v33, %v102_v28  ;;  %v788_v44 = vpop.f32.mrb[37].mxu0  ;;  %v1019_v47 = vadd.f32 %v914_v35, %v134_v46  ;;  %v916_v49 = vpop.f32.mrb[37].mxu1  ;;  %v1466_v35 = vsel %vm19_vm3, %v1389_v15, 0.0  ;;  %v139_v15 = vld [vmem:[#allocation2 + $0x1b8] sm:$0xff] }
 0x146   :  { %v2566_v6 = vld [vmem:[#allocation2 + $0x80] sm:$0xff]  ;;  %v789_v55 = vpop.f32.mrb[38].mxu0  ;;  %v917_v57 = vpop.f32.mrb[38].mxu1  ;;  %v1465_v44 = vadd.f32 %v1464_v24, %v1463_v16 }
 0x147   :  { %v2568_v56 = vld [vmem:[#allocation2 + $0x180] sm:$0xff]  ;;  %1189 = vst.msk [vmem:[%s3009_s2 + $0x80] sm:$0xff] %vm19_vm3, %v2566_v6  ;;  %1052 = vst.msk [vmem:[#allocation2 + $0x90] sm:$0xff] %vm19_vm3, %v987_v39  ;;  %v988_v20 = vadd.f32 %v789_v55, %v103_v34  ;;  %v791_v59 = vpop.f32.mrb[39].mxu0  ;;  %v919_v60 = vpop.f32.mrb[39].mxu1  ;;  %v1020_v0 = vadd.f32 %v917_v57, %v135_v52  ;;  %v1391_v55 = vmul.f32 %v2566_v6, %v2566_v6 }
 0x148   :  { %1221 = vst.msk [vmem:[%s3009_s2 + $0x180] sm:$0xff] %vm19_vm3, %v2568_v56  ;;  %1084 = vst.msk [vmem:[#allocation2 + $0x190] sm:$0xff] %vm19_vm3, %v1019_v47  ;;  %v2585_v61 = vld [vmem:[#allocation2 + $0x88] sm:$0xff]  ;;  %v1266_v47 = vadd.f32 %v1265_v43, %v1264_v40  ;;  %v1467_v17 = vadd.f32 %v1466_v35, %v1465_v44  ;;  %v1269_v59 = vsel %vm19_vm3, %v2566_v6, 0.0 }
 0x149   :  { %1190 = vst.msk [vmem:[%s3009_s2 + $0x88] sm:$0xff] %vm19_vm3, %v2585_v61  ;;  %1053 = vst.msk [vmem:[#allocation2 + $0x98] sm:$0xff] %vm19_vm3, %v988_v20  ;;  %v2596_v7 = vld [vmem:[#allocation2 + $0x188] sm:$0xff]  ;;  %v1468_v20 = vsel %vm19_vm3, %v1390_v37, 0.0  ;;  %v1470_v4 = vsel %vm19_vm3, %v1391_v55, 0.0  ;;  %v1392_v9 = vmul.f32 %v2585_v61, %v2585_v61  ;;  %v1271_v43 = vsel %vm19_vm3, %v2585_v61, 0.0 }
 0x14a   :  { %1222 = vst.msk [vmem:[%s3009_s2 + $0x188] sm:$0xff] %vm19_vm3, %v2596_v7  ;;  %1085 = vst.msk [vmem:[#allocation2 + $0x198] sm:$0xff] %vm19_vm3, %v1020_v0  ;;  %v1268_v60 = vadd.f32 %v1267_v54, %v1266_v47  ;;  %v107_v0 = vld [vmem:[#allocation2 + $0xb8] sm:$0xff]  ;;  %v1469_v16 = vadd.f32 %v1468_v20, %v1467_v17  ;;  %v109_v54 = vld [vmem:[#allocation2 + $0xc8] sm:$0xff] }
 0x14c   :  { %v794_v14 = vpop.f32.mrb[40].mxu0  ;;  %v922_v23 = vpop.f32.mrb[40].mxu1  ;;  %v1471_v61 = vadd.f32 %v1470_v4, %v1469_v16 }
 0x14d   :  { %v989_v27 = vadd.f32 %v794_v14, %v104_v12  ;;  %v796_v28 = vpop.f32.mrb[41].mxu0  ;;  %v1021_v46 = vadd.f32 %v922_v23, %v136_v13  ;;  %v924_v30 = vpop.f32.mrb[41].mxu1  ;;  %v1270_v14 = vadd.f32 %v1269_v59, %v1268_v60 }
 0x14e   :  { %v1127_v32 = vld [vmem:[#allocation2 + $0x90] sm:$0xff]  ;;  %v797_v36 = vpop.f32.mrb[42].mxu0  ;;  %v925_v34 = vpop.f32.mrb[42].mxu1 }
 0x14f   :  { %v2611_v33 = vld [vmem:[#allocation2 + $0x190] sm:$0xff]  ;;  %1191 = vst.msk [vmem:[%s3009_s2 + $0x90] sm:$0xff] %vm19_vm3, %v1127_v32  ;;  %1054 = vst.msk [vmem:[#allocation2 + $0xa0] sm:$0xff] %vm19_vm3, %v989_v27  ;;  %v990_v10 = vadd.f32 %v797_v36, %v105_v18  ;;  %v799_v38 = vpop.f32.mrb[43].mxu0  ;;  %v927_v39 = vpop.f32.mrb[43].mxu1  ;;  %v1022_v52 = vadd.f32 %v925_v34, %v137_v31  ;;  %v1393_v27 = vmul.f32 %v1127_v32, %v1127_v32  ;;  %v1472_v36 = vsel %vm19_vm3, %v1392_v9, 0.0 }
 0x150   :  { %1223 = vst.msk [vmem:[%s3009_s2 + $0x190] sm:$0xff] %vm19_vm3, %v2611_v33  ;;  %1086 = vst.msk [vmem:[#allocation2 + $0x1a0] sm:$0xff] %vm19_vm3, %v1021_v46  ;;  %v1128_v49 = vld [vmem:[#allocation2 + $0x98] sm:$0xff]  ;;  %v1273_v34 = vsel %vm19_vm3, %v1127_v32, 0.0  ;;  %v1272_v37 = vadd.f32 %v1271_v43, %v1270_v14  ;;  %v140_v32 = vld [vmem:[#allocation2 + $0x1c0] sm:$0xff]  ;;  %v1473_v44 = vadd.f32 %v1472_v36, %v1471_v61 }
 0x151   :  { %1192 = vst.msk [vmem:[%s3009_s2 + $0x98] sm:$0xff] %vm19_vm3, %v1128_v49  ;;  %1055 = vst.msk [vmem:[#allocation2 + $0xa8] sm:$0xff] %vm19_vm3, %v990_v10  ;;  %v2636_v57 = vld [vmem:[#allocation2 + $0x198] sm:$0xff]  ;;  %v108_v10 = vld [vmem:[#allocation2 + $0xc0] sm:$0xff]  ;;  %v1474_v38 = vsel %vm19_vm3, %v1393_v27, 0.0  ;;  %v1394_v39 = vmul.f32 %v1128_v49, %v1128_v49  ;;  %v1275_v17 = vsel %vm19_vm3, %v1128_v49, 0.0 }
 0x152   :  { %1224 = vst.msk [vmem:[%s3009_s2 + $0x198] sm:$0xff] %vm19_vm3, %v2636_v57  ;;  %1087 = vst.msk [vmem:[#allocation2 + $0x1a8] sm:$0xff] %vm19_vm3, %v1022_v52  ;;  %v1274_v47 = vadd.f32 %v1273_v34, %v1272_v37  ;;  %v111_v37 = vld [vmem:[#allocation2 + $0xd8] sm:$0xff] }
 0x154   :  { %v802_v25 = vpop.f32.mrb[44].mxu0  ;;  %v930_v2 = vpop.f32.mrb[44].mxu1  ;;  %v1276_v16 = vadd.f32 %v1275_v17, %v1274_v47 }
 0x155   :  { %v991_v11 = vadd.f32 %v802_v25, %v106_v58  ;;  %v804_v12 = vpop.f32.mrb[45].mxu0  ;;  %v1023_v13 = vadd.f32 %v930_v2, %v138_v19  ;;  %v932_v50 = vpop.f32.mrb[45].mxu1  ;;  %v141_v25 = vld [vmem:[#allocation2 + $0x1c8] sm:$0xff] }
 0x156   :  { %v1129_v18 = vld [vmem:[#allocation2 + $0xa0] sm:$0xff]  ;;  %v805_v23 = vpop.f32.mrb[46].mxu0  ;;  %v933_v6 = vpop.f32.mrb[46].mxu1  ;;  %v1476_v12 = vsel %vm19_vm3, %v1394_v39, 0.0 }
 0x157   :  { %v2650_v24 = vld [vmem:[#allocation2 + $0x1a0] sm:$0xff]  ;;  %1193 = vst.msk [vmem:[%s3009_s2 + $0xa0] sm:$0xff] %vm19_vm3, %v1129_v18  ;;  %1056 = vst.msk [vmem:[#allocation2 + $0xb0] sm:$0xff] %vm19_vm3, %v991_v11  ;;  %v992_v28 = vadd.f32 %v805_v23, %v107_v0  ;;  %v807_v46 = vpop.f32.mrb[47].mxu0  ;;  %v935_v30 = vpop.f32.mrb[47].mxu1  ;;  %v1024_v40 = vadd.f32 %v933_v6, %v139_v15  ;;  %v1395_v58 = vmul.f32 %v1129_v18, %v1129_v18 }
 0x158   :  { %1225 = vst.msk [vmem:[%s3009_s2 + $0x1a0] sm:$0xff] %vm19_vm3, %v2650_v24  ;;  %1088 = vst.msk [vmem:[#allocation2 + $0x1b0] sm:$0xff] %vm19_vm3, %v1023_v13  ;;  %v1130_v31 = vld [vmem:[#allocation2 + $0xa8] sm:$0xff]  ;;  %v1475_v0 = vadd.f32 %v1474_v38, %v1473_v44  ;;  %v1277_v13 = vsel %vm19_vm3, %v1129_v18, 0.0  ;;  %v110_v46 = vld [vmem:[#allocation2 + $0xd0] sm:$0xff] }
 0x159   :  { %1194 = vst.msk [vmem:[%s3009_s2 + $0xa8] sm:$0xff] %vm19_vm3, %v1130_v31  ;;  %1057 = vst.msk [vmem:[#allocation2 + $0xb8] sm:$0xff] %vm19_vm3, %v992_v28  ;;  %v2672_v35 = vld [vmem:[#allocation2 + $0x1a8] sm:$0xff]  ;;  %v1478_v23 = vsel %vm19_vm3, %v1395_v58, 0.0  ;;  %v1396_v6 = vmul.f32 %v1130_v31, %v1130_v31  ;;  %v1278_v28 = vadd.f32 %v1277_v13, %v1276_v16  ;;  %v142_v30 = vld [vmem:[#allocation2 + $0x1d0] sm:$0xff]  ;;  %v1279_v61 = vsel %vm19_vm3, %v1130_v31, 0.0 }
 0x15a   :  { %1226 = vst.msk [vmem:[%s3009_s2 + $0x1a8] sm:$0xff] %vm19_vm3, %v2672_v35  ;;  %1089 = vst.msk [vmem:[#allocation2 + $0x1b8] sm:$0xff] %vm19_vm3, %v1024_v40  ;;  %v1477_v27 = vadd.f32 %v1476_v12, %v1475_v0  ;;  %v112_v16 = vld [vmem:[#allocation2 + $0xe0] sm:$0xff] }
 0x15c   :  { %v810_v52 = vpop.f32.mrb[48].mxu0  ;;  %v938_v55 = vpop.f32.mrb[48].mxu1  ;;  %v1479_v36 = vadd.f32 %v1478_v23, %v1477_v27 }
 0x15d   :  { %v993_v19 = vadd.f32 %v810_v52, %v108_v10  ;;  %v812_v20 = vpop.f32.mrb[49].mxu0  ;;  %v1025_v59 = vadd.f32 %v938_v55, %v140_v32  ;;  %v940_v60 = vpop.f32.mrb[49].mxu1  ;;  %v1480_v32 = vsel %vm19_vm3, %v1396_v6, 0.0  ;;  %v1280_v55 = vadd.f32 %v1279_v61, %v1278_v28  ;;  %v113_v28 = vld [vmem:[#allocation2 + $0xe8] sm:$0xff] }
 0x15e   :  { %v1131_v2 = vld [vmem:[#allocation2 + $0xb0] sm:$0xff]  ;;  %v813_v4 = vpop.f32.mrb[50].mxu0  ;;  %v941_v11 = vpop.f32.mrb[50].mxu1 }
 0x15f   :  { %v2682_v9 = vld [vmem:[#allocation2 + $0x1b0] sm:$0xff]  ;;  %1195 = vst.msk [vmem:[%s3009_s2 + $0xb0] sm:$0xff] %vm19_vm3, %v1131_v2  ;;  %1058 = vst.msk [vmem:[#allocation2 + $0xc0] sm:$0xff] %vm19_vm3, %v993_v19  ;;  %v994_v49 = vadd.f32 %v813_v4, %v109_v54  ;;  %v815_v50 = vpop.f32.mrb[51].mxu0  ;;  %v943_v15 = vpop.f32.mrb[51].mxu1  ;;  %v1026_v18 = vadd.f32 %v941_v11, %v141_v25  ;;  %v1397_v40 = vmul.f32 %v1131_v2, %v1131_v2  ;;  %v1281_v38 = vsel %vm19_vm3, %v1131_v2, 0.0 }
 0x160   :  { %1227 = vst.msk [vmem:[%s3009_s2 + $0x1b0] sm:$0xff] %vm19_vm3, %v2682_v9  ;;  %1090 = vst.msk [vmem:[#allocation2 + $0x1c0] sm:$0xff] %vm19_vm3, %v1025_v59  ;;  %v1132_v14 = vld [vmem:[#allocation2 + $0xb8] sm:$0xff]  ;;  %v1481_v2 = vadd.f32 %v1480_v32, %v1479_v36  ;;  %v1282_v4 = vadd.f32 %v1281_v38, %v1280_v55 }
 0x161   :  { %1196 = vst.msk [vmem:[%s3009_s2 + $0xb8] sm:$0xff] %vm19_vm3, %v1132_v14  ;;  %1059 = vst.msk [vmem:[#allocation2 + $0xc8] sm:$0xff] %vm19_vm3, %v994_v49  ;;  %v2703_v43 = vld [vmem:[#allocation2 + $0x1b8] sm:$0xff]  ;;  %v1482_v20 = vsel %vm19_vm3, %v1397_v40, 0.0  ;;  %v1398_v59 = vmul.f32 %v1132_v14, %v1132_v14  ;;  %v1283_v13 = vsel %vm19_vm3, %v1132_v14, 0.0  ;;  %v144_v14 = vld [vmem:[#allocation2 + $0x1e0] sm:$0xff] }
 0x162   :  { %1228 = vst.msk [vmem:[%s3009_s2 + $0x1b8] sm:$0xff] %vm19_vm3, %v2703_v43  ;;  %1091 = vst.msk [vmem:[#allocation2 + $0x1c8] sm:$0xff] %vm19_vm3, %v1026_v18  ;;  %v143_v54 = vld [vmem:[#allocation2 + $0x1d8] sm:$0xff]  ;;  %v1483_v15 = vadd.f32 %v1482_v20, %v1481_v2  ;;  %v1284_v6 = vadd.f32 %v1283_v13, %v1282_v4 }
 0x163   :  { %v1484_v18 = vsel %vm19_vm3, %v1398_v59, 0.0 }
 0x164   :  { %v818_v34 = vpop.f32.mrb[52].mxu0  ;;  %v946_v10 = vpop.f32.mrb[52].mxu1  ;;  %v1485_v32 = vadd.f32 %v1484_v18, %v1483_v15  ;;  %v115_v18 = vld [vmem:[#allocation2 + $0xf8] sm:$0xff] }
 0x165   :  { %v995_v39 = vadd.f32 %v818_v34, %v110_v46  ;;  %v820_v44 = vpop.f32.mrb[53].mxu0  ;;  %v1027_v47 = vadd.f32 %v946_v10, %v142_v30  ;;  %v948_v52 = vpop.f32.mrb[53].mxu1  ;;  %v145_v10 = vld [vmem:[#allocation2 + $0x1e8] sm:$0xff] }
 0x166   :  { %v1133_v17 = vld [vmem:[#allocation2 + $0xc0] sm:$0xff]  ;;  %v821_v58 = vpop.f32.mrb[54].mxu0  ;;  %v949_v31 = vpop.f32.mrb[54].mxu1 }
 0x167   :  { %v2714_v19 = vld [vmem:[#allocation2 + $0x1c0] sm:$0xff]  ;;  %1197 = vst.msk [vmem:[%s3009_s2 + $0xc0] sm:$0xff] %vm19_vm3, %v1133_v17  ;;  %1060 = vst.msk [vmem:[#allocation2 + $0xd0] sm:$0xff] %vm19_vm3, %v995_v39  ;;  %v996_v60 = vadd.f32 %v821_v58, %v111_v37  ;;  %v823_v25 = vpop.f32.mrb[55].mxu0  ;;  %v951_v0 = vpop.f32.mrb[55].mxu1  ;;  %v1028_v12 = vadd.f32 %v949_v31, %v143_v54  ;;  %v1399_v49 = vmul.f32 %v1133_v17, %v1133_v17  ;;  %v1285_v23 = vsel %vm19_vm3, %v1133_v17, 0.0 }
 0x168   :  { %1229 = vst.msk [vmem:[%s3009_s2 + $0x1c0] sm:$0xff] %vm19_vm3, %v2714_v19  ;;  %1092 = vst.msk [vmem:[#allocation2 + $0x1d0] sm:$0xff] %vm19_vm3, %v1027_v47  ;;  %v1134_v11 = vld [vmem:[#allocation2 + $0xc8] sm:$0xff]  ;;  %v1286_v38 = vadd.f32 %v1285_v23, %v1284_v6 }
 0x169   :  { %1198 = vst.msk [vmem:[%s3009_s2 + $0xc8] sm:$0xff] %vm19_vm3, %v1134_v11  ;;  %1061 = vst.msk [vmem:[#allocation2 + $0xd8] sm:$0xff] %vm19_vm3, %v996_v60  ;;  %v2734_v50 = vld [vmem:[#allocation2 + $0x1c8] sm:$0xff]  ;;  %v1486_v30 = vsel %vm19_vm3, %v1399_v49, 0.0  ;;  %v1400_v61 = vmul.f32 %v1134_v11, %v1134_v11  ;;  %v1287_v54 = vsel %vm19_vm3, %v1134_v11, 0.0  ;;  %v114_v11 = vld [vmem:[#allocation2 + $0xf0] sm:$0xff] }
 0x16a   :  { %1230 = vst.msk [vmem:[%s3009_s2 + $0x1c8] sm:$0xff] %vm19_vm3, %v2734_v50  ;;  %1093 = vst.msk [vmem:[#allocation2 + $0x1d8] sm:$0xff] %vm19_vm3, %v1028_v12  ;;  %v1487_v20 = vadd.f32 %v1486_v30, %v1485_v32  ;;  %v1288_v4 = vadd.f32 %v1287_v54, %v1286_v38  ;;  %v146_v12 = vld [vmem:[#allocation2 + $0x1f0] sm:$0xff] }
 0x16b   :  { %v1488_v25 = vsel %vm19_vm3, %v1400_v61, 0.0  ;;  %v147_v61 = vld [vmem:[#allocation2 + $0x1f8] sm:$0xff] }
 0x16c   :  { %v826_v27 = vpop.f32.mrb[56].mxu0  ;;  %v954_v46 = vpop.f32.mrb[56].mxu1  ;;  %v1489_v15 = vadd.f32 %v1488_v25, %v1487_v20 }
 0x16d   :  { %v997_v40 = vadd.f32 %v826_v27, %v112_v16  ;;  %v828_v36 = vpop.f32.mrb[57].mxu0  ;;  %v1029_v34 = vadd.f32 %v954_v46, %v144_v14  ;;  %v956_v37 = vpop.f32.mrb[57].mxu1 }
 0x16e   :  { %v1135_v39 = vld [vmem:[#allocation2 + $0xd0] sm:$0xff]  ;;  %v829_v44 = vpop.f32.mrb[58].mxu0  ;;  %v957_v52 = vpop.f32.mrb[58].mxu1 }
 0x16f   :  { %v2745_v47 = vld [vmem:[#allocation2 + $0x1d0] sm:$0xff]  ;;  %1199 = vst.msk [vmem:[%s3009_s2 + $0xd0] sm:$0xff] %vm19_vm3, %v1135_v39  ;;  %v1401_v55 = vmul.f32 %v1135_v39, %v1135_v39  ;;  %1062 = vst.msk [vmem:[#allocation2 + $0xe0] sm:$0xff] %vm19_vm3, %v997_v40  ;;  %v998_v17 = vadd.f32 %v829_v44, %v113_v28  ;;  %v831_v58 = vpop.f32.mrb[59].mxu0  ;;  %v959_v31 = vpop.f32.mrb[59].mxu1  ;;  %v1030_v60 = vadd.f32 %v957_v52, %v145_v10  ;;  %v1289_v0 = vsel %vm19_vm3, %v1135_v39, 0.0 }
 0x170   :  { %1231 = vst.msk [vmem:[%s3009_s2 + $0x1d0] sm:$0xff] %vm19_vm3, %v2745_v47  ;;  %1094 = vst.msk [vmem:[#allocation2 + $0x1e0] sm:$0xff] %vm19_vm3, %v1029_v34  ;;  %v1136_v59 = vld [vmem:[#allocation2 + $0xd8] sm:$0xff]  ;;  %v1290_v16 = vadd.f32 %v1289_v0, %v1288_v4 }
 0x171   :  { %1200 = vst.msk [vmem:[%s3009_s2 + $0xd8] sm:$0xff] %vm19_vm3, %v1136_v59  ;;  %1063 = vst.msk [vmem:[#allocation2 + $0xe8] sm:$0xff] %vm19_vm3, %v998_v17  ;;  %v2766_v2 = vld [vmem:[#allocation2 + $0x1d8] sm:$0xff]  ;;  %v1490_v13 = vsel %vm19_vm3, %v1401_v55, 0.0  ;;  %v1402_v49 = vmul.f32 %v1136_v59, %v1136_v59  ;;  %v1291_v6 = vsel %vm19_vm3, %v1136_v59, 0.0 }
 0x172   :  { %1232 = vst.msk [vmem:[%s3009_s2 + $0x1d8] sm:$0xff] %vm19_vm3, %v2766_v2  ;;  %1095 = vst.msk [vmem:[#allocation2 + $0x1e8] sm:$0xff] %vm19_vm3, %v1030_v60  ;;  %v1491_v40 = vadd.f32 %v1490_v13, %v1489_v15  ;;  %v1292_v55 = vadd.f32 %v1291_v6, %v1290_v16  ;;  %v1407_v6 = vmul.f32 %v2241_v45, %v2241_v45 }
 0x173   :  { %v1492_v32 = vsel %vm19_vm3, %v1402_v49, 0.0 }
 0x174   :  { %v834_v14 = vpop.f32.mrb[60].mxu0  ;;  %v962_v23 = vpop.f32.mrb[60].mxu1  ;;  %v1493_v60 = vadd.f32 %v1492_v32, %v1491_v40 }
 0x175   :  { %v999_v27 = vadd.f32 %v834_v14, %v114_v11  ;;  %v836_v28 = vpop.f32.mrb[61].mxu0  ;;  %v1031_v46 = vadd.f32 %v962_v23, %v146_v12  ;;  %v964_v30 = vpop.f32.mrb[61].mxu1 }
 0x176   :  { %v1137_v36 = vld [vmem:[#allocation2 + $0xe0] sm:$0xff]  ;;  %v837_v34 = vpop.f32.mrb[62].mxu0  ;;  %v965_v10 = vpop.f32.mrb[62].mxu1 }
 0x177   :  { %v2776_v37 = vld [vmem:[#allocation2 + $0x1e0] sm:$0xff]  ;;  %1201 = vst.msk [vmem:[%s3009_s2 + $0xe0] sm:$0xff] %vm19_vm3, %v1137_v36  ;;  %v1293_v38 = vsel %vm19_vm3, %v1137_v36, 0.0  ;;  %v1403_v39 = vmul.f32 %v1137_v36, %v1137_v36  ;;  %1064 = vst.msk [vmem:[#allocation2 + $0xf0] sm:$0xff] %vm19_vm3, %v999_v27  ;;  %v1000_v44 = vadd.f32 %v837_v34, %v115_v18  ;;  %v839_v52 = vpop.f32.mrb[63].mxu0  ;;  %v967_v54 = vpop.f32.mrb[63].mxu1  ;;  %v1032_v58 = vadd.f32 %v965_v10, %v147_v61 }
 0x178   :  { %1233 = vst.msk [vmem:[%s3009_s2 + $0x1e0] sm:$0xff] %vm19_vm3, %v2776_v37  ;;  %1096 = vst.msk [vmem:[#allocation2 + $0x1f0] sm:$0xff] %vm19_vm3, %v1031_v46  ;;  %v1138_v17 = vld [vmem:[#allocation2 + $0xe8] sm:$0xff]  ;;  %v1294_v25 = vadd.f32 %v1293_v38, %v1292_v55  ;;  %v1301_v36 = vsel %vm19_vm3, %v2241_v45, 0.0  ;;  %v1408_v34 = vmul.f32 %v2257_v51, %v2257_v51  ;;  %v1409_v52 = vmul.f32 %v2273_v1, %v2273_v1 }
 0x179   :  { %v1494_v31 = vsel %vm19_vm3, %v1403_v39, 0.0  ;;  %1202 = vst.msk [vmem:[%s3009_s2 + $0xe8] sm:$0xff] %vm19_vm3, %v1138_v17  ;;  %v1404_v20 = vmul.f32 %v1138_v17, %v1138_v17  ;;  %1065 = vst.msk [vmem:[#allocation2 + $0xf8] sm:$0xff] %vm19_vm3, %v1000_v44  ;;  %v2797_v59 = vld [vmem:[#allocation2 + $0x1e8] sm:$0xff]  ;;  %v1295_v0 = vsel %vm19_vm3, %v1138_v17, 0.0  ;;  %v1502_v39 = vsel %vm19_vm3, %v1407_v6, 0.0 }
 0x17a   :  { %1234 = vst.msk [vmem:[%s3009_s2 + $0x1e8] sm:$0xff] %vm19_vm3, %v2797_v59  ;;  %1097 = vst.msk [vmem:[#allocation2 + $0x1f8] sm:$0xff] %vm19_vm3, %v1032_v58  ;;  %v1495_v4 = vadd.f32 %v1494_v31, %v1493_v60  ;;  %v1296_v12 = vadd.f32 %v1295_v0, %v1294_v25  ;;  %v1303_v44 = vsel %vm19_vm3, %v2257_v51, 0.0  ;;  %v1504_v17 = vsel %vm19_vm3, %v1408_v34, 0.0 }
 0x17b   :  { %v1496_v11 = vsel %vm19_vm3, %v1404_v20, 0.0  ;;  %v1305_v45 = vsel %vm19_vm3, %v2273_v1, 0.0  ;;  %v1410_v58 = vmul.f32 %v2295_v8, %v2295_v8  ;;  %v1506_v60 = vsel %vm19_vm3, %v1409_v52, 0.0 }
 0x17c   :  { %v1497_v14 = vadd.f32 %v1496_v11, %v1495_v4  ;;  %v1307_v51 = vsel %vm19_vm3, %v2295_v8, 0.0  ;;  %v1411_v25 = vmul.f32 %v2305_v22, %v2305_v22  ;;  %v1309_v1 = vsel %vm19_vm3, %v2305_v22, 0.0 }
 0x17d   :  { %v1508_v11 = vsel %vm19_vm3, %v1410_v58, 0.0  ;;  %v1311_v8 = vsel %vm19_vm3, %v2327_v29, 0.0  ;;  %v1313_v22 = vsel %vm19_vm3, %v2337_v42, 0.0  ;;  %v1417_v52 = vmul.f32 %v2422_v48, %v2422_v48 }
 0x17e   :  { %v1139_v13 = vld [vmem:[#allocation2 + $0xf0] sm:$0xff] }
 0x17f   :  { %v2807_v49 = vld [vmem:[#allocation2 + $0x1f0] sm:$0xff]  ;;  %1203 = vst.msk [vmem:[%s3009_s2 + $0xf0] sm:$0xff] %vm19_vm3, %v1139_v13  ;;  %v1297_v15 = vsel %vm19_vm3, %v1139_v13, 0.0  ;;  %v1405_v16 = vmul.f32 %v1139_v13, %v1139_v13 }
 0x180   :  { %1235 = vst.msk [vmem:[%s3009_s2 + $0x1f0] sm:$0xff] %vm19_vm3, %v2807_v49  ;;  %v1298_v18 = vadd.f32 %v1297_v15, %v1296_v12  ;;  %v1140_v23 = vld [vmem:[#allocation2 + $0xf8] sm:$0xff]  ;;  %v1412_v12 = vmul.f32 %v2327_v29, %v2327_v29  ;;  %v1315_v29 = vsel %vm19_vm3, %v2359_v53, 0.0 }
 0x181   :  { %v1498_v27 = vsel %vm19_vm3, %v1405_v16, 0.0  ;;  %1204 = vst.msk [vmem:[%s3009_s2 + $0xf8] sm:$0xff] %vm19_vm3, %v1140_v23  ;;  %v1299_v28 = vsel %vm19_vm3, %v1140_v23, 0.0  ;;  %v1406_v46 = vmul.f32 %v1140_v23, %v1140_v23  ;;  %v2827_v30 = vld [vmem:[#allocation2 + $0x1f8] sm:$0xff]  ;;  %v1510_v16 = vsel %vm19_vm3, %v1411_v25, 0.0 }
 0x182   :  { %v1499_v61 = vadd.f32 %v1498_v27, %v1497_v14  ;;  %v1300_v40 = vadd.f32 %v1299_v28, %v1298_v18  ;;  %1236 = vst.msk [vmem:[%s3009_s2 + $0x1f8] sm:$0xff] %vm19_vm3, %v2827_v30  ;;  %v1413_v14 = vmul.f32 %v2337_v42, %v2337_v42  ;;  %v1512_v6 = vsel %vm19_vm3, %v1412_v12, 0.0 }
 0x183   :  { %v1500_v10 = vsel %vm19_vm3, %v1406_v46, 0.0  ;;  %v1414_v27 = vmul.f32 %v2359_v53, %v2359_v53  ;;  %v1317_v42 = vsel %vm19_vm3, %v2371_v5, 0.0  ;;  %v1319_v53 = vsel %vm19_vm3, %v2404_v21, 0.0 }
 0x184   :  { %v1302_v32 = vadd.f32 %v1301_v36, %v1300_v40  ;;  %v1501_v38 = vadd.f32 %v1500_v10, %v1499_v61  ;;  %v1514_v61 = vsel %vm19_vm3, %v1413_v14, 0.0  ;;  %v1415_v40 = vmul.f32 %v2371_v5, %v2371_v5 }
 0x185   :  { %v1516_v10 = vsel %vm19_vm3, %v1414_v27, 0.0  ;;  %v1321_v5 = vsel %vm19_vm3, %v2422_v48, 0.0  ;;  %v1325_v48 = vsel %vm19_vm3, %v2467_v26, 0.0  ;;  %v1422_v14 = vmul.f32 %v2541_v63, %v2541_v63 }
 0x186   :  { %v1304_v54 = vadd.f32 %v1303_v44, %v1302_v32  ;;  %v1503_v55 = vadd.f32 %v1502_v39, %v1501_v38  ;;  %v1416_v32 = vmul.f32 %v2404_v21, %v2404_v21  ;;  %v1518_v44 = vsel %vm19_vm3, %v1415_v40, 0.0 }
 0x187   :  { %v1323_v21 = vsel %vm19_vm3, %v2450_v62, 0.0 }
 0x188   :  { %v1306_v31 = vadd.f32 %v1305_v45, %v1304_v54  ;;  %v1505_v20 = vadd.f32 %v1504_v17, %v1503_v55  ;;  %v1520_v17 = vsel %vm19_vm3, %v1416_v32, 0.0  ;;  %v1418_v45 = vmul.f32 %v2450_v62, %v2450_v62 }
 0x189   :  { %v1327_v62 = vsel %vm19_vm3, %v2496_v41, 0.0 }
 0x18a   :  { %v1308_v0 = vadd.f32 %v1307_v51, %v1306_v31  ;;  %v1507_v4 = vadd.f32 %v1506_v60, %v1505_v20  ;;  %v1522_v20 = vsel %vm19_vm3, %v1417_v52, 0.0  ;;  %v1419_v60 = vmul.f32 %v2467_v26, %v2467_v26 }
 0x18b   :  { %v1329_v26 = vsel %vm19_vm3, %v2512_v3, 0.0  ;;  %v1427_v52 = vmul.f32 %v2650_v24, %v2650_v24 }
 0x18c   :  { %v1310_v13 = vadd.f32 %v1309_v1, %v1308_v0  ;;  %v1509_v15 = vadd.f32 %v1508_v11, %v1507_v4  ;;  %v1524_v0 = vsel %vm19_vm3, %v1418_v45, 0.0  ;;  %v1420_v4 = vmul.f32 %v2496_v41, %v2496_v41 }
 0x18d   :  { %v1526_v12 = vsel %vm19_vm3, %v1419_v60, 0.0  ;;  %v1331_v41 = vsel %vm19_vm3, %v2541_v63, 0.0  ;;  %v1335_v63 = vsel %vm19_vm3, %v2596_v7, 0.0 }
 0x18e   :  { %v1312_v18 = vadd.f32 %v1311_v8, %v1310_v13  ;;  %v1511_v23 = vadd.f32 %v1510_v16, %v1509_v15  ;;  %v1421_v13 = vmul.f32 %v2512_v3, %v2512_v3  ;;  %v1528_v8 = vsel %vm19_vm3, %v1420_v4, 0.0 }
 0x18f   :  { %v1333_v3 = vsel %vm19_vm3, %v2568_v56, 0.0 }
 0x190   :  { %v1314_v28 = vadd.f32 %v1313_v22, %v1312_v18  ;;  %v1513_v46 = vadd.f32 %v1512_v6, %v1511_v23  ;;  %v1530_v6 = vsel %vm19_vm3, %v1421_v13, 0.0  ;;  %v1423_v22 = vmul.f32 %v2568_v56, %v2568_v56 }
 0x191   :  { %v1337_v56 = vsel %vm19_vm3, %v2611_v33, 0.0  ;;  %v1432_v13 = vmul.f32 %v2734_v50, %v2734_v50 }
 0x192   :  { %v1316_v36 = vadd.f32 %v1315_v29, %v1314_v28  ;;  %v1515_v34 = vadd.f32 %v1514_v61, %v1513_v46  ;;  %v1532_v46 = vsel %vm19_vm3, %v1422_v14, 0.0  ;;  %v1424_v61 = vmul.f32 %v2596_v7, %v2596_v7 }
 0x193   :  { %v1339_v7 = vsel %vm19_vm3, %v2636_v57, 0.0 }
 0x194   :  { %v1517_v38 = vadd.f32 %v1516_v10, %v1515_v34  ;;  %v1318_v39 = vadd.f32 %v1317_v42, %v1316_v36  ;;  %v1534_v36 = vsel %vm19_vm3, %v1423_v22, 0.0  ;;  %v1425_v34 = vmul.f32 %v2611_v33, %v2611_v33 }
 0x195   :  { %v1536_v32 = vsel %vm19_vm3, %v1424_v61, 0.0  ;;  %v1341_v33 = vsel %vm19_vm3, %v2650_v24, 0.0  ;;  %v1345_v24 = vsel %vm19_vm3, %v2682_v9, 0.0 }
 0x196   :  { %v1320_v54 = vadd.f32 %v1319_v53, %v1318_v39  ;;  %v1519_v55 = vadd.f32 %v1518_v44, %v1517_v38  ;;  %v1426_v38 = vmul.f32 %v2636_v57, %v2636_v57  ;;  %v1538_v53 = vsel %vm19_vm3, %v1425_v34, 0.0 }
 0x197   :  { %v1343_v57 = vsel %vm19_vm3, %v2672_v35, 0.0  ;;  %v1359_v34 = vsel %vm19_vm3, %v2797_v59, 0.0 }
 0x198   :  { %v1322_v58 = vadd.f32 %v1321_v5, %v1320_v54  ;;  %v1521_v31 = vadd.f32 %v1520_v17, %v1519_v55  ;;  %v1540_v17 = vsel %vm19_vm3, %v1426_v38, 0.0  ;;  %v1428_v5 = vmul.f32 %v2672_v35, %v2672_v35 }
 0x199   :  { %v1347_v35 = vsel %vm19_vm3, %v2703_v43, 0.0  ;;  %v1438_v38 = vmul.f32 %v2827_v30, %v2827_v30 }
 0x19a   :  { %v1324_v51 = vadd.f32 %v1323_v21, %v1322_v58  ;;  %v1523_v25 = vadd.f32 %v1522_v20, %v1521_v31  ;;  %v1542_v31 = vsel %vm19_vm3, %v1427_v52, 0.0  ;;  %v1429_v20 = vmul.f32 %v2682_v9, %v2682_v9 }
 0x19b   :  { %v1349_v9 = vsel %vm19_vm3, %v2714_v19, 0.0 }
 0x19c   :  { %v1326_v11 = vadd.f32 %v1325_v48, %v1324_v51  ;;  %v1525_v1 = vadd.f32 %v1524_v0, %v1523_v25  ;;  %v1544_v51 = vsel %vm19_vm3, %v1428_v5, 0.0  ;;  %v1430_v25 = vmul.f32 %v2703_v43, %v2703_v43 }
 0x19d   :  { %v1546_v4 = vsel %vm19_vm3, %v1429_v20, 0.0  ;;  %v1351_v43 = vsel %vm19_vm3, %v2734_v50, 0.0  ;;  %v1355_v50 = vsel %vm19_vm3, %v2766_v2, 0.0  ;;  %v1237_v20 = vld [vmem:[%s3010_s3] sm:$0x1] }
 0x19e   :  { %v1328_v15 = vadd.f32 %v1327_v62, %v1326_v11  ;;  %v1527_v16 = vadd.f32 %v1526_v12, %v1525_v1  ;;  %v1431_v11 = vmul.f32 %v2714_v19, %v2714_v19  ;;  %v1548_v62 = vsel %vm19_vm3, %v1430_v25, 0.0 }
 0x19f   :  { %v1353_v19 = vsel %vm19_vm3, %v2745_v47, 0.0 }
 0x1a0   :  { %v1330_v18 = vadd.f32 %v1329_v26, %v1328_v15  ;;  %v1529_v23 = vadd.f32 %v1528_v8, %v1527_v16  ;;  %v1550_v8 = vsel %vm19_vm3, %v1431_v11, 0.0  ;;  %v1433_v26 = vmul.f32 %v2745_v47, %v2745_v47 }
 0x1a1   :  { %v1357_v47 = vsel %vm19_vm3, %v2776_v37, 0.0 }
 0x1a2   :  { %v1332_v27 = vadd.f32 %v1331_v41, %v1330_v18  ;;  %v1531_v28 = vadd.f32 %v1530_v6, %v1529_v23  ;;  %v1552_v23 = vsel %vm19_vm3, %v1432_v13, 0.0  ;;  %v1434_v6 = vmul.f32 %v2766_v2, %v2766_v2 }
 0x1a4   :  { %v1334_v29 = vadd.f32 %v1333_v3, %v1332_v27  ;;  %v1533_v40 = vadd.f32 %v1532_v46, %v1531_v28  ;;  %v1554_v27 = vsel %vm19_vm3, %v1433_v26, 0.0  ;;  %v1435_v28 = vmul.f32 %v2776_v37, %v2776_v37 }
 0x1a5   :  { %v1556_v61 = vsel %vm19_vm3, %v1434_v6, 0.0 }
 0x1a6   :  { %v1535_v10 = vadd.f32 %v1534_v36, %v1533_v40  ;;  %v1336_v42 = vadd.f32 %v1335_v63, %v1334_v29  ;;  %v1436_v29 = vmul.f32 %v2797_v59, %v2797_v59  ;;  %v1437_v40 = vmul.f32 %v2807_v49, %v2807_v49 }
 0x1a7   :  { %v1558_v2 = vsel %vm19_vm3, %v1435_v28, 0.0  ;;  %v1564_v59 = vsel %vm19_vm3, %v1438_v38, 0.0 }
 0x1a8   :  { %v1537_v39 = vadd.f32 %v1536_v32, %v1535_v10  ;;  %v1338_v44 = vadd.f32 %v1337_v56, %v1336_v42  ;;  %v1361_v10 = vsel %vm19_vm3, %v2807_v49, 0.0  ;;  %v1560_v37 = vsel %vm19_vm3, %v1436_v29, 0.0 }
 0x1a9   :  { %v1562_v56 = vsel %vm19_vm3, %v1437_v40, 0.0 }
 0x1aa   :  { %v1539_v54 = vadd.f32 %v1538_v53, %v1537_v39  ;;  %v1340_v55 = vadd.f32 %v1339_v7, %v1338_v44  ;;  %v1363_v53 = vsel %vm19_vm3, %v2827_v30, 0.0 }
 0x1ac   :  { %v1541_v45 = vadd.f32 %v1540_v17, %v1539_v54  ;;  %v1342_v58 = vadd.f32 %v1341_v33, %v1340_v55 }
 0x1ae   :  { %v1543_v21 = vadd.f32 %v1542_v31, %v1541_v45  ;;  %v1344_v60 = vadd.f32 %v1343_v57, %v1342_v58 }
 0x1b0   :  { %v1545_v0 = vadd.f32 %v1544_v51, %v1543_v21  ;;  %v1346_v48 = vadd.f32 %v1345_v24, %v1344_v60  ;;  %v1374_v60 = vld [vmem:[%s3011_s4] sm:$0x1] }
 0x1b2   :  { %v1547_v1 = vadd.f32 %v1546_v4, %v1545_v0  ;;  %v1348_v12 = vadd.f32 %v1347_v35, %v1346_v48 }
 0x1b4   :  { %v1549_v15 = vadd.f32 %v1548_v62, %v1547_v1  ;;  %v1350_v16 = vadd.f32 %v1349_v9, %v1348_v12 }
 0x1b6   :  { %v1551_v14 = vadd.f32 %v1550_v8, %v1549_v15  ;;  %v1352_v18 = vadd.f32 %v1351_v43, %v1350_v16 }
 0x1b8   :  { %v1553_v41 = vadd.f32 %v1552_v23, %v1551_v14  ;;  %v1354_v22 = vadd.f32 %v1353_v19, %v1352_v18 }
 0x1ba   :  { %v1555_v46 = vadd.f32 %v1554_v27, %v1553_v41  ;;  %v1356_v3 = vadd.f32 %v1355_v50, %v1354_v22 }
 0x1bc   :  { %v1557_v36 = vadd.f32 %v1556_v61, %v1555_v46  ;;  %v1358_v63 = vadd.f32 %v1357_v47, %v1356_v3 }
 0x1be   :  { %v1559_v42 = vadd.f32 %v1558_v2, %v1557_v36  ;;  %v1360_v32 = vadd.f32 %v1359_v34, %v1358_v63 }
 0x1c0   :  { %v1561_v39 = vadd.f32 %v1560_v37, %v1559_v42  ;;  %v1362_v44 = vadd.f32 %v1361_v10, %v1360_v32 }
 0x1c2   :  { %v1563_v7 = vadd.f32 %v1562_v56, %v1561_v39  ;;  %v1364_v52 = vadd.f32 %v1363_v53, %v1362_v44 }
 0x1c4   :  { %v1365_v54 = vrot.slane %v1364_v52, 4  ;;  %v1565_v49 = vadd.f32 %v1564_v59, %v1563_v7 }
 0x1c6   :  { %v1366_v55 = vadd.f32 %v1365_v54, %v1364_v52  ;;  %v1566_v17 = vrot.slane %v1565_v49, 4 }
 0x1c8   :  { %v1367_v33 = vrot.slane %v1366_v55, 2  ;;  %v1567_v5 = vadd.f32 %v1566_v17, %v1565_v49 }
 0x1ca   :  { %v1368_v45 = vadd.f32 %v1367_v33, %v1366_v55  ;;  %v1568_v58 = vrot.slane %v1567_v5, 2 }
 0x1cc   :  { %v1369_v31 = vrot.slane %v1368_v45, 1  ;;  %v1569_v57 = vadd.f32 %v1568_v58, %v1567_v5 }
 0x1ce   :  { %v1370_v21 = vadd.f32 %v1369_v31, %v1368_v45  ;;  %v1570_v30 = vrot.slane %v1569_v57, 1 }
 0x1d0   :  { %v1371_v51 = vadd.f32 %v1370_v21, %v1237_v20  ;;  %v1571_v24 = vadd.f32 %v1570_v30, %v1569_v57 }
 0x1d2   :  { %1373 = vst.msk [vmem:[%s3010_s3] sm:$0x1] %vm1103_vm4, %v1371_v51  ;;  %v1572_v25 = vadd.f32 %v1571_v24, %v1374_v60 }
 0x1d4   :  { %1573 = vst.msk [vmem:[%s3011_s4] sm:$0x1] %vm1103_vm4, %v1572_v25 }

// kernel: resnet_forward.29
= control target key start
LH: loop header
LB: loop body
LE: loop exit
PB: predicated region body
PF: predicated region fallthrough
CT: control target
= control target key end

     0   :  { %vm19_vm0 = vcmask 64512   ;;  %v541_v1 = vmov 0.0   ;;  %vm144_vm1 = vcmask 588800   ;;  %vm169_vm2 = vcmask 1043456   ;;  %s812_s1 = inlined_call_operand.vmem [shape: bf16[72,8], index: 1, kind: input, shape index: {}]   ;;  %s813_s0 = inlined_call_operand.vmem [shape: bf16[128,72], index: 0, kind: input, shape index: {}]   ;;  %s814_s3 = inlined_call_operand.vmem [shape: f32[1,8], index: 3, kind: output, shape index: {1}]   ;;  %s815_s4 = inlined_call_operand.vmem [shape: f32[1,8], index: 4, kind: output, shape index: {2}]   ;;  %s816_s2 = inlined_call_operand.vmem [shape: f32[128,8], index: 2, kind: output, shape index: {0}]  }
   0x1   :  { %v528_v0 = vld [vmem:[%s812_s1] sm:$0xff]   ;;  %22 = vst.msk [vmem:[#allocation2 + $0x10] sm:$0xff] %vm19_vm0, %v541_v1  ;;  %20 = vst.msk [vmem:[#allocation2] sm:$0xff] %vm19_vm0, %v541_v1  ;;  %v529_v2 = vld [vmem:[%s812_s1 + $0x8] sm:$0xff]   ;;  %vm308_vm3 = vcmask 57344  }
   0x2   :  { %21 = vst.msk [vmem:[#allocation2 + $0x8] sm:$0xff] %vm19_vm0, %v541_v1  ;;  %23 = vst.msk [vmem:[#allocation2 + $0x18] sm:$0xff] %vm19_vm0, %v541_v1  ;;  %489 = vmatprep.subr.bf16.mxu0 %v528_v0  ;;  %515 = vmatprep.subr.bf16.mxu1 %v528_v0  ;;  %v530_v3 = vld [vmem:[%s812_s1 + $0x10] sm:$0xff]   ;;  %v533_v4 = vld [vmem:[%s813_s0] sm:$0xff]  }
   0x3   :  { %24 = vst.msk [vmem:[#allocation2 + $0x20] sm:$0xff] %vm19_vm0, %v541_v1  ;;  %25 = vst.msk [vmem:[#allocation2 + $0x28] sm:$0xff] %vm19_vm0, %v541_v1  ;;  %490 = vmatpush3.bf16.msra.mxu0 %v528_v0  ;;  %520 = vmatpush3.bf16.msra.mxu1 %v528_v0  ;;  %v531_v5 = vld [vmem:[%s812_s1 + $0x18] sm:$0xff]   ;;  %v537_v6 = vld [vmem:[%s813_s0 + $0x20] sm:$0xff]  }
   0x4   :  { %26 = vst.msk [vmem:[#allocation2 + $0x30] sm:$0xff] %vm19_vm0, %v541_v1  ;;  %27 = vst.msk [vmem:[#allocation2 + $0x38] sm:$0xff] %vm19_vm0, %v541_v1  ;;  %491 = vmatprep.subr.bf16.mxu0 %v529_v2  ;;  %516 = vmatprep.subr.bf16.mxu1 %v529_v2  ;;  %v532_v7 = vld [vmem:[%s812_s1 + $0x20] ss:$0 sps:$4 sm:$0xff]   ;;  %v534_v9 = vld [vmem:[%s813_s0 + $0x8] sm:$0xff]  }
   0x5   :  { %28 = vst.msk [vmem:[#allocation2 + $0x40] sm:$0xff] %vm19_vm0, %v541_v1  ;;  %29 = vst.msk [vmem:[#allocation2 + $0x48] sm:$0xff] %vm19_vm0, %v541_v1  ;;  %499 = vmatprep.mubr.msk.bf16.mxu0 %vm144_vm1, %v533_v4  ;;  %507 = vmatprep.mubr.msk.bf16.mxu1 %vm144_vm1, %v537_v6  ;;  %v171_v8 = vsel %vm169_vm2, %v532_v7, 0  ;;  %v538_v10 = vld [vmem:[%s813_s0 + $0x28] sm:$0xff]   ;;  %v535_v11 = vld [vmem:[%s813_s0 + $0x10] sm:$0xff]  }
   0x6   :  { %30 = vst.msk [vmem:[#allocation2 + $0x50] sm:$0xff] %vm19_vm0, %v541_v1  ;;  %31 = vst.msk [vmem:[#allocation2 + $0x58] sm:$0xff] %vm19_vm0, %v541_v1  ;;  %v539_v12 = vld [vmem:[%s813_s0 + $0x30] sm:$0xff]   ;;  %v536_v13 = vld [vmem:[%s813_s0 + $0x18] sm:$0xff]  }
   0x7   :  { %32 = vst.msk [vmem:[#allocation2 + $0x60] sm:$0xff] %vm19_vm0, %v541_v1  ;;  %33 = vst.msk [vmem:[#allocation2 + $0x68] sm:$0xff] %vm19_vm0, %v541_v1  ;;  %492 = vmatpush3.bf16.msra.mxu0 %v529_v2  ;;  %521 = vmatpush3.bf16.msra.mxu1 %v529_v2  ;;  %v540_v14 = vld [vmem:[%s813_s0 + $0x38] sm:$0xff]  }
   0x8   :  { %34 = vst.msk [vmem:[#allocation2 + $0x70] sm:$0xff] %vm19_vm0, %v541_v1  ;;  %35 = vst.msk [vmem:[#allocation2 + $0x78] sm:$0xff] %vm19_vm0, %v541_v1  ;;  %493 = vmatprep.subr.bf16.mxu0 %v530_v3  ;;  %517 = vmatprep.subr.bf16.mxu1 %v530_v3  ;;  %v38_v15 = vld [vmem:[#allocation2 + $0x10] sm:$0xff]  ;;  %v36_v17 = vld [vmem:[#allocation2] sm:$0xff] }
   0x9   :  { %309 = vst.msk [vmem:[%s814_s3] sm:$0x1] %vm308_vm3, %v541_v1  ;;  %310 = vst.msk [vmem:[%s815_s4] sm:$0x1] %vm308_vm3, %v541_v1  ;;  %v39_v20 = vld [vmem:[#allocation2 + $0x18] sm:$0xff]  ;;  %v37_v25 = vld [vmem:[#allocation2 + $0x8] sm:$0xff] }
   0xa   :  { %v40_v41 = vld [vmem:[#allocation2 + $0x20] sm:$0xff]  ;;  %v41_v48 = vld [vmem:[#allocation2 + $0x28] sm:$0xff] }
   0xb   :  { %494 = vmatpush3.bf16.msra.mxu0 %v530_v3  ;;  %522 = vmatpush3.bf16.msra.mxu1 %v530_v3  ;;  %v42_v39 = vld [vmem:[#allocation2 + $0x30] sm:$0xff]  ;;  %v43_v44 = vld [vmem:[#allocation2 + $0x38] sm:$0xff] }
   0xc   :  { %495 = vmatprep.subr.bf16.mxu0 %v531_v5  ;;  %518 = vmatprep.subr.bf16.mxu1 %v531_v5  ;;  %v44_v18 = vld [vmem:[#allocation2 + $0x40] sm:$0xff]  ;;  %v45_v28 = vld [vmem:[#allocation2 + $0x48] sm:$0xff] }
   0xd   :  { %v46_v16 = vld [vmem:[#allocation2 + $0x50] sm:$0xff]  ;;  %v47_v22 = vld [vmem:[#allocation2 + $0x58] sm:$0xff] }
   0xe   :  { %v48_v42 = vld [vmem:[#allocation2 + $0x60] sm:$0xff] }
   0xf   :  { %496 = vmatpush3.bf16.msra.mxu0 %v531_v5  ;;  %523 = vmatpush3.bf16.msra.mxu1 %v531_v5  ;;  %v50_v40 = vld [vmem:[#allocation2 + $0x70] sm:$0xff] }
  0x10   :  { %525 = vmatprep.subr.msk.bf16.mxu0 %vm169_vm2, %v532_v7  ;;  %526 = vmatprep.subr.msk.bf16.mxu1 %vm169_vm2, %v532_v7 }
  0x13   :  { %498 = vmatpush3.bf16.msra.mxu0 %v171_v8  ;;  %524 = vmatpush3.bf16.msra.mxu1 %v171_v8  ;;  %v51_v8 = vld [vmem:[#allocation2 + $0x78] sm:$0xff] }
  0x16   :  { %500 = vmatmul.mubr.msk.bf16.vlgmr.msra.gmra.mrb[0].mxu0 %vm144_vm1, %v534_v9  ;;  %508 = vmatmul.mubr.msk.bf16.vlgmr.msra.gmra.mrb[0].mxu1 %vm144_vm1, %v538_v10  ;;  %v49_v10 = vld [vmem:[#allocation2 + $0x68] sm:$0xff] }
  0x17   :  { %503 = vmatprep.mubr.msk.bf16.mxu0 %vm144_vm1, %v535_v11  ;;  %511 = vmatprep.mubr.msk.bf16.mxu1 %vm144_vm1, %v539_v12 }
  0x1e   :  { %504 = vmatmul.mubr.msk.bf16.gmra.mrb[4].mxu0 %vm144_vm1, %v536_v13  ;;  %512 = vmatmul.mubr.msk.bf16.gmra.mrb[4].mxu1 %vm144_vm1, %v540_v14 }
  0xe9   :  { %v501_v19 = vpop.f32.mrb[0].mxu0  ;;  %v509_v21 = vpop.f32.mrb[0].mxu1 }
  0xea   :  { %v272_v23 = vadd.f32 %v501_v19, %v38_v15  ;;  %v207_v24 = vpop.f32.mrb[1].mxu0  ;;  %v280_v26 = vadd.f32 %v509_v21, %v46_v16  ;;  %v239_v27 = vpop.f32.mrb[1].mxu1 }
  0xeb   :  { %v270_v29 = vadd.f32 %v207_v24, %v36_v17  ;;  %v502_v30 = vpop.f32.mrb[2].mxu0  ;;  %v278_v31 = vadd.f32 %v239_v27, %v44_v18  ;;  %v510_v32 = vpop.f32.mrb[2].mxu1 }
  0xec   :  { %289 = vst.msk [vmem:[#allocation2 + $0x10] sm:$0xff] %vm19_vm0, %v272_v23  ;;  %v273_v33 = vadd.f32 %v502_v30, %v39_v20  ;;  %v210_v34 = vpop.f32.mrb[3].mxu0  ;;  %297 = vst.msk [vmem:[#allocation2 + $0x50] sm:$0xff] %vm19_vm0, %v280_v26  ;;  %v281_v35 = vadd.f32 %v510_v32, %v47_v22  ;;  %v242_v36 = vpop.f32.mrb[3].mxu1 }
  0xed   :  { %287 = vst.msk [vmem:[#allocation2] sm:$0xff] %vm19_vm0, %v270_v29  ;;  %v271_v37 = vadd.f32 %v210_v34, %v37_v25  ;;  %295 = vst.msk [vmem:[#allocation2 + $0x40] sm:$0xff] %vm19_vm0, %v278_v31  ;;  %v279_v38 = vadd.f32 %v242_v36, %v45_v28 }
  0xee   :  { %290 = vst.msk [vmem:[#allocation2 + $0x18] sm:$0xff] %vm19_vm0, %v273_v33  ;;  %298 = vst.msk [vmem:[#allocation2 + $0x58] sm:$0xff] %vm19_vm0, %v281_v35 }
  0xef   :  { %288 = vst.msk [vmem:[#allocation2 + $0x8] sm:$0xff] %vm19_vm0, %v271_v37  ;;  %296 = vst.msk [vmem:[#allocation2 + $0x48] sm:$0xff] %vm19_vm0, %v279_v38 }
  0xf1   :  { %v505_v43 = vpop.f32.mrb[4].mxu0  ;;  %v513_v45 = vpop.f32.mrb[4].mxu1 }
  0xf2   :  { %v276_v46 = vadd.f32 %v505_v43, %v42_v39  ;;  %v223_v47 = vpop.f32.mrb[5].mxu0  ;;  %v284_v49 = vadd.f32 %v513_v45, %v50_v40  ;;  %v255_v50 = vpop.f32.mrb[5].mxu1 }
  0xf3   :  { %v316_v51 = vld [vmem:[#allocation2 + $0x10] sm:$0xff]  ;;  %v274_v52 = vadd.f32 %v223_v47, %v40_v41  ;;  %v506_v53 = vpop.f32.mrb[6].mxu0  ;;  %v282_v55 = vadd.f32 %v255_v50, %v48_v42  ;;  %v514_v56 = vpop.f32.mrb[6].mxu1 }
  0xf4   :  { %v664_v54 = vld [vmem:[#allocation2 + $0x50] sm:$0xff]  ;;  %332 = vst.msk [vmem:[%s816_s2 + $0x10] sm:$0xff] %vm19_vm0, %v316_v51  ;;  %v314_v57 = vld [vmem:[#allocation2] sm:$0xff]  ;;  %293 = vst.msk [vmem:[#allocation2 + $0x30] sm:$0xff] %vm19_vm0, %v276_v46  ;;  %v277_v58 = vadd.f32 %v506_v53, %v43_v44  ;;  %v226_v59 = vpop.f32.mrb[7].mxu0  ;;  %v258_v61 = vpop.f32.mrb[7].mxu1  ;;  %v390_v4 = vmul.f32 %v316_v51, %v316_v51  ;;  %v285_v17 = vadd.f32 %v514_v56, %v51_v8 }
  0xf5   :  { %340 = vst.msk [vmem:[%s816_s2 + $0x50] sm:$0xff] %vm19_vm0, %v664_v54  ;;  %v676_v60 = vld [vmem:[#allocation2 + $0x40] sm:$0xff]  ;;  %301 = vst.msk [vmem:[#allocation2 + $0x70] sm:$0xff] %vm19_vm0, %v284_v49  ;;  %v388_v62 = vmul.f32 %v314_v57, %v314_v57  ;;  %v317_v63 = vld [vmem:[#allocation2 + $0x18] sm:$0xff]  ;;  %v275_v0 = vadd.f32 %v226_v59, %v41_v48  ;;  %v347_v5 = vsel %vm19_vm0, %v314_v57, 0.0  ;;  %v350_v11 = vsel %vm19_vm0, %v316_v51, 0.0 }
  0xf6   :  { %330 = vst.msk [vmem:[%s816_s2] sm:$0xff] %vm19_vm0, %v314_v57  ;;  %291 = vst.msk [vmem:[#allocation2 + $0x20] sm:$0xff] %vm19_vm0, %v274_v52  ;;  %v689_v1 = vld [vmem:[#allocation2 + $0x58] sm:$0xff]  ;;  %v315_v2 = vld [vmem:[#allocation2 + $0x8] sm:$0xff]  ;;  %v391_v13 = vmul.f32 %v317_v63, %v317_v63  ;;  %v407_v18 = vsel %vm19_vm0, %v390_v4, 0.0  ;;  %v352_v19 = vsel %vm19_vm0, %v317_v63, 0.0  ;;  %v283_v22 = vadd.f32 %v258_v61, %v49_v10 }
  0xf7   :  { %338 = vst.msk [vmem:[%s816_s2 + $0x40] sm:$0xff] %vm19_vm0, %v676_v60  ;;  %299 = vst.msk [vmem:[#allocation2 + $0x60] sm:$0xff] %vm19_vm0, %v282_v55  ;;  %v702_v3 = vld [vmem:[#allocation2 + $0x48] sm:$0xff]  ;;  %v348_v6 = vsel %vm19_vm0, %v315_v2, 0.0  ;;  %v389_v7 = vmul.f32 %v315_v2, %v315_v2  ;;  %v404_v12 = vsel %vm19_vm0, %v388_v62, 0.0  ;;  %v396_v43 = vmul.f32 %v676_v60, %v676_v60 }
  0xf8   :  { %333 = vst.msk [vmem:[%s816_s2 + $0x18] sm:$0xff] %vm19_vm0, %v317_v63  ;;  %294 = vst.msk [vmem:[#allocation2 + $0x38] sm:$0xff] %vm19_vm0, %v277_v58  ;;  %v349_v9 = vadd.f32 %v348_v6, %v347_v5  ;;  %v409_v27 = vsel %vm19_vm0, %v391_v13, 0.0  ;;  %v362_v48 = vsel %vm19_vm0, %v676_v60, 0.0  ;;  %v397_v56 = vmul.f32 %v702_v3, %v702_v3 }
  0xf9   :  { %341 = vst.msk [vmem:[%s816_s2 + $0x58] sm:$0xff] %vm19_vm0, %v689_v1  ;;  %331 = vst.msk [vmem:[%s816_s2 + $0x8] sm:$0xff] %vm19_vm0, %v315_v2  ;;  %v405_v14 = vsel %vm19_vm0, %v389_v7, 0.0  ;;  %v419_v55 = vsel %vm19_vm0, %v396_v43, 0.0  ;;  %v398_v59 = vmul.f32 %v664_v54, %v664_v54  ;;  %v364_v60 = vsel %vm19_vm0, %v702_v3, 0.0 }
  0xfa   :  { %292 = vst.msk [vmem:[#allocation2 + $0x28] sm:$0xff] %vm19_vm0, %v275_v0  ;;  %339 = vst.msk [vmem:[%s816_s2 + $0x48] sm:$0xff] %vm19_vm0, %v702_v3  ;;  %v351_v15 = vadd.f32 %v350_v11, %v349_v9  ;;  %v406_v16 = vadd.f32 %v405_v14, %v404_v12  ;;  %v366_v63 = vsel %vm19_vm0, %v664_v54, 0.0  ;;  %v399_v0 = vmul.f32 %v689_v1, %v689_v1 }
  0xfb   :  { %v320_v20 = vld [vmem:[#allocation2 + $0x30] sm:$0xff]  ;;  %302 = vst.msk [vmem:[#allocation2 + $0x78] sm:$0xff] %vm19_vm0, %v285_v17  ;;  %300 = vst.msk [vmem:[#allocation2 + $0x68] sm:$0xff] %vm19_vm0, %v283_v22  ;;  %v421_v2 = vsel %vm19_vm0, %v397_v56, 0.0  ;;  %v423_v7 = vsel %vm19_vm0, %v398_v59, 0.0  ;;  %v368_v8 = vsel %vm19_vm0, %v689_v1, 0.0 }
  0xfc   :  { %v721_v21 = vld [vmem:[#allocation2 + $0x70] sm:$0xff]  ;;  %v408_v23 = vadd.f32 %v407_v18, %v406_v16  ;;  %336 = vst.msk [vmem:[%s816_s2 + $0x30] sm:$0xff] %vm19_vm0, %v320_v20  ;;  %v353_v25 = vadd.f32 %v352_v19, %v351_v15  ;;  %v394_v34 = vmul.f32 %v320_v20, %v320_v20  ;;  %v358_v40 = vsel %vm19_vm0, %v320_v20, 0.0 }
  0xfd   :  { %v318_v24 = vld [vmem:[#allocation2 + $0x20] sm:$0xff]  ;;  %344 = vst.msk [vmem:[%s816_s2 + $0x70] sm:$0xff] %vm19_vm0, %v721_v21  ;;  %v425_v11 = vsel %vm19_vm0, %v399_v0, 0.0  ;;  %v402_v15 = vmul.f32 %v721_v21, %v721_v21  ;;  %v374_v1 = vsel %vm19_vm0, %v721_v21, 0.0 }
  0xfe   :  { %v326_v26 = vld [vmem:[#allocation2 + $0x60] sm:$0xff]  ;;  %334 = vst.msk [vmem:[%s816_s2 + $0x20] sm:$0xff] %vm19_vm0, %v318_v24  ;;  %v354_v28 = vsel %vm19_vm0, %v318_v24, 0.0  ;;  %v392_v29 = vmul.f32 %v318_v24, %v318_v24  ;;  %v410_v32 = vadd.f32 %v409_v27, %v408_v23  ;;  %v415_v46 = vsel %vm19_vm0, %v394_v34, 0.0 }
  0xff   :  { %v321_v30 = vld [vmem:[#allocation2 + $0x38] sm:$0xff]  ;;  %342 = vst.msk [vmem:[%s816_s2 + $0x60] sm:$0xff] %vm19_vm0, %v326_v26  ;;  %v355_v31 = vadd.f32 %v354_v28, %v353_v25  ;;  %v400_v4 = vmul.f32 %v326_v26, %v326_v26  ;;  %v370_v3 = vsel %vm19_vm0, %v326_v26, 0.0  ;;  %v431_v24 = vsel %vm19_vm0, %v402_v15, 0.0 }
 0x100   :  { %337 = vst.msk [vmem:[%s816_s2 + $0x38] sm:$0xff] %vm19_vm0, %v321_v30  ;;  %v411_v35 = vsel %vm19_vm0, %v392_v29, 0.0  ;;  %v395_v41 = vmul.f32 %v321_v30, %v321_v30  ;;  %v360_v47 = vsel %vm19_vm0, %v321_v30, 0.0 }
 0x101   :  { %v319_v33 = vld [vmem:[#allocation2 + $0x28] sm:$0xff]  ;;  %v412_v38 = vadd.f32 %v411_v35, %v410_v32  ;;  %v427_v54 = vsel %vm19_vm0, %v400_v4, 0.0 }
 0x102   :  { %335 = vst.msk [vmem:[%s816_s2 + $0x28] sm:$0xff] %vm19_vm0, %v319_v33  ;;  %v356_v36 = vsel %vm19_vm0, %v319_v33, 0.0  ;;  %v393_v37 = vmul.f32 %v319_v33, %v319_v33  ;;  %v329_v49 = vld [vmem:[#allocation2 + $0x78] sm:$0xff]  ;;  %v327_v52 = vld [vmem:[#allocation2 + $0x68] sm:$0xff]  ;;  %v417_v53 = vsel %vm19_vm0, %v395_v41, 0.0 }
 0x103   :  { %v357_v39 = vadd.f32 %v356_v36, %v355_v31  ;;  %345 = vst.msk [vmem:[%s816_s2 + $0x78] sm:$0xff] %vm19_vm0, %v329_v49  ;;  %343 = vst.msk [vmem:[%s816_s2 + $0x68] sm:$0xff] %vm19_vm0, %v327_v52  ;;  %v401_v12 = vmul.f32 %v327_v52, %v327_v52  ;;  %v372_v16 = vsel %vm19_vm0, %v327_v52, 0.0  ;;  %v403_v19 = vmul.f32 %v329_v49, %v329_v49  ;;  %v387_v41 = vld [vmem:[%s815_s4] sm:$0x1] }
 0x104   :  { %v413_v42 = vsel %vm19_vm0, %v393_v37, 0.0  ;;  %v376_v25 = vsel %vm19_vm0, %v329_v49, 0.0 }
 0x105   :  { %v359_v44 = vadd.f32 %v358_v40, %v357_v39  ;;  %v414_v45 = vadd.f32 %v413_v42, %v412_v38  ;;  %v429_v20 = vsel %vm19_vm0, %v401_v12, 0.0  ;;  %v433_v28 = vsel %vm19_vm0, %v403_v19, 0.0  ;;  %v346_v38 = vld [vmem:[%s814_s3] sm:$0x1] }
 0x107   :  { %v416_v50 = vadd.f32 %v415_v46, %v414_v45  ;;  %v361_v51 = vadd.f32 %v360_v47, %v359_v44 }
 0x109   :  { %v363_v57 = vadd.f32 %v362_v48, %v361_v51  ;;  %v418_v58 = vadd.f32 %v417_v53, %v416_v50 }
 0x10b   :  { %v420_v61 = vadd.f32 %v419_v55, %v418_v58  ;;  %v365_v62 = vadd.f32 %v364_v60, %v363_v57 }
 0x10d   :  { %v367_v5 = vadd.f32 %v366_v63, %v365_v62  ;;  %v422_v6 = vadd.f32 %v421_v2, %v420_v61 }
 0x10f   :  { %v424_v9 = vadd.f32 %v423_v7, %v422_v6  ;;  %v369_v10 = vadd.f32 %v368_v8, %v367_v5 }
 0x111   :  { %v371_v13 = vadd.f32 %v370_v3, %v369_v10  ;;  %v426_v14 = vadd.f32 %v425_v11, %v424_v9 }
 0x113   :  { %v428_v17 = vadd.f32 %v427_v54, %v426_v14  ;;  %v373_v18 = vadd.f32 %v372_v16, %v371_v13 }
 0x115   :  { %v375_v22 = vadd.f32 %v374_v1, %v373_v18  ;;  %v430_v23 = vadd.f32 %v429_v20, %v428_v17 }
 0x117   :  { %v377_v26 = vadd.f32 %v376_v25, %v375_v22  ;;  %v432_v27 = vadd.f32 %v431_v24, %v430_v23 }
 0x119   :  { %v378_v29 = vrot.slane %v377_v26, 4  ;;  %v434_v30 = vadd.f32 %v433_v28, %v432_v27 }
 0x11b   :  { %v379_v31 = vadd.f32 %v378_v29, %v377_v26  ;;  %v435_v32 = vrot.slane %v434_v30, 4 }
 0x11d   :  { %v380_v33 = vrot.slane %v379_v31, 2  ;;  %v436_v34 = vadd.f32 %v435_v32, %v434_v30 }
 0x11f   :  { %v381_v21 = vadd.f32 %v380_v33, %v379_v31  ;;  %v437_v35 = vrot.slane %v436_v34, 2 }
 0x121   :  { %v382_v36 = vrot.slane %v381_v21, 1  ;;  %v438_v37 = vadd.f32 %v437_v35, %v436_v34 }
 0x123   :  { %v383_v39 = vadd.f32 %v382_v36, %v381_v21  ;;  %v439_v40 = vrot.slane %v438_v37, 1 }
 0x125   :  { %v384_v42 = vadd.f32 %v383_v39, %v346_v38  ;;  %v440_v43 = vadd.f32 %v439_v40, %v438_v37 }
 0x127   :  { %386 = vst.msk [vmem:[%s814_s3] sm:$0x1] %vm308_vm3, %v384_v42  ;;  %v441_v44 = vadd.f32 %v440_v43, %v387_v41 }
 0x129   :  { %442 = vst.msk [vmem:[%s815_s4] sm:$0x1] %vm308_vm3, %v441_v44 }

// kernel: resnet_forward.30
= control target key start
LH: loop header
LB: loop body
LE: loop exit
PB: predicated region body
PF: predicated region fallthrough
CT: control target
= control target key end

     0   :  { %s72_s0 = inlined_call_operand.vmem [shape: f32[8,128], index: 0, kind: input, shape index: {}]   ;;  %s73_s1 = inlined_call_operand.vmem [shape: f32[1,128], index: 1, kind: input, shape index: {}]   ;;  %s74_s2 = inlined_call_operand.vmem [shape: f32[1,128], index: 2, kind: input, shape index: {}]   ;;  %s75_s3 = inlined_call_operand.vmem [shape: bf16[8,128], index: 3, kind: output, shape index: {}]  }
   0x1   :  { %v14_v0 = vld [vmem:[%s72_s0] sm:$0xff] }
   0x2   :  { %v38_v1 = vld [vmem:[%s73_s1] ss:$0 sm:$0xff] }
   0x3   :  { %v39_v2 = vld [vmem:[%s74_s2] ss:$0 sm:$0xff]  ;;  %v22_v3 = vmul.f32 %v38_v1, %v14_v0 }
   0x5   :  { %v30_v4 = vadd.f32 %v39_v2, %v22_v3 }
   0x7   :  { %v31_v5 = vmax.f32 %v30_v4, 0.0 }
   0x9   :  { %v32_v6 = vpack.c.bf16 %v31_v5, %v31_v5 }
   0xb   :  { %33 = vst [vmem:[%s75_s3] sm:$0xf] %v32_v6 }

// kernel: resnet_forward.28
= control target key start
LH: loop header
LB: loop body
LE: loop exit
PB: predicated region body
PF: predicated region fallthrough
CT: control target
= control target key end

     0   :  { %vm520_vm0 = vcmask 64512   ;;  %vm522_vm1 = vcmask 57344   ;;  %vm2314_vm2 = vcmask 1041409   ;;  %vm2316_vm3 = vcmask 1042434   ;;  %s6224_s0 = inlined_call_operand.vmem [shape: bf16[128,9,8], index: 0, kind: input, shape index: {}]   ;;  %s6225_s1 = inlined_call_operand.vmem [shape: bf16[128,8], index: 1, kind: output, shape index: {}]  }
   0x1   :  { %v2755_v0 = vld [vmem:[%s6224_s0] ss:$8 sps:$4 sm:$0xff]   ;;  %v2760_v1 = vld [vmem:[%s6224_s0 + $0x4] sm:$0x1]  ;;  %v2765_v2 = vld [vmem:[%s6224_s0 + $0xc] sm:$0x1] }
   0x2   :  { %v2770_v3 = vld [vmem:[%s6224_s0 + $0x10] ss:$8 sps:$4 sm:$0xff]   ;;  %v2775_v4 = vld [vmem:[%s6224_s0 + $0x14] sm:$0x1]  ;;  %v2780_v5 = vld [vmem:[%s6224_s0 + $0x1c] sm:$0x1] }
   0x3   :  { %v2789_v10 = vld [vmem:[%s6224_s0 + $0x20] ss:$8 sps:$4 sm:$0xff]   ;;  %v2794_v11 = vld [vmem:[%s6224_s0 + $0x24] sm:$0x1]  ;;  %v2799_v12 = vld [vmem:[%s6224_s0 + $0x2c] sm:$0x1] }
   0x4   :  { %v2808_v17 = vld [vmem:[%s6224_s0 + $0x30] ss:$8 sps:$4 sm:$0xff]   ;;  %v2813_v18 = vld [vmem:[%s6224_s0 + $0x34] sm:$0x1]  ;;  %v2818_v19 = vld [vmem:[%s6224_s0 + $0x3c] sm:$0x1] }
   0x5   :  { %v2827_v24 = vld [vmem:[%s6224_s0 + $0x40] ss:$8 sps:$4 sm:$0xff]   ;;  %v2832_v25 = vld [vmem:[%s6224_s0 + $0x44] sm:$0x1]  ;;  %v2837_v26 = vld [vmem:[%s6224_s0 + $0x4c] sm:$0x1] }
   0x6   :  { %v2846_v31 = vld [vmem:[%s6224_s0 + $0x50] ss:$8 sps:$4 sm:$0xff]   ;;  %v2851_v32 = vld [vmem:[%s6224_s0 + $0x54] sm:$0x1]  ;;  %v2856_v33 = vld [vmem:[%s6224_s0 + $0x5c] sm:$0x1] }
   0x7   :  { %v2865_v38 = vld [vmem:[%s6224_s0 + $0x60] ss:$8 sps:$4 sm:$0xff]   ;;  %v2870_v39 = vld [vmem:[%s6224_s0 + $0x64] sm:$0x1]  ;;  %v2875_v40 = vld [vmem:[%s6224_s0 + $0x6c] sm:$0x1] }
   0x8   :  { %v2884_v45 = vld [vmem:[%s6224_s0 + $0x70] ss:$8 sps:$4 sm:$0xff]   ;;  %v2889_v46 = vld [vmem:[%s6224_s0 + $0x74] sm:$0x1]  ;;  %v2894_v47 = vld [vmem:[%s6224_s0 + $0x7c] sm:$0x1] }
   0x9   :  { %v2903_v52 = vld [vmem:[%s6224_s0 + $0x80] ss:$8 sps:$4 sm:$0xff]   ;;  %v2908_v53 = vld [vmem:[%s6224_s0 + $0x84] sm:$0x1]  ;;  %v2913_v54 = vld [vmem:[%s6224_s0 + $0x8c] sm:$0x1] }
   0xa   :  { %v2922_v59 = vld [vmem:[%s6224_s0 + $0x90] ss:$8 sps:$4 sm:$0xff]   ;;  %v2927_v60 = vld [vmem:[%s6224_s0 + $0x94] sm:$0x1]  ;;  %v2932_v61 = vld [vmem:[%s6224_s0 + $0x9c] sm:$0x1] }
   0xb   :  { %v2941_v56 = vld [vmem:[%s6224_s0 + $0xa0] ss:$8 sps:$4 sm:$0xff]   ;;  %v2946_v55 = vld [vmem:[%s6224_s0 + $0xa4] sm:$0x1]  ;;  %v2951_v62 = vld [vmem:[%s6224_s0 + $0xac] sm:$0x1] }
   0xc   :  { %v2960_v50 = vld [vmem:[%s6224_s0 + $0xb0] ss:$8 sps:$4 sm:$0xff]   ;;  %v2965_v49 = vld [vmem:[%s6224_s0 + $0xb4] sm:$0x1]  ;;  %v2970_v63 = vld [vmem:[%s6224_s0 + $0xbc] sm:$0x1] }
   0xd   :  { %v2979_v44 = vld [vmem:[%s6224_s0 + $0xc0] ss:$8 sps:$4 sm:$0xff]   ;;  %v2984_v43 = vld [vmem:[%s6224_s0 + $0xc4] sm:$0x1]  ;;  %v2989_v58 = vld [vmem:[%s6224_s0 + $0xcc] sm:$0x1] }
   0xe   :  { %v2998_v41 = vld [vmem:[%s6224_s0 + $0xd0] ss:$8 sps:$4 sm:$0xff]   ;;  %v3003_v37 = vld [vmem:[%s6224_s0 + $0xd4] sm:$0x1]  ;;  %v3008_v57 = vld [vmem:[%s6224_s0 + $0xdc] sm:$0x1] }
   0xf   :  { %v3017_v35 = vld [vmem:[%s6224_s0 + $0xe0] ss:$8 sps:$4 sm:$0xff]   ;;  %v3022_v34 = vld [vmem:[%s6224_s0 + $0xe4] sm:$0x1]  ;;  %v3027_v51 = vld [vmem:[%s6224_s0 + $0xec] sm:$0x1] }
  0x10   :  { %v3036_v29 = vld [vmem:[%s6224_s0 + $0xf0] ss:$8 sps:$4 sm:$0xff]   ;;  %v3041_v28 = vld [vmem:[%s6224_s0 + $0xf4] sm:$0x1]  ;;  %v3046_v48 = vld [vmem:[%s6224_s0 + $0xfc] sm:$0x1] }
  0x11   :  { %6510 = vst [vmem:[#allocation2_spill] sm:$0xff] %v3036_v29  ;;  %6511 = vst [vmem:[#allocation3_spill] sm:$0xff] %v3041_v28  ;;  %v3055_v23 = vld [vmem:[%s6224_s0 + $0x100] ss:$8 sps:$4 sm:$0xff]   ;;  %v3060_v22 = vld [vmem:[%s6224_s0 + $0x104] sm:$0x1] }
  0x12   :  { %6512 = vst [vmem:[#allocation4_spill] sm:$0xff] %v3046_v48  ;;  %6513 = vst [vmem:[#allocation5_spill] sm:$0xff] %v3055_v23  ;;  %v3065_v42 = vld [vmem:[%s6224_s0 + $0x10c] sm:$0x1]  ;;  %v3074_v20 = vld [vmem:[%s6224_s0 + $0x110] ss:$8 sps:$4 sm:$0xff]  }
  0x13   :  { %6514 = vst [vmem:[#allocation6_spill] sm:$0xff] %v3060_v22  ;;  %6515 = vst [vmem:[#allocation7_spill] sm:$0xff] %v3065_v42  ;;  %v3079_v16 = vld [vmem:[%s6224_s0 + $0x114] sm:$0x1]  ;;  %v3084_v36 = vld [vmem:[%s6224_s0 + $0x11c] sm:$0x1]  ;;  %v6657_v22 = vunpack.c.l.bf16 %v2755_v0  ;;  %v6661_v42 = vunpack.c.l.bf16 %v2770_v3 }
  0x14   :  { %6516 = vst [vmem:[#allocation8_spill] sm:$0xff] %v3074_v20  ;;  %6517 = vst [vmem:[#allocation9_spill] sm:$0xff] %v3079_v16  ;;  %v3093_v14 = vld [vmem:[%s6224_s0 + $0x120] ss:$8 sps:$4 sm:$0xff]   ;;  %v3098_v13 = vld [vmem:[%s6224_s0 + $0x124] sm:$0x1] }
  0x15   :  { %6518 = vst [vmem:[#allocation10_spill] sm:$0xff] %v3084_v36  ;;  %6519 = vst [vmem:[#allocation11_spill] sm:$0xff] %v3093_v14  ;;  %v3103_v30 = vld [vmem:[%s6224_s0 + $0x12c] sm:$0x1]  ;;  %v3112_v8 = vld [vmem:[%s6224_s0 + $0x130] ss:$8 sps:$4 sm:$0xff]  }
  0x16   :  { %6520 = vst [vmem:[#allocation12_spill] sm:$0xff] %v3098_v13  ;;  %6521 = vst [vmem:[#allocation13_spill] sm:$0xff] %v3103_v30  ;;  %v3117_v7 = vld [vmem:[%s6224_s0 + $0x134] sm:$0x1]  ;;  %v3122_v27 = vld [vmem:[%s6224_s0 + $0x13c] sm:$0x1] }
  0x17   :  { %6522 = vst [vmem:[#allocation14_spill] sm:$0xff] %v3112_v8  ;;  %6523 = vst [vmem:[#allocation15_spill] sm:$0xff] %v3117_v7  ;;  %v3131_v36 = vld [vmem:[%s6224_s0 + $0x140] ss:$8 sps:$4 sm:$0xff]   ;;  %v3136_v16 = vld [vmem:[%s6224_s0 + $0x144] sm:$0x1] }
  0x18   :  { %6524 = vst [vmem:[#allocation16_spill] sm:$0xff] %v3122_v27  ;;  %6525 = vst [vmem:[#allocation17_spill] sm:$0xff] %v3131_v36  ;;  %v3141_v21 = vld [vmem:[%s6224_s0 + $0x14c] sm:$0x1]  ;;  %v3150_v13 = vld [vmem:[%s6224_s0 + $0x150] ss:$8 sps:$4 sm:$0xff]  }
  0x19   :  { %6526 = vst [vmem:[#allocation18_spill] sm:$0xff] %v3136_v16  ;;  %6527 = vst [vmem:[#allocation19_spill] sm:$0xff] %v3141_v21  ;;  %v3155_v14 = vld [vmem:[%s6224_s0 + $0x154] sm:$0x1]  ;;  %v3160_v15 = vld [vmem:[%s6224_s0 + $0x15c] sm:$0x1] }
  0x1a   :  { %6528 = vst [vmem:[#allocation20_spill] sm:$0xff] %v3150_v13  ;;  %6529 = vst [vmem:[#allocation21_spill] sm:$0xff] %v3155_v14  ;;  %v3169_v7 = vld [vmem:[%s6224_s0 + $0x160] ss:$8 sps:$4 sm:$0xff]   ;;  %v3174_v8 = vld [vmem:[%s6224_s0 + $0x164] sm:$0x1] }
  0x1b   :  { %6530 = vst [vmem:[#allocation22_spill] sm:$0xff] %v3160_v15  ;;  %6531 = vst [vmem:[#allocation23_spill] sm:$0xff] %v3169_v7  ;;  %v3179_v9 = vld [vmem:[%s6224_s0 + $0x16c] sm:$0x1]  ;;  %v3188_v16 = vld [vmem:[%s6224_s0 + $0x170] ss:$8 sps:$4 sm:$0xff]  }
  0x1c   :  { %6532 = vst [vmem:[#allocation24_spill] sm:$0xff] %v3174_v8  ;;  %6533 = vst [vmem:[#allocation25_spill] sm:$0xff] %v3179_v9  ;;  %v3193_v36 = vld [vmem:[%s6224_s0 + $0x174] sm:$0x1]  ;;  %v3198_v6 = vld [vmem:[%s6224_s0 + $0x17c] sm:$0x1] }
  0x1d   :  { %6534 = vst [vmem:[#allocation26_spill] sm:$0xff] %v3188_v16  ;;  %6535 = vst [vmem:[#allocation27_spill] sm:$0xff] %v3193_v36  ;;  %v3207_v14 = vld [vmem:[%s6224_s0 + $0x180] ss:$8 sps:$4 sm:$0xff]   ;;  %v3212_v13 = vld [vmem:[%s6224_s0 + $0x184] sm:$0x1] }
  0x1e   :  { %6536 = vst [vmem:[#allocation28_spill] sm:$0xff] %v3198_v6  ;;  %6537 = vst [vmem:[#allocation29_spill] sm:$0xff] %v3207_v14  ;;  %v3217_v30 = vld [vmem:[%s6224_s0 + $0x18c] sm:$0x1]  ;;  %v3226_v8 = vld [vmem:[%s6224_s0 + $0x190] ss:$8 sps:$4 sm:$0xff]  }
  0x1f   :  { %6538 = vst [vmem:[#allocation30_spill] sm:$0xff] %v3212_v13  ;;  %6539 = vst [vmem:[#allocation31_spill] sm:$0xff] %v3217_v30  ;;  %v3231_v7 = vld [vmem:[%s6224_s0 + $0x194] sm:$0x1]  ;;  %v3236_v27 = vld [vmem:[%s6224_s0 + $0x19c] sm:$0x1] }
  0x20   :  { %6540 = vst [vmem:[#allocation32_spill] sm:$0xff] %v3226_v8  ;;  %6541 = vst [vmem:[#allocation33_spill] sm:$0xff] %v3231_v7  ;;  %v3245_v36 = vld [vmem:[%s6224_s0 + $0x1a0] ss:$8 sps:$4 sm:$0xff]   ;;  %v3250_v16 = vld [vmem:[%s6224_s0 + $0x1a4] sm:$0x1] }
  0x21   :  { %6542 = vst [vmem:[#allocation34_spill] sm:$0xff] %v3236_v27  ;;  %6543 = vst [vmem:[#allocation35_spill] sm:$0xff] %v3245_v36  ;;  %v3255_v21 = vld [vmem:[%s6224_s0 + $0x1ac] sm:$0x1]  ;;  %v3264_v13 = vld [vmem:[%s6224_s0 + $0x1b0] ss:$8 sps:$4 sm:$0xff]  }
  0x22   :  { %6544 = vst [vmem:[#allocation36_spill] sm:$0xff] %v3250_v16  ;;  %6545 = vst [vmem:[#allocation37_spill] sm:$0xff] %v3255_v21  ;;  %v3269_v14 = vld [vmem:[%s6224_s0 + $0x1b4] sm:$0x1]  ;;  %v3274_v15 = vld [vmem:[%s6224_s0 + $0x1bc] sm:$0x1] }
  0x23   :  { %6546 = vst [vmem:[#allocation38_spill] sm:$0xff] %v3264_v13  ;;  %6547 = vst [vmem:[#allocation39_spill] sm:$0xff] %v3269_v14  ;;  %v3283_v7 = vld [vmem:[%s6224_s0 + $0x1c0] ss:$8 sps:$4 sm:$0xff]   ;;  %v3288_v8 = vld [vmem:[%s6224_s0 + $0x1c4] sm:$0x1] }
  0x24   :  { %6548 = vst [vmem:[#allocation40_spill] sm:$0xff] %v3274_v15  ;;  %6549 = vst [vmem:[#allocation41_spill] sm:$0xff] %v3283_v7  ;;  %v3293_v9 = vld [vmem:[%s6224_s0 + $0x1cc] sm:$0x1]  ;;  %v3302_v16 = vld [vmem:[%s6224_s0 + $0x1d0] ss:$8 sps:$4 sm:$0xff]  }
  0x25   :  { %6550 = vst [vmem:[#allocation42_spill] sm:$0xff] %v3288_v8  ;;  %6551 = vst [vmem:[#allocation43_spill] sm:$0xff] %v3293_v9  ;;  %v3307_v36 = vld [vmem:[%s6224_s0 + $0x1d4] sm:$0x1]  ;;  %v3312_v6 = vld [vmem:[%s6224_s0 + $0x1dc] sm:$0x1] }
  0x26   :  { %6552 = vst [vmem:[#allocation44_spill] sm:$0xff] %v3302_v16  ;;  %6553 = vst [vmem:[#allocation45_spill] sm:$0xff] %v3307_v36  ;;  %v3321_v14 = vld [vmem:[%s6224_s0 + $0x1e0] ss:$8 sps:$4 sm:$0xff]   ;;  %v3326_v13 = vld [vmem:[%s6224_s0 + $0x1e4] sm:$0x1] }
  0x27   :  { %6554 = vst [vmem:[#allocation46_spill] sm:$0xff] %v3312_v6  ;;  %6555 = vst [vmem:[#allocation47_spill] sm:$0xff] %v3321_v14  ;;  %v3331_v30 = vld [vmem:[%s6224_s0 + $0x1ec] sm:$0x1]  ;;  %v3340_v8 = vld [vmem:[%s6224_s0 + $0x1f0] ss:$8 sps:$4 sm:$0xff]  }
  0x28   :  { %6556 = vst [vmem:[#allocation48_spill] sm:$0xff] %v3326_v13  ;;  %6557 = vst [vmem:[#allocation49_spill] sm:$0xff] %v3331_v30  ;;  %v3345_v7 = vld [vmem:[%s6224_s0 + $0x1f4] sm:$0x1]  ;;  %v3350_v27 = vld [vmem:[%s6224_s0 + $0x1fc] sm:$0x1] }
  0x29   :  { %6558 = vst [vmem:[#allocation50_spill] sm:$0xff] %v3340_v8  ;;  %6559 = vst [vmem:[#allocation51_spill] sm:$0xff] %v3345_v7  ;;  %v3359_v36 = vld [vmem:[%s6224_s0 + $0x200] ss:$8 sps:$4 sm:$0xff]   ;;  %v3364_v16 = vld [vmem:[%s6224_s0 + $0x204] sm:$0x1] }
  0x2a   :  { %6560 = vst [vmem:[#allocation52_spill] sm:$0xff] %v3350_v27  ;;  %6561 = vst [vmem:[#allocation53_spill] sm:$0xff] %v3359_v36  ;;  %v3369_v21 = vld [vmem:[%s6224_s0 + $0x20c] sm:$0x1]  ;;  %v3378_v13 = vld [vmem:[%s6224_s0 + $0x210] ss:$8 sps:$4 sm:$0xff]  }
  0x2b   :  { %6562 = vst [vmem:[#allocation54_spill] sm:$0xff] %v3364_v16  ;;  %6563 = vst [vmem:[#allocation55_spill] sm:$0xff] %v3369_v21  ;;  %v3383_v14 = vld [vmem:[%s6224_s0 + $0x214] sm:$0x1]  ;;  %v3388_v15 = vld [vmem:[%s6224_s0 + $0x21c] sm:$0x1] }
  0x2c   :  { %6564 = vst [vmem:[#allocation56_spill] sm:$0xff] %v3378_v13  ;;  %6565 = vst [vmem:[#allocation57_spill] sm:$0xff] %v3383_v14  ;;  %v3397_v7 = vld [vmem:[%s6224_s0 + $0x220] ss:$8 sps:$4 sm:$0xff]   ;;  %v3402_v8 = vld [vmem:[%s6224_s0 + $0x224] sm:$0x1] }
  0x2d   :  { %6566 = vst [vmem:[#allocation58_spill] sm:$0xff] %v3388_v15  ;;  %6567 = vst [vmem:[#allocation59_spill] sm:$0xff] %v3397_v7  ;;  %v3407_v9 = vld [vmem:[%s6224_s0 + $0x22c] sm:$0x1]  ;;  %v3416_v16 = vld [vmem:[%s6224_s0 + $0x230] ss:$8 sps:$4 sm:$0xff]  }
  0x2e   :  { %6568 = vst [vmem:[#allocation60_spill] sm:$0xff] %v3402_v8  ;;  %6569 = vst [vmem:[#allocation61_spill] sm:$0xff] %v3407_v9  ;;  %v3421_v36 = vld [vmem:[%s6224_s0 + $0x234] sm:$0x1]  ;;  %v3426_v6 = vld [vmem:[%s6224_s0 + $0x23c] sm:$0x1] }
  0x2f   :  { %6570 = vst [vmem:[#allocation62_spill] sm:$0xff] %v3416_v16  ;;  %6571 = vst [vmem:[#allocation63_spill] sm:$0xff] %v3421_v36  ;;  %v3435_v14 = vld [vmem:[%s6224_s0 + $0x240] ss:$8 sps:$4 sm:$0xff]   ;;  %v3440_v13 = vld [vmem:[%s6224_s0 + $0x244] sm:$0x1] }
  0x30   :  { %6572 = vst [vmem:[#allocation64_spill] sm:$0xff] %v3426_v6  ;;  %6573 = vst [vmem:[#allocation65_spill] sm:$0xff] %v3435_v14  ;;  %v3445_v30 = vld [vmem:[%s6224_s0 + $0x24c] sm:$0x1]  ;;  %v3454_v8 = vld [vmem:[%s6224_s0 + $0x250] ss:$8 sps:$4 sm:$0xff]  }
  0x31   :  { %6574 = vst [vmem:[#allocation66_spill] sm:$0xff] %v3440_v13  ;;  %6575 = vst [vmem:[#allocation67_spill] sm:$0xff] %v3445_v30  ;;  %v3459_v7 = vld [vmem:[%s6224_s0 + $0x254] sm:$0x1]  ;;  %v3464_v27 = vld [vmem:[%s6224_s0 + $0x25c] sm:$0x1] }
  0x32   :  { %6576 = vst [vmem:[#allocation68_spill] sm:$0xff] %v3454_v8  ;;  %6577 = vst [vmem:[#allocation69_spill] sm:$0xff] %v3459_v7  ;;  %v3473_v36 = vld [vmem:[%s6224_s0 + $0x260] ss:$8 sps:$4 sm:$0xff]   ;;  %v3478_v16 = vld [vmem:[%s6224_s0 + $0x264] sm:$0x1] }
  0x33   :  { %6578 = vst [vmem:[#allocation70_spill] sm:$0xff] %v3464_v27  ;;  %6579 = vst [vmem:[#allocation71_spill] sm:$0xff] %v3473_v36  ;;  %v3483_v21 = vld [vmem:[%s6224_s0 + $0x26c] sm:$0x1]  ;;  %v3492_v13 = vld [vmem:[%s6224_s0 + $0x270] ss:$8 sps:$4 sm:$0xff]  }
  0x34   :  { %6580 = vst [vmem:[#allocation72_spill] sm:$0xff] %v3478_v16  ;;  %6581 = vst [vmem:[#allocation73_spill] sm:$0xff] %v3483_v21  ;;  %v3497_v14 = vld [vmem:[%s6224_s0 + $0x274] sm:$0x1]  ;;  %v3502_v15 = vld [vmem:[%s6224_s0 + $0x27c] sm:$0x1] }
  0x35   :  { %6582 = vst [vmem:[#allocation74_spill] sm:$0xff] %v3492_v13  ;;  %6583 = vst [vmem:[#allocation75_spill] sm:$0xff] %v3497_v14  ;;  %v3511_v7 = vld [vmem:[%s6224_s0 + $0x280] ss:$8 sps:$4 sm:$0xff]   ;;  %v3516_v8 = vld [vmem:[%s6224_s0 + $0x284] sm:$0x1] }
  0x36   :  { %6584 = vst [vmem:[#allocation76_spill] sm:$0xff] %v3502_v15  ;;  %6585 = vst [vmem:[#allocation77_spill] sm:$0xff] %v3511_v7  ;;  %v3521_v9 = vld [vmem:[%s6224_s0 + $0x28c] sm:$0x1]  ;;  %v3530_v16 = vld [vmem:[%s6224_s0 + $0x290] ss:$8 sps:$4 sm:$0xff]  }
  0x37   :  { %6586 = vst [vmem:[#allocation78_spill] sm:$0xff] %v3516_v8  ;;  %6587 = vst [vmem:[#allocation79_spill] sm:$0xff] %v3521_v9  ;;  %v3535_v36 = vld [vmem:[%s6224_s0 + $0x294] sm:$0x1]  ;;  %v3540_v6 = vld [vmem:[%s6224_s0 + $0x29c] sm:$0x1] }
  0x38   :  { %6588 = vst [vmem:[#allocation80_spill] sm:$0xff] %v3530_v16  ;;  %6589 = vst [vmem:[#allocation81_spill] sm:$0xff] %v3535_v36  ;;  %v3549_v14 = vld [vmem:[%s6224_s0 + $0x2a0] ss:$8 sps:$4 sm:$0xff]   ;;  %v3554_v13 = vld [vmem:[%s6224_s0 + $0x2a4] sm:$0x1] }
  0x39   :  { %6590 = vst [vmem:[#allocation82_spill] sm:$0xff] %v3540_v6  ;;  %6591 = vst [vmem:[#allocation83_spill] sm:$0xff] %v3549_v14  ;;  %v3559_v30 = vld [vmem:[%s6224_s0 + $0x2ac] sm:$0x1]  ;;  %v3568_v8 = vld [vmem:[%s6224_s0 + $0x2b0] ss:$8 sps:$4 sm:$0xff]  }
  0x3a   :  { %6592 = vst [vmem:[#allocation84_spill] sm:$0xff] %v3554_v13  ;;  %6593 = vst [vmem:[#allocation85_spill] sm:$0xff] %v3559_v30  ;;  %v3573_v7 = vld [vmem:[%s6224_s0 + $0x2b4] sm:$0x1]  ;;  %v3578_v27 = vld [vmem:[%s6224_s0 + $0x2bc] sm:$0x1] }
  0x3b   :  { %6594 = vst [vmem:[#allocation86_spill] sm:$0xff] %v3568_v8  ;;  %6595 = vst [vmem:[#allocation87_spill] sm:$0xff] %v3573_v7  ;;  %v3587_v36 = vld [vmem:[%s6224_s0 + $0x2c0] ss:$8 sps:$4 sm:$0xff]   ;;  %v3592_v16 = vld [vmem:[%s6224_s0 + $0x2c4] sm:$0x1] }
  0x3c   :  { %6596 = vst [vmem:[#allocation88_spill] sm:$0xff] %v3578_v27  ;;  %6597 = vst [vmem:[#allocation89_spill] sm:$0xff] %v3587_v36  ;;  %v3597_v21 = vld [vmem:[%s6224_s0 + $0x2cc] sm:$0x1]  ;;  %v3606_v13 = vld [vmem:[%s6224_s0 + $0x2d0] ss:$8 sps:$4 sm:$0xff]  }
  0x3d   :  { %6598 = vst [vmem:[#allocation90_spill] sm:$0xff] %v3592_v16  ;;  %6599 = vst [vmem:[#allocation91_spill] sm:$0xff] %v3597_v21  ;;  %v3611_v14 = vld [vmem:[%s6224_s0 + $0x2d4] sm:$0x1]  ;;  %v3616_v15 = vld [vmem:[%s6224_s0 + $0x2dc] sm:$0x1] }
  0x3e   :  { %6600 = vst [vmem:[#allocation92_spill] sm:$0xff] %v3606_v13  ;;  %6601 = vst [vmem:[#allocation93_spill] sm:$0xff] %v3611_v14  ;;  %v3625_v7 = vld [vmem:[%s6224_s0 + $0x2e0] ss:$8 sps:$4 sm:$0xff]   ;;  %v3630_v8 = vld [vmem:[%s6224_s0 + $0x2e4] sm:$0x1] }
  0x3f   :  { %6602 = vst [vmem:[#allocation94_spill] sm:$0xff] %v3616_v15  ;;  %6603 = vst [vmem:[#allocation95_spill] sm:$0xff] %v3625_v7  ;;  %v3635_v9 = vld [vmem:[%s6224_s0 + $0x2ec] sm:$0x1]  ;;  %v3644_v16 = vld [vmem:[%s6224_s0 + $0x2f0] ss:$8 sps:$4 sm:$0xff]  }
  0x40   :  { %6604 = vst [vmem:[#allocation96_spill] sm:$0xff] %v3630_v8  ;;  %6605 = vst [vmem:[#allocation97_spill] sm:$0xff] %v3635_v9  ;;  %v3649_v36 = vld [vmem:[%s6224_s0 + $0x2f4] sm:$0x1]  ;;  %v3654_v6 = vld [vmem:[%s6224_s0 + $0x2fc] sm:$0x1] }
  0x41   :  { %6606 = vst [vmem:[#allocation98_spill] sm:$0xff] %v3644_v16  ;;  %6607 = vst [vmem:[#allocation99_spill] sm:$0xff] %v3649_v36  ;;  %v3663_v14 = vld [vmem:[%s6224_s0 + $0x300] ss:$8 sps:$4 sm:$0xff]   ;;  %v3668_v13 = vld [vmem:[%s6224_s0 + $0x304] sm:$0x1] }
  0x42   :  { %6608 = vst [vmem:[#allocation100_spill] sm:$0xff] %v3654_v6  ;;  %6609 = vst [vmem:[#allocation101_spill] sm:$0xff] %v3663_v14  ;;  %v3673_v30 = vld [vmem:[%s6224_s0 + $0x30c] sm:$0x1]  ;;  %v3682_v8 = vld [vmem:[%s6224_s0 + $0x310] ss:$8 sps:$4 sm:$0xff]  }
  0x43   :  { %6610 = vst [vmem:[#allocation102_spill] sm:$0xff] %v3668_v13  ;;  %6611 = vst [vmem:[#allocation103_spill] sm:$0xff] %v3673_v30  ;;  %v3687_v7 = vld [vmem:[%s6224_s0 + $0x314] sm:$0x1]  ;;  %v3692_v27 = vld [vmem:[%s6224_s0 + $0x31c] sm:$0x1] }
  0x44   :  { %6612 = vst [vmem:[#allocation104_spill] sm:$0xff] %v3682_v8  ;;  %6613 = vst [vmem:[#allocation105_spill] sm:$0xff] %v3687_v7  ;;  %v3701_v36 = vld [vmem:[%s6224_s0 + $0x320] ss:$8 sps:$4 sm:$0xff]   ;;  %v3706_v16 = vld [vmem:[%s6224_s0 + $0x324] sm:$0x1] }
  0x45   :  { %6614 = vst [vmem:[#allocation106_spill] sm:$0xff] %v3692_v27  ;;  %6615 = vst [vmem:[#allocation107_spill] sm:$0xff] %v3701_v36  ;;  %v3711_v21 = vld [vmem:[%s6224_s0 + $0x32c] sm:$0x1]  ;;  %v3720_v13 = vld [vmem:[%s6224_s0 + $0x330] ss:$8 sps:$4 sm:$0xff]  }
  0x46   :  { %6616 = vst [vmem:[#allocation108_spill] sm:$0xff] %v3706_v16  ;;  %6617 = vst [vmem:[#allocation109_spill] sm:$0xff] %v3711_v21  ;;  %v3725_v14 = vld [vmem:[%s6224_s0 + $0x334] sm:$0x1]  ;;  %v3730_v15 = vld [vmem:[%s6224_s0 + $0x33c] sm:$0x1] }
  0x47   :  { %6618 = vst [vmem:[#allocation110_spill] sm:$0xff] %v3720_v13  ;;  %6619 = vst [vmem:[#allocation111_spill] sm:$0xff] %v3725_v14  ;;  %v3739_v7 = vld [vmem:[%s6224_s0 + $0x340] ss:$8 sps:$4 sm:$0xff]   ;;  %v3744_v8 = vld [vmem:[%s6224_s0 + $0x344] sm:$0x1] }
  0x48   :  { %6620 = vst [vmem:[#allocation112_spill] sm:$0xff] %v3730_v15  ;;  %6621 = vst [vmem:[#allocation113_spill] sm:$0xff] %v3739_v7  ;;  %v3749_v9 = vld [vmem:[%s6224_s0 + $0x34c] sm:$0x1]  ;;  %v3758_v16 = vld [vmem:[%s6224_s0 + $0x350] ss:$8 sps:$4 sm:$0xff]  }
  0x49   :  { %6622 = vst [vmem:[#allocation114_spill] sm:$0xff] %v3744_v8  ;;  %6623 = vst [vmem:[#allocation115_spill] sm:$0xff] %v3749_v9  ;;  %v3763_v36 = vld [vmem:[%s6224_s0 + $0x354] sm:$0x1]  ;;  %v3768_v6 = vld [vmem:[%s6224_s0 + $0x35c] sm:$0x1] }
  0x4a   :  { %6624 = vst [vmem:[#allocation116_spill] sm:$0xff] %v3758_v16  ;;  %6625 = vst [vmem:[#allocation117_spill] sm:$0xff] %v3763_v36  ;;  %v3777_v14 = vld [vmem:[%s6224_s0 + $0x360] ss:$8 sps:$4 sm:$0xff]   ;;  %v3782_v13 = vld [vmem:[%s6224_s0 + $0x364] sm:$0x1] }
  0x4b   :  { %6626 = vst [vmem:[#allocation118_spill] sm:$0xff] %v3768_v6  ;;  %6627 = vst [vmem:[#allocation119_spill] sm:$0xff] %v3777_v14  ;;  %v3787_v30 = vld [vmem:[%s6224_s0 + $0x36c] sm:$0x1]  ;;  %v3796_v8 = vld [vmem:[%s6224_s0 + $0x370] ss:$8 sps:$4 sm:$0xff]  }
  0x4c   :  { %6628 = vst [vmem:[#allocation120_spill] sm:$0xff] %v3782_v13  ;;  %6629 = vst [vmem:[#allocation121_spill] sm:$0xff] %v3787_v30  ;;  %v3801_v7 = vld [vmem:[%s6224_s0 + $0x374] sm:$0x1]  ;;  %v3806_v21 = vld [vmem:[%s6224_s0 + $0x37c] sm:$0x1] }
  0x4d   :  { %6630 = vst [vmem:[#allocation122_spill] sm:$0xff] %v3796_v8  ;;  %6631 = vst [vmem:[#allocation123_spill] sm:$0xff] %v3801_v7  ;;  %v3815_v36 = vld [vmem:[%s6224_s0 + $0x380] ss:$8 sps:$4 sm:$0xff]   ;;  %v3820_v16 = vld [vmem:[%s6224_s0 + $0x384] sm:$0x1] }
  0x4e   :  { %6632 = vst [vmem:[#allocation124_spill] sm:$0xff] %v3806_v21  ;;  %6633 = vst [vmem:[#allocation125_spill] sm:$0xff] %v3815_v36  ;;  %v3825_v15 = vld [vmem:[%s6224_s0 + $0x38c] sm:$0x1]  ;;  %v3834_v13 = vld [vmem:[%s6224_s0 + $0x390] ss:$8 sps:$4 sm:$0xff]  }
  0x4f   :  { %6634 = vst [vmem:[#allocation126_spill] sm:$0xff] %v3820_v16  ;;  %6635 = vst [vmem:[#allocation127_spill] sm:$0xff] %v3825_v15  ;;  %v3839_v14 = vld [vmem:[%s6224_s0 + $0x394] sm:$0x1]  ;;  %v3844_v9 = vld [vmem:[%s6224_s0 + $0x39c] sm:$0x1] }
  0x50   :  { %6636 = vst [vmem:[#allocation128_spill] sm:$0xff] %v3834_v13  ;;  %6637 = vst [vmem:[#allocation129_spill] sm:$0xff] %v3839_v14  ;;  %v3853_v7 = vld [vmem:[%s6224_s0 + $0x3a0] ss:$8 sps:$4 sm:$0xff]   ;;  %v3858_v8 = vld [vmem:[%s6224_s0 + $0x3a4] sm:$0x1] }
  0x51   :  { %6638 = vst [vmem:[#allocation130_spill] sm:$0xff] %v3844_v9  ;;  %6639 = vst [vmem:[#allocation131_spill] sm:$0xff] %v3853_v7  ;;  %v3863_v27 = vld [vmem:[%s6224_s0 + $0x3ac] sm:$0x1]  ;;  %v3872_v16 = vld [vmem:[%s6224_s0 + $0x3b0] ss:$8 sps:$4 sm:$0xff]  }
  0x52   :  { %6640 = vst [vmem:[#allocation132_spill] sm:$0xff] %v3858_v8  ;;  %6641 = vst [vmem:[#allocation133_spill] sm:$0xff] %v3863_v27  ;;  %v3877_v36 = vld [vmem:[%s6224_s0 + $0x3b4] sm:$0x1]  ;;  %v3882_v6 = vld [vmem:[%s6224_s0 + $0x3bc] sm:$0x1]  ;;  %v6658_v27 = vunpack.c.l.bf16 %v2760_v1 }
  0x53   :  { %6642 = vst [vmem:[#allocation134_spill] sm:$0xff] %v3872_v16  ;;  %6643 = vst [vmem:[#allocation135_spill] sm:$0xff] %v3877_v36  ;;  %v3891_v14 = vld [vmem:[%s6224_s0 + $0x3c0] ss:$8 sps:$4 sm:$0xff]   ;;  %v3896_v13 = vld [vmem:[%s6224_s0 + $0x3c4] sm:$0x1] }
  0x54   :  { %6644 = vst [vmem:[#allocation136_spill] sm:$0xff] %v3882_v6  ;;  %6645 = vst [vmem:[#allocation137_spill] sm:$0xff] %v3891_v14  ;;  %v3901_v30 = vld [vmem:[%s6224_s0 + $0x3cc] sm:$0x1]  ;;  %v3910_v8 = vld [vmem:[%s6224_s0 + $0x3d0] ss:$8 sps:$4 sm:$0xff]  }
  0x55   :  { %6646 = vst [vmem:[#allocation138_spill] sm:$0xff] %v3896_v13  ;;  %6647 = vst [vmem:[#allocation139_spill] sm:$0xff] %v3901_v30  ;;  %v3915_v7 = vld [vmem:[%s6224_s0 + $0x3d4] sm:$0x1]  ;;  %v3920_v21 = vld [vmem:[%s6224_s0 + $0x3dc] sm:$0x1]  ;;  %v6659_v30 = vunpack.c.h.bf16 %v2755_v0 }
  0x56   :  { %6648 = vst [vmem:[#allocation140_spill] sm:$0xff] %v3910_v8  ;;  %6649 = vst [vmem:[#allocation141_spill] sm:$0xff] %v3915_v7  ;;  %v3929_v36 = vld [vmem:[%s6224_s0 + $0x3e0] ss:$8 sps:$4 sm:$0xff]   ;;  %v3934_v16 = vld [vmem:[%s6224_s0 + $0x3e4] sm:$0x1]  ;;  %v6660_v7 = vunpack.c.l.bf16 %v2765_v2 }
  0x57   :  { %6650 = vst [vmem:[#allocation142_spill] sm:$0xff] %v3920_v21  ;;  %6651 = vst [vmem:[#allocation143_spill] sm:$0xff] %v3929_v36  ;;  %v3939_v15 = vld [vmem:[%s6224_s0 + $0x3ec] sm:$0x1]  ;;  %v3948_v13 = vld [vmem:[%s6224_s0 + $0x3f0] ss:$8 sps:$4 sm:$0xff]  }
  0x58   :  { %6652 = vst [vmem:[#allocation144_spill] sm:$0xff] %v3934_v16  ;;  %6653 = vst [vmem:[#allocation145_spill] sm:$0xff] %v3939_v15  ;;  %v3953_v14 = vld [vmem:[%s6224_s0 + $0x3f4] sm:$0x1]  ;;  %v3958_v9 = vld [vmem:[%s6224_s0 + $0x3fc] sm:$0x1] }
  0x59   :  { %6654 = vst [vmem:[#allocation146_spill] sm:$0xff] %v3948_v13  ;;  %6655 = vst [vmem:[#allocation147_spill] sm:$0xff] %v3953_v14  ;;  %v521_v23 = vsel %vm520_vm0, %v6657_v22, -inf  ;;  %v523_v6 = vsel %vm522_vm1, %v6658_v27, -inf  ;;  %v531_v21 = vsel %vm520_vm0, %v6659_v30, -inf  ;;  %v532_v8 = vsel %vm522_vm1, %v6660_v7, -inf }
  0x5a   :  { %6656 = vst [vmem:[#allocation148_spill] sm:$0xff] %v3958_v9  ;;  %v524_v14 = vmax.f32 %v521_v23, %v523_v6  ;;  %v533_v20 = vmax.f32 %v531_v21, %v532_v8  ;;  %v540_v9 = vsel %vm520_vm0, %v6661_v42, -inf  ;;  %v6662_v22 = vunpack.c.l.bf16 %v2775_v4 }
  0x5b   :  { %v6663_v27 = vunpack.c.h.bf16 %v2770_v3  ;;  %v6664_v30 = vunpack.c.l.bf16 %v2780_v5  ;;  %v6665_v6 = vunpack.c.l.bf16 %v2789_v10  ;;  %v6666_v4 = vunpack.c.l.bf16 %v2794_v11 }
  0x5c   :  { %v541_v1 = vsel %vm522_vm1, %v6662_v22, -inf  ;;  %v525_v8 = vrot.slane %v524_v14, 4  ;;  %v534_v21 = vrot.slane %v533_v20, 4  ;;  %v6667_v3 = vunpack.c.h.bf16 %v2789_v10 }
  0x5d   :  { %v542_v13 = vmax.f32 %v540_v9, %v541_v1  ;;  %v549_v0 = vsel %vm520_vm0, %v6663_v27, -inf  ;;  %v550_v2 = vsel %vm522_vm1, %v6664_v30, -inf  ;;  %v558_v7 = vsel %vm520_vm0, %v6665_v6, -inf }
  0x5e   :  { %v551_v23 = vmax.f32 %v549_v0, %v550_v2  ;;  %v559_v42 = vsel %vm522_vm1, %v6666_v4, -inf  ;;  %v567_v1 = vsel %vm520_vm0, %v6667_v3, -inf  ;;  %v6668_v5 = vunpack.c.l.bf16 %v2799_v12 }
  0x5f   :  { %v543_v9 = vrot.slane %v542_v13, 4  ;;  %v560_v22 = vmax.f32 %v558_v7, %v559_v42  ;;  %v526_v30 = vmax.f32 %v524_v14, %v525_v8  ;;  %v535_v15 = vmax.f32 %v533_v20, %v534_v21 }
  0x60   :  { %v568_v27 = vsel %vm522_vm1, %v6668_v5, -inf  ;;  %v552_v6 = vrot.slane %v551_v23, 4  ;;  %v6669_v11 = vunpack.c.l.bf16 %v2808_v17  ;;  %v6670_v7 = vunpack.c.l.bf16 %v2813_v18 }
  0x61   :  { %v569_v16 = vmax.f32 %v567_v1, %v568_v27  ;;  %v544_v36 = vmax.f32 %v542_v13, %v543_v9  ;;  %v561_v0 = vrot.slane %v560_v22, 4  ;;  %v527_v4 = vrot.slane %v526_v30, 2 }
  0x62   :  { %v576_v2 = vsel %vm520_vm0, %v6669_v11, -inf  ;;  %v577_v10 = vsel %vm522_vm1, %v6670_v7, -inf  ;;  %v536_v42 = vrot.slane %v535_v15, 2  ;;  %v553_v3 = vmax.f32 %v551_v23, %v552_v6 }
  0x63   :  { %v570_v12 = vrot.slane %v569_v16, 4  ;;  %v545_v48 = vrot.slane %v544_v36, 2  ;;  %v562_v5 = vmax.f32 %v560_v22, %v561_v0  ;;  %v578_v14 = vmax.f32 %v576_v2, %v577_v10 }
  0x64   :  { %v6671_v20 = vunpack.c.h.bf16 %v2808_v17  ;;  %v528_v8 = vmax.f32 %v526_v30, %v527_v4  ;;  %v537_v21 = vmax.f32 %v535_v15, %v536_v42  ;;  %v554_v9 = vrot.slane %v553_v3, 2 }
  0x65   :  { %v571_v1 = vmax.f32 %v569_v16, %v570_v12  ;;  %v546_v27 = vmax.f32 %v544_v36, %v545_v48  ;;  %v563_v11 = vrot.slane %v562_v5, 2  ;;  %v579_v18 = vrot.slane %v578_v14, 4 }
  0x66   :  { %v585_v13 = vsel %vm520_vm0, %v6671_v20, -inf  ;;  %v6672_v7 = vunpack.c.l.bf16 %v2818_v19  ;;  %v529_v23 = vrot.slane %v528_v8, 1  ;;  %v538_v6 = vrot.slane %v537_v21, 1 }
  0x67   :  { %v555_v29 = vmax.f32 %v553_v3, %v554_v9  ;;  %v572_v22 = vrot.slane %v571_v1, 2  ;;  %v547_v0 = vrot.slane %v546_v27, 1  ;;  %v564_v2 = vmax.f32 %v562_v5, %v563_v11 }
  0x68   :  { %v586_v28 = vsel %vm522_vm1, %v6672_v7, -inf  ;;  %v580_v17 = vmax.f32 %v578_v14, %v579_v18  ;;  %v4016_v20 = vmax.f32 %v528_v8, %v529_v23  ;;  %v4018_v15 = vmax.f32 %v537_v21, %v538_v6 }
  0x69   :  { %v587_v10 = vmax.f32 %v585_v13, %v586_v28  ;;  %v556_v16 = vrot.slane %v555_v29, 1  ;;  %v573_v36 = vmax.f32 %v571_v1, %v572_v22  ;;  %v4020_v48 = vmax.f32 %v546_v27, %v547_v0 }
  0x6a   :  { %v565_v30 = vrot.slane %v564_v2, 1  ;;  %v581_v19 = vrot.slane %v580_v17, 2  ;;  %v6673_v3 = vunpack.c.l.bf16 %v2827_v24  ;;  %v6674_v28 = vunpack.c.l.bf16 %v2832_v25 }
  0x6b   :  { %v588_v4 = vrot.slane %v587_v10, 4  ;;  %v4022_v42 = vmax.f32 %v555_v29, %v556_v16  ;;  %v574_v12 = vrot.slane %v573_v36, 1  ;;  %v6675_v27 = vunpack.c.h.bf16 %v2827_v24 }
  0x6c   :  { %v594_v5 = vsel %vm520_vm0, %v6673_v3, -inf  ;;  %v595_v14 = vsel %vm522_vm1, %v6674_v28, -inf  ;;  %v4030_v13 = vmax.f32 %v564_v2, %v565_v30  ;;  %v582_v8 = vmax.f32 %v580_v17, %v581_v19 }
  0x6d   :  { %v589_v21 = vmax.f32 %v587_v10, %v588_v4  ;;  %v596_v9 = vmax.f32 %v594_v5, %v595_v14  ;;  %v4032_v1 = vmax.f32 %v573_v36, %v574_v12  ;;  %v603_v29 = vsel %vm520_vm0, %v6675_v27, -inf }
  0x6e   :  { %v6676_v11 = vunpack.c.l.bf16 %v2837_v26  ;;  %v6677_v7 = vunpack.c.l.bf16 %v2846_v31  ;;  %v583_v23 = vrot.slane %v582_v8, 1  ;;  %v6678_v2 = vunpack.c.l.bf16 %v2851_v32 }
  0x6f   :  { %v590_v6 = vrot.slane %v589_v21, 2  ;;  %v597_v22 = vrot.slane %v596_v9, 4  ;;  %v6679_v24 = vunpack.c.h.bf16 %v2846_v31  ;;  %v6680_v26 = vunpack.c.l.bf16 %v2856_v33 }
  0x70   :  { %v604_v18 = vsel %vm522_vm1, %v6676_v11, -inf  ;;  %v612_v25 = vsel %vm520_vm0, %v6677_v7, -inf  ;;  %v613_v17 = vsel %vm522_vm1, %v6678_v2, -inf  ;;  %v6681_v36 = vunpack.c.l.bf16 %v2865_v38 }
  0x71   :  { %v605_v0 = vmax.f32 %v603_v29, %v604_v18  ;;  %v621_v10 = vsel %vm520_vm0, %v6679_v24, -inf  ;;  %v622_v16 = vsel %vm522_vm1, %v6680_v26, -inf  ;;  %v4055_v19 = vmax.f32 %v582_v8, %v583_v23 }
  0x72   :  { %v630_v30 = vsel %vm520_vm0, %v6681_v36, -inf  ;;  %v591_v4 = vmax.f32 %v589_v21, %v590_v6  ;;  %v598_v12 = vmax.f32 %v596_v9, %v597_v22  ;;  %v614_v32 = vmax.f32 %v612_v25, %v613_v17 }
  0x73   :  { %v606_v3 = vrot.slane %v605_v0, 4  ;;  %v623_v5 = vmax.f32 %v621_v10, %v622_v16  ;;  %v6682_v28 = vunpack.c.l.bf16 %v2870_v39  ;;  %v6683_v14 = vunpack.c.h.bf16 %v2865_v38 }
  0x74   :  { %v592_v27 = vrot.slane %v591_v4, 1  ;;  %v599_v29 = vrot.slane %v598_v12, 2  ;;  %v615_v7 = vrot.slane %v614_v32, 4  ;;  %v6684_v21 = vunpack.c.l.bf16 %v2875_v40 }
  0x75   :  { %v631_v31 = vsel %vm522_vm1, %v6682_v28, -inf  ;;  %v639_v33 = vsel %vm520_vm0, %v6683_v14, -inf  ;;  %v607_v11 = vmax.f32 %v605_v0, %v606_v3  ;;  %v624_v8 = vrot.slane %v623_v5, 4 }
  0x76   :  { %v632_v18 = vmax.f32 %v630_v30, %v631_v31  ;;  %v640_v9 = vsel %vm522_vm1, %v6684_v21, -inf  ;;  %v6685_v25 = vunpack.c.l.bf16 %v2884_v45  ;;  %v4069_v23 = vmax.f32 %v591_v4, %v592_v27 }
  0x77   :  { %v600_v6 = vmax.f32 %v598_v12, %v599_v29  ;;  %v608_v38 = vrot.slane %v607_v11, 2  ;;  %v616_v2 = vmax.f32 %v614_v32, %v615_v7  ;;  %v625_v17 = vmax.f32 %v623_v5, %v624_v8 }
  0x78   :  { %v648_v39 = vsel %vm520_vm0, %v6685_v25, -inf  ;;  %v633_v22 = vrot.slane %v632_v18, 4  ;;  %v641_v24 = vmax.f32 %v639_v33, %v640_v9  ;;  %v6686_v0 = vunpack.c.l.bf16 %v2889_v46 }
  0x79   :  { %v601_v26 = vrot.slane %v600_v6, 1  ;;  %v609_v40 = vmax.f32 %v607_v11, %v608_v38  ;;  %v617_v30 = vrot.slane %v616_v2, 2  ;;  %v626_v3 = vrot.slane %v625_v17, 2 }
  0x7a   :  { %v649_v10 = vsel %vm522_vm1, %v6686_v0, -inf  ;;  %v634_v16 = vmax.f32 %v632_v18, %v633_v22  ;;  %v642_v28 = vrot.slane %v641_v24, 4  ;;  %v6687_v4 = vunpack.c.h.bf16 %v2884_v45 }
  0x7b   :  { %v650_v36 = vmax.f32 %v648_v39, %v649_v10  ;;  %v4077_v31 = vmax.f32 %v600_v6, %v601_v26  ;;  %v610_v32 = vrot.slane %v609_v40, 1  ;;  %v618_v33 = vmax.f32 %v616_v2, %v617_v30 }
  0x7c   :  { %v657_v12 = vsel %vm520_vm0, %v6687_v4, -inf  ;;  %v635_v5 = vrot.slane %v634_v16, 2  ;;  %v627_v46 = vmax.f32 %v625_v17, %v626_v3  ;;  %v643_v27 = vmax.f32 %v641_v24, %v642_v28 }
  0x7d   :  { %v651_v14 = vrot.slane %v650_v36, 4  ;;  %v6688_v29 = vunpack.c.l.bf16 %v2894_v47  ;;  %v4082_v18 = vmax.f32 %v609_v40, %v610_v32  ;;  %v619_v45 = vrot.slane %v618_v33, 1 }
  0x7e   :  { %v636_v7 = vmax.f32 %v634_v16, %v635_v5  ;;  %v628_v9 = vrot.slane %v627_v46, 1  ;;  %v644_v25 = vrot.slane %v643_v27, 2  ;;  %v6689_v39 = vunpack.c.l.bf16 %v2903_v52 }
  0x7f   :  { %v658_v11 = vsel %vm522_vm1, %v6688_v29, -inf  ;;  %v652_v8 = vmax.f32 %v650_v36, %v651_v14  ;;  %v6690_v17 = vunpack.c.l.bf16 %v2908_v53  ;;  %v4090_v24 = vmax.f32 %v618_v33, %v619_v45 }
  0x80   :  { %v659_v21 = vmax.f32 %v657_v12, %v658_v11  ;;  %v666_v6 = vsel %vm520_vm0, %v6689_v39, -inf  ;;  %v637_v38 = vrot.slane %v636_v7, 1  ;;  %v4092_v0 = vmax.f32 %v627_v46, %v628_v9 }
  0x81   :  { %v653_v22 = vrot.slane %v652_v8, 2  ;;  %v667_v47 = vsel %vm522_vm1, %v6690_v17, -inf  ;;  %v645_v10 = vmax.f32 %v643_v27, %v644_v25  ;;  %v6691_v30 = vunpack.c.h.bf16 %v2903_v52 }
  0x82   :  { %v660_v2 = vrot.slane %v659_v21, 4  ;;  %v668_v26 = vmax.f32 %v666_v6, %v667_v47  ;;  %v4094_v40 = vmax.f32 %v636_v7, %v637_v38  ;;  %v6692_v53 = vunpack.c.l.bf16 %v2913_v54 }
  0x83   :  { %v654_v16 = vmax.f32 %v652_v8, %v653_v22  ;;  %v675_v3 = vsel %vm520_vm0, %v6691_v30, -inf  ;;  %v646_v28 = vrot.slane %v645_v10, 1  ;;  %v6693_v32 = vunpack.c.l.bf16 %v2922_v59 }
  0x84   :  { %v661_v36 = vmax.f32 %v659_v21, %v660_v2  ;;  %v669_v4 = vrot.slane %v668_v26, 4  ;;  %v676_v12 = vsel %vm522_vm1, %v6692_v53, -inf  ;;  %v6694_v27 = vunpack.c.l.bf16 %v2927_v60 }
  0x85   :  { %v684_v5 = vsel %vm520_vm0, %v6693_v32, -inf  ;;  %v655_v14 = vrot.slane %v654_v16, 1  ;;  %v677_v46 = vmax.f32 %v675_v3, %v676_v12  ;;  %v4108_v52 = vmax.f32 %v645_v10, %v646_v28 }
  0x86   :  { %v662_v33 = vrot.slane %v661_v36, 2  ;;  %v685_v29 = vsel %vm522_vm1, %v6694_v27, -inf  ;;  %v670_v11 = vmax.f32 %v668_v26, %v669_v4  ;;  %v6695_v8 = vunpack.c.h.bf16 %v2922_v59 }
  0x87   :  { %v686_v7 = vmax.f32 %v684_v5, %v685_v29  ;;  %v4113_v21 = vmax.f32 %v654_v16, %v655_v14  ;;  %v678_v9 = vrot.slane %v677_v46, 4  ;;  %v6696_v25 = vunpack.c.l.bf16 %v2932_v61 }
  0x88   :  { %v693_v54 = vsel %vm520_vm0, %v6695_v8, -inf  ;;  %v663_v45 = vmax.f32 %v661_v36, %v662_v33  ;;  %v671_v6 = vrot.slane %v670_v11, 2  ;;  %v6697_v22 = vunpack.c.l.bf16 %v2941_v56 }
  0x89   :  { %v694_v39 = vsel %vm522_vm1, %v6696_v25, -inf  ;;  %v687_v60 = vrot.slane %v686_v7, 4  ;;  %v679_v47 = vmax.f32 %v677_v46, %v678_v9  ;;  %v6698_v59 = vunpack.c.l.bf16 %v2946_v55 }
  0x8a   :  { %v695_v38 = vmax.f32 %v693_v54, %v694_v39  ;;  %v702_v2 = vsel %vm520_vm0, %v6697_v22, -inf  ;;  %v664_v17 = vrot.slane %v663_v45, 1  ;;  %v6699_v26 = vunpack.c.h.bf16 %v2941_v56 }
  0x8b   :  { %v703_v10 = vsel %vm522_vm1, %v6698_v59, -inf  ;;  %v672_v61 = vmax.f32 %v670_v11, %v671_v6  ;;  %v688_v36 = vmax.f32 %v686_v7, %v687_v60  ;;  %v680_v4 = vrot.slane %v679_v47, 2 }
  0x8c   :  { %v711_v16 = vsel %vm520_vm0, %v6699_v26, -inf  ;;  %v696_v30 = vrot.slane %v695_v38, 4  ;;  %v704_v3 = vmax.f32 %v702_v2, %v703_v10  ;;  %v4127_v28 = vmax.f32 %v663_v45, %v664_v17 }
  0x8d   :  { %v6700_v53 = vunpack.c.l.bf16 %v2951_v62  ;;  %v6701_v32 = vunpack.c.l.bf16 %v2960_v50  ;;  %v673_v5 = vrot.slane %v672_v61, 1  ;;  %v689_v14 = vrot.slane %v688_v36, 2 }
  0x8e   :  { %v697_v56 = vmax.f32 %v695_v38, %v696_v30  ;;  %v705_v33 = vrot.slane %v704_v3, 4  ;;  %v681_v46 = vmax.f32 %v679_v47, %v680_v4  ;;  %v6702_v29 = vunpack.c.l.bf16 %v2965_v49 }
  0x8f   :  { %v712_v12 = vsel %vm522_vm1, %v6700_v53, -inf  ;;  %v720_v55 = vsel %vm520_vm0, %v6701_v32, -inf  ;;  %v6703_v7 = vunpack.c.h.bf16 %v2960_v50  ;;  %v4141_v8 = vmax.f32 %v672_v61, %v673_v5 }
  0x90   :  { %v713_v27 = vmax.f32 %v711_v16, %v712_v12  ;;  %v721_v11 = vsel %vm522_vm1, %v6702_v29, -inf  ;;  %v690_v54 = vmax.f32 %v688_v36, %v689_v14  ;;  %v698_v45 = vrot.slane %v697_v56, 2 }
  0x91   :  { %v729_v62 = vsel %vm520_vm0, %v6703_v7, -inf  ;;  %v706_v9 = vmax.f32 %v704_v3, %v705_v33  ;;  %v682_v25 = vrot.slane %v681_v46, 1  ;;  %v722_v6 = vmax.f32 %v720_v55, %v721_v11 }
  0x92   :  { %v714_v39 = vrot.slane %v713_v27, 4  ;;  %v6704_v60 = vunpack.c.l.bf16 %v2970_v63  ;;  %v691_v22 = vrot.slane %v690_v54, 1  ;;  %v699_v49 = vmax.f32 %v697_v56, %v698_v45 }
  0x93   :  { %v707_v2 = vrot.slane %v706_v9, 2  ;;  %v4146_v47 = vmax.f32 %v681_v46, %v682_v25  ;;  %v723_v59 = vrot.slane %v722_v6, 4  ;;  %v6705_v10 = vunpack.c.l.bf16 %v2979_v44 }
  0x94   :  { %v730_v38 = vsel %vm522_vm1, %v6704_v60, -inf  ;;  %v715_v50 = vmax.f32 %v713_v27, %v714_v39  ;;  %v4151_v16 = vmax.f32 %v690_v54, %v691_v22  ;;  %v700_v61 = vrot.slane %v699_v49, 1 }
  0x95   :  { %v731_v17 = vmax.f32 %v729_v62, %v730_v38  ;;  %v738_v26 = vsel %vm520_vm0, %v6705_v10, -inf  ;;  %v708_v36 = vmax.f32 %v706_v9, %v707_v2  ;;  %v724_v3 = vmax.f32 %v722_v6, %v723_v59 }
  0x96   :  { %v716_v63 = vrot.slane %v715_v50, 2  ;;  %v6706_v4 = vunpack.c.l.bf16 %v2984_v43  ;;  %v6707_v12 = vunpack.c.h.bf16 %v2979_v44  ;;  %v4159_v55 = vmax.f32 %v699_v49, %v700_v61 }
  0x97   :  { %v732_v30 = vrot.slane %v731_v17, 4  ;;  %v709_v5 = vrot.slane %v708_v36, 1  ;;  %v725_v46 = vrot.slane %v724_v3, 2  ;;  %v6708_v27 = vunpack.c.l.bf16 %v2989_v58 }
  0x98   :  { %v739_v53 = vsel %vm522_vm1, %v6706_v4, -inf  ;;  %v747_v32 = vsel %vm520_vm0, %v6707_v12, -inf  ;;  %v717_v33 = vmax.f32 %v715_v50, %v716_v63  ;;  %v6709_v11 = vunpack.c.l.bf16 %v2998_v41 }
  0x99   :  { %v733_v14 = vmax.f32 %v731_v17, %v732_v30  ;;  %v740_v56 = vmax.f32 %v738_v26, %v739_v53  ;;  %v748_v29 = vsel %vm522_vm1, %v6708_v27, -inf  ;;  %v4167_v7 = vmax.f32 %v708_v36, %v709_v5 }
  0x9a   :  { %v756_v43 = vsel %vm520_vm0, %v6709_v11, -inf  ;;  %v749_v54 = vmax.f32 %v747_v32, %v748_v29  ;;  %v718_v45 = vrot.slane %v717_v33, 1  ;;  %v726_v9 = vmax.f32 %v724_v3, %v725_v46  ;;  %v6717_v29 = vld [vmem:[#allocation2_spill] sm:$0xff] }
  0x9b   :  { %v734_v44 = vrot.slane %v733_v14, 2  ;;  %v741_v62 = vrot.slane %v740_v56, 4  ;;  %v6710_v25 = vunpack.c.l.bf16 %v3003_v37  ;;  %v6711_v6 = vunpack.c.h.bf16 %v2998_v41 }
  0x9c   :  { %v750_v22 = vrot.slane %v749_v54, 4  ;;  %v4175_v2 = vmax.f32 %v717_v33, %v718_v45  ;;  %v727_v17 = vrot.slane %v726_v9, 1  ;;  %v6712_v50 = vunpack.c.l.bf16 %v3008_v57 }
  0x9d   :  { %v757_v39 = vsel %vm522_vm1, %v6710_v25, -inf  ;;  %v765_v58 = vsel %vm520_vm0, %v6711_v6, -inf  ;;  %v735_v60 = vmax.f32 %v733_v14, %v734_v44  ;;  %v742_v38 = vmax.f32 %v740_v56, %v741_v62 }
  0x9e   :  { %v758_v49 = vmax.f32 %v756_v43, %v757_v39  ;;  %v766_v59 = vsel %vm522_vm1, %v6712_v50, -inf  ;;  %v6713_v10 = vunpack.c.l.bf16 %v3017_v35  ;;  %v751_v41 = vmax.f32 %v749_v54, %v750_v22 }
  0x9f   :  { %v736_v26 = vrot.slane %v735_v60, 1  ;;  %v743_v61 = vrot.slane %v742_v38, 2  ;;  %v4183_v30 = vmax.f32 %v726_v9, %v727_v17  ;;  %v767_v63 = vmax.f32 %v765_v58, %v766_v59  ;;  %v6719_v9 = vld [vmem:[#allocation3_spill] sm:$0xff]  ;;  %v6722_v59 = vld [vmem:[#allocation4_spill] sm:$0xff] }
  0xa0   :  { %v774_v37 = vsel %vm520_vm0, %v6713_v10, -inf  ;;  %v759_v36 = vrot.slane %v758_v49, 4  ;;  %v6714_v3 = vunpack.c.l.bf16 %v3022_v34  ;;  %v6715_v53 = vunpack.c.h.bf16 %v3017_v35 }
  0xa1   :  { %v4191_v12 = vmax.f32 %v735_v60, %v736_v26  ;;  %v744_v32 = vmax.f32 %v742_v38, %v743_v61  ;;  %v752_v5 = vrot.slane %v751_v41, 2  ;;  %v768_v56 = vrot.slane %v767_v63, 4 }
  0xa2   :  { %v775_v4 = vsel %vm522_vm1, %v6714_v3, -inf  ;;  %v783_v57 = vsel %vm520_vm0, %v6715_v53, -inf  ;;  %v760_v14 = vmax.f32 %v758_v49, %v759_v36  ;;  %v6716_v46 = vunpack.c.l.bf16 %v3027_v51  ;;  %v6724_v53 = vld [vmem:[#allocation5_spill] sm:$0xff] }
  0xa3   :  { %v776_v33 = vmax.f32 %v774_v37, %v775_v4  ;;  %v6718_v11 = vunpack.c.l.bf16 %v6717_v29  ;;  %v745_v43 = vrot.slane %v744_v32, 1  ;;  %v753_v44 = vmax.f32 %v751_v41, %v752_v5 }
  0xa4   :  { %v784_v27 = vsel %vm522_vm1, %v6716_v46, -inf  ;;  %v761_v35 = vrot.slane %v760_v14, 2  ;;  %v769_v54 = vmax.f32 %v767_v63, %v768_v56  ;;  %v6720_v25 = vunpack.c.l.bf16 %v6719_v9 }
  0xa5   :  { %v792_v34 = vsel %vm520_vm0, %v6718_v11, -inf  ;;  %v785_v62 = vmax.f32 %v783_v57, %v784_v27  ;;  %v777_v45 = vrot.slane %v776_v33, 4  ;;  %v6721_v6 = vunpack.c.h.bf16 %v6717_v29 }
  0xa6   :  { %v793_v39 = vsel %vm522_vm1, %v6720_v25, -inf  ;;  %v4205_v58 = vmax.f32 %v744_v32, %v745_v43  ;;  %v754_v60 = vrot.slane %v753_v44, 1  ;;  %v762_v38 = vmax.f32 %v760_v14, %v761_v35 }
  0xa7   :  { %v801_v51 = vsel %vm520_vm0, %v6721_v6, -inf  ;;  %v786_v22 = vrot.slane %v785_v62, 4  ;;  %v770_v49 = vrot.slane %v769_v54, 2  ;;  %v778_v17 = vmax.f32 %v776_v33, %v777_v45  ;;  %v6726_v33 = vld [vmem:[#allocation6_spill] sm:$0xff]  ;;  %v6729_v45 = vld [vmem:[#allocation7_spill] sm:$0xff] }
  0xa8   :  { %v794_v50 = vmax.f32 %v792_v34, %v793_v39  ;;  %v6723_v10 = vunpack.c.l.bf16 %v6722_v59  ;;  %v4210_v26 = vmax.f32 %v753_v44, %v754_v60  ;;  %v763_v61 = vrot.slane %v762_v38, 1 }
  0xa9   :  { %v787_v41 = vmax.f32 %v785_v62, %v786_v22  ;;  %v771_v63 = vmax.f32 %v769_v54, %v770_v49  ;;  %v779_v3 = vrot.slane %v778_v17, 2  ;;  %v6725_v57 = vunpack.c.l.bf16 %v6724_v53 }
  0xaa   :  { %v802_v37 = vsel %vm522_vm1, %v6723_v10, -inf  ;;  %v795_v4 = vrot.slane %v794_v50, 4  ;;  %v4215_v5 = vmax.f32 %v762_v38, %v763_v61  ;;  %v6727_v46 = vunpack.c.l.bf16 %v6726_v33 }
  0xab   :  { %v803_v36 = vmax.f32 %v801_v51, %v802_v37  ;;  %v810_v32 = vsel %vm520_vm0, %v6725_v57, -inf  ;;  %v788_v14 = vrot.slane %v787_v41, 2  ;;  %v772_v29 = vrot.slane %v771_v63, 1 }
  0xac   :  { %v811_v27 = vsel %vm522_vm1, %v6727_v46, -inf  ;;  %v780_v11 = vmax.f32 %v778_v17, %v779_v3  ;;  %v796_v34 = vmax.f32 %v794_v50, %v795_v4  ;;  %v6728_v62 = vunpack.c.h.bf16 %v6724_v53  ;;  %v6731_v17 = vld [vmem:[#allocation8_spill] sm:$0xff]  ;;  %v6736_v46 = vld [vmem:[#allocation10_spill] sm:$0xff] }
  0xad   :  { %v804_v56 = vrot.slane %v803_v36, 4  ;;  %v812_v43 = vmax.f32 %v810_v32, %v811_v27  ;;  %v789_v44 = vmax.f32 %v787_v41, %v788_v14  ;;  %v6730_v9 = vunpack.c.l.bf16 %v6729_v45  ;;  %v6733_v41 = vld [vmem:[#allocation9_spill] sm:$0xff] }
  0xae   :  { %v819_v54 = vsel %vm520_vm0, %v6728_v62, -inf  ;;  %v4226_v39 = vmax.f32 %v771_v63, %v772_v29  ;;  %v781_v6 = vrot.slane %v780_v11, 1  ;;  %v797_v51 = vrot.slane %v796_v34, 2 }
  0xaf   :  { %v805_v35 = vmax.f32 %v803_v36, %v804_v56  ;;  %v820_v25 = vsel %vm522_vm1, %v6730_v9, -inf  ;;  %v813_v60 = vrot.slane %v812_v43, 4  ;;  %v790_v38 = vrot.slane %v789_v44, 1 }
  0xb0   :  { %v821_v49 = vmax.f32 %v819_v54, %v820_v25  ;;  %v6732_v50 = vunpack.c.l.bf16 %v6731_v17  ;;  %v4231_v10 = vmax.f32 %v780_v11, %v781_v6  ;;  %v798_v37 = vmax.f32 %v796_v34, %v797_v51  ;;  %v6740_v25 = vld [vmem:[#allocation12_spill] sm:$0xff] }
  0xb1   :  { %v806_v22 = vrot.slane %v805_v35, 2  ;;  %v814_v61 = vmax.f32 %v812_v43, %v813_v60  ;;  %v6734_v36 = vunpack.c.l.bf16 %v6733_v41  ;;  %v4236_v63 = vmax.f32 %v789_v44, %v790_v38 }
  0xb2   :  { %v828_v59 = vsel %vm520_vm0, %v6732_v50, -inf  ;;  %v822_v53 = vrot.slane %v821_v49, 4  ;;  %v799_v32 = vrot.slane %v798_v37, 1  ;;  %v6735_v56 = vunpack.c.h.bf16 %v6731_v17 }
  0xb3   :  { %v829_v3 = vsel %vm522_vm1, %v6734_v36, -inf  ;;  %v807_v4 = vmax.f32 %v805_v35, %v806_v22  ;;  %v815_v14 = vrot.slane %v814_v61, 2  ;;  %v6737_v27 = vunpack.c.l.bf16 %v6736_v46  ;;  %v6738_v35 = vld [vmem:[#allocation11_spill] sm:$0xff] }
  0xb4   :  { %v830_v57 = vmax.f32 %v828_v59, %v829_v3  ;;  %v837_v33 = vsel %vm520_vm0, %v6735_v56, -inf  ;;  %v823_v34 = vmax.f32 %v821_v49, %v822_v53  ;;  %v4244_v54 = vmax.f32 %v798_v37, %v799_v32 }
  0xb5   :  { %v838_v29 = vsel %vm522_vm1, %v6737_v27, -inf  ;;  %v808_v11 = vrot.slane %v807_v4, 1  ;;  %v816_v44 = vmax.f32 %v814_v61, %v815_v14  ;;  %v6739_v45 = vunpack.c.l.bf16 %v6738_v35  ;;  %v6743_v61 = vld [vmem:[#allocation13_spill] sm:$0xff]  ;;  %v6747_v27 = vld [vmem:[#allocation15_spill] sm:$0xff] }
  0xb6   :  { %v831_v43 = vrot.slane %v830_v57, 4  ;;  %v839_v62 = vmax.f32 %v837_v33, %v838_v29  ;;  %v6741_v6 = vunpack.c.l.bf16 %v6740_v25  ;;  %v824_v38 = vrot.slane %v823_v34, 2  ;;  %v6745_v33 = vld [vmem:[#allocation14_spill] sm:$0xff] }
  0xb7   :  { %v846_v9 = vsel %vm520_vm0, %v6739_v45, -inf  ;;  %v4252_v60 = vmax.f32 %v807_v4, %v808_v11  ;;  %v817_v50 = vrot.slane %v816_v44, 1  ;;  %v6742_v59 = vunpack.c.h.bf16 %v6738_v35 }
  0xb8   :  { %v847_v51 = vsel %vm522_vm1, %v6741_v6, -inf  ;;  %v832_v22 = vmax.f32 %v830_v57, %v831_v43  ;;  %v840_v17 = vrot.slane %v839_v62, 4  ;;  %v6744_v41 = vunpack.c.l.bf16 %v6743_v61  ;;  %v6750_v6 = vld [vmem:[#allocation16_spill] sm:$0xff] }
  0xb9   :  { %v848_v49 = vmax.f32 %v846_v9, %v847_v51  ;;  %v855_v37 = vsel %vm520_vm0, %v6742_v59, -inf  ;;  %v825_v3 = vmax.f32 %v823_v34, %v824_v38  ;;  %v4260_v56 = vmax.f32 %v816_v44, %v817_v50 }
  0xba   :  { %v856_v36 = vsel %vm522_vm1, %v6744_v41, -inf  ;;  %v833_v53 = vrot.slane %v832_v22, 2  ;;  %v841_v32 = vmax.f32 %v839_v62, %v840_v17  ;;  %v6746_v57 = vunpack.c.l.bf16 %v6745_v33 }
  0xbb   :  { %v857_v14 = vmax.f32 %v855_v37, %v856_v36  ;;  %v849_v4 = vrot.slane %v848_v49, 4  ;;  %v6748_v29 = vunpack.c.l.bf16 %v6747_v27  ;;  %v826_v43 = vrot.slane %v825_v3, 1  ;;  %v6752_v36 = vld [vmem:[#allocation17_spill] sm:$0xff] }
  0xbc   :  { %v864_v46 = vsel %vm520_vm0, %v6746_v57, -inf  ;;  %v834_v35 = vmax.f32 %v832_v22, %v833_v53  ;;  %v842_v45 = vrot.slane %v841_v32, 2  ;;  %v6749_v62 = vunpack.c.h.bf16 %v6745_v33 }
  0xbd   :  { %v865_v11 = vsel %vm522_vm1, %v6748_v29, -inf  ;;  %v858_v9 = vrot.slane %v857_v14, 4  ;;  %v850_v25 = vmax.f32 %v848_v49, %v849_v4  ;;  %v6751_v51 = vunpack.c.l.bf16 %v6750_v6 }
  0xbe   :  { %v866_v34 = vmax.f32 %v864_v46, %v865_v11  ;;  %v873_v44 = vsel %vm520_vm0, %v6749_v62, -inf  ;;  %v4274_v17 = vmax.f32 %v825_v3, %v826_v43  ;;  %v835_v50 = vrot.slane %v834_v35, 1  ;;  %v6754_v46 = vld [vmem:[#allocation18_spill] sm:$0xff] }
  0xbf   :  { %v874_v38 = vsel %vm522_vm1, %v6751_v51, -inf  ;;  %v843_v59 = vmax.f32 %v841_v32, %v842_v45  ;;  %v859_v37 = vmax.f32 %v857_v14, %v858_v9  ;;  %v851_v61 = vrot.slane %v850_v25, 2 }
  0xc0   :  { %v867_v41 = vrot.slane %v866_v34, 4  ;;  %v875_v22 = vmax.f32 %v873_v44, %v874_v38  ;;  %v6753_v53 = vunpack.c.l.bf16 %v6752_v36  ;;  %v4279_v4 = vmax.f32 %v834_v35, %v835_v50  ;;  %v6757_v44 = vld [vmem:[#allocation19_spill] sm:$0xff] }
  0xc1   :  { %v844_v33 = vrot.slane %v843_v59, 1  ;;  %v860_v57 = vrot.slane %v859_v37, 2  ;;  %v6755_v27 = vunpack.c.l.bf16 %v6754_v46  ;;  %v852_v3 = vmax.f32 %v850_v25, %v851_v61 }
  0xc2   :  { %v882_v49 = vsel %vm520_vm0, %v6753_v53, -inf  ;;  %v868_v11 = vmax.f32 %v866_v34, %v867_v41  ;;  %v876_v43 = vrot.slane %v875_v22, 4  ;;  %v6756_v9 = vunpack.c.h.bf16 %v6752_v36  ;;  %v6759_v34 = vld [vmem:[#allocation20_spill] sm:$0xff]  ;;  %v6761_v41 = vld [vmem:[#allocation21_spill] sm:$0xff] }
  0xc3   :  { %v883_v29 = vsel %vm522_vm1, %v6755_v27, -inf  ;;  %v4284_v14 = vmax.f32 %v843_v59, %v844_v33  ;;  %v861_v45 = vmax.f32 %v859_v37, %v860_v57  ;;  %v6758_v35 = vunpack.c.l.bf16 %v6757_v44 }
  0xc4   :  { %v884_v32 = vmax.f32 %v882_v49, %v883_v29  ;;  %v891_v62 = vsel %vm520_vm0, %v6756_v9, -inf  ;;  %v853_v51 = vrot.slane %v852_v3, 1  ;;  %v869_v38 = vrot.slane %v868_v11, 2 }
  0xc5   :  { %v892_v6 = vsel %vm522_vm1, %v6758_v35, -inf  ;;  %v877_v50 = vmax.f32 %v875_v22, %v876_v43  ;;  %v862_v46 = vrot.slane %v861_v45, 1  ;;  %v6760_v61 = vunpack.c.l.bf16 %v6759_v34 }
  0xc6   :  { %v885_v53 = vrot.slane %v884_v32, 4  ;;  %v893_v25 = vmax.f32 %v891_v62, %v892_v6  ;;  %v6762_v37 = vunpack.c.l.bf16 %v6761_v41  ;;  %v4298_v49 = vmax.f32 %v852_v3, %v853_v51 }
  0xc7   :  { %v900_v59 = vsel %vm520_vm0, %v6760_v61, -inf  ;;  %v870_v33 = vmax.f32 %v868_v11, %v869_v38  ;;  %v878_v57 = vrot.slane %v877_v50, 2  ;;  %v4300_v29 = vmax.f32 %v861_v45, %v862_v46  ;;  %v6765_v61 = vld [vmem:[#allocation22_spill] sm:$0xff]  ;;  %v6767_v38 = vld [vmem:[#allocation23_spill] sm:$0xff] }
  0xc8   :  { %v901_v36 = vsel %vm522_vm1, %v6762_v37, -inf  ;;  %v886_v27 = vmax.f32 %v884_v32, %v885_v53  ;;  %v894_v9 = vrot.slane %v893_v25, 4  ;;  %v6764_v43 = vunpack.c.h.bf16 %v6759_v34 }
  0xc9   :  { %6763 = vst [vmem:[#allocation2_spill] sm:$0xff] %v4300_v29  ;;  %v902_v22 = vmax.f32 %v900_v59, %v901_v36  ;;  %v871_v44 = vrot.slane %v870_v33, 1  ;;  %v879_v35 = vmax.f32 %v877_v50, %v878_v57  ;;  %v6766_v41 = vunpack.c.l.bf16 %v6765_v61  ;;  %v6770_v59 = vld [vmem:[#allocation24_spill] sm:$0xff] }
  0xca   :  { %v909_v62 = vsel %vm520_vm0, %v6764_v43, -inf  ;;  %v887_v6 = vrot.slane %v886_v27, 2  ;;  %v895_v3 = vmax.f32 %v893_v25, %v894_v9  ;;  %v6768_v32 = vunpack.c.l.bf16 %v6767_v38 }
  0xcb   :  { %v910_v37 = vsel %vm522_vm1, %v6766_v41, -inf  ;;  %v903_v51 = vrot.slane %v902_v22, 4  ;;  %v4311_v53 = vmax.f32 %v870_v33, %v871_v44  ;;  %v880_v46 = vrot.slane %v879_v35, 1 }
  0xcc   :  { %v911_v11 = vmax.f32 %v909_v62, %v910_v37  ;;  %v918_v45 = vsel %vm520_vm0, %v6768_v32, -inf  ;;  %v888_v34 = vmax.f32 %v886_v27, %v887_v6  ;;  %v6771_v36 = vunpack.c.l.bf16 %v6770_v59  ;;  %v6774_v37 = vld [vmem:[#allocation25_spill] sm:$0xff] }
  0xcd   :  { %6769 = vst [vmem:[#allocation3_spill] sm:$0xff] %v4311_v53  ;;  %v896_v57 = vrot.slane %v895_v3, 2  ;;  %v904_v43 = vmax.f32 %v902_v22, %v903_v51  ;;  %v4316_v41 = vmax.f32 %v879_v35, %v880_v46  ;;  %v6773_v9 = vunpack.c.h.bf16 %v6767_v38  ;;  %v6777_v51 = vld [vmem:[#allocation26_spill] sm:$0xff]  ;;  %v6779_v46 = vld [vmem:[#allocation27_spill] sm:$0xff] }
  0xce   :  { %v919_v50 = vsel %vm522_vm1, %v6771_v36, -inf  ;;  %v912_v61 = vrot.slane %v911_v11, 4  ;;  %v889_v25 = vrot.slane %v888_v34, 1  ;;  %v6775_v33 = vunpack.c.l.bf16 %v6774_v37 }
  0xcf   :  { %v920_v29 = vmax.f32 %v918_v45, %v919_v50  ;;  %6772 = vst [vmem:[#allocation4_spill] sm:$0xff] %v4316_v41  ;;  %v927_v62 = vsel %vm520_vm0, %v6773_v9, -inf  ;;  %v897_v27 = vmax.f32 %v895_v3, %v896_v57  ;;  %v905_v6 = vrot.slane %v904_v43, 2  ;;  %v6782_v57 = vld [vmem:[#allocation28_spill] sm:$0xff] }
  0xd0   :  { %v928_v44 = vsel %vm522_vm1, %v6775_v33, -inf  ;;  %v913_v32 = vmax.f32 %v911_v11, %v912_v61  ;;  %v4324_v36 = vmax.f32 %v888_v34, %v889_v25  ;;  %v6778_v45 = vunpack.c.l.bf16 %v6777_v51 }
  0xd1   :  { %v921_v59 = vrot.slane %v920_v29, 4  ;;  %v929_v22 = vmax.f32 %v927_v62, %v928_v44  ;;  %v6780_v50 = vunpack.c.l.bf16 %v6779_v46  ;;  %v898_v9 = vrot.slane %v897_v27, 1 }
  0xd2   :  { %6776 = vst [vmem:[#allocation5_spill] sm:$0xff] %v4324_v36  ;;  %v936_v35 = vsel %vm520_vm0, %v6778_v45, -inf  ;;  %v906_v41 = vmax.f32 %v904_v43, %v905_v6  ;;  %v914_v37 = vrot.slane %v913_v32, 2  ;;  %v6781_v11 = vunpack.c.h.bf16 %v6777_v51  ;;  %v6785_v6 = vld [vmem:[#allocation29_spill] sm:$0xff] }
  0xd3   :  { %v937_v38 = vsel %vm522_vm1, %v6780_v50, -inf  ;;  %v922_v53 = vmax.f32 %v920_v29, %v921_v59  ;;  %v930_v33 = vrot.slane %v929_v22, 4  ;;  %v6783_v61 = vunpack.c.l.bf16 %v6782_v57 }
  0xd4   :  { %v938_v3 = vmax.f32 %v936_v35, %v937_v38  ;;  %v945_v34 = vsel %vm520_vm0, %v6781_v11, -inf  ;;  %v4338_v62 = vmax.f32 %v897_v27, %v898_v9  ;;  %v907_v44 = vrot.slane %v906_v41, 1  ;;  %v6788_v11 = vld [vmem:[#allocation30_spill] sm:$0xff] }
  0xd5   :  { %v946_v25 = vsel %vm522_vm1, %v6783_v61, -inf  ;;  %v915_v45 = vmax.f32 %v913_v32, %v914_v37  ;;  %v923_v46 = vrot.slane %v922_v53, 2  ;;  %v931_v50 = vmax.f32 %v929_v22, %v930_v33 }
  0xd6   :  { %6784 = vst [vmem:[#allocation6_spill] sm:$0xff] %v4338_v62  ;;  %v939_v36 = vrot.slane %v938_v3, 4  ;;  %v947_v43 = vmax.f32 %v945_v34, %v946_v25  ;;  %v6786_v29 = vunpack.c.l.bf16 %v6785_v6  ;;  %v4343_v35 = vmax.f32 %v906_v41, %v907_v44  ;;  %v6792_v25 = vld [vmem:[#allocation31_spill] sm:$0xff] }
  0xd7   :  { %v916_v51 = vrot.slane %v915_v45, 1  ;;  %v924_v38 = vmax.f32 %v922_v53, %v923_v46  ;;  %v6789_v57 = vunpack.c.l.bf16 %v6788_v11  ;;  %v932_v27 = vrot.slane %v931_v50, 2 }
  0xd8   :  { %v954_v59 = vsel %vm520_vm0, %v6786_v29, -inf  ;;  %6787 = vst [vmem:[#allocation7_spill] sm:$0xff] %v4343_v35  ;;  %v940_v9 = vmax.f32 %v938_v3, %v939_v36  ;;  %v948_v62 = vrot.slane %v947_v43, 4  ;;  %v6791_v33 = vunpack.c.h.bf16 %v6785_v6  ;;  %v6795_v3 = vld [vmem:[#allocation32_spill] sm:$0xff] }
  0xd9   :  { %v955_v61 = vsel %vm522_vm1, %v6789_v57, -inf  ;;  %v4348_v37 = vmax.f32 %v915_v45, %v916_v51  ;;  %v925_v22 = vrot.slane %v924_v38, 1  ;;  %v6793_v41 = vunpack.c.l.bf16 %v6792_v25  ;;  %v6797_v51 = vld [vmem:[#allocation33_spill] sm:$0xff] }
  0xda   :  { %v956_v32 = vmax.f32 %v954_v59, %v955_v61  ;;  %v963_v34 = vsel %vm520_vm0, %v6791_v33, -inf  ;;  %v933_v53 = vmax.f32 %v931_v50, %v932_v27  ;;  %v941_v46 = vrot.slane %v940_v9, 2 }
  0xdb   :  { %6790 = vst [vmem:[#allocation8_spill] sm:$0xff] %v4348_v37  ;;  %v964_v44 = vsel %vm522_vm1, %v6793_v41, -inf  ;;  %v949_v29 = vmax.f32 %v947_v43, %v948_v62  ;;  %v4356_v57 = vmax.f32 %v924_v38, %v925_v22  ;;  %v6796_v59 = vunpack.c.l.bf16 %v6795_v3  ;;  %v6800_v38 = vld [vmem:[#allocation34_spill] sm:$0xff] }
  0xdc   :  { %v957_v11 = vrot.slane %v956_v32, 4  ;;  %v965_v36 = vmax.f32 %v963_v34, %v964_v44  ;;  %v6798_v61 = vunpack.c.l.bf16 %v6797_v51  ;;  %v934_v33 = vrot.slane %v933_v53, 1 }
  0xdd   :  { %6794 = vst [vmem:[#allocation9_spill] sm:$0xff] %v4356_v57  ;;  %v972_v45 = vsel %vm520_vm0, %v6796_v59, -inf  ;;  %v942_v37 = vmax.f32 %v940_v9, %v941_v46  ;;  %v950_v25 = vrot.slane %v949_v29, 2  ;;  %v6799_v62 = vunpack.c.h.bf16 %v6795_v3  ;;  %v6803_v46 = vld [vmem:[#allocation35_spill] sm:$0xff] }
  0xde   :  { %v973_v6 = vsel %vm522_vm1, %v6798_v61, -inf  ;;  %v958_v35 = vmax.f32 %v956_v32, %v957_v11  ;;  %v966_v41 = vrot.slane %v965_v36, 4  ;;  %v6801_v27 = vunpack.c.l.bf16 %v6800_v38 }
  0xdf   :  { %v974_v50 = vmax.f32 %v972_v45, %v973_v6  ;;  %v981_v43 = vsel %vm520_vm0, %v6799_v62, -inf  ;;  %v4370_v34 = vmax.f32 %v933_v53, %v934_v33  ;;  %v943_v44 = vrot.slane %v942_v37, 1  ;;  %v6806_v62 = vld [vmem:[#allocation36_spill] sm:$0xff] }
  0xe0   :  { %v982_v22 = vsel %vm522_vm1, %v6801_v27, -inf  ;;  %v951_v59 = vmax.f32 %v949_v29, %v950_v25  ;;  %v959_v51 = vrot.slane %v958_v35, 2  ;;  %v967_v61 = vmax.f32 %v965_v36, %v966_v41 }
  0xe1   :  { %6802 = vst [vmem:[#allocation10_spill] sm:$0xff] %v4370_v34  ;;  %v975_v57 = vrot.slane %v974_v50, 4  ;;  %v983_v9 = vmax.f32 %v981_v43, %v982_v22  ;;  %v6804_v32 = vunpack.c.l.bf16 %v6803_v46  ;;  %v4375_v45 = vmax.f32 %v942_v37, %v943_v44  ;;  %v6810_v22 = vld [vmem:[#allocation37_spill] sm:$0xff] }
  0xe2   :  { %v952_v3 = vrot.slane %v951_v59, 1  ;;  %v960_v6 = vmax.f32 %v958_v35, %v959_v51  ;;  %v6807_v38 = vunpack.c.l.bf16 %v6806_v62  ;;  %v968_v53 = vrot.slane %v967_v61, 2 }
  0xe3   :  { %v990_v11 = vsel %vm520_vm0, %v6804_v32, -inf  ;;  %6805 = vst [vmem:[#allocation11_spill] sm:$0xff] %v4375_v45  ;;  %v976_v33 = vmax.f32 %v974_v50, %v975_v57  ;;  %v984_v34 = vrot.slane %v983_v9, 4  ;;  %v6809_v41 = vunpack.c.h.bf16 %v6803_v46  ;;  %v6813_v50 = vld [vmem:[#allocation38_spill] sm:$0xff] }
  0xe4   :  { %v991_v27 = vsel %vm522_vm1, %v6807_v38, -inf  ;;  %v4380_v25 = vmax.f32 %v951_v59, %v952_v3  ;;  %v961_v36 = vrot.slane %v960_v6, 1  ;;  %v6811_v37 = vunpack.c.l.bf16 %v6810_v22  ;;  %v6815_v3 = vld [vmem:[#allocation39_spill] sm:$0xff] }
  0xe5   :  { %v992_v29 = vmax.f32 %v990_v11, %v991_v27  ;;  %v999_v43 = vsel %vm520_vm0, %v6809_v41, -inf  ;;  %v969_v35 = vmax.f32 %v967_v61, %v968_v53  ;;  %v977_v51 = vrot.slane %v976_v33, 2 }
  0xe6   :  { %6808 = vst [vmem:[#allocation12_spill] sm:$0xff] %v4380_v25  ;;  %v1000_v44 = vsel %vm522_vm1, %v6811_v37, -inf  ;;  %v985_v32 = vmax.f32 %v983_v9, %v984_v34  ;;  %v4388_v38 = vmax.f32 %v960_v6, %v961_v36  ;;  %v6814_v11 = vunpack.c.l.bf16 %v6813_v50  ;;  %v6818_v6 = vld [vmem:[#allocation40_spill] sm:$0xff] }
  0xe7   :  { %v993_v62 = vrot.slane %v992_v29, 4  ;;  %v1001_v57 = vmax.f32 %v999_v43, %v1000_v44  ;;  %v6816_v27 = vunpack.c.l.bf16 %v6815_v3  ;;  %v970_v41 = vrot.slane %v969_v35, 1 }
  0xe8   :  { %6812 = vst [vmem:[#allocation13_spill] sm:$0xff] %v4388_v38  ;;  %v1008_v59 = vsel %vm520_vm0, %v6814_v11, -inf  ;;  %v978_v25 = vmax.f32 %v976_v33, %v977_v51  ;;  %v986_v22 = vrot.slane %v985_v32, 2  ;;  %v6817_v34 = vunpack.c.h.bf16 %v6813_v50  ;;  %v6821_v51 = vld [vmem:[#allocation41_spill] sm:$0xff] }
  0xe9   :  { %v1009_v46 = vsel %vm522_vm1, %v6816_v27, -inf  ;;  %v994_v45 = vmax.f32 %v992_v29, %v993_v62  ;;  %v1002_v37 = vrot.slane %v1001_v57, 4  ;;  %v6819_v53 = vunpack.c.l.bf16 %v6818_v6 }
  0xea   :  { %v1010_v61 = vmax.f32 %v1008_v59, %v1009_v46  ;;  %v1017_v9 = vsel %vm520_vm0, %v6817_v34, -inf  ;;  %v4402_v43 = vmax.f32 %v969_v35, %v970_v41  ;;  %v979_v44 = vrot.slane %v978_v25, 1  ;;  %v6824_v34 = vld [vmem:[#allocation42_spill] sm:$0xff] }
  0xeb   :  { %v1018_v36 = vsel %vm522_vm1, %v6819_v53, -inf  ;;  %v987_v11 = vmax.f32 %v985_v32, %v986_v22  ;;  %v995_v3 = vrot.slane %v994_v45, 2  ;;  %v1003_v27 = vmax.f32 %v1001_v57, %v1002_v37 }
  0xec   :  { %6820 = vst [vmem:[#allocation14_spill] sm:$0xff] %v4402_v43  ;;  %v1011_v38 = vrot.slane %v1010_v61, 4  ;;  %v1019_v33 = vmax.f32 %v1017_v9, %v1018_v36  ;;  %v6822_v29 = vunpack.c.l.bf16 %v6821_v51  ;;  %v4407_v59 = vmax.f32 %v978_v25, %v979_v44  ;;  %v6828_v36 = vld [vmem:[#allocation43_spill] sm:$0xff] }
  0xed   :  { %v988_v50 = vrot.slane %v987_v11, 1  ;;  %v996_v46 = vmax.f32 %v994_v45, %v995_v3  ;;  %v6825_v6 = vunpack.c.l.bf16 %v6824_v34  ;;  %v1004_v35 = vrot.slane %v1003_v27, 2 }
  0xee   :  { %v1026_v62 = vsel %vm520_vm0, %v6822_v29, -inf  ;;  %6823 = vst [vmem:[#allocation15_spill] sm:$0xff] %v4407_v59  ;;  %v1012_v41 = vmax.f32 %v1010_v61, %v1011_v38  ;;  %v1020_v43 = vrot.slane %v1019_v33, 4  ;;  %v6827_v37 = vunpack.c.h.bf16 %v6821_v51  ;;  %v6831_v61 = vld [vmem:[#allocation44_spill] sm:$0xff] }
  0xef   :  { %v1027_v53 = vsel %vm522_vm1, %v6825_v6, -inf  ;;  %v4412_v22 = vmax.f32 %v987_v11, %v988_v50  ;;  %v997_v57 = vrot.slane %v996_v46, 1  ;;  %v6829_v25 = vunpack.c.l.bf16 %v6828_v36  ;;  %v6833_v50 = vld [vmem:[#allocation45_spill] sm:$0xff] }
  0xf0   :  { %v1028_v32 = vmax.f32 %v1026_v62, %v1027_v53  ;;  %v1035_v9 = vsel %vm520_vm0, %v6827_v37, -inf  ;;  %v1005_v45 = vmax.f32 %v1003_v27, %v1004_v35  ;;  %v1013_v3 = vrot.slane %v1012_v41, 2 }
  0xf1   :  { %6826 = vst [vmem:[#allocation16_spill] sm:$0xff] %v4412_v22  ;;  %v1036_v44 = vsel %vm522_vm1, %v6829_v25, -inf  ;;  %v1021_v29 = vmax.f32 %v1019_v33, %v1020_v43  ;;  %v4420_v6 = vmax.f32 %v996_v46, %v997_v57  ;;  %v6832_v62 = vunpack.c.l.bf16 %v6831_v61  ;;  %v6836_v46 = vld [vmem:[#allocation46_spill] sm:$0xff] }
  0xf2   :  { %v1029_v34 = vrot.slane %v1028_v32, 4  ;;  %v1037_v38 = vmax.f32 %v1035_v9, %v1036_v44  ;;  %v6834_v53 = vunpack.c.l.bf16 %v6833_v50  ;;  %v1006_v37 = vrot.slane %v1005_v45, 1 }
  0xf3   :  { %6830 = vst [vmem:[#allocation17_spill] sm:$0xff] %v4420_v6  ;;  %v1044_v11 = vsel %vm520_vm0, %v6832_v62, -inf  ;;  %v1014_v22 = vmax.f32 %v1012_v41, %v1013_v3  ;;  %v1022_v36 = vrot.slane %v1021_v29, 2  ;;  %v6835_v43 = vunpack.c.h.bf16 %v6831_v61  ;;  %v6839_v3 = vld [vmem:[#allocation47_spill] sm:$0xff] }
  0xf4   :  { %v1045_v51 = vsel %vm522_vm1, %v6834_v53, -inf  ;;  %v1030_v59 = vmax.f32 %v1028_v32, %v1029_v34  ;;  %v1038_v25 = vrot.slane %v1037_v38, 4  ;;  %v6837_v35 = vunpack.c.l.bf16 %v6836_v46 }
  0xf5   :  { %v1046_v27 = vmax.f32 %v1044_v11, %v1045_v51  ;;  %v1053_v33 = vsel %vm520_vm0, %v6835_v43, -inf  ;;  %v4434_v9 = vmax.f32 %v1005_v45, %v1006_v37  ;;  %v1015_v44 = vrot.slane %v1014_v22, 1  ;;  %v6842_v43 = vld [vmem:[#allocation48_spill] sm:$0xff] }
  0xf6   :  { %v1054_v57 = vsel %vm522_vm1, %v6837_v35, -inf  ;;  %v1023_v62 = vmax.f32 %v1021_v29, %v1022_v36  ;;  %v1031_v50 = vrot.slane %v1030_v59, 2  ;;  %v1039_v53 = vmax.f32 %v1037_v38, %v1038_v25 }
  0xf7   :  { %6838 = vst [vmem:[#allocation18_spill] sm:$0xff] %v4434_v9  ;;  %v1047_v6 = vrot.slane %v1046_v27, 4  ;;  %v1055_v41 = vmax.f32 %v1053_v33, %v1054_v57  ;;  %v6840_v32 = vunpack.c.l.bf16 %v6839_v3  ;;  %v4439_v11 = vmax.f32 %v1014_v22, %v1015_v44  ;;  %v6846_v57 = vld [vmem:[#allocation49_spill] sm:$0xff] }
  0xf8   :  { %v1024_v61 = vrot.slane %v1023_v62, 1  ;;  %v1032_v51 = vmax.f32 %v1030_v59, %v1031_v50  ;;  %v6843_v46 = vunpack.c.l.bf16 %v6842_v43  ;;  %v1040_v45 = vrot.slane %v1039_v53, 2 }
  0xf9   :  { %v1062_v34 = vsel %vm520_vm0, %v6840_v32, -inf  ;;  %6841 = vst [vmem:[#allocation19_spill] sm:$0xff] %v4439_v11  ;;  %v1048_v37 = vmax.f32 %v1046_v27, %v1047_v6  ;;  %v1056_v9 = vrot.slane %v1055_v41, 4  ;;  %v6845_v25 = vunpack.c.h.bf16 %v6839_v3  ;;  %v6849_v27 = vld [vmem:[#allocation50_spill] sm:$0xff] }
  0xfa   :  { %v1063_v35 = vsel %vm522_vm1, %v6843_v46, -inf  ;;  %v4444_v36 = vmax.f32 %v1023_v62, %v1024_v61  ;;  %v1033_v38 = vrot.slane %v1032_v51, 1  ;;  %v6847_v22 = vunpack.c.l.bf16 %v6846_v57  ;;  %v6851_v61 = vld [vmem:[#allocation51_spill] sm:$0xff] }
  0xfb   :  { %v1064_v29 = vmax.f32 %v1062_v34, %v1063_v35  ;;  %v1071_v33 = vsel %vm520_vm0, %v6845_v25, -inf  ;;  %v1041_v59 = vmax.f32 %v1039_v53, %v1040_v45  ;;  %v1049_v50 = vrot.slane %v1048_v37, 2 }
  0xfc   :  { %6844 = vst [vmem:[#allocation20_spill] sm:$0xff] %v4444_v36  ;;  %v1072_v44 = vsel %vm522_vm1, %v6847_v22, -inf  ;;  %v1057_v32 = vmax.f32 %v1055_v41, %v1056_v9  ;;  %v4452_v46 = vmax.f32 %v1032_v51, %v1033_v38  ;;  %v6850_v34 = vunpack.c.l.bf16 %v6849_v27  ;;  %v6854_v51 = vld [vmem:[#allocation52_spill] sm:$0xff] }
  0xfd   :  { %v1065_v43 = vrot.slane %v1064_v29, 4  ;;  %v1073_v6 = vmax.f32 %v1071_v33, %v1072_v44  ;;  %v6852_v35 = vunpack.c.l.bf16 %v6851_v61  ;;  %v1042_v25 = vrot.slane %v1041_v59, 1 }
  0xfe   :  { %6848 = vst [vmem:[#allocation21_spill] sm:$0xff] %v4452_v46  ;;  %v1080_v62 = vsel %vm520_vm0, %v6850_v34, -inf  ;;  %v1050_v36 = vmax.f32 %v1048_v37, %v1049_v50  ;;  %v1058_v57 = vrot.slane %v1057_v32, 2  ;;  %v6853_v9 = vunpack.c.h.bf16 %v6849_v27  ;;  %v6857_v50 = vld [vmem:[#allocation53_spill] sm:$0xff] }
  0xff   :  { %v1081_v3 = vsel %vm522_vm1, %v6852_v35, -inf  ;;  %v1066_v11 = vmax.f32 %v1064_v29, %v1065_v43  ;;  %v1074_v22 = vrot.slane %v1073_v6, 4  ;;  %v6855_v45 = vunpack.c.l.bf16 %v6854_v51 }
 0x100   :  { %v1082_v53 = vmax.f32 %v1080_v62, %v1081_v3  ;;  %v1089_v41 = vsel %vm520_vm0, %v6853_v9, -inf  ;;  %v4466_v33 = vmax.f32 %v1041_v59, %v1042_v25  ;;  %v1051_v44 = vrot.slane %v1050_v36, 1  ;;  %v6860_v9 = vld [vmem:[#allocation54_spill] sm:$0xff] }
 0x101   :  { %v1090_v38 = vsel %vm522_vm1, %v6855_v45, -inf  ;;  %v1059_v34 = vmax.f32 %v1057_v32, %v1058_v57  ;;  %v1067_v61 = vrot.slane %v1066_v11, 2  ;;  %v1075_v35 = vmax.f32 %v1073_v6, %v1074_v22 }
 0x102   :  { %6856 = vst [vmem:[#allocation22_spill] sm:$0xff] %v4466_v33  ;;  %v1083_v46 = vrot.slane %v1082_v53, 4  ;;  %v1091_v37 = vmax.f32 %v1089_v41, %v1090_v38  ;;  %v6858_v29 = vunpack.c.l.bf16 %v6857_v50  ;;  %v4471_v62 = vmax.f32 %v1050_v36, %v1051_v44  ;;  %v6864_v38 = vld [vmem:[#allocation55_spill] sm:$0xff] }
 0x103   :  { %v1060_v27 = vrot.slane %v1059_v34, 1  ;;  %v1068_v3 = vmax.f32 %v1066_v11, %v1067_v61  ;;  %v6861_v51 = vunpack.c.l.bf16 %v6860_v9  ;;  %v1076_v59 = vrot.slane %v1075_v35, 2 }
 0x104   :  { %v1098_v43 = vsel %vm520_vm0, %v6858_v29, -inf  ;;  %6859 = vst [vmem:[#allocation23_spill] sm:$0xff] %v4471_v62  ;;  %v1084_v25 = vmax.f32 %v1082_v53, %v1083_v46  ;;  %v1092_v33 = vrot.slane %v1091_v37, 4  ;;  %v6863_v22 = vunpack.c.h.bf16 %v6857_v50  ;;  %v6867_v53 = vld [vmem:[#allocation56_spill] sm:$0xff] }
 0x105   :  { %v1099_v45 = vsel %vm522_vm1, %v6861_v51, -inf  ;;  %v4476_v57 = vmax.f32 %v1059_v34, %v1060_v27  ;;  %v1069_v6 = vrot.slane %v1068_v3, 1  ;;  %v6865_v36 = vunpack.c.l.bf16 %v6864_v38  ;;  %v6869_v27 = vld [vmem:[#allocation57_spill] sm:$0xff] }
 0x106   :  { %v1100_v32 = vmax.f32 %v1098_v43, %v1099_v45  ;;  %v1107_v41 = vsel %vm520_vm0, %v6863_v22, -inf  ;;  %v1077_v11 = vmax.f32 %v1075_v35, %v1076_v59  ;;  %v1085_v61 = vrot.slane %v1084_v25, 2 }
 0x107   :  { %6862 = vst [vmem:[#allocation24_spill] sm:$0xff] %v4476_v57  ;;  %v1108_v44 = vsel %vm522_vm1, %v6865_v36, -inf  ;;  %v1093_v29 = vmax.f32 %v1091_v37, %v1092_v33  ;;  %v4484_v51 = vmax.f32 %v1068_v3, %v1069_v6  ;;  %v6868_v43 = vunpack.c.l.bf16 %v6867_v53  ;;  %v6872_v3 = vld [vmem:[#allocation58_spill] sm:$0xff] }
 0x108   :  { %v1101_v9 = vrot.slane %v1100_v32, 4  ;;  %v1109_v46 = vmax.f32 %v1107_v41, %v1108_v44  ;;  %v6870_v45 = vunpack.c.l.bf16 %v6869_v27  ;;  %v1078_v22 = vrot.slane %v1077_v11, 1 }
 0x109   :  { %6866 = vst [vmem:[#allocation25_spill] sm:$0xff] %v4484_v51  ;;  %v1116_v34 = vsel %vm520_vm0, %v6868_v43, -inf  ;;  %v1086_v57 = vmax.f32 %v1084_v25, %v1085_v61  ;;  %v1094_v38 = vrot.slane %v1093_v29, 2  ;;  %v6871_v33 = vunpack.c.h.bf16 %v6867_v53  ;;  %v6875_v61 = vld [vmem:[#allocation59_spill] sm:$0xff] }
 0x10a   :  { %v1117_v50 = vsel %vm522_vm1, %v6870_v45, -inf  ;;  %v1102_v62 = vmax.f32 %v1100_v32, %v1101_v9  ;;  %v1110_v36 = vrot.slane %v1109_v46, 4  ;;  %v6873_v59 = vunpack.c.l.bf16 %v6872_v3 }
 0x10b   :  { %v1118_v35 = vmax.f32 %v1116_v34, %v1117_v50  ;;  %v1125_v37 = vsel %vm520_vm0, %v6871_v33, -inf  ;;  %v4498_v41 = vmax.f32 %v1077_v11, %v1078_v22  ;;  %v1087_v44 = vrot.slane %v1086_v57, 1  ;;  %v6878_v33 = vld [vmem:[#allocation60_spill] sm:$0xff] }
 0x10c   :  { %v1126_v6 = vsel %vm522_vm1, %v6873_v59, -inf  ;;  %v1095_v43 = vmax.f32 %v1093_v29, %v1094_v38  ;;  %v1103_v27 = vrot.slane %v1102_v62, 2  ;;  %v1111_v45 = vmax.f32 %v1109_v46, %v1110_v36 }
 0x10d   :  { %6874 = vst [vmem:[#allocation26_spill] sm:$0xff] %v4498_v41  ;;  %v1119_v51 = vrot.slane %v1118_v35, 4  ;;  %v1127_v25 = vmax.f32 %v1125_v37, %v1126_v6  ;;  %v6876_v32 = vunpack.c.l.bf16 %v6875_v61  ;;  %v4503_v34 = vmax.f32 %v1086_v57, %v1087_v44  ;;  %v6882_v6 = vld [vmem:[#allocation61_spill] sm:$0xff] }
 0x10e   :  { %v1096_v53 = vrot.slane %v1095_v43, 1  ;;  %v1104_v50 = vmax.f32 %v1102_v62, %v1103_v27  ;;  %v6879_v3 = vunpack.c.l.bf16 %v6878_v33  ;;  %v1112_v11 = vrot.slane %v1111_v45, 2 }
 0x10f   :  { %v1134_v9 = vsel %vm520_vm0, %v6876_v32, -inf  ;;  %6877 = vst [vmem:[#allocation27_spill] sm:$0xff] %v4503_v34  ;;  %v1120_v22 = vmax.f32 %v1118_v35, %v1119_v51  ;;  %v1128_v41 = vrot.slane %v1127_v25, 4  ;;  %v6881_v36 = vunpack.c.h.bf16 %v6875_v61  ;;  %v6885_v35 = vld [vmem:[#allocation62_spill] sm:$0xff] }
 0x110   :  { %v1135_v59 = vsel %vm522_vm1, %v6879_v3, -inf  ;;  %v4508_v38 = vmax.f32 %v1095_v43, %v1096_v53  ;;  %v1105_v46 = vrot.slane %v1104_v50, 1  ;;  %v6883_v57 = vunpack.c.l.bf16 %v6882_v6  ;;  %v6887_v53 = vld [vmem:[#allocation63_spill] sm:$0xff] }
 0x111   :  { %v1136_v29 = vmax.f32 %v1134_v9, %v1135_v59  ;;  %v1143_v37 = vsel %vm520_vm0, %v6881_v36, -inf  ;;  %v1113_v62 = vmax.f32 %v1111_v45, %v1112_v11  ;;  %v1121_v27 = vrot.slane %v1120_v22, 2 }
 0x112   :  { %6880 = vst [vmem:[#allocation28_spill] sm:$0xff] %v4508_v38  ;;  %v1144_v44 = vsel %vm522_vm1, %v6883_v57, -inf  ;;  %v1129_v32 = vmax.f32 %v1127_v25, %v1128_v41  ;;  %v4516_v3 = vmax.f32 %v1104_v50, %v1105_v46  ;;  %v6886_v9 = vunpack.c.l.bf16 %v6885_v35  ;;  %v6890_v50 = vld [vmem:[#allocation64_spill] sm:$0xff] }
 0x113   :  { %v1137_v33 = vrot.slane %v1136_v29, 4  ;;  %v1145_v51 = vmax.f32 %v1143_v37, %v1144_v44  ;;  %v6888_v59 = vunpack.c.l.bf16 %v6887_v53  ;;  %v1114_v36 = vrot.slane %v1113_v62, 1 }
 0x114   :  { %6884 = vst [vmem:[#allocation29_spill] sm:$0xff] %v4516_v3  ;;  %v1152_v43 = vsel %vm520_vm0, %v6886_v9, -inf  ;;  %v1122_v38 = vmax.f32 %v1120_v22, %v1121_v27  ;;  %v1130_v6 = vrot.slane %v1129_v32, 2  ;;  %v6889_v41 = vunpack.c.h.bf16 %v6885_v35  ;;  %v6893_v27 = vld [vmem:[#allocation65_spill] sm:$0xff] }
 0x115   :  { %v1153_v61 = vsel %vm522_vm1, %v6888_v59, -inf  ;;  %v1138_v34 = vmax.f32 %v1136_v29, %v1137_v33  ;;  %v1146_v57 = vrot.slane %v1145_v51, 4  ;;  %v6891_v11 = vunpack.c.l.bf16 %v6890_v50 }
 0x116   :  { %v1154_v45 = vmax.f32 %v1152_v43, %v1153_v61  ;;  %v1161_v25 = vsel %vm520_vm0, %v6889_v41, -inf  ;;  %v4530_v37 = vmax.f32 %v1113_v62, %v1114_v36  ;;  %v1123_v44 = vrot.slane %v1122_v38, 1  ;;  %v6896_v41 = vld [vmem:[#allocation66_spill] sm:$0xff] }
 0x117   :  { %v1162_v46 = vsel %vm522_vm1, %v6891_v11, -inf  ;;  %v1131_v9 = vmax.f32 %v1129_v32, %v1130_v6  ;;  %v1139_v53 = vrot.slane %v1138_v34, 2  ;;  %v1147_v59 = vmax.f32 %v1145_v51, %v1146_v57 }
 0x118   :  { %6892 = vst [vmem:[#allocation30_spill] sm:$0xff] %v4530_v37  ;;  %v1155_v3 = vrot.slane %v1154_v45, 4  ;;  %v1163_v22 = vmax.f32 %v1161_v25, %v1162_v46  ;;  %v6894_v29 = vunpack.c.l.bf16 %v6893_v27  ;;  %v4535_v43 = vmax.f32 %v1122_v38, %v1123_v44  ;;  %v6900_v46 = vld [vmem:[#allocation67_spill] sm:$0xff] }
 0x119   :  { %v1132_v35 = vrot.slane %v1131_v9, 1  ;;  %v1140_v61 = vmax.f32 %v1138_v34, %v1139_v53  ;;  %v6897_v50 = vunpack.c.l.bf16 %v6896_v41  ;;  %v1148_v62 = vrot.slane %v1147_v59, 2 }
 0x11a   :  { %v1170_v33 = vsel %vm520_vm0, %v6894_v29, -inf  ;;  %6895 = vst [vmem:[#allocation31_spill] sm:$0xff] %v4535_v43  ;;  %v1156_v36 = vmax.f32 %v1154_v45, %v1155_v3  ;;  %v1164_v37 = vrot.slane %v1163_v22, 4  ;;  %v6899_v57 = vunpack.c.h.bf16 %v6893_v27  ;;  %v6903_v45 = vld [vmem:[#allocation68_spill] sm:$0xff] }
 0x11b   :  { %v1171_v11 = vsel %vm522_vm1, %v6897_v50, -inf  ;;  %v4540_v6 = vmax.f32 %v1131_v9, %v1132_v35  ;;  %v1141_v51 = vrot.slane %v1140_v61, 1  ;;  %v6901_v38 = vunpack.c.l.bf16 %v6900_v46  ;;  %v6905_v35 = vld [vmem:[#allocation69_spill] sm:$0xff] }
 0x11c   :  { %v1172_v32 = vmax.f32 %v1170_v33, %v1171_v11  ;;  %v1179_v25 = vsel %vm520_vm0, %v6899_v57, -inf  ;;  %v1149_v34 = vmax.f32 %v1147_v59, %v1148_v62  ;;  %v1157_v53 = vrot.slane %v1156_v36, 2 }
 0x11d   :  { %6898 = vst [vmem:[#allocation32_spill] sm:$0xff] %v4540_v6  ;;  %v1180_v44 = vsel %vm522_vm1, %v6901_v38, -inf  ;;  %v1165_v29 = vmax.f32 %v1163_v22, %v1164_v37  ;;  %v4548_v50 = vmax.f32 %v1140_v61, %v1141_v51  ;;  %v6904_v33 = vunpack.c.l.bf16 %v6903_v45  ;;  %v6908_v61 = vld [vmem:[#allocation70_spill] sm:$0xff] }
 0x11e   :  { %v1173_v41 = vrot.slane %v1172_v32, 4  ;;  %v1181_v3 = vmax.f32 %v1179_v25, %v1180_v44  ;;  %v6906_v11 = vunpack.c.l.bf16 %v6905_v35  ;;  %v1150_v57 = vrot.slane %v1149_v34, 1 }
 0x11f   :  { %6902 = vst [vmem:[#allocation33_spill] sm:$0xff] %v4548_v50  ;;  %v1188_v9 = vsel %vm520_vm0, %v6904_v33, -inf  ;;  %v1158_v6 = vmax.f32 %v1156_v36, %v1157_v53  ;;  %v1166_v46 = vrot.slane %v1165_v29, 2  ;;  %v6907_v37 = vunpack.c.h.bf16 %v6903_v45  ;;  %v6911_v53 = vld [vmem:[#allocation71_spill] sm:$0xff] }
 0x120   :  { %v1189_v27 = vsel %vm522_vm1, %v6906_v11, -inf  ;;  %v1174_v43 = vmax.f32 %v1172_v32, %v1173_v41  ;;  %v1182_v38 = vrot.slane %v1181_v3, 4  ;;  %v6909_v62 = vunpack.c.l.bf16 %v6908_v61 }
 0x121   :  { %v1190_v59 = vmax.f32 %v1188_v9, %v1189_v27  ;;  %v1197_v22 = vsel %vm520_vm0, %v6907_v37, -inf  ;;  %v4562_v25 = vmax.f32 %v1149_v34, %v1150_v57  ;;  %v1159_v44 = vrot.slane %v1158_v6, 1  ;;  %v6914_v37 = vld [vmem:[#allocation72_spill] sm:$0xff] }
 0x122   :  { %v1198_v51 = vsel %vm522_vm1, %v6909_v62, -inf  ;;  %v1167_v33 = vmax.f32 %v1165_v29, %v1166_v46  ;;  %v1175_v35 = vrot.slane %v1174_v43, 2  ;;  %v1183_v11 = vmax.f32 %v1181_v3, %v1182_v38 }
 0x123   :  { %6910 = vst [vmem:[#allocation34_spill] sm:$0xff] %v4562_v25  ;;  %v1191_v50 = vrot.slane %v1190_v59, 4  ;;  %v1199_v36 = vmax.f32 %v1197_v22, %v1198_v51  ;;  %v6912_v32 = vunpack.c.l.bf16 %v6911_v53  ;;  %v4567_v9 = vmax.f32 %v1158_v6, %v1159_v44  ;;  %v6918_v51 = vld [vmem:[#allocation73_spill] sm:$0xff] }
 0x124   :  { %v1168_v45 = vrot.slane %v1167_v33, 1  ;;  %v1176_v27 = vmax.f32 %v1174_v43, %v1175_v35  ;;  %v6915_v61 = vunpack.c.l.bf16 %v6914_v37  ;;  %v1184_v34 = vrot.slane %v1183_v11, 2 }
 0x125   :  { %v1206_v41 = vsel %vm520_vm0, %v6912_v32, -inf  ;;  %6913 = vst [vmem:[#allocation35_spill] sm:$0xff] %v4567_v9  ;;  %v1192_v57 = vmax.f32 %v1190_v59, %v1191_v50  ;;  %v1200_v25 = vrot.slane %v1199_v36, 4  ;;  %v6917_v38 = vunpack.c.h.bf16 %v6911_v53  ;;  %v6921_v59 = vld [vmem:[#allocation74_spill] sm:$0xff] }
 0x126   :  { %v1207_v62 = vsel %vm522_vm1, %v6915_v61, -inf  ;;  %v4572_v46 = vmax.f32 %v1167_v33, %v1168_v45  ;;  %v1177_v3 = vrot.slane %v1176_v27, 1  ;;  %v6919_v6 = vunpack.c.l.bf16 %v6918_v51  ;;  %v6923_v45 = vld [vmem:[#allocation75_spill] sm:$0xff] }
 0x127   :  { %v1208_v29 = vmax.f32 %v1206_v41, %v1207_v62  ;;  %v1215_v22 = vsel %vm520_vm0, %v6917_v38, -inf  ;;  %v1185_v43 = vmax.f32 %v1183_v11, %v1184_v34  ;;  %v1193_v35 = vrot.slane %v1192_v57, 2 }
 0x128   :  { %6916 = vst [vmem:[#allocation36_spill] sm:$0xff] %v4572_v46  ;;  %v1216_v44 = vsel %vm522_vm1, %v6919_v6, -inf  ;;  %v1201_v32 = vmax.f32 %v1199_v36, %v1200_v25  ;;  %v4580_v61 = vmax.f32 %v1176_v27, %v1177_v3  ;;  %v6922_v41 = vunpack.c.l.bf16 %v6921_v59  ;;  %v6926_v27 = vld [vmem:[#allocation76_spill] sm:$0xff] }
 0x129   :  { %v1209_v37 = vrot.slane %v1208_v29, 4  ;;  %v1217_v50 = vmax.f32 %v1215_v22, %v1216_v44  ;;  %v6924_v62 = vunpack.c.l.bf16 %v6923_v45  ;;  %v1186_v38 = vrot.slane %v1185_v43, 1 }
 0x12a   :  { %6920 = vst [vmem:[#allocation37_spill] sm:$0xff] %v4580_v61  ;;  %v1224_v33 = vsel %vm520_vm0, %v6922_v41, -inf  ;;  %v1194_v46 = vmax.f32 %v1192_v57, %v1193_v35  ;;  %v1202_v51 = vrot.slane %v1201_v32, 2  ;;  %v6925_v25 = vunpack.c.h.bf16 %v6921_v59  ;;  %v6929_v35 = vld [vmem:[#allocation77_spill] sm:$0xff] }
 0x12b   :  { %v1225_v53 = vsel %vm522_vm1, %v6924_v62, -inf  ;;  %v1210_v9 = vmax.f32 %v1208_v29, %v1209_v37  ;;  %v1218_v6 = vrot.slane %v1217_v50, 4  ;;  %v6927_v34 = vunpack.c.l.bf16 %v6926_v27 }
 0x12c   :  { %v1226_v11 = vmax.f32 %v1224_v33, %v1225_v53  ;;  %v1233_v36 = vsel %vm520_vm0, %v6925_v25, -inf  ;;  %v4594_v22 = vmax.f32 %v1185_v43, %v1186_v38  ;;  %v1195_v44 = vrot.slane %v1194_v46, 1  ;;  %v6932_v25 = vld [vmem:[#allocation78_spill] sm:$0xff] }
 0x12d   :  { %v1234_v3 = vsel %vm522_vm1, %v6927_v34, -inf  ;;  %v1203_v41 = vmax.f32 %v1201_v32, %v1202_v51  ;;  %v1211_v45 = vrot.slane %v1210_v9, 2  ;;  %v1219_v62 = vmax.f32 %v1217_v50, %v1218_v6 }
 0x12e   :  { %6928 = vst [vmem:[#allocation38_spill] sm:$0xff] %v4594_v22  ;;  %v1227_v61 = vrot.slane %v1226_v11, 4  ;;  %v1235_v57 = vmax.f32 %v1233_v36, %v1234_v3  ;;  %v6930_v29 = vunpack.c.l.bf16 %v6929_v35  ;;  %v4599_v33 = vmax.f32 %v1194_v46, %v1195_v44  ;;  %v6936_v3 = vld [vmem:[#allocation79_spill] sm:$0xff] }
 0x12f   :  { %v1204_v59 = vrot.slane %v1203_v41, 1  ;;  %v1212_v53 = vmax.f32 %v1210_v9, %v1211_v45  ;;  %v6933_v27 = vunpack.c.l.bf16 %v6932_v25  ;;  %v1220_v43 = vrot.slane %v1219_v62, 2 }
 0x130   :  { %v1242_v37 = vsel %vm520_vm0, %v6930_v29, -inf  ;;  %6931 = vst [vmem:[#allocation39_spill] sm:$0xff] %v4599_v33  ;;  %v1228_v38 = vmax.f32 %v1226_v11, %v1227_v61  ;;  %v1236_v22 = vrot.slane %v1235_v57, 4  ;;  %v6935_v6 = vunpack.c.h.bf16 %v6929_v35  ;;  %v6939_v11 = vld [vmem:[#allocation80_spill] sm:$0xff] }
 0x131   :  { %v1243_v34 = vsel %vm522_vm1, %v6933_v27, -inf  ;;  %v4604_v51 = vmax.f32 %v1203_v41, %v1204_v59  ;;  %v1213_v50 = vrot.slane %v1212_v53, 1  ;;  %v6937_v46 = vunpack.c.l.bf16 %v6936_v3  ;;  %v6941_v59 = vld [vmem:[#allocation81_spill] sm:$0xff] }
 0x132   :  { %v1244_v32 = vmax.f32 %v1242_v37, %v1243_v34  ;;  %v1251_v36 = vsel %vm520_vm0, %v6935_v6, -inf  ;;  %v1221_v9 = vmax.f32 %v1219_v62, %v1220_v43  ;;  %v1229_v45 = vrot.slane %v1228_v38, 2 }
 0x133   :  { %6934 = vst [vmem:[#allocation40_spill] sm:$0xff] %v4604_v51  ;;  %v1252_v44 = vsel %vm522_vm1, %v6937_v46, -inf  ;;  %v1237_v29 = vmax.f32 %v1235_v57, %v1236_v22  ;;  %v4612_v27 = vmax.f32 %v1212_v53, %v1213_v50  ;;  %v6940_v37 = vunpack.c.l.bf16 %v6939_v11  ;;  %v6944_v53 = vld [vmem:[#allocation82_spill] sm:$0xff] }
 0x134   :  { %v1245_v25 = vrot.slane %v1244_v32, 4  ;;  %v1253_v61 = vmax.f32 %v1251_v36, %v1252_v44  ;;  %v6942_v34 = vunpack.c.l.bf16 %v6941_v59  ;;  %v1222_v6 = vrot.slane %v1221_v9, 1 }
 0x135   :  { %6938 = vst [vmem:[#allocation41_spill] sm:$0xff] %v4612_v27  ;;  %v1260_v41 = vsel %vm520_vm0, %v6940_v37, -inf  ;;  %v1230_v51 = vmax.f32 %v1228_v38, %v1229_v45  ;;  %v1238_v3 = vrot.slane %v1237_v29, 2  ;;  %v6943_v22 = vunpack.c.h.bf16 %v6939_v11  ;;  %v6947_v45 = vld [vmem:[#allocation83_spill] sm:$0xff] }
 0x136   :  { %v1261_v35 = vsel %vm522_vm1, %v6942_v34, -inf  ;;  %v1246_v33 = vmax.f32 %v1244_v32, %v1245_v25  ;;  %v1254_v46 = vrot.slane %v1253_v61, 4  ;;  %v6945_v43 = vunpack.c.l.bf16 %v6944_v53 }
 0x137   :  { %v1262_v62 = vmax.f32 %v1260_v41, %v1261_v35  ;;  %v1269_v57 = vsel %vm520_vm0, %v6943_v22, -inf  ;;  %v4626_v36 = vmax.f32 %v1221_v9, %v1222_v6  ;;  %v1231_v44 = vrot.slane %v1230_v51, 1  ;;  %v6950_v22 = vld [vmem:[#allocation84_spill] sm:$0xff] }
 0x138   :  { %v1270_v50 = vsel %vm522_vm1, %v6945_v43, -inf  ;;  %v1239_v37 = vmax.f32 %v1237_v29, %v1238_v3  ;;  %v1247_v59 = vrot.slane %v1246_v33, 2  ;;  %v1255_v34 = vmax.f32 %v1253_v61, %v1254_v46 }
 0x139   :  { %6946 = vst [vmem:[#allocation42_spill] sm:$0xff] %v4626_v36  ;;  %v1263_v27 = vrot.slane %v1262_v62, 4  ;;  %v1271_v38 = vmax.f32 %v1269_v57, %v1270_v50  ;;  %v6948_v32 = vunpack.c.l.bf16 %v6947_v45  ;;  %v4631_v41 = vmax.f32 %v1230_v51, %v1231_v44  ;;  %v6954_v50 = vld [vmem:[#allocation85_spill] sm:$0xff] }
 0x13a   :  { %v1240_v11 = vrot.slane %v1239_v37, 1  ;;  %v1248_v35 = vmax.f32 %v1246_v33, %v1247_v59  ;;  %v6951_v53 = vunpack.c.l.bf16 %v6950_v22  ;;  %v1256_v9 = vrot.slane %v1255_v34, 2 }
 0x13b   :  { %v1278_v25 = vsel %vm520_vm0, %v6948_v32, -inf  ;;  %6949 = vst [vmem:[#allocation43_spill] sm:$0xff] %v4631_v41  ;;  %v1264_v6 = vmax.f32 %v1262_v62, %v1263_v27  ;;  %v1272_v36 = vrot.slane %v1271_v38, 4  ;;  %v6953_v46 = vunpack.c.h.bf16 %v6947_v45  ;;  %v6957_v62 = vld [vmem:[#allocation86_spill] sm:$0xff] }
 0x13c   :  { %v1279_v43 = vsel %vm522_vm1, %v6951_v53, -inf  ;;  %v4636_v3 = vmax.f32 %v1239_v37, %v1240_v11  ;;  %v1249_v61 = vrot.slane %v1248_v35, 1  ;;  %v6955_v51 = vunpack.c.l.bf16 %v6954_v50  ;;  %v6959_v11 = vld [vmem:[#allocation87_spill] sm:$0xff] }
 0x13d   :  { %v1280_v29 = vmax.f32 %v1278_v25, %v1279_v43  ;;  %v1287_v57 = vsel %vm520_vm0, %v6953_v46, -inf  ;;  %v1257_v33 = vmax.f32 %v1255_v34, %v1256_v9  ;;  %v1265_v59 = vrot.slane %v1264_v6, 2 }
 0x13e   :  { %6952 = vst [vmem:[#allocation44_spill] sm:$0xff] %v4636_v3  ;;  %v1288_v44 = vsel %vm522_vm1, %v6955_v51, -inf  ;;  %v1273_v32 = vmax.f32 %v1271_v38, %v1272_v36  ;;  %v4644_v53 = vmax.f32 %v1248_v35, %v1249_v61  ;;  %v6958_v25 = vunpack.c.l.bf16 %v6957_v62  ;;  %v6962_v35 = vld [vmem:[#allocation88_spill] sm:$0xff] }
 0x13f   :  { %v1281_v22 = vrot.slane %v1280_v29, 4  ;;  %v1289_v27 = vmax.f32 %v1287_v57, %v1288_v44  ;;  %v6960_v43 = vunpack.c.l.bf16 %v6959_v11  ;;  %v1258_v46 = vrot.slane %v1257_v33, 1 }
 0x140   :  { %6956 = vst [vmem:[#allocation45_spill] sm:$0xff] %v4644_v53  ;;  %v1296_v37 = vsel %vm520_vm0, %v6958_v25, -inf  ;;  %v1266_v3 = vmax.f32 %v1264_v6, %v1265_v59  ;;  %v1274_v50 = vrot.slane %v1273_v32, 2  ;;  %v6961_v36 = vunpack.c.h.bf16 %v6957_v62  ;;  %v6965_v59 = vld [vmem:[#allocation89_spill] sm:$0xff] }
 0x141   :  { %v1297_v45 = vsel %vm522_vm1, %v6960_v43, -inf  ;;  %v1282_v41 = vmax.f32 %v1280_v29, %v1281_v22  ;;  %v1290_v51 = vrot.slane %v1289_v27, 4  ;;  %v6963_v9 = vunpack.c.l.bf16 %v6962_v35 }
 0x142   :  { %v1298_v34 = vmax.f32 %v1296_v37, %v1297_v45  ;;  %v1305_v38 = vsel %vm520_vm0, %v6961_v36, -inf  ;;  %v4658_v57 = vmax.f32 %v1257_v33, %v1258_v46  ;;  %v1267_v44 = vrot.slane %v1266_v3, 1  ;;  %v6968_v36 = vld [vmem:[#allocation90_spill] sm:$0xff] }
 0x143   :  { %v1306_v61 = vsel %vm522_vm1, %v6963_v9, -inf  ;;  %v1275_v25 = vmax.f32 %v1273_v32, %v1274_v50  ;;  %v1283_v11 = vrot.slane %v1282_v41, 2  ;;  %v1291_v43 = vmax.f32 %v1289_v27, %v1290_v51 }
 0x144   :  { %6964 = vst [vmem:[#allocation46_spill] sm:$0xff] %v4658_v57  ;;  %v1299_v53 = vrot.slane %v1298_v34, 4  ;;  %v1307_v6 = vmax.f32 %v1305_v38, %v1306_v61  ;;  %v6966_v29 = vunpack.c.l.bf16 %v6965_v59  ;;  %v4663_v37 = vmax.f32 %v1266_v3, %v1267_v44  ;;  %v6972_v61 = vld [vmem:[#allocation91_spill] sm:$0xff] }
 0x145   :  { %v1276_v62 = vrot.slane %v1275_v25, 1  ;;  %v1284_v45 = vmax.f32 %v1282_v41, %v1283_v11  ;;  %v6969_v35 = vunpack.c.l.bf16 %v6968_v36  ;;  %v1292_v33 = vrot.slane %v1291_v43, 2 }
 0x146   :  { %v1314_v22 = vsel %vm520_vm0, %v6966_v29, -inf  ;;  %6967 = vst [vmem:[#allocation47_spill] sm:$0xff] %v4663_v37  ;;  %v1300_v46 = vmax.f32 %v1298_v34, %v1299_v53  ;;  %v1308_v57 = vrot.slane %v1307_v6, 4  ;;  %v6971_v51 = vunpack.c.h.bf16 %v6965_v59  ;;  %v6975_v34 = vld [vmem:[#allocation92_spill] sm:$0xff] }
 0x147   :  { %v1315_v9 = vsel %vm522_vm1, %v6969_v35, -inf  ;;  %v4668_v50 = vmax.f32 %v1275_v25, %v1276_v62  ;;  %v1285_v27 = vrot.slane %v1284_v45, 1  ;;  %v6973_v3 = vunpack.c.l.bf16 %v6972_v61  ;;  %v6977_v62 = vld [vmem:[#allocation93_spill] sm:$0xff] }
 0x148   :  { %v1316_v32 = vmax.f32 %v1314_v22, %v1315_v9  ;;  %v1323_v38 = vsel %vm520_vm0, %v6971_v51, -inf  ;;  %v1293_v41 = vmax.f32 %v1291_v43, %v1292_v33  ;;  %v1301_v11 = vrot.slane %v1300_v46, 2 }
 0x149   :  { %6970 = vst [vmem:[#allocation48_spill] sm:$0xff] %v4668_v50  ;;  %v1324_v44 = vsel %vm522_vm1, %v6973_v3, -inf  ;;  %v1309_v29 = vmax.f32 %v1307_v6, %v1308_v57  ;;  %v4676_v35 = vmax.f32 %v1284_v45, %v1285_v27  ;;  %v6976_v22 = vunpack.c.l.bf16 %v6975_v34  ;;  %v6980_v45 = vld [vmem:[#allocation94_spill] sm:$0xff] }
 0x14a   :  { %v1317_v36 = vrot.slane %v1316_v32, 4  ;;  %v1325_v53 = vmax.f32 %v1323_v38, %v1324_v44  ;;  %v6978_v9 = vunpack.c.l.bf16 %v6977_v62  ;;  %v1294_v51 = vrot.slane %v1293_v41, 1 }
 0x14b   :  { %6974 = vst [vmem:[#allocation49_spill] sm:$0xff] %v4676_v35  ;;  %v1332_v25 = vsel %vm520_vm0, %v6976_v22, -inf  ;;  %v1302_v50 = vmax.f32 %v1300_v46, %v1301_v11  ;;  %v1310_v61 = vrot.slane %v1309_v29, 2  ;;  %v6979_v57 = vunpack.c.h.bf16 %v6975_v34  ;;  %v6983_v11 = vld [vmem:[#allocation95_spill] sm:$0xff] }
 0x14c   :  { %v1333_v59 = vsel %vm522_vm1, %v6978_v9, -inf  ;;  %v1318_v37 = vmax.f32 %v1316_v32, %v1317_v36  ;;  %v1326_v3 = vrot.slane %v1325_v53, 4  ;;  %v6981_v33 = vunpack.c.l.bf16 %v6980_v45 }
 0x14d   :  { %v1334_v43 = vmax.f32 %v1332_v25, %v1333_v59  ;;  %v1341_v6 = vsel %vm520_vm0, %v6979_v57, -inf  ;;  %v4690_v38 = vmax.f32 %v1293_v41, %v1294_v51  ;;  %v1303_v44 = vrot.slane %v1302_v50, 1  ;;  %v6986_v57 = vld [vmem:[#allocation96_spill] sm:$0xff] }
 0x14e   :  { %v1342_v27 = vsel %vm522_vm1, %v6981_v33, -inf  ;;  %v1311_v22 = vmax.f32 %v1309_v29, %v1310_v61  ;;  %v1319_v62 = vrot.slane %v1318_v37, 2  ;;  %v1327_v9 = vmax.f32 %v1325_v53, %v1326_v3 }
 0x14f   :  { %6982 = vst [vmem:[#allocation50_spill] sm:$0xff] %v4690_v38  ;;  %v1335_v35 = vrot.slane %v1334_v43, 4  ;;  %v1343_v46 = vmax.f32 %v1341_v6, %v1342_v27  ;;  %v6984_v32 = vunpack.c.l.bf16 %v6983_v11  ;;  %v4695_v25 = vmax.f32 %v1302_v50, %v1303_v44  ;;  %v6990_v27 = vld [vmem:[#allocation97_spill] sm:$0xff] }
 0x150   :  { %v1312_v34 = vrot.slane %v1311_v22, 1  ;;  %v1320_v59 = vmax.f32 %v1318_v37, %v1319_v62  ;;  %v6987_v45 = vunpack.c.l.bf16 %v6986_v57  ;;  %v1328_v41 = vrot.slane %v1327_v9, 2 }
 0x151   :  { %v1350_v36 = vsel %vm520_vm0, %v6984_v32, -inf  ;;  %6985 = vst [vmem:[#allocation51_spill] sm:$0xff] %v4695_v25  ;;  %v1336_v51 = vmax.f32 %v1334_v43, %v1335_v35  ;;  %v1344_v38 = vrot.slane %v1343_v46, 4  ;;  %v6989_v3 = vunpack.c.h.bf16 %v6983_v11  ;;  %v6993_v43 = vld [vmem:[#allocation98_spill] sm:$0xff] }
 0x152   :  { %v1351_v33 = vsel %vm522_vm1, %v6987_v45, -inf  ;;  %v4700_v61 = vmax.f32 %v1311_v22, %v1312_v34  ;;  %v1321_v53 = vrot.slane %v1320_v59, 1  ;;  %v6991_v50 = vunpack.c.l.bf16 %v6990_v27  ;;  %v6995_v34 = vld [vmem:[#allocation99_spill] sm:$0xff] }
 0x153   :  { %v1352_v29 = vmax.f32 %v1350_v36, %v1351_v33  ;;  %v1359_v6 = vsel %vm520_vm0, %v6989_v3, -inf  ;;  %v1329_v37 = vmax.f32 %v1327_v9, %v1328_v41  ;;  %v1337_v62 = vrot.slane %v1336_v51, 2 }
 0x154   :  { %6988 = vst [vmem:[#allocation52_spill] sm:$0xff] %v4700_v61  ;;  %v1360_v44 = vsel %vm522_vm1, %v6991_v50, -inf  ;;  %v1345_v32 = vmax.f32 %v1343_v46, %v1344_v38  ;;  %v4708_v45 = vmax.f32 %v1320_v59, %v1321_v53  ;;  %v6994_v36 = vunpack.c.l.bf16 %v6993_v43  ;;  %v6998_v59 = vld [vmem:[#allocation100_spill] sm:$0xff] }
 0x155   :  { %v1353_v57 = vrot.slane %v1352_v29, 4  ;;  %v1361_v35 = vmax.f32 %v1359_v6, %v1360_v44  ;;  %v6996_v33 = vunpack.c.l.bf16 %v6995_v34  ;;  %v1330_v3 = vrot.slane %v1329_v37, 1 }
 0x156   :  { %6992 = vst [vmem:[#allocation53_spill] sm:$0xff] %v4708_v45  ;;  %v1368_v22 = vsel %vm520_vm0, %v6994_v36, -inf  ;;  %v1338_v61 = vmax.f32 %v1336_v51, %v1337_v62  ;;  %v1346_v27 = vrot.slane %v1345_v32, 2  ;;  %v6997_v38 = vunpack.c.h.bf16 %v6993_v43  ;;  %v7001_v62 = vld [vmem:[#allocation101_spill] sm:$0xff] }
 0x157   :  { %v1369_v11 = vsel %vm522_vm1, %v6996_v33, -inf  ;;  %v1354_v25 = vmax.f32 %v1352_v29, %v1353_v57  ;;  %v1362_v50 = vrot.slane %v1361_v35, 4  ;;  %v6999_v41 = vunpack.c.l.bf16 %v6998_v59 }
 0x158   :  { %v1370_v9 = vmax.f32 %v1368_v22, %v1369_v11  ;;  %v1377_v46 = vsel %vm520_vm0, %v6997_v38, -inf  ;;  %v4722_v6 = vmax.f32 %v1329_v37, %v1330_v3  ;;  %v1339_v44 = vrot.slane %v1338_v61, 1  ;;  %v7004_v38 = vld [vmem:[#allocation102_spill] sm:$0xff] }
 0x159   :  { %v1378_v53 = vsel %vm522_vm1, %v6999_v41, -inf  ;;  %v1347_v36 = vmax.f32 %v1345_v32, %v1346_v27  ;;  %v1355_v34 = vrot.slane %v1354_v25, 2  ;;  %v1363_v33 = vmax.f32 %v1361_v35, %v1362_v50 }
 0x15a   :  { %7000 = vst [vmem:[#allocation54_spill] sm:$0xff] %v4722_v6  ;;  %v1371_v45 = vrot.slane %v1370_v9, 4  ;;  %v1379_v51 = vmax.f32 %v1377_v46, %v1378_v53  ;;  %v7002_v29 = vunpack.c.l.bf16 %v7001_v62  ;;  %v4727_v22 = vmax.f32 %v1338_v61, %v1339_v44  ;;  %v7008_v53 = vld [vmem:[#allocation103_spill] sm:$0xff] }
 0x15b   :  { %v1348_v43 = vrot.slane %v1347_v36, 1  ;;  %v1356_v11 = vmax.f32 %v1354_v25, %v1355_v34  ;;  %v7005_v59 = vunpack.c.l.bf16 %v7004_v38  ;;  %v1364_v37 = vrot.slane %v1363_v33, 2 }
 0x15c   :  { %v1386_v57 = vsel %vm520_vm0, %v7002_v29, -inf  ;;  %7003 = vst [vmem:[#allocation55_spill] sm:$0xff] %v4727_v22  ;;  %v1372_v3 = vmax.f32 %v1370_v9, %v1371_v45  ;;  %v1380_v6 = vrot.slane %v1379_v51, 4  ;;  %v7007_v50 = vunpack.c.h.bf16 %v7001_v62  ;;  %v7011_v9 = vld [vmem:[#allocation104_spill] sm:$0xff] }
 0x15d   :  { %v1387_v41 = vsel %vm522_vm1, %v7005_v59, -inf  ;;  %v4732_v27 = vmax.f32 %v1347_v36, %v1348_v43  ;;  %v1357_v35 = vrot.slane %v1356_v11, 1  ;;  %v7009_v61 = vunpack.c.l.bf16 %v7008_v53  ;;  %v7013_v43 = vld [vmem:[#allocation105_spill] sm:$0xff] }
 0x15e   :  { %v1388_v32 = vmax.f32 %v1386_v57, %v1387_v41  ;;  %v1395_v46 = vsel %vm520_vm0, %v7007_v50, -inf  ;;  %v1365_v25 = vmax.f32 %v1363_v33, %v1364_v37  ;;  %v1373_v34 = vrot.slane %v1372_v3, 2 }
 0x15f   :  { %7006 = vst [vmem:[#allocation56_spill] sm:$0xff] %v4732_v27  ;;  %v1396_v44 = vsel %vm522_vm1, %v7009_v61, -inf  ;;  %v1381_v29 = vmax.f32 %v1379_v51, %v1380_v6  ;;  %v4740_v59 = vmax.f32 %v1356_v11, %v1357_v35  ;;  %v7012_v57 = vunpack.c.l.bf16 %v7011_v9  ;;  %v7016_v11 = vld [vmem:[#allocation106_spill] sm:$0xff] }
 0x160   :  { %v1389_v38 = vrot.slane %v1388_v32, 4  ;;  %v1397_v45 = vmax.f32 %v1395_v46, %v1396_v44  ;;  %v7014_v41 = vunpack.c.l.bf16 %v7013_v43  ;;  %v1366_v50 = vrot.slane %v1365_v25, 1 }
 0x161   :  { %7010 = vst [vmem:[#allocation57_spill] sm:$0xff] %v4740_v59  ;;  %v1404_v36 = vsel %vm520_vm0, %v7012_v57, -inf  ;;  %v1374_v27 = vmax.f32 %v1372_v3, %v1373_v34  ;;  %v1382_v53 = vrot.slane %v1381_v29, 2  ;;  %v7015_v6 = vunpack.c.h.bf16 %v7011_v9  ;;  %v7019_v34 = vld [vmem:[#allocation107_spill] sm:$0xff] }
 0x162   :  { %v1405_v62 = vsel %vm522_vm1, %v7014_v41, -inf  ;;  %v1390_v22 = vmax.f32 %v1388_v32, %v1389_v38  ;;  %v1398_v61 = vrot.slane %v1397_v45, 4  ;;  %v7017_v37 = vunpack.c.l.bf16 %v7016_v11 }
 0x163   :  { %v1406_v33 = vmax.f32 %v1404_v36, %v1405_v62  ;;  %v1413_v51 = vsel %vm520_vm0, %v7015_v6, -inf  ;;  %v4754_v46 = vmax.f32 %v1365_v25, %v1366_v50  ;;  %v1375_v44 = vrot.slane %v1374_v27, 1  ;;  %v7022_v6 = vld [vmem:[#allocation108_spill] sm:$0xff] }
 0x164   :  { %v1414_v35 = vsel %vm522_vm1, %v7017_v37, -inf  ;;  %v1383_v57 = vmax.f32 %v1381_v29, %v1382_v53  ;;  %v1391_v43 = vrot.slane %v1390_v22, 2  ;;  %v1399_v41 = vmax.f32 %v1397_v45, %v1398_v61 }
 0x165   :  { %7018 = vst [vmem:[#allocation58_spill] sm:$0xff] %v4754_v46  ;;  %v1407_v59 = vrot.slane %v1406_v33, 4  ;;  %v1415_v3 = vmax.f32 %v1413_v51, %v1414_v35  ;;  %v7020_v32 = vunpack.c.l.bf16 %v7019_v34  ;;  %v4759_v36 = vmax.f32 %v1374_v27, %v1375_v44  ;;  %v7026_v35 = vld [vmem:[#allocation109_spill] sm:$0xff] }
 0x166   :  { %v1384_v9 = vrot.slane %v1383_v57, 1  ;;  %v1392_v62 = vmax.f32 %v1390_v22, %v1391_v43  ;;  %v7023_v11 = vunpack.c.l.bf16 %v7022_v6  ;;  %v1400_v25 = vrot.slane %v1399_v41, 2 }
 0x167   :  { %v1422_v38 = vsel %vm520_vm0, %v7020_v32, -inf  ;;  %7021 = vst [vmem:[#allocation59_spill] sm:$0xff] %v4759_v36  ;;  %v1408_v50 = vmax.f32 %v1406_v33, %v1407_v59  ;;  %v1416_v46 = vrot.slane %v1415_v3, 4  ;;  %v7025_v61 = vunpack.c.h.bf16 %v7019_v34  ;;  %v7029_v33 = vld [vmem:[#allocation110_spill] sm:$0xff] }
 0x168   :  { %v1423_v37 = vsel %vm522_vm1, %v7023_v11, -inf  ;;  %v4764_v53 = vmax.f32 %v1383_v57, %v1384_v9  ;;  %v1393_v45 = vrot.slane %v1392_v62, 1  ;;  %v7027_v27 = vunpack.c.l.bf16 %v7026_v35  ;;  %v7031_v9 = vld [vmem:[#allocation111_spill] sm:$0xff] }
 0x169   :  { %v1424_v29 = vmax.f32 %v1422_v38, %v1423_v37  ;;  %v1431_v51 = vsel %vm520_vm0, %v7025_v61, -inf  ;;  %v1401_v22 = vmax.f32 %v1399_v41, %v1400_v25  ;;  %v1409_v43 = vrot.slane %v1408_v50, 2 }
 0x16a   :  { %7024 = vst [vmem:[#allocation60_spill] sm:$0xff] %v4764_v53  ;;  %v1432_v44 = vsel %vm522_vm1, %v7027_v27, -inf  ;;  %v1417_v32 = vmax.f32 %v1415_v3, %v1416_v46  ;;  %v4772_v11 = vmax.f32 %v1392_v62, %v1393_v45  ;;  %v7030_v38 = vunpack.c.l.bf16 %v7029_v33  ;;  %v7034_v62 = vld [vmem:[#allocation112_spill] sm:$0xff] }
 0x16b   :  { %v1425_v6 = vrot.slane %v1424_v29, 4  ;;  %v1433_v59 = vmax.f32 %v1431_v51, %v1432_v44  ;;  %v7032_v37 = vunpack.c.l.bf16 %v7031_v9  ;;  %v1402_v61 = vrot.slane %v1401_v22, 1 }
 0x16c   :  { %7028 = vst [vmem:[#allocation61_spill] sm:$0xff] %v4772_v11  ;;  %v1440_v57 = vsel %vm520_vm0, %v7030_v38, -inf  ;;  %v1410_v53 = vmax.f32 %v1408_v50, %v1409_v43  ;;  %v1418_v35 = vrot.slane %v1417_v32, 2  ;;  %v7033_v46 = vunpack.c.h.bf16 %v7029_v33  ;;  %v7037_v43 = vld [vmem:[#allocation113_spill] sm:$0xff] }
 0x16d   :  { %v1441_v34 = vsel %vm522_vm1, %v7032_v37, -inf  ;;  %v1426_v36 = vmax.f32 %v1424_v29, %v1425_v6  ;;  %v1434_v27 = vrot.slane %v1433_v59, 4  ;;  %v7035_v25 = vunpack.c.l.bf16 %v7034_v62 }
 0x16e   :  { %v1442_v41 = vmax.f32 %v1440_v57, %v1441_v34  ;;  %v1449_v3 = vsel %vm520_vm0, %v7033_v46, -inf  ;;  %v4786_v51 = vmax.f32 %v1401_v22, %v1402_v61  ;;  %v1411_v44 = vrot.slane %v1410_v53, 1  ;;  %v7040_v46 = vld [vmem:[#allocation114_spill] sm:$0xff] }
 0x16f   :  { %v1450_v45 = vsel %vm522_vm1, %v7035_v25, -inf  ;;  %v1419_v38 = vmax.f32 %v1417_v32, %v1418_v35  ;;  %v1427_v9 = vrot.slane %v1426_v36, 2  ;;  %v1435_v37 = vmax.f32 %v1433_v59, %v1434_v27 }
 0x170   :  { %7036 = vst [vmem:[#allocation62_spill] sm:$0xff] %v4786_v51  ;;  %v1443_v11 = vrot.slane %v1442_v41, 4  ;;  %v1451_v50 = vmax.f32 %v1449_v3, %v1450_v45  ;;  %v7038_v29 = vunpack.c.l.bf16 %v7037_v43  ;;  %v4791_v57 = vmax.f32 %v1410_v53, %v1411_v44  ;;  %v7044_v45 = vld [vmem:[#allocation115_spill] sm:$0xff] }
 0x171   :  { %v1420_v33 = vrot.slane %v1419_v38, 1  ;;  %v1428_v34 = vmax.f32 %v1426_v36, %v1427_v9  ;;  %v7041_v62 = vunpack.c.l.bf16 %v7040_v46  ;;  %v1436_v22 = vrot.slane %v1435_v37, 2 }
 0x172   :  { %v1458_v6 = vsel %vm520_vm0, %v7038_v29, -inf  ;;  %7039 = vst [vmem:[#allocation63_spill] sm:$0xff] %v4791_v57  ;;  %v1444_v61 = vmax.f32 %v1442_v41, %v1443_v11  ;;  %v1452_v51 = vrot.slane %v1451_v50, 4  ;;  %v7043_v27 = vunpack.c.h.bf16 %v7037_v43  ;;  %v7047_v41 = vld [vmem:[#allocation116_spill] sm:$0xff] }
 0x173   :  { %v1459_v25 = vsel %vm522_vm1, %v7041_v62, -inf  ;;  %v4796_v35 = vmax.f32 %v1419_v38, %v1420_v33  ;;  %v1429_v59 = vrot.slane %v1428_v34, 1  ;;  %v7045_v53 = vunpack.c.l.bf16 %v7044_v45  ;;  %v7049_v33 = vld [vmem:[#allocation117_spill] sm:$0xff] }
 0x174   :  { %v1460_v32 = vmax.f32 %v1458_v6, %v1459_v25  ;;  %v1467_v3 = vsel %vm520_vm0, %v7043_v27, -inf  ;;  %v1437_v36 = vmax.f32 %v1435_v37, %v1436_v22  ;;  %v1445_v9 = vrot.slane %v1444_v61, 2 }
 0x175   :  { %7042 = vst [vmem:[#allocation64_spill] sm:$0xff] %v4796_v35  ;;  %v1468_v44 = vsel %vm522_vm1, %v7045_v53, -inf  ;;  %v1453_v29 = vmax.f32 %v1451_v50, %v1452_v51  ;;  %v4804_v62 = vmax.f32 %v1428_v34, %v1429_v59  ;;  %v7048_v6 = vunpack.c.l.bf16 %v7047_v41  ;;  %v7052_v34 = vld [vmem:[#allocation118_spill] sm:$0xff] }
 0x176   :  { %v1461_v46 = vrot.slane %v1460_v32, 4  ;;  %v1469_v11 = vmax.f32 %v1467_v3, %v1468_v44  ;;  %v7050_v25 = vunpack.c.l.bf16 %v7049_v33  ;;  %v1438_v27 = vrot.slane %v1437_v36, 1 }
 0x177   :  { %7046 = vst [vmem:[#allocation65_spill] sm:$0xff] %v4804_v62  ;;  %v1476_v38 = vsel %vm520_vm0, %v7048_v6, -inf  ;;  %v1446_v35 = vmax.f32 %v1444_v61, %v1445_v9  ;;  %v1454_v45 = vrot.slane %v1453_v29, 2  ;;  %v7051_v51 = vunpack.c.h.bf16 %v7047_v41  ;;  %v7055_v9 = vld [vmem:[#allocation119_spill] sm:$0xff] }
 0x178   :  { %v1477_v43 = vsel %vm522_vm1, %v7050_v25, -inf  ;;  %v1462_v57 = vmax.f32 %v1460_v32, %v1461_v46  ;;  %v1470_v53 = vrot.slane %v1469_v11, 4  ;;  %v7053_v22 = vunpack.c.l.bf16 %v7052_v34 }
 0x179   :  { %v1478_v37 = vmax.f32 %v1476_v38, %v1477_v43  ;;  %v1485_v50 = vsel %vm520_vm0, %v7051_v51, -inf  ;;  %v4818_v3 = vmax.f32 %v1437_v36, %v1438_v27  ;;  %v1447_v44 = vrot.slane %v1446_v35, 1  ;;  %v7058_v51 = vld [vmem:[#allocation120_spill] sm:$0xff] }
 0x17a   :  { %v1486_v59 = vsel %vm522_vm1, %v7053_v22, -inf  ;;  %v1455_v6 = vmax.f32 %v1453_v29, %v1454_v45  ;;  %v1463_v33 = vrot.slane %v1462_v57, 2  ;;  %v1471_v25 = vmax.f32 %v1469_v11, %v1470_v53 }
 0x17b   :  { %7054 = vst [vmem:[#allocation66_spill] sm:$0xff] %v4818_v3  ;;  %v1479_v62 = vrot.slane %v1478_v37, 4  ;;  %v1487_v61 = vmax.f32 %v1485_v50, %v1486_v59  ;;  %v7056_v32 = vunpack.c.l.bf16 %v7055_v9  ;;  %v4823_v38 = vmax.f32 %v1446_v35, %v1447_v44  ;;  %v7062_v59 = vld [vmem:[#allocation121_spill] sm:$0xff] }
 0x17c   :  { %v1456_v41 = vrot.slane %v1455_v6, 1  ;;  %v1464_v43 = vmax.f32 %v1462_v57, %v1463_v33  ;;  %v7059_v34 = vunpack.c.l.bf16 %v7058_v51  ;;  %v1472_v36 = vrot.slane %v1471_v25, 2 }
 0x17d   :  { %v1494_v46 = vsel %vm520_vm0, %v7056_v32, -inf  ;;  %7057 = vst [vmem:[#allocation67_spill] sm:$0xff] %v4823_v38  ;;  %v1480_v27 = vmax.f32 %v1478_v37, %v1479_v62  ;;  %v1488_v3 = vrot.slane %v1487_v61, 4  ;;  %v7061_v53 = vunpack.c.h.bf16 %v7055_v9  ;;  %v7065_v37 = vld [vmem:[#allocation122_spill] sm:$0xff] }
 0x17e   :  { %v1495_v22 = vsel %vm522_vm1, %v7059_v34, -inf  ;;  %v4828_v45 = vmax.f32 %v1455_v6, %v1456_v41  ;;  %v1465_v11 = vrot.slane %v1464_v43, 1  ;;  %v7063_v35 = vunpack.c.l.bf16 %v7062_v59  ;;  %v7067_v41 = vld [vmem:[#allocation123_spill] sm:$0xff] }
 0x17f   :  { %v1496_v29 = vmax.f32 %v1494_v46, %v1495_v22  ;;  %v1503_v50 = vsel %vm520_vm0, %v7061_v53, -inf  ;;  %v1473_v57 = vmax.f32 %v1471_v25, %v1472_v36  ;;  %v1481_v33 = vrot.slane %v1480_v27, 2 }
 0x180   :  { %7060 = vst [vmem:[#allocation68_spill] sm:$0xff] %v4828_v45  ;;  %v1504_v44 = vsel %vm522_vm1, %v7063_v35, -inf  ;;  %v1489_v32 = vmax.f32 %v1487_v61, %v1488_v3  ;;  %v4836_v34 = vmax.f32 %v1464_v43, %v1465_v11  ;;  %v7066_v46 = vunpack.c.l.bf16 %v7065_v37  ;;  %v7070_v43 = vld [vmem:[#allocation124_spill] sm:$0xff] }
 0x181   :  { %v1497_v51 = vrot.slane %v1496_v29, 4  ;;  %v1505_v62 = vmax.f32 %v1503_v50, %v1504_v44  ;;  %v7068_v22 = vunpack.c.l.bf16 %v7067_v41  ;;  %v1474_v53 = vrot.slane %v1473_v57, 1 }
 0x182   :  { %7064 = vst [vmem:[#allocation69_spill] sm:$0xff] %v4836_v34  ;;  %v1512_v6 = vsel %vm520_vm0, %v7066_v46, -inf  ;;  %v1482_v45 = vmax.f32 %v1480_v27, %v1481_v33  ;;  %v1490_v59 = vrot.slane %v1489_v32, 2  ;;  %v7069_v3 = vunpack.c.h.bf16 %v7065_v37  ;;  %v7073_v33 = vld [vmem:[#allocation125_spill] sm:$0xff] }
 0x183   :  { %v1513_v9 = vsel %vm522_vm1, %v7068_v22, -inf  ;;  %v1498_v38 = vmax.f32 %v1496_v29, %v1497_v51  ;;  %v1506_v35 = vrot.slane %v1505_v62, 4  ;;  %v7071_v36 = vunpack.c.l.bf16 %v7070_v43 }
 0x184   :  { %v1514_v25 = vmax.f32 %v1512_v6, %v1513_v9  ;;  %v1521_v61 = vsel %vm520_vm0, %v7069_v3, -inf  ;;  %v4850_v50 = vmax.f32 %v1473_v57, %v1474_v53  ;;  %v1483_v44 = vrot.slane %v1482_v45, 1  ;;  %v7076_v3 = vld [vmem:[#allocation126_spill] sm:$0xff] }
 0x185   :  { %v1522_v11 = vsel %vm522_vm1, %v7071_v36, -inf  ;;  %v1491_v46 = vmax.f32 %v1489_v32, %v1490_v59  ;;  %v1499_v41 = vrot.slane %v1498_v38, 2  ;;  %v1507_v22 = vmax.f32 %v1505_v62, %v1506_v35 }
 0x186   :  { %7072 = vst [vmem:[#allocation70_spill] sm:$0xff] %v4850_v50  ;;  %v1515_v34 = vrot.slane %v1514_v25, 4  ;;  %v1523_v27 = vmax.f32 %v1521_v61, %v1522_v11  ;;  %v7074_v29 = vunpack.c.l.bf16 %v7073_v33  ;;  %v4855_v6 = vmax.f32 %v1482_v45, %v1483_v44  ;;  %v7080_v11 = vld [vmem:[#allocation127_spill] sm:$0xff] }
 0x187   :  { %v1492_v37 = vrot.slane %v1491_v46, 1  ;;  %v1500_v9 = vmax.f32 %v1498_v38, %v1499_v41  ;;  %v7077_v43 = vunpack.c.l.bf16 %v7076_v3  ;;  %v1508_v57 = vrot.slane %v1507_v22, 2 }
 0x188   :  { %v1530_v51 = vsel %vm520_vm0, %v7074_v29, -inf  ;;  %7075 = vst [vmem:[#allocation71_spill] sm:$0xff] %v4855_v6  ;;  %v1516_v53 = vmax.f32 %v1514_v25, %v1515_v34  ;;  %v1524_v50 = vrot.slane %v1523_v27, 4  ;;  %v7079_v35 = vunpack.c.h.bf16 %v7073_v33  ;;  %v7083_v25 = vld [vmem:[#allocation128_spill] sm:$0xff] }
 0x189   :  { %v1531_v36 = vsel %vm522_vm1, %v7077_v43, -inf  ;;  %v4860_v59 = vmax.f32 %v1491_v46, %v1492_v37  ;;  %v1501_v62 = vrot.slane %v1500_v9, 1  ;;  %v7081_v45 = vunpack.c.l.bf16 %v7080_v11  ;;  %v7085_v37 = vld [vmem:[#allocation129_spill] sm:$0xff] }
 0x18a   :  { %v1532_v32 = vmax.f32 %v1530_v51, %v1531_v36  ;;  %v1539_v61 = vsel %vm520_vm0, %v7079_v35, -inf  ;;  %v1509_v38 = vmax.f32 %v1507_v22, %v1508_v57  ;;  %v1517_v41 = vrot.slane %v1516_v53, 2 }
 0x18b   :  { %7078 = vst [vmem:[#allocation72_spill] sm:$0xff] %v4860_v59  ;;  %v1540_v44 = vsel %vm522_vm1, %v7081_v45, -inf  ;;  %v1525_v29 = vmax.f32 %v1523_v27, %v1524_v50  ;;  %v4868_v43 = vmax.f32 %v1500_v9, %v1501_v62  ;;  %v7084_v51 = vunpack.c.l.bf16 %v7083_v25  ;;  %v7088_v9 = vld [vmem:[#allocation130_spill] sm:$0xff] }
 0x18c   :  { %v1533_v3 = vrot.slane %v1532_v32, 4  ;;  %v1541_v34 = vmax.f32 %v1539_v61, %v1540_v44  ;;  %v7086_v36 = vunpack.c.l.bf16 %v7085_v37  ;;  %v1510_v35 = vrot.slane %v1509_v38, 1 }
 0x18d   :  { %7082 = vst [vmem:[#allocation73_spill] sm:$0xff] %v4868_v43  ;;  %v1548_v46 = vsel %vm520_vm0, %v7084_v51, -inf  ;;  %v1518_v59 = vmax.f32 %v1516_v53, %v1517_v41  ;;  %v1526_v11 = vrot.slane %v1525_v29, 2  ;;  %v7087_v50 = vunpack.c.h.bf16 %v7083_v25  ;;  %v7091_v41 = vld [vmem:[#allocation131_spill] sm:$0xff] }
 0x18e   :  { %v1549_v33 = vsel %vm522_vm1, %v7086_v36, -inf  ;;  %v1534_v6 = vmax.f32 %v1532_v32, %v1533_v3  ;;  %v1542_v45 = vrot.slane %v1541_v34, 4  ;;  %v7089_v57 = vunpack.c.l.bf16 %v7088_v9 }
 0x18f   :  { %v1550_v22 = vmax.f32 %v1548_v46, %v1549_v33  ;;  %v1557_v27 = vsel %vm520_vm0, %v7087_v50, -inf  ;;  %v4882_v61 = vmax.f32 %v1509_v38, %v1510_v35  ;;  %v1519_v44 = vrot.slane %v1518_v59, 1  ;;  %v7094_v50 = vld [vmem:[#allocation132_spill] sm:$0xff] }
 0x190   :  { %v1558_v62 = vsel %vm522_vm1, %v7089_v57, -inf  ;;  %v1527_v51 = vmax.f32 %v1525_v29, %v1526_v11  ;;  %v1535_v37 = vrot.slane %v1534_v6, 2  ;;  %v1543_v36 = vmax.f32 %v1541_v34, %v1542_v45 }
 0x191   :  { %7090 = vst [vmem:[#allocation74_spill] sm:$0xff] %v4882_v61  ;;  %v1551_v43 = vrot.slane %v1550_v22, 4  ;;  %v1559_v53 = vmax.f32 %v1557_v27, %v1558_v62  ;;  %v7092_v32 = vunpack.c.l.bf16 %v7091_v41  ;;  %v4887_v46 = vmax.f32 %v1518_v59, %v1519_v44  ;;  %v7098_v62 = vld [vmem:[#allocation133_spill] sm:$0xff] }
 0x192   :  { %v1528_v25 = vrot.slane %v1527_v51, 1  ;;  %v1536_v33 = vmax.f32 %v1534_v6, %v1535_v37  ;;  %v7095_v9 = vunpack.c.l.bf16 %v7094_v50  ;;  %v1544_v38 = vrot.slane %v1543_v36, 2 }
 0x193   :  { %v1566_v3 = vsel %vm520_vm0, %v7092_v32, -inf  ;;  %7093 = vst [vmem:[#allocation75_spill] sm:$0xff] %v4887_v46  ;;  %v1552_v35 = vmax.f32 %v1550_v22, %v1551_v43  ;;  %v1560_v61 = vrot.slane %v1559_v53, 4  ;;  %v7097_v45 = vunpack.c.h.bf16 %v7091_v41  ;;  %v7101_v22 = vld [vmem:[#allocation134_spill] sm:$0xff] }
 0x194   :  { %v1567_v57 = vsel %vm522_vm1, %v7095_v9, -inf  ;;  %v4892_v11 = vmax.f32 %v1527_v51, %v1528_v25  ;;  %v1537_v34 = vrot.slane %v1536_v33, 1  ;;  %v7099_v59 = vunpack.c.l.bf16 %v7098_v62  ;;  %v7103_v25 = vld [vmem:[#allocation135_spill] sm:$0xff] }
 0x195   :  { %v1568_v29 = vmax.f32 %v1566_v3, %v1567_v57  ;;  %v1575_v27 = vsel %vm520_vm0, %v7097_v45, -inf  ;;  %v1545_v6 = vmax.f32 %v1543_v36, %v1544_v38  ;;  %v1553_v37 = vrot.slane %v1552_v35, 2 }
 0x196   :  { %7096 = vst [vmem:[#allocation76_spill] sm:$0xff] %v4892_v11  ;;  %v1576_v44 = vsel %vm522_vm1, %v7099_v59, -inf  ;;  %v1561_v32 = vmax.f32 %v1559_v53, %v1560_v61  ;;  %v4900_v9 = vmax.f32 %v1536_v33, %v1537_v34  ;;  %v7102_v3 = vunpack.c.l.bf16 %v7101_v22  ;;  %v7106_v33 = vld [vmem:[#allocation136_spill] sm:$0xff] }
 0x197   :  { %v1569_v50 = vrot.slane %v1568_v29, 4  ;;  %v1577_v43 = vmax.f32 %v1575_v27, %v1576_v44  ;;  %v7104_v57 = vunpack.c.l.bf16 %v7103_v25  ;;  %v1546_v45 = vrot.slane %v1545_v6, 1 }
 0x198   :  { %7100 = vst [vmem:[#allocation77_spill] sm:$0xff] %v4900_v9  ;;  %v1584_v51 = vsel %vm520_vm0, %v7102_v3, -inf  ;;  %v1554_v11 = vmax.f32 %v1552_v35, %v1553_v37  ;;  %v1562_v62 = vrot.slane %v1561_v32, 2  ;;  %v7105_v61 = vunpack.c.h.bf16 %v7101_v22  ;;  %v7109_v37 = vld [vmem:[#allocation137_spill] sm:$0xff] }
 0x199   :  { %v1585_v41 = vsel %vm522_vm1, %v7104_v57, -inf  ;;  %v1570_v46 = vmax.f32 %v1568_v29, %v1569_v50  ;;  %v1578_v59 = vrot.slane %v1577_v43, 4  ;;  %v7107_v38 = vunpack.c.l.bf16 %v7106_v33 }
 0x19a   :  { %v1586_v36 = vmax.f32 %v1584_v51, %v1585_v41  ;;  %v1593_v53 = vsel %vm520_vm0, %v7105_v61, -inf  ;;  %v4914_v27 = vmax.f32 %v1545_v6, %v1546_v45  ;;  %v1555_v44 = vrot.slane %v1554_v11, 1  ;;  %v7112_v61 = vld [vmem:[#allocation138_spill] sm:$0xff] }
 0x19b   :  { %v1594_v34 = vsel %vm522_vm1, %v7107_v38, -inf  ;;  %v1563_v3 = vmax.f32 %v1561_v32, %v1562_v62  ;;  %v1571_v25 = vrot.slane %v1570_v46, 2  ;;  %v1579_v57 = vmax.f32 %v1577_v43, %v1578_v59 }
 0x19c   :  { %7108 = vst [vmem:[#allocation78_spill] sm:$0xff] %v4914_v27  ;;  %v1587_v9 = vrot.slane %v1586_v36, 4  ;;  %v1595_v35 = vmax.f32 %v1593_v53, %v1594_v34  ;;  %v7110_v29 = vunpack.c.l.bf16 %v7109_v37  ;;  %v4919_v51 = vmax.f32 %v1554_v11, %v1555_v44  ;;  %v7116_v34 = vld [vmem:[#allocation139_spill] sm:$0xff] }
 0x19d   :  { %v1564_v22 = vrot.slane %v1563_v3, 1  ;;  %v1572_v41 = vmax.f32 %v1570_v46, %v1571_v25  ;;  %v7113_v33 = vunpack.c.l.bf16 %v7112_v61  ;;  %v1580_v6 = vrot.slane %v1579_v57, 2 }
 0x19e   :  { %v1602_v50 = vsel %vm520_vm0, %v7110_v29, -inf  ;;  %7111 = vst [vmem:[#allocation79_spill] sm:$0xff] %v4919_v51  ;;  %v1588_v45 = vmax.f32 %v1586_v36, %v1587_v9  ;;  %v1596_v27 = vrot.slane %v1595_v35, 4  ;;  %v7115_v59 = vunpack.c.h.bf16 %v7109_v37  ;;  %v7119_v36 = vld [vmem:[#allocation140_spill] sm:$0xff] }
 0x19f   :  { %v1603_v38 = vsel %vm522_vm1, %v7113_v33, -inf  ;;  %v4924_v62 = vmax.f32 %v1563_v3, %v1564_v22  ;;  %v1573_v43 = vrot.slane %v1572_v41, 1  ;;  %v7117_v11 = vunpack.c.l.bf16 %v7116_v34  ;;  %v7121_v22 = vld [vmem:[#allocation141_spill] sm:$0xff] }
 0x1a0   :  { %v1604_v32 = vmax.f32 %v1602_v50, %v1603_v38  ;;  %v1611_v53 = vsel %vm520_vm0, %v7115_v59, -inf  ;;  %v1581_v46 = vmax.f32 %v1579_v57, %v1580_v6  ;;  %v1589_v25 = vrot.slane %v1588_v45, 2 }
 0x1a1   :  { %7114 = vst [vmem:[#allocation80_spill] sm:$0xff] %v4924_v62  ;;  %v1612_v44 = vsel %vm522_vm1, %v7117_v11, -inf  ;;  %v1597_v29 = vmax.f32 %v1595_v35, %v1596_v27  ;;  %v4932_v33 = vmax.f32 %v1572_v41, %v1573_v43  ;;  %v7120_v50 = vunpack.c.l.bf16 %v7119_v36  ;;  %v7124_v41 = vld [vmem:[#allocation142_spill] sm:$0xff] }
 0x1a2   :  { %v1605_v61 = vrot.slane %v1604_v32, 4  ;;  %v1613_v9 = vmax.f32 %v1611_v53, %v1612_v44  ;;  %v7122_v38 = vunpack.c.l.bf16 %v7121_v22  ;;  %v1582_v59 = vrot.slane %v1581_v46, 1 }
 0x1a3   :  { %7118 = vst [vmem:[#allocation81_spill] sm:$0xff] %v4932_v33  ;;  %v1620_v3 = vsel %vm520_vm0, %v7120_v50, -inf  ;;  %v1590_v62 = vmax.f32 %v1588_v45, %v1589_v25  ;;  %v1598_v34 = vrot.slane %v1597_v29, 2  ;;  %v7123_v27 = vunpack.c.h.bf16 %v7119_v36  ;;  %v7127_v25 = vld [vmem:[#allocation143_spill] sm:$0xff] }
 0x1a4   :  { %v1621_v37 = vsel %vm522_vm1, %v7122_v38, -inf  ;;  %v1606_v51 = vmax.f32 %v1604_v32, %v1605_v61  ;;  %v1614_v11 = vrot.slane %v1613_v9, 4  ;;  %v7125_v6 = vunpack.c.l.bf16 %v7124_v41 }
 0x1a5   :  { %v1622_v57 = vmax.f32 %v1620_v3, %v1621_v37  ;;  %v1629_v35 = vsel %vm520_vm0, %v7123_v27, -inf  ;;  %v4946_v53 = vmax.f32 %v1581_v46, %v1582_v59  ;;  %v1591_v44 = vrot.slane %v1590_v62, 1  ;;  %v7130_v27 = vld [vmem:[#allocation144_spill] sm:$0xff] }
 0x1a6   :  { %v1630_v43 = vsel %vm522_vm1, %v7125_v6, -inf  ;;  %v1599_v50 = vmax.f32 %v1597_v29, %v1598_v34  ;;  %v1607_v22 = vrot.slane %v1606_v51, 2  ;;  %v1615_v38 = vmax.f32 %v1613_v9, %v1614_v11 }
 0x1a7   :  { %7126 = vst [vmem:[#allocation82_spill] sm:$0xff] %v4946_v53  ;;  %v1623_v33 = vrot.slane %v1622_v57, 4  ;;  %v1631_v45 = vmax.f32 %v1629_v35, %v1630_v43  ;;  %v7128_v32 = vunpack.c.l.bf16 %v7127_v25  ;;  %v4951_v3 = vmax.f32 %v1590_v62, %v1591_v44  ;;  %v7134_v43 = vld [vmem:[#allocation145_spill] sm:$0xff] }
 0x1a8   :  { %v1600_v36 = vrot.slane %v1599_v50, 1  ;;  %v1608_v37 = vmax.f32 %v1606_v51, %v1607_v22  ;;  %v7131_v41 = vunpack.c.l.bf16 %v7130_v27  ;;  %v1616_v46 = vrot.slane %v1615_v38, 2 }
 0x1a9   :  { %v1638_v61 = vsel %vm520_vm0, %v7128_v32, -inf  ;;  %7129 = vst [vmem:[#allocation83_spill] sm:$0xff] %v4951_v3  ;;  %v1624_v59 = vmax.f32 %v1622_v57, %v1623_v33  ;;  %v1632_v53 = vrot.slane %v1631_v45, 4  ;;  %v7133_v11 = vunpack.c.h.bf16 %v7127_v25  ;;  %v7137_v57 = vld [vmem:[#allocation146_spill] sm:$0xff] }
 0x1aa   :  { %v1639_v6 = vsel %vm522_vm1, %v7131_v41, -inf  ;;  %v4956_v34 = vmax.f32 %v1599_v50, %v1600_v36  ;;  %v1609_v9 = vrot.slane %v1608_v37, 1  ;;  %v7135_v62 = vunpack.c.l.bf16 %v7134_v43  ;;  %v7139_v36 = vld [vmem:[#allocation147_spill] sm:$0xff] }
 0x1ab   :  { %v1640_v29 = vmax.f32 %v1638_v61, %v1639_v6  ;;  %v1647_v35 = vsel %vm520_vm0, %v7133_v11, -inf  ;;  %v1617_v51 = vmax.f32 %v1615_v38, %v1616_v46  ;;  %v1625_v22 = vrot.slane %v1624_v59, 2 }
 0x1ac   :  { %7132 = vst [vmem:[#allocation84_spill] sm:$0xff] %v4956_v34  ;;  %v1648_v44 = vsel %vm522_vm1, %v7135_v62, -inf  ;;  %v1633_v32 = vmax.f32 %v1631_v45, %v1632_v53  ;;  %v4964_v41 = vmax.f32 %v1608_v37, %v1609_v9  ;;  %v7138_v61 = vunpack.c.l.bf16 %v7137_v57  ;;  %v7142_v37 = vld [vmem:[#allocation148_spill] sm:$0xff] }
 0x1ad   :  { %v1641_v27 = vrot.slane %v1640_v29, 4  ;;  %v1649_v33 = vmax.f32 %v1647_v35, %v1648_v44  ;;  %v7140_v6 = vunpack.c.l.bf16 %v7139_v36  ;;  %v1618_v11 = vrot.slane %v1617_v51, 1 }
 0x1ae   :  { %7136 = vst [vmem:[#allocation85_spill] sm:$0xff] %v4964_v41  ;;  %v1656_v50 = vsel %vm520_vm0, %v7138_v61, -inf  ;;  %v1626_v34 = vmax.f32 %v1624_v59, %v1625_v22  ;;  %v1634_v43 = vrot.slane %v1633_v32, 2  ;;  %v7141_v53 = vunpack.c.h.bf16 %v7137_v57 }
 0x1af   :  { %v1657_v25 = vsel %vm522_vm1, %v7140_v6, -inf  ;;  %v1642_v3 = vmax.f32 %v1640_v29, %v1641_v27  ;;  %v1650_v62 = vrot.slane %v1649_v33, 4  ;;  %v7143_v46 = vunpack.c.l.bf16 %v7142_v37  ;;  %v7222_v29 = vld [vmem:[#allocation78_spill] sm:$0xff]  ;;  %v7225_v37 = vld [vmem:[#allocation81_spill] sm:$0xff] }
 0x1b0   :  { %v1658_v38 = vmax.f32 %v1656_v50, %v1657_v25  ;;  %v1665_v45 = vsel %vm520_vm0, %v7141_v53, -inf  ;;  %v4978_v35 = vmax.f32 %v1617_v51, %v1618_v11  ;;  %v1627_v44 = vrot.slane %v1626_v34, 1 }
 0x1b1   :  { %v1666_v9 = vsel %vm522_vm1, %v7143_v46, -inf  ;;  %v1635_v61 = vmax.f32 %v1633_v32, %v1634_v43  ;;  %v1643_v36 = vrot.slane %v1642_v3, 2  ;;  %v1651_v6 = vmax.f32 %v1649_v33, %v1650_v62  ;;  %v7223_v46 = vld [vmem:[#allocation79_spill] sm:$0xff] }
 0x1b2   :  { %7144 = vst [vmem:[#allocation86_spill] sm:$0xff] %v4978_v35  ;;  %v1659_v41 = vrot.slane %v1658_v38, 4  ;;  %v1667_v59 = vmax.f32 %v1665_v45, %v1666_v9  ;;  %v4982_v22 = vmax.f32 %v1626_v34, %v1627_v44  ;;  %v7150_v9 = vld [vmem:[#allocation6_spill] sm:$0xff]  ;;  %v7227_v43 = vld [vmem:[#allocation83_spill] sm:$0xff]  ;;  %vm2318_vm4 = vcmask 1043459  }
 0x1b3   :  { %v1636_v27 = vrot.slane %v1635_v61, 1  ;;  %v1644_v57 = vmax.f32 %v1642_v3, %v1643_v36  ;;  %v1652_v25 = vrot.slane %v1651_v6, 2  ;;  %v7226_v34 = vld [vmem:[#allocation82_spill] sm:$0xff]  ;;  %v7228_v32 = vld [vmem:[#allocation84_spill] sm:$0xff]  ;;  %vm2320_vm5 = vcmask 1044484  }
 0x1b4   :  { %v1660_v53 = vmax.f32 %v1658_v38, %v1659_v41  ;;  %v1668_v51 = vrot.slane %v1667_v59, 4  ;;  %v7224_v38 = vld [vmem:[#allocation80_spill] sm:$0xff]  ;;  %vm2322_vm6 = vcmask 1045509   ;;  %vm2324_vm7 = vcmask 1046534  }
 0x1b5   :  { %v4988_v11 = vmax.f32 %v1635_v61, %v1636_v27  ;;  %v1645_v33 = vrot.slane %v1644_v57, 1  ;;  %v1653_v62 = vmax.f32 %v1651_v6, %v1652_v25  ;;  %v7148_v6 = vld [vmem:[#allocation4_spill] sm:$0xff]  ;;  %v7229_v50 = vld [vmem:[#allocation85_spill] sm:$0xff]  ;;  %v7277_v27 = vld [vmem:[#allocation7_spill] sm:$0xff]  ;;  %vm2326_vm8 = vcmask 1047559  }
 0x1b6   :  { %v1661_v3 = vrot.slane %v1660_v53, 2  ;;  %v1669_v45 = vmax.f32 %v1667_v59, %v1668_v51  ;;  %v7233_v59 = vpack.c.bf16 %v4022_v42, %v4022_v42  ;;  %v7237_v42 = vpack.c.bf16 %v4069_v23, %v4069_v23 }
 0x1b7   :  { %v4996_v41 = vmax.f32 %v1644_v57, %v1645_v33  ;;  %v1654_v44 = vrot.slane %v1653_v62, 1  ;;  %v7147_v57 = vld [vmem:[#allocation3_spill] sm:$0xff]  ;;  %v7241_v23 = vpack.c.bf16 %v4092_v0, %v4092_v0  ;;  %v7245_v0 = vpack.c.bf16 %v4127_v28, %v4127_v28 }
 0x1b8   :  { %v1662_v61 = vmax.f32 %v1660_v53, %v1661_v3  ;;  %v1670_v36 = vrot.slane %v1669_v45, 2  ;;  %v7149_v3 = vld [vmem:[#allocation5_spill] sm:$0xff]  ;;  %v7249_v28 = vpack.c.bf16 %v4159_v55, %v4159_v55  ;;  %v7253_v55 = vpack.c.bf16 %v4191_v12, %v4191_v12 }
 0x1b9   :  { %v5014_v51 = vmax.f32 %v1653_v62, %v1654_v44  ;;  %v7232_v44 = vpack.c.bf16 %v4020_v48, %v4020_v48  ;;  %v7236_v48 = vpack.c.bf16 %v4055_v19, %v4055_v19  ;;  %v7240_v19 = vpack.c.bf16 %v4090_v24, %v4090_v24 }
 0x1ba   :  { %v1663_v33 = vrot.slane %v1662_v61, 1  ;;  %v1671_v53 = vmax.f32 %v1669_v45, %v1670_v36  ;;  %v7146_v45 = vld [vmem:[#allocation2_spill] sm:$0xff]  ;;  %v7244_v24 = vpack.c.bf16 %v4113_v21, %v4113_v21  ;;  %v7248_v21 = vpack.c.bf16 %v4151_v16, %v4151_v16 }
 0x1bb   :  { %v5261_v36 = vunpack.c.l.b16 %v7232_v44  ;;  %v5281_v44 = vunpack.c.l.b16 %v7236_v48  ;;  %v5301_v48 = vunpack.c.l.b16 %v7240_v19  ;;  %v7252_v16 = vpack.c.bf16 %v4183_v30, %v4183_v30 }
 0x1bc   :  { %v5026_v25 = vmax.f32 %v1662_v61, %v1663_v33  ;;  %v1672_v62 = vrot.slane %v1671_v53, 1  ;;  %v7230_v61 = vpack.c.bf16 %v4016_v20, %v4016_v20  ;;  %v7234_v20 = vpack.c.bf16 %v4030_v13, %v4030_v13 }
 0x1bd   :  { %v7238_v13 = vpack.c.bf16 %v4077_v31, %v4077_v31  ;;  %v7242_v31 = vpack.c.bf16 %v4094_v40, %v4094_v40  ;;  %v5321_v19 = vunpack.c.l.b16 %v7244_v24  ;;  %v7246_v40 = vpack.c.bf16 %v4141_v8, %v4141_v8 }
 0x1be   :  { %7145 = vst [vmem:[#allocation87_spill] sm:$0xff] %v5026_v25  ;;  %v5040_v33 = vmax.f32 %v1671_v53, %v1672_v62  ;;  %v5251_v35 = vunpack.c.l.b16 %v7230_v61  ;;  %v7231_v62 = vpack.c.bf16 %v4018_v15, %v4018_v15  ;;  %v5266_v25 = vunpack.c.l.b16 %v7233_v59 }
 0x1bf   :  { %v5271_v61 = vunpack.c.l.b16 %v7234_v20  ;;  %v7235_v15 = vpack.c.bf16 %v4032_v1, %v4032_v1  ;;  %v5286_v59 = vunpack.c.l.b16 %v7237_v42  ;;  %v5291_v20 = vunpack.c.l.b16 %v7238_v13 }
 0x1c0   :  { %v5256_v53 = vunpack.c.l.b16 %v7231_v62  ;;  %v7239_v1 = vpack.c.bf16 %v4082_v18, %v4082_v18  ;;  %v5306_v42 = vunpack.c.l.b16 %v7241_v23  ;;  %v5311_v13 = vunpack.c.l.b16 %v7242_v31 }
 0x1c1   :  { %v5276_v62 = vunpack.c.l.b16 %v7235_v15  ;;  %v7243_v18 = vpack.c.bf16 %v4108_v52, %v4108_v52  ;;  %v5326_v23 = vunpack.c.l.b16 %v7245_v0  ;;  %v5331_v31 = vunpack.c.l.b16 %v7246_v40 }
 0x1c2   :  { %v5296_v15 = vunpack.c.l.b16 %v7239_v1  ;;  %v7247_v52 = vpack.c.bf16 %v4146_v47, %v4146_v47  ;;  %v5341_v24 = vunpack.c.l.b16 %v7248_v21  ;;  %v5346_v0 = vunpack.c.l.b16 %v7249_v28 }
 0x1c3   :  { %v5316_v1 = vunpack.c.l.b16 %v7243_v18  ;;  %v7250_v8 = vpack.c.bf16 %v4167_v7, %v4167_v7  ;;  %v7251_v47 = vpack.c.bf16 %v4175_v2, %v4175_v2  ;;  %v5361_v21 = vunpack.c.l.b16 %v7252_v16 }
 0x1c4   :  { %v5336_v18 = vunpack.c.l.b16 %v7247_v52  ;;  %v5366_v28 = vunpack.c.l.b16 %v7253_v55  ;;  %v7254_v7 = vpack.c.bf16 %v4205_v58, %v4205_v58  ;;  %v7255_v2 = vpack.c.bf16 %v4210_v26, %v4210_v26 }
 0x1c5   :  { %v5351_v40 = vunpack.c.l.b16 %v7250_v8  ;;  %v5356_v52 = vunpack.c.l.b16 %v7251_v47  ;;  %v7256_v30 = vpack.c.bf16 %v4215_v5, %v4215_v5  ;;  %v7257_v12 = vpack.c.bf16 %v4226_v39, %v4226_v39 }
 0x1c6   :  { %v5371_v8 = vunpack.c.l.b16 %v7254_v7  ;;  %v5376_v47 = vunpack.c.l.b16 %v7255_v2  ;;  %v7258_v58 = vpack.c.bf16 %v4231_v10, %v4231_v10  ;;  %v7259_v26 = vpack.c.bf16 %v4236_v63, %v4236_v63 }
 0x1c7   :  { %v5381_v16 = vunpack.c.l.b16 %v7256_v30  ;;  %v5386_v55 = vunpack.c.l.b16 %v7257_v12  ;;  %v7260_v5 = vpack.c.bf16 %v4244_v54, %v4244_v54  ;;  %v7261_v39 = vpack.c.bf16 %v4252_v60, %v4252_v60 }
 0x1c8   :  { %v5391_v7 = vunpack.c.l.b16 %v7258_v58  ;;  %v5396_v2 = vunpack.c.l.b16 %v7259_v26  ;;  %v7262_v10 = vpack.c.bf16 %v4260_v56, %v4260_v56  ;;  %v7263_v63 = vpack.c.bf16 %v4274_v17, %v4274_v17 }
 0x1c9   :  { %v5401_v30 = vunpack.c.l.b16 %v7260_v5  ;;  %v5406_v12 = vunpack.c.l.b16 %v7261_v39  ;;  %v7264_v54 = vpack.c.bf16 %v4279_v4, %v4279_v4  ;;  %v7265_v60 = vpack.c.bf16 %v4284_v14, %v4284_v14 }
 0x1ca   :  { %v5411_v58 = vunpack.c.l.b16 %v7262_v10  ;;  %v5416_v26 = vunpack.c.l.b16 %v7263_v63  ;;  %v7267_v56 = vpack.c.bf16 %v4298_v49, %v4298_v49  ;;  %v7269_v17 = vpack.c.bf16 %v7146_v45, %v7146_v45 }
 0x1cb   :  { %v5421_v5 = vunpack.c.l.b16 %v7264_v54  ;;  %v5426_v39 = vunpack.c.l.b16 %v7265_v60  ;;  %v7271_v4 = vpack.c.bf16 %v7147_v57, %v7147_v57  ;;  %v7273_v14 = vpack.c.bf16 %v7148_v6, %v7148_v6 }
 0x1cc   :  { %v5431_v10 = vunpack.c.l.b16 %v7267_v56  ;;  %v5436_v63 = vunpack.c.l.b16 %v7269_v17  ;;  %v7275_v49 = vpack.c.bf16 %v7149_v3, %v7149_v3  ;;  %v7276_v45 = vpack.c.bf16 %v7150_v9, %v7150_v9 }
 0x1cd   :  { %7266 = vst [vmem:[#allocation88_spill] sm:$0xff] %v5426_v39  ;;  %v5441_v54 = vunpack.c.l.b16 %v7271_v4  ;;  %v5446_v60 = vunpack.c.l.b16 %v7273_v14  ;;  %v7278_v57 = vpack.c.bf16 %v7277_v27, %v7277_v27  ;;  %v7309_v39 = vld [vmem:[#allocation18_spill] sm:$0xff]  ;;  %vm2465_vm9 = vcmask 60416  }
 0x1ce   :  { %7268 = vst [vmem:[#allocation89_spill] sm:$0xff] %v5431_v10  ;;  %7270 = vst [vmem:[#allocation90_spill] sm:$0xff] %v5436_v63  ;;  %v5451_v56 = vunpack.c.l.b16 %v7275_v49  ;;  %v5456_v17 = vunpack.c.l.b16 %v7276_v45  ;;  %v7286_v63 = vld [vmem:[#allocation10_spill] sm:$0xff]  ;;  %v7289_v10 = vld [vmem:[#allocation11_spill] sm:$0xff] }
 0x1cf   :  { %7272 = vst [vmem:[#allocation91_spill] sm:$0xff] %v5441_v54  ;;  %7274 = vst [vmem:[#allocation92_spill] sm:$0xff] %v5446_v60  ;;  %v5461_v4 = vunpack.c.l.b16 %v7278_v57  ;;  %v7280_v54 = vld [vmem:[#allocation8_spill] sm:$0xff]  ;;  %v7283_v60 = vld [vmem:[#allocation9_spill] sm:$0xff]  ;;  %v7287_v9 = vpack.c.bf16 %v7286_v63, %v7286_v63  ;;  %v7290_v27 = vpack.c.bf16 %v7289_v10, %v7289_v10 }
 0x1d0   :  { %v7281_v6 = vpack.c.bf16 %v7280_v54, %v7280_v54  ;;  %v7284_v3 = vpack.c.bf16 %v7283_v60, %v7283_v60 }
 0x1d1   :  { %7279 = vst [vmem:[#allocation93_spill] sm:$0xff] %v5461_v4  ;;  %v5476_v45 = vunpack.c.l.b16 %v7287_v9  ;;  %v5481_v57 = vunpack.c.l.b16 %v7290_v27  ;;  %v7292_v4 = vld [vmem:[#allocation12_spill] sm:$0xff] }
 0x1d2   :  { %v5466_v14 = vunpack.c.l.b16 %v7281_v6  ;;  %v5471_v49 = vunpack.c.l.b16 %v7284_v3  ;;  %v7293_v54 = vpack.c.bf16 %v7292_v4, %v7292_v4 }
 0x1d3   :  { %7288 = vst [vmem:[#allocation96_spill] sm:$0xff] %v5476_v45  ;;  %7291 = vst [vmem:[#allocation97_spill] sm:$0xff] %v5481_v57  ;;  %v7300_v45 = vld [vmem:[#allocation15_spill] sm:$0xff]  ;;  %v7303_v57 = vld [vmem:[#allocation16_spill] sm:$0xff] }
 0x1d4   :  { %7282 = vst [vmem:[#allocation94_spill] sm:$0xff] %v5466_v14  ;;  %7285 = vst [vmem:[#allocation95_spill] sm:$0xff] %v5471_v49  ;;  %v5486_v6 = vunpack.c.l.b16 %v7293_v54  ;;  %v7295_v14 = vld [vmem:[#allocation13_spill] sm:$0xff]  ;;  %v7297_v49 = vld [vmem:[#allocation14_spill] sm:$0xff]  ;;  %v7301_v10 = vpack.c.bf16 %v7300_v45, %v7300_v45  ;;  %v7304_v4 = vpack.c.bf16 %v7303_v57, %v7303_v57 }
 0x1d5   :  { %v7296_v60 = vpack.c.bf16 %v7295_v14, %v7295_v14  ;;  %v7298_v63 = vpack.c.bf16 %v7297_v49, %v7297_v49  ;;  %v7310_v49 = vpack.c.bf16 %v7309_v39, %v7309_v39 }
 0x1d6   :  { %7294 = vst [vmem:[#allocation98_spill] sm:$0xff] %v5486_v6  ;;  %v5501_v27 = vunpack.c.l.b16 %v7301_v10  ;;  %v5506_v54 = vunpack.c.l.b16 %v7304_v4  ;;  %v7306_v6 = vld [vmem:[#allocation17_spill] sm:$0xff] }
 0x1d7   :  { %v5491_v3 = vunpack.c.l.b16 %v7296_v60  ;;  %v5496_v9 = vunpack.c.l.b16 %v7298_v63  ;;  %v7307_v14 = vpack.c.bf16 %v7306_v6, %v7306_v6  ;;  %v5516_v63 = vunpack.c.l.b16 %v7310_v49 }
 0x1d8   :  { %7302 = vst [vmem:[#allocation100_spill] sm:$0xff] %v5501_v27  ;;  %7305 = vst [vmem:[#allocation101_spill] sm:$0xff] %v5506_v54  ;;  %v7315_v27 = vld [vmem:[#allocation20_spill] sm:$0xff]  ;;  %v7318_v54 = vld [vmem:[#allocation21_spill] sm:$0xff] }
 0x1d9   :  { %7299 = vst [vmem:[#allocation99_spill] sm:$0xff] %v5496_v9  ;;  %v5511_v60 = vunpack.c.l.b16 %v7307_v14  ;;  %7311 = vst [vmem:[#allocation103_spill] sm:$0xff] %v5516_v63  ;;  %v7312_v9 = vld [vmem:[#allocation19_spill] sm:$0xff]  ;;  %v7316_v57 = vpack.c.bf16 %v7315_v27, %v7315_v27  ;;  %v7319_v6 = vpack.c.bf16 %v7318_v54, %v7318_v54 }
 0x1da   :  { %v7313_v45 = vpack.c.bf16 %v7312_v9, %v7312_v9  ;;  %v7324_v63 = vld [vmem:[#allocation23_spill] sm:$0xff] }
 0x1db   :  { %7308 = vst [vmem:[#allocation102_spill] sm:$0xff] %v5511_v60  ;;  %v5526_v4 = vunpack.c.l.b16 %v7316_v57  ;;  %v5531_v14 = vunpack.c.l.b16 %v7319_v6  ;;  %v7321_v60 = vld [vmem:[#allocation22_spill] sm:$0xff]  ;;  %v7325_v9 = vpack.c.bf16 %v7324_v63, %v7324_v63 }
 0x1dc   :  { %v5521_v10 = vunpack.c.l.b16 %v7313_v45  ;;  %v7322_v39 = vpack.c.bf16 %v7321_v60, %v7321_v60 }
 0x1dd   :  { %7317 = vst [vmem:[#allocation105_spill] sm:$0xff] %v5526_v4  ;;  %7320 = vst [vmem:[#allocation106_spill] sm:$0xff] %v5531_v14  ;;  %v5541_v45 = vunpack.c.l.b16 %v7325_v9  ;;  %v7330_v4 = vld [vmem:[#allocation25_spill] sm:$0xff]  ;;  %v7333_v14 = vld [vmem:[#allocation26_spill] sm:$0xff] }
 0x1de   :  { %7314 = vst [vmem:[#allocation104_spill] sm:$0xff] %v5521_v10  ;;  %v5536_v49 = vunpack.c.l.b16 %v7322_v39  ;;  %v7327_v10 = vld [vmem:[#allocation24_spill] sm:$0xff]  ;;  %v7331_v54 = vpack.c.bf16 %v7330_v4, %v7330_v4  ;;  %v7334_v60 = vpack.c.bf16 %v7333_v14, %v7333_v14 }
 0x1df   :  { %7326 = vst [vmem:[#allocation108_spill] sm:$0xff] %v5541_v45  ;;  %v7328_v27 = vpack.c.bf16 %v7327_v10, %v7327_v10  ;;  %v7339_v45 = vld [vmem:[#allocation28_spill] sm:$0xff] }
 0x1e0   :  { %7323 = vst [vmem:[#allocation107_spill] sm:$0xff] %v5536_v49  ;;  %v5551_v6 = vunpack.c.l.b16 %v7331_v54  ;;  %v5556_v39 = vunpack.c.l.b16 %v7334_v60  ;;  %v7336_v49 = vld [vmem:[#allocation27_spill] sm:$0xff]  ;;  %v7340_v10 = vpack.c.bf16 %v7339_v45, %v7339_v45 }
 0x1e1   :  { %v5546_v57 = vunpack.c.l.b16 %v7328_v27  ;;  %v7337_v63 = vpack.c.bf16 %v7336_v49, %v7336_v49 }
 0x1e2   :  { %7332 = vst [vmem:[#allocation110_spill] sm:$0xff] %v5551_v6  ;;  %7335 = vst [vmem:[#allocation111_spill] sm:$0xff] %v5556_v39  ;;  %v5566_v27 = vunpack.c.l.b16 %v7340_v10  ;;  %v7345_v6 = vld [vmem:[#allocation30_spill] sm:$0xff]  ;;  %v7348_v39 = vld [vmem:[#allocation31_spill] sm:$0xff] }
 0x1e3   :  { %7329 = vst [vmem:[#allocation109_spill] sm:$0xff] %v5546_v57  ;;  %v5561_v9 = vunpack.c.l.b16 %v7337_v63  ;;  %v7342_v57 = vld [vmem:[#allocation29_spill] sm:$0xff]  ;;  %v7346_v14 = vpack.c.bf16 %v7345_v6, %v7345_v6  ;;  %v7349_v49 = vpack.c.bf16 %v7348_v39, %v7348_v39 }
 0x1e4   :  { %7341 = vst [vmem:[#allocation113_spill] sm:$0xff] %v5566_v27  ;;  %v7343_v4 = vpack.c.bf16 %v7342_v57, %v7342_v57  ;;  %v7354_v27 = vld [vmem:[#allocation33_spill] sm:$0xff] }
 0x1e5   :  { %7338 = vst [vmem:[#allocation112_spill] sm:$0xff] %v5561_v9  ;;  %v5576_v60 = vunpack.c.l.b16 %v7346_v14  ;;  %v5581_v63 = vunpack.c.l.b16 %v7349_v49  ;;  %v7351_v9 = vld [vmem:[#allocation32_spill] sm:$0xff]  ;;  %v7355_v57 = vpack.c.bf16 %v7354_v27, %v7354_v27 }
 0x1e6   :  { %v5571_v54 = vunpack.c.l.b16 %v7343_v4  ;;  %v7352_v45 = vpack.c.bf16 %v7351_v9, %v7351_v9 }
 0x1e7   :  { %7347 = vst [vmem:[#allocation115_spill] sm:$0xff] %v5576_v60  ;;  %7350 = vst [vmem:[#allocation116_spill] sm:$0xff] %v5581_v63  ;;  %v5591_v4 = vunpack.c.l.b16 %v7355_v57  ;;  %v7360_v60 = vld [vmem:[#allocation35_spill] sm:$0xff]  ;;  %v7363_v63 = vld [vmem:[#allocation36_spill] sm:$0xff] }
 0x1e8   :  { %7344 = vst [vmem:[#allocation114_spill] sm:$0xff] %v5571_v54  ;;  %v5586_v10 = vunpack.c.l.b16 %v7352_v45  ;;  %v7357_v54 = vld [vmem:[#allocation34_spill] sm:$0xff]  ;;  %v7361_v39 = vpack.c.bf16 %v7360_v60, %v7360_v60  ;;  %v7364_v9 = vpack.c.bf16 %v7363_v63, %v7363_v63 }
 0x1e9   :  { %7356 = vst [vmem:[#allocation118_spill] sm:$0xff] %v5591_v4  ;;  %v7358_v6 = vpack.c.bf16 %v7357_v54, %v7357_v54  ;;  %v7369_v4 = vld [vmem:[#allocation38_spill] sm:$0xff] }
 0x1ea   :  { %7353 = vst [vmem:[#allocation117_spill] sm:$0xff] %v5586_v10  ;;  %v5601_v49 = vunpack.c.l.b16 %v7361_v39  ;;  %v5606_v45 = vunpack.c.l.b16 %v7364_v9  ;;  %v7366_v10 = vld [vmem:[#allocation37_spill] sm:$0xff]  ;;  %v7370_v54 = vpack.c.bf16 %v7369_v4, %v7369_v4 }
 0x1eb   :  { %v5596_v14 = vunpack.c.l.b16 %v7358_v6  ;;  %v7367_v27 = vpack.c.bf16 %v7366_v10, %v7366_v10 }
 0x1ec   :  { %7362 = vst [vmem:[#allocation120_spill] sm:$0xff] %v5601_v49  ;;  %7365 = vst [vmem:[#allocation121_spill] sm:$0xff] %v5606_v45  ;;  %v5616_v6 = vunpack.c.l.b16 %v7370_v54  ;;  %v7375_v49 = vld [vmem:[#allocation40_spill] sm:$0xff]  ;;  %v7378_v45 = vld [vmem:[#allocation41_spill] sm:$0xff] }
 0x1ed   :  { %7359 = vst [vmem:[#allocation119_spill] sm:$0xff] %v5596_v14  ;;  %v5611_v57 = vunpack.c.l.b16 %v7367_v27  ;;  %v7372_v14 = vld [vmem:[#allocation39_spill] sm:$0xff]  ;;  %v7376_v63 = vpack.c.bf16 %v7375_v49, %v7375_v49  ;;  %v7379_v10 = vpack.c.bf16 %v7378_v45, %v7378_v45 }
 0x1ee   :  { %7371 = vst [vmem:[#allocation123_spill] sm:$0xff] %v5616_v6  ;;  %v7373_v60 = vpack.c.bf16 %v7372_v14, %v7372_v14  ;;  %v7384_v6 = vld [vmem:[#allocation43_spill] sm:$0xff] }
 0x1ef   :  { %7368 = vst [vmem:[#allocation122_spill] sm:$0xff] %v5611_v57  ;;  %v5626_v9 = vunpack.c.l.b16 %v7376_v63  ;;  %v5631_v27 = vunpack.c.l.b16 %v7379_v10  ;;  %v7381_v57 = vld [vmem:[#allocation42_spill] sm:$0xff]  ;;  %v7385_v14 = vpack.c.bf16 %v7384_v6, %v7384_v6 }
 0x1f0   :  { %v5621_v39 = vunpack.c.l.b16 %v7373_v60  ;;  %v7382_v4 = vpack.c.bf16 %v7381_v57, %v7381_v57 }
 0x1f1   :  { %7377 = vst [vmem:[#allocation125_spill] sm:$0xff] %v5626_v9  ;;  %7380 = vst [vmem:[#allocation126_spill] sm:$0xff] %v5631_v27  ;;  %v5641_v60 = vunpack.c.l.b16 %v7385_v14  ;;  %v7390_v9 = vld [vmem:[#allocation45_spill] sm:$0xff]  ;;  %v7393_v27 = vld [vmem:[#allocation46_spill] sm:$0xff] }
 0x1f2   :  { %7374 = vst [vmem:[#allocation124_spill] sm:$0xff] %v5621_v39  ;;  %v5636_v54 = vunpack.c.l.b16 %v7382_v4  ;;  %v7387_v39 = vld [vmem:[#allocation44_spill] sm:$0xff]  ;;  %v7391_v45 = vpack.c.bf16 %v7390_v9, %v7390_v9  ;;  %v7394_v57 = vpack.c.bf16 %v7393_v27, %v7393_v27 }
 0x1f3   :  { %7386 = vst [vmem:[#allocation128_spill] sm:$0xff] %v5641_v60  ;;  %v7388_v49 = vpack.c.bf16 %v7387_v39, %v7387_v39  ;;  %v7399_v60 = vld [vmem:[#allocation48_spill] sm:$0xff] }
 0x1f4   :  { %7383 = vst [vmem:[#allocation127_spill] sm:$0xff] %v5636_v54  ;;  %v5651_v10 = vunpack.c.l.b16 %v7391_v45  ;;  %v5656_v4 = vunpack.c.l.b16 %v7394_v57  ;;  %v7396_v54 = vld [vmem:[#allocation47_spill] sm:$0xff]  ;;  %v7400_v39 = vpack.c.bf16 %v7399_v60, %v7399_v60 }
 0x1f5   :  { %v5646_v63 = vunpack.c.l.b16 %v7388_v49  ;;  %v7397_v6 = vpack.c.bf16 %v7396_v54, %v7396_v54 }
 0x1f6   :  { %7392 = vst [vmem:[#allocation130_spill] sm:$0xff] %v5651_v10  ;;  %7395 = vst [vmem:[#allocation131_spill] sm:$0xff] %v5656_v4  ;;  %v5666_v49 = vunpack.c.l.b16 %v7400_v39  ;;  %v7405_v10 = vld [vmem:[#allocation50_spill] sm:$0xff]  ;;  %v7408_v4 = vld [vmem:[#allocation51_spill] sm:$0xff] }
 0x1f7   :  { %7389 = vst [vmem:[#allocation129_spill] sm:$0xff] %v5646_v63  ;;  %v5661_v14 = vunpack.c.l.b16 %v7397_v6  ;;  %v7402_v63 = vld [vmem:[#allocation49_spill] sm:$0xff]  ;;  %v7406_v27 = vpack.c.bf16 %v7405_v10, %v7405_v10  ;;  %v7409_v54 = vpack.c.bf16 %v7408_v4, %v7408_v4 }
 0x1f8   :  { %7401 = vst [vmem:[#allocation133_spill] sm:$0xff] %v5666_v49  ;;  %v7403_v9 = vpack.c.bf16 %v7402_v63, %v7402_v63  ;;  %v7414_v49 = vld [vmem:[#allocation53_spill] sm:$0xff] }
 0x1f9   :  { %7398 = vst [vmem:[#allocation132_spill] sm:$0xff] %v5661_v14  ;;  %v5676_v57 = vunpack.c.l.b16 %v7406_v27  ;;  %v5681_v6 = vunpack.c.l.b16 %v7409_v54  ;;  %v7411_v14 = vld [vmem:[#allocation52_spill] sm:$0xff]  ;;  %v7415_v63 = vpack.c.bf16 %v7414_v49, %v7414_v49 }
 0x1fa   :  { %v5671_v45 = vunpack.c.l.b16 %v7403_v9  ;;  %v7412_v60 = vpack.c.bf16 %v7411_v14, %v7411_v14 }
 0x1fb   :  { %7407 = vst [vmem:[#allocation135_spill] sm:$0xff] %v5676_v57  ;;  %7410 = vst [vmem:[#allocation136_spill] sm:$0xff] %v5681_v6  ;;  %v5691_v9 = vunpack.c.l.b16 %v7415_v63  ;;  %v7420_v57 = vld [vmem:[#allocation55_spill] sm:$0xff]  ;;  %v7423_v6 = vld [vmem:[#allocation56_spill] sm:$0xff] }
 0x1fc   :  { %7404 = vst [vmem:[#allocation134_spill] sm:$0xff] %v5671_v45  ;;  %v5686_v39 = vunpack.c.l.b16 %v7412_v60  ;;  %v7417_v45 = vld [vmem:[#allocation54_spill] sm:$0xff]  ;;  %v7421_v4 = vpack.c.bf16 %v7420_v57, %v7420_v57  ;;  %v7424_v14 = vpack.c.bf16 %v7423_v6, %v7423_v6 }
 0x1fd   :  { %7416 = vst [vmem:[#allocation138_spill] sm:$0xff] %v5691_v9  ;;  %v7418_v10 = vpack.c.bf16 %v7417_v45, %v7417_v45  ;;  %v7429_v9 = vld [vmem:[#allocation58_spill] sm:$0xff] }
 0x1fe   :  { %7413 = vst [vmem:[#allocation137_spill] sm:$0xff] %v5686_v39  ;;  %v5701_v54 = vunpack.c.l.b16 %v7421_v4  ;;  %v5706_v60 = vunpack.c.l.b16 %v7424_v14  ;;  %v7426_v39 = vld [vmem:[#allocation57_spill] sm:$0xff]  ;;  %v7430_v45 = vpack.c.bf16 %v7429_v9, %v7429_v9 }
 0x1ff   :  { %v5696_v27 = vunpack.c.l.b16 %v7418_v10  ;;  %v7427_v49 = vpack.c.bf16 %v7426_v39, %v7426_v39 }
 0x200   :  { %7422 = vst [vmem:[#allocation140_spill] sm:$0xff] %v5701_v54  ;;  %7425 = vst [vmem:[#allocation141_spill] sm:$0xff] %v5706_v60  ;;  %v5716_v10 = vunpack.c.l.b16 %v7430_v45  ;;  %v7435_v54 = vld [vmem:[#allocation60_spill] sm:$0xff]  ;;  %v7438_v60 = vld [vmem:[#allocation61_spill] sm:$0xff] }
 0x201   :  { %7419 = vst [vmem:[#allocation139_spill] sm:$0xff] %v5696_v27  ;;  %v5711_v63 = vunpack.c.l.b16 %v7427_v49  ;;  %v7432_v27 = vld [vmem:[#allocation59_spill] sm:$0xff]  ;;  %v7436_v6 = vpack.c.bf16 %v7435_v54, %v7435_v54  ;;  %v7439_v39 = vpack.c.bf16 %v7438_v60, %v7438_v60 }
 0x202   :  { %7431 = vst [vmem:[#allocation143_spill] sm:$0xff] %v5716_v10  ;;  %v7433_v57 = vpack.c.bf16 %v7432_v27, %v7432_v27  ;;  %v7444_v10 = vld [vmem:[#allocation63_spill] sm:$0xff] }
 0x203   :  { %7428 = vst [vmem:[#allocation142_spill] sm:$0xff] %v5711_v63  ;;  %v5726_v14 = vunpack.c.l.b16 %v7436_v6  ;;  %v5731_v49 = vunpack.c.l.b16 %v7439_v39  ;;  %v7441_v63 = vld [vmem:[#allocation62_spill] sm:$0xff]  ;;  %v7445_v27 = vpack.c.bf16 %v7444_v10, %v7444_v10 }
 0x204   :  { %v5721_v4 = vunpack.c.l.b16 %v7433_v57  ;;  %v7442_v9 = vpack.c.bf16 %v7441_v63, %v7441_v63 }
 0x205   :  { %7437 = vst [vmem:[#allocation145_spill] sm:$0xff] %v5726_v14  ;;  %7440 = vst [vmem:[#allocation146_spill] sm:$0xff] %v5731_v49  ;;  %v5741_v57 = vunpack.c.l.b16 %v7445_v27  ;;  %v7450_v14 = vld [vmem:[#allocation65_spill] sm:$0xff]  ;;  %v7453_v49 = vld [vmem:[#allocation66_spill] sm:$0xff] }
 0x206   :  { %7434 = vst [vmem:[#allocation144_spill] sm:$0xff] %v5721_v4  ;;  %v5736_v45 = vunpack.c.l.b16 %v7442_v9  ;;  %v7447_v4 = vld [vmem:[#allocation64_spill] sm:$0xff]  ;;  %v7451_v60 = vpack.c.bf16 %v7450_v14, %v7450_v14  ;;  %v7454_v63 = vpack.c.bf16 %v7453_v49, %v7453_v49 }
 0x207   :  { %7446 = vst [vmem:[#allocation148_spill] sm:$0xff] %v5741_v57  ;;  %v7448_v54 = vpack.c.bf16 %v7447_v4, %v7447_v4  ;;  %v7459_v57 = vld [vmem:[#allocation68_spill] sm:$0xff] }
 0x208   :  { %7443 = vst [vmem:[#allocation147_spill] sm:$0xff] %v5736_v45  ;;  %v5751_v39 = vunpack.c.l.b16 %v7451_v60  ;;  %v5756_v9 = vunpack.c.l.b16 %v7454_v63  ;;  %v7456_v45 = vld [vmem:[#allocation67_spill] sm:$0xff]  ;;  %v7460_v4 = vpack.c.bf16 %v7459_v57, %v7459_v57 }
 0x209   :  { %v5746_v6 = vunpack.c.l.b16 %v7448_v54  ;;  %v7457_v10 = vpack.c.bf16 %v7456_v45, %v7456_v45 }
 0x20a   :  { %7452 = vst [vmem:[#allocation3_spill] sm:$0xff] %v5751_v39  ;;  %7455 = vst [vmem:[#allocation4_spill] sm:$0xff] %v5756_v9  ;;  %v5766_v54 = vunpack.c.l.b16 %v7460_v4  ;;  %v7465_v39 = vld [vmem:[#allocation70_spill] sm:$0xff]  ;;  %v7468_v9 = vld [vmem:[#allocation71_spill] sm:$0xff] }
 0x20b   :  { %7449 = vst [vmem:[#allocation2_spill] sm:$0xff] %v5746_v6  ;;  %v5761_v27 = vunpack.c.l.b16 %v7457_v10  ;;  %v7462_v6 = vld [vmem:[#allocation69_spill] sm:$0xff]  ;;  %v7466_v49 = vpack.c.bf16 %v7465_v39, %v7465_v39  ;;  %v7469_v45 = vpack.c.bf16 %v7468_v9, %v7468_v9 }
 0x20c   :  { %7461 = vst [vmem:[#allocation6_spill] sm:$0xff] %v5766_v54  ;;  %v7463_v14 = vpack.c.bf16 %v7462_v6, %v7462_v6  ;;  %v7474_v54 = vld [vmem:[#allocation73_spill] sm:$0xff] }
 0x20d   :  { %7458 = vst [vmem:[#allocation5_spill] sm:$0xff] %v5761_v27  ;;  %v5776_v63 = vunpack.c.l.b16 %v7466_v49  ;;  %v5781_v10 = vunpack.c.l.b16 %v7469_v45  ;;  %v7471_v27 = vld [vmem:[#allocation72_spill] sm:$0xff]  ;;  %v7475_v6 = vpack.c.bf16 %v7474_v54, %v7474_v54 }
 0x20e   :  { %v5771_v60 = vunpack.c.l.b16 %v7463_v14  ;;  %v7472_v57 = vpack.c.bf16 %v7471_v27, %v7471_v27 }
 0x20f   :  { %7467 = vst [vmem:[#allocation79_spill] sm:$0xff] %v5776_v63  ;;  %7470 = vst [vmem:[#allocation80_spill] sm:$0xff] %v5781_v10  ;;  %v5791_v14 = vunpack.c.l.b16 %v7475_v6  ;;  %v7478_v63 = vld [vmem:[#allocation75_spill] sm:$0xff]  ;;  %v7480_v10 = vld [vmem:[#allocation76_spill] sm:$0xff] }
 0x210   :  { %7464 = vst [vmem:[#allocation78_spill] sm:$0xff] %v5771_v60  ;;  %v5786_v4 = vunpack.c.l.b16 %v7472_v57  ;;  %v7476_v60 = vld [vmem:[#allocation74_spill] sm:$0xff]  ;;  %v7479_v9 = vpack.c.bf16 %v7478_v63, %v7478_v63  ;;  %v7481_v27 = vpack.c.bf16 %v7480_v10, %v7480_v10  ;;  %v7486_v63 = vpack.c.bf16 %v7223_v46, %v7223_v46 }
 0x211   :  { %v7477_v39 = vpack.c.bf16 %v7476_v60, %v7476_v60  ;;  %v7485_v60 = vpack.c.bf16 %v7222_v29, %v7222_v29  ;;  %v7487_v10 = vpack.c.bf16 %v7224_v38, %v7224_v38  ;;  %v7489_v29 = vpack.c.bf16 %v7226_v34, %v7226_v34 }
 0x212   :  { %7473 = vst [vmem:[#allocation81_spill] sm:$0xff] %v5786_v4  ;;  %v5801_v45 = vunpack.c.l.b16 %v7479_v9  ;;  %v5806_v57 = vunpack.c.l.b16 %v7481_v27  ;;  %v7483_v4 = vld [vmem:[#allocation77_spill] sm:$0xff]  ;;  %v5821_v9 = vunpack.c.l.b16 %v7486_v63  ;;  %v7490_v46 = vpack.c.bf16 %v7227_v43, %v7227_v43 }
 0x213   :  { %v5796_v49 = vunpack.c.l.b16 %v7477_v39  ;;  %v7484_v54 = vpack.c.bf16 %v7483_v4, %v7483_v4  ;;  %v5816_v39 = vunpack.c.l.b16 %v7485_v60  ;;  %v5826_v27 = vunpack.c.l.b16 %v7487_v10 }
 0x214   :  { %7482 = vst [vmem:[#allocation82_spill] sm:$0xff] %v5806_v57  ;;  %v7488_v4 = vpack.c.bf16 %v7225_v37, %v7225_v37  ;;  %v5836_v60 = vunpack.c.l.b16 %v7489_v29  ;;  %v5841_v63 = vunpack.c.l.b16 %v7490_v46  ;;  %v7491_v38 = vpack.c.bf16 %v7228_v32, %v7228_v32  ;;  %v7494_v57 = vld [vmem:[#allocation86_spill] sm:$0xff] }
 0x215   :  { %v5811_v6 = vunpack.c.l.b16 %v7484_v54  ;;  %v7493_v37 = vpack.c.bf16 %v7229_v50, %v7229_v50  ;;  %v7495_v34 = vpack.c.bf16 %v7494_v57, %v7494_v57  ;;  %v7496_v43 = vpack.c.bf16 %v4982_v22, %v4982_v22 }
 0x216   :  { %v5831_v54 = vunpack.c.l.b16 %v7488_v4  ;;  %v5846_v10 = vunpack.c.l.b16 %v7491_v38  ;;  %v7497_v32 = vpack.c.bf16 %v4988_v11, %v4988_v11  ;;  %v7498_v50 = vpack.c.bf16 %v4996_v41, %v4996_v41 }
 0x217   :  { %v5851_v4 = vunpack.c.l.b16 %v7493_v37  ;;  %v5856_v29 = vunpack.c.l.b16 %v7495_v34  ;;  %v5861_v46 = vunpack.c.l.b16 %v7496_v43  ;;  %v7499_v57 = vpack.c.bf16 %v5014_v51, %v5014_v51 }
 0x218   :  { %7492 = vst [vmem:[#allocation83_spill] sm:$0xff] %v5846_v10  ;;  %v5866_v38 = vunpack.c.l.b16 %v7497_v32  ;;  %v5871_v37 = vunpack.c.l.b16 %v7498_v50  ;;  %v7500_v10 = vld [vmem:[#allocation87_spill] sm:$0xff]  ;;  %v7502_v11 = vpack.c.bf16 %v5040_v33, %v5040_v33  ;;  %v2315_v41 = vsel %vm2314_vm2, %v5256_v53, %v5251_v35 }
 0x219   :  { %v5876_v34 = vunpack.c.l.b16 %v7499_v57  ;;  %v7501_v22 = vpack.c.bf16 %v7500_v10, %v7500_v10  ;;  %v2317_v51 = vsel %vm2316_vm3, %v5261_v36, %v2315_v41  ;;  %v2328_v33 = vsel %vm2314_vm2, %v5296_v15, %v5291_v20 }
 0x21a   :  { %v5886_v32 = vunpack.c.l.b16 %v7502_v11  ;;  %v2335_v10 = vsel %vm2314_vm2, %v5336_v18, %v5331_v31  ;;  %v2342_v50 = vsel %vm2314_vm2, %v5376_v47, %v5371_v8  ;;  %v2319_v35 = vsel %vm2318_vm4, %v5266_v25, %v2317_v51  ;;  %v7509_v11 = vld [vmem:[#allocation108_spill] sm:$0xff] }
 0x21b   :  { %v5881_v43 = vunpack.c.l.b16 %v7501_v22  ;;  %v2329_v53 = vsel %vm2316_vm3, %v5301_v48, %v2328_v33  ;;  %v2336_v36 = vsel %vm2316_vm3, %v5341_v24, %v2335_v10  ;;  %v2343_v20 = vsel %vm2316_vm3, %v5381_v16, %v2342_v50  ;;  %v7507_v22 = vld [vmem:[#allocation93_spill] sm:$0xff] }
 0x21c   :  { %v2321_v15 = vsel %vm2320_vm5, %v5271_v61, %v2319_v35  ;;  %v2330_v31 = vsel %vm2318_vm4, %v5306_v42, %v2329_v53  ;;  %v2337_v18 = vsel %vm2318_vm4, %v5346_v0, %v2336_v36  ;;  %v2344_v25 = vsel %vm2318_vm4, %v5386_v55, %v2343_v20  ;;  %v7503_v55 = vld [vmem:[#allocation99_spill] sm:$0xff]  ;;  %v7512_v33 = vld [vmem:[#allocation101_spill] sm:$0xff]  ;;  %v7514_v53 = vld [vmem:[#allocation90_spill] sm:$0xff] }
 0x21d   :  { %v2323_v48 = vsel %vm2322_vm6, %v5276_v62, %v2321_v15  ;;  %v2331_v24 = vsel %vm2320_vm5, %v5311_v13, %v2330_v31  ;;  %v2338_v8 = vsel %vm2320_vm5, %v5351_v40, %v2337_v18  ;;  %v2345_v61 = vsel %vm2320_vm5, %v5391_v7, %v2344_v25  ;;  %v7504_v7 = vld [vmem:[#allocation106_spill] sm:$0xff]  ;;  %v7513_v50 = vld [vmem:[#allocation109_spill] sm:$0xff]  ;;  %v7515_v20 = vld [vmem:[#allocation95_spill] sm:$0xff] }
 0x21e   :  { %v2325_v42 = vsel %vm2324_vm7, %v5281_v44, %v2323_v48  ;;  %v2332_v0 = vsel %vm2322_vm6, %v5316_v1, %v2331_v24  ;;  %v2339_v47 = vsel %vm2322_vm6, %v5356_v52, %v2338_v8  ;;  %v2346_v62 = vsel %vm2322_vm6, %v5396_v2, %v2345_v61  ;;  %v7505_v2 = vld [vmem:[#allocation107_spill] sm:$0xff]  ;;  %v7516_v31 = vld [vmem:[#allocation102_spill] sm:$0xff]  ;;  %v7519_v61 = vld [vmem:[#allocation96_spill] sm:$0xff] }
 0x21f   :  { %v5936_v13 = vsel %vm2326_vm8, %v5286_v59, %v2325_v42  ;;  %v2333_v40 = vsel %vm2324_vm7, %v5321_v19, %v2332_v0  ;;  %v2340_v16 = vsel %vm2324_vm7, %v5361_v21, %v2339_v47  ;;  %v2347_v44 = vsel %vm2324_vm7, %v5401_v30, %v2346_v62  ;;  %v7517_v25 = vld [vmem:[#allocation110_spill] sm:$0xff]  ;;  %v7518_v24 = vld [vmem:[#allocation91_spill] sm:$0xff] }
 0x220   :  { %v5946_v1 = vsel %vm2326_vm8, %v5326_v23, %v2333_v40  ;;  %v5950_v52 = vsel %vm2326_vm8, %v5366_v28, %v2340_v16  ;;  %v5954_v59 = vsel %vm2326_vm8, %v5406_v12, %v2347_v44  ;;  %v2349_v19 = vsel %vm2314_vm2, %v5416_v26, %v5411_v58  ;;  %v7506_v12 = vld [vmem:[#allocation88_spill] sm:$0xff]  ;;  %v7520_v0 = vld [vmem:[#allocation103_spill] sm:$0xff] }
 0x221   :  { %v2350_v21 = vsel %vm2316_vm3, %v5421_v5, %v2349_v19  ;;  %v2356_v23 = vsel %vm2314_vm2, %v5456_v17, %v5451_v56  ;;  %v2363_v28 = vsel %vm2314_vm2, %v7503_v55, %v5491_v3  ;;  %v2370_v30 = vsel %vm2314_vm2, %v7505_v2, %v7504_v7  ;;  %v7508_v26 = vld [vmem:[#allocation100_spill] sm:$0xff]  ;;  %v7510_v17 = vld [vmem:[#allocation89_spill] sm:$0xff]  ;;  %v7511_v3 = vld [vmem:[#allocation94_spill] sm:$0xff] }
 0x222   :  { %v2351_v57 = vsel %vm2318_vm4, %v7506_v12, %v2350_v21  ;;  %v2357_v58 = vsel %vm2316_vm3, %v7507_v22, %v2356_v23  ;;  %v2364_v5 = vsel %vm2316_vm3, %v7508_v26, %v2363_v28  ;;  %v2371_v56 = vsel %vm2316_vm3, %v7509_v11, %v2370_v30  ;;  %v7521_v62 = vld [vmem:[#allocation111_spill] sm:$0xff]  ;;  %v7522_v16 = vld [vmem:[#allocation92_spill] sm:$0xff]  ;;  %v7523_v19 = vld [vmem:[#allocation97_spill] sm:$0xff] }
 0x223   :  { %v2352_v41 = vsel %vm2320_vm5, %v7510_v17, %v2351_v57  ;;  %v2358_v51 = vsel %vm2318_vm4, %v7511_v3, %v2357_v58  ;;  %v2365_v10 = vsel %vm2318_vm4, %v7512_v33, %v2364_v5  ;;  %v2372_v35 = vsel %vm2318_vm4, %v7513_v50, %v2371_v56  ;;  %v7524_v23 = vld [vmem:[#allocation104_spill] sm:$0xff]  ;;  %v7526_v2 = vld [vmem:[#allocation98_spill] sm:$0xff]  ;;  %v7527_v12 = vld [vmem:[#allocation105_spill] sm:$0xff] }
 0x224   :  { %v2353_v36 = vsel %vm2322_vm6, %v7514_v53, %v2352_v41  ;;  %v2359_v15 = vsel %vm2320_vm5, %v7515_v20, %v2358_v51  ;;  %v2366_v18 = vsel %vm2320_vm5, %v7516_v31, %v2365_v10  ;;  %v2373_v48 = vsel %vm2320_vm5, %v7517_v25, %v2372_v35  ;;  %v7525_v28 = vld [vmem:[#allocation112_spill] sm:$0xff]  ;;  %v7528_v22 = vld [vmem:[#allocation113_spill] sm:$0xff]  ;;  %v7529_v26 = vld [vmem:[#allocation114_spill] sm:$0xff] }
 0x225   :  { %v2354_v8 = vsel %vm2324_vm7, %v7518_v24, %v2353_v36  ;;  %v2360_v42 = vsel %vm2322_vm6, %v7519_v61, %v2359_v15  ;;  %v2367_v47 = vsel %vm2322_vm6, %v7520_v0, %v2366_v18  ;;  %v2374_v40 = vsel %vm2322_vm6, %v7521_v62, %v2373_v48  ;;  %v7530_v5 = vld [vmem:[#allocation115_spill] sm:$0xff]  ;;  %v7531_v56 = vld [vmem:[#allocation116_spill] sm:$0xff]  ;;  %v7532_v41 = vld [vmem:[#allocation122_spill] sm:$0xff] }
 0x226   :  { %v6004_v44 = vsel %vm2326_vm8, %v7522_v16, %v2354_v8  ;;  %v2361_v21 = vsel %vm2324_vm7, %v7523_v19, %v2360_v42  ;;  %v2368_v55 = vsel %vm2324_vm7, %v7524_v23, %v2367_v47  ;;  %v2375_v7 = vsel %vm2324_vm7, %v7525_v28, %v2374_v40  ;;  %v7533_v3 = vld [vmem:[#allocation123_spill] sm:$0xff]  ;;  %v7534_v33 = vld [vmem:[#allocation130_spill] sm:$0xff]  ;;  %v7538_v20 = vld [vmem:[#allocation117_spill] sm:$0xff] }
 0x227   :  { %v6014_v30 = vsel %vm2326_vm8, %v7526_v2, %v2361_v21  ;;  %v6018_v57 = vsel %vm2326_vm8, %v7527_v12, %v2368_v55  ;;  %v6022_v58 = vsel %vm2326_vm8, %v7528_v22, %v2375_v7  ;;  %v2377_v11 = vsel %vm2314_vm2, %v7530_v5, %v7529_v26  ;;  %v7535_v10 = vld [vmem:[#allocation131_spill] sm:$0xff]  ;;  %v7536_v35 = vld [vmem:[#allocation138_spill] sm:$0xff]  ;;  %v7539_v31 = vld [vmem:[#allocation124_spill] sm:$0xff] }
 0x228   :  { %v2378_v17 = vsel %vm2316_vm3, %v7531_v56, %v2377_v11  ;;  %v2384_v51 = vsel %vm2314_vm2, %v7533_v3, %v7532_v41  ;;  %v2391_v50 = vsel %vm2314_vm2, %v7535_v10, %v7534_v33  ;;  %v7537_v53 = vld [vmem:[#allocation139_spill] sm:$0xff]  ;;  %v7540_v25 = vld [vmem:[#allocation132_spill] sm:$0xff]  ;;  %v7542_v61 = vld [vmem:[#allocation118_spill] sm:$0xff] }
 0x229   :  { %v2398_v36 = vsel %vm2314_vm2, %v7537_v53, %v7536_v35  ;;  %v2379_v15 = vsel %vm2318_vm4, %v7538_v20, %v2378_v17  ;;  %v2385_v18 = vsel %vm2316_vm3, %v7539_v31, %v2384_v51  ;;  %v2392_v48 = vsel %vm2316_vm3, %v7540_v25, %v2391_v50  ;;  %v7541_v24 = vld [vmem:[#allocation140_spill] sm:$0xff]  ;;  %v7543_v0 = vld [vmem:[#allocation125_spill] sm:$0xff]  ;;  %v7546_v21 = vld [vmem:[#allocation119_spill] sm:$0xff] }
 0x22a   :  { %v2399_v8 = vsel %vm2316_vm3, %v7541_v24, %v2398_v36  ;;  %v2380_v42 = vsel %vm2320_vm5, %v7542_v61, %v2379_v15  ;;  %v2386_v47 = vsel %vm2318_vm4, %v7543_v0, %v2385_v18  ;;  %v7544_v62 = vld [vmem:[#allocation133_spill] sm:$0xff]  ;;  %v7547_v55 = vld [vmem:[#allocation126_spill] sm:$0xff]  ;;  %v7550_v26 = vld [vmem:[#allocation120_spill] sm:$0xff] }
 0x22b   :  { %v2393_v40 = vsel %vm2318_vm4, %v7544_v62, %v2392_v48  ;;  %v7545_v16 = vld [vmem:[#allocation141_spill] sm:$0xff]  ;;  %v2381_v23 = vsel %vm2322_vm6, %v7546_v21, %v2380_v42  ;;  %v2387_v28 = vsel %vm2320_vm5, %v7547_v55, %v2386_v47  ;;  %v7548_v7 = vld [vmem:[#allocation134_spill] sm:$0xff]  ;;  %v7551_v11 = vld [vmem:[#allocation127_spill] sm:$0xff]  ;;  %v2419_v21 = vsel %vm2314_vm2, %v5816_v39, %v5811_v6 }
 0x22c   :  { %v2400_v19 = vsel %vm2318_vm4, %v7545_v16, %v2399_v8  ;;  %v2394_v2 = vsel %vm2320_vm5, %v7548_v7, %v2393_v40  ;;  %v7549_v12 = vld [vmem:[#allocation142_spill] sm:$0xff]  ;;  %v2382_v5 = vsel %vm2324_vm7, %v7550_v26, %v2381_v23  ;;  %v2388_v56 = vsel %vm2322_vm6, %v7551_v11, %v2387_v28  ;;  %v7552_v17 = vld [vmem:[#allocation135_spill] sm:$0xff]  ;;  %v7554_v33 = vld [vmem:[#allocation121_spill] sm:$0xff] }
 0x22d   :  { %v2401_v22 = vsel %vm2320_vm5, %v7549_v12, %v2400_v19  ;;  %v2395_v41 = vsel %vm2322_vm6, %v7552_v17, %v2394_v2  ;;  %v7553_v3 = vld [vmem:[#allocation143_spill] sm:$0xff]  ;;  %v2383_v10 = vsel %vm2326_vm8, %v7554_v33, %v2382_v5  ;;  %v7555_v50 = vld [vmem:[#allocation128_spill] sm:$0xff]  ;;  %v7558_v31 = vld [vmem:[#allocation129_spill] sm:$0xff]  ;;  %v2426_v23 = vsel %vm2314_vm2, %v5856_v29, %v5851_v4 }
 0x22e   :  { %v2402_v51 = vsel %vm2322_vm6, %v7553_v3, %v2401_v22  ;;  %v2389_v35 = vsel %vm2324_vm7, %v7555_v50, %v2388_v56  ;;  %v7556_v53 = vld [vmem:[#allocation136_spill] sm:$0xff]  ;;  %v7559_v25 = vld [vmem:[#allocation137_spill] sm:$0xff]  ;;  %v7561_v61 = vld [vmem:[#allocation146_spill] sm:$0xff]  ;;  %v2420_v12 = vsel %vm2316_vm3, %v5821_v9, %v2419_v21  ;;  %v2427_v22 = vsel %vm2316_vm3, %v5861_v46, %v2426_v23 }
 0x22f   :  { %v2396_v36 = vsel %vm2324_vm7, %v7556_v53, %v2395_v41  ;;  %v7557_v20 = vld [vmem:[#allocation144_spill] sm:$0xff]  ;;  %v2390_v18 = vsel %vm2326_vm8, %v7558_v31, %v2389_v35  ;;  %v7560_v24 = vld [vmem:[#allocation145_spill] sm:$0xff]  ;;  %v7562_v42 = vld [vmem:[#allocation147_spill] sm:$0xff]  ;;  %v2421_v4 = vsel %vm2318_vm4, %v5826_v27, %v2420_v12  ;;  %v2428_v29 = vsel %vm2318_vm4, %v5866_v38, %v2427_v22 }
 0x230   :  { %v2403_v15 = vsel %vm2324_vm7, %v7557_v20, %v2402_v51  ;;  %v2397_v48 = vsel %vm2326_vm8, %v7559_v25, %v2396_v36  ;;  %v2405_v0 = vsel %vm2314_vm2, %v7562_v42, %v7561_v61  ;;  %v7563_v47 = vld [vmem:[#allocation148_spill] sm:$0xff]  ;;  %v7564_v40 = vld [vmem:[#allocation78_spill] sm:$0xff]  ;;  %v7565_v16 = vld [vmem:[#allocation79_spill] sm:$0xff]  ;;  %v2422_v46 = vsel %vm2320_vm5, %v5831_v54, %v2421_v4 }
 0x231   :  { %v2404_v8 = vsel %vm2326_vm8, %v7560_v24, %v2403_v15  ;;  %v2406_v62 = vsel %vm2316_vm3, %v7563_v47, %v2405_v0  ;;  %v2412_v19 = vsel %vm2314_vm2, %v7565_v16, %v7564_v40  ;;  %v7566_v55 = vld [vmem:[#allocation2_spill] sm:$0xff]  ;;  %v7567_v7 = vld [vmem:[#allocation80_spill] sm:$0xff]  ;;  %v7568_v26 = vld [vmem:[#allocation3_spill] sm:$0xff]  ;;  %v2429_v17 = vsel %vm2320_vm5, %v5871_v37, %v2428_v29 }
 0x232   :  { %v2407_v28 = vsel %vm2318_vm4, %v7566_v55, %v2406_v62  ;;  %v2413_v2 = vsel %vm2316_vm3, %v7567_v7, %v2412_v19  ;;  %v7569_v6 = vld [vmem:[#allocation81_spill] sm:$0xff]  ;;  %v7570_v11 = vld [vmem:[#allocation4_spill] sm:$0xff]  ;;  %v2423_v38 = vsel %vm2322_vm6, %v5836_v60, %v2422_v46  ;;  %v2430_v51 = vsel %vm2322_vm6, %v5876_v34, %v2429_v17  ;;  %v7572_v33 = vld [vmem:[#allocation6_spill] sm:$0xff] }
 0x233   :  { %v2408_v5 = vsel %vm2320_vm5, %v7568_v26, %v2407_v28  ;;  %v2414_v39 = vsel %vm2318_vm4, %v7569_v6, %v2413_v2  ;;  %v7571_v41 = vld [vmem:[#allocation5_spill] sm:$0xff]  ;;  %v2424_v37 = vsel %vm2324_vm7, %v5841_v63, %v2423_v38  ;;  %v2431_v50 = vsel %vm2324_vm7, %v5881_v43, %v2430_v51  ;;  %v7573_v35 = vld [vmem:[#allocation82_spill] sm:$0xff]  ;;  %v7574_v53 = vld [vmem:[#allocation83_spill] sm:$0xff] }
 0x234   :  { %v2409_v56 = vsel %vm2322_vm6, %v7570_v11, %v2408_v5  ;;  %v2415_v9 = vsel %vm2320_vm5, %v5791_v14, %v2414_v39  ;;  %v2425_v60 = vsel %vm2326_vm8, %v7574_v53, %v2424_v37  ;;  %v2432_v34 = vsel %vm2326_vm8, %v5886_v32, %v2431_v50 }
 0x235   :  { %v2410_v3 = vsel %vm2324_vm7, %v7571_v41, %v2409_v56  ;;  %v2416_v27 = vsel %vm2322_vm6, %v5796_v49, %v2415_v9  ;;  %v2433_v36 = vpack.c.b16 %v5936_v13, %v5936_v13  ;;  %v2435_v63 = vpack.c.b16 %v5950_v52, %v5950_v52 }
 0x236   :  { %v2411_v14 = vsel %vm2326_vm8, %v7572_v33, %v2410_v3  ;;  %v2417_v54 = vsel %vm2324_vm7, %v5801_v45, %v2416_v27  ;;  %v2434_v45 = vpack.c.b16 %v5946_v1, %v5946_v1  ;;  %v2436_v43 = vpack.c.b16 %v5954_v59, %v5954_v59 }
 0x237   :  { %v2418_v49 = vsel %vm2326_vm8, %v7573_v35, %v2417_v54  ;;  %v2437_v20 = vpack.c.b16 %v6004_v44, %v6004_v44  ;;  %v2438_v15 = vpack.c.b16 %v6014_v30, %v6014_v30  ;;  %v2439_v32 = vpack.c.b16 %v6018_v57, %v6018_v57  ;;  %2466 = vst.msk [vmem:[%s6225_s1] sm:$0xf] %vm2465_vm9, %v2433_v36 }
 0x238   :  { %v2440_v13 = vpack.c.b16 %v6022_v58, %v6022_v58  ;;  %v2441_v31 = vpack.c.b16 %v2383_v10, %v2383_v10  ;;  %v2442_v1 = vpack.c.b16 %v2390_v18, %v2390_v18  ;;  %v2443_v25 = vpack.c.b16 %v2397_v48, %v2397_v48  ;;  %2467 = vst.msk [vmem:[%s6225_s1 + $0x4] sm:$0xf] %vm2465_vm9, %v2434_v45 }
 0x239   :  { %v2444_v24 = vpack.c.b16 %v2404_v8, %v2404_v8  ;;  %v2445_v52 = vpack.c.b16 %v2411_v14, %v2411_v14  ;;  %v2446_v61 = vpack.c.b16 %v2418_v49, %v2418_v49  ;;  %v2447_v42 = vpack.c.b16 %v2425_v60, %v2425_v60  ;;  %2468 = vst.msk [vmem:[%s6225_s1 + $0x8] sm:$0xf] %vm2465_vm9, %v2435_v63 }
 0x23a   :  { %v2448_v59 = vpack.c.b16 %v2432_v34, %v2432_v34  ;;  %2469 = vst.msk [vmem:[%s6225_s1 + $0xc] sm:$0xf] %vm2465_vm9, %v2436_v43  ;;  %2470 = vst.msk [vmem:[%s6225_s1 + $0x10] sm:$0xf] %vm2465_vm9, %v2437_v20 }
 0x23b   :  { %2471 = vst.msk [vmem:[%s6225_s1 + $0x14] sm:$0xf] %vm2465_vm9, %v2438_v15  ;;  %2472 = vst.msk [vmem:[%s6225_s1 + $0x18] sm:$0xf] %vm2465_vm9, %v2439_v32 }
 0x23c   :  { %2473 = vst.msk [vmem:[%s6225_s1 + $0x1c] sm:$0xf] %vm2465_vm9, %v2440_v13  ;;  %2474 = vst.msk [vmem:[%s6225_s1 + $0x20] sm:$0xf] %vm2465_vm9, %v2441_v31 }
 0x23d   :  { %2475 = vst.msk [vmem:[%s6225_s1 + $0x24] sm:$0xf] %vm2465_vm9, %v2442_v1  ;;  %2476 = vst.msk [vmem:[%s6225_s1 + $0x28] sm:$0xf] %vm2465_vm9, %v2443_v25 }
 0x23e   :  { %2477 = vst.msk [vmem:[%s6225_s1 + $0x2c] sm:$0xf] %vm2465_vm9, %v2444_v24  ;;  %2478 = vst.msk [vmem:[%s6225_s1 + $0x30] sm:$0xf] %vm2465_vm9, %v2445_v52 }
 0x23f   :  { %2479 = vst.msk [vmem:[%s6225_s1 + $0x34] sm:$0xf] %vm2465_vm9, %v2446_v61  ;;  %2480 = vst.msk [vmem:[%s6225_s1 + $0x38] sm:$0xf] %vm2465_vm9, %v2447_v42 }
 0x240   :  { %2481 = vst.msk [vmem:[%s6225_s1 + $0x3c] sm:$0xf] %vm2465_vm9, %v2448_v59 }

// kernel: tile.163
= control target key start
LH: loop header
LB: loop body
LE: loop exit
PB: predicated region body
PF: predicated region fallthrough
CT: control target
= control target key end

     0   :  { %s22_s0 = inlined_call_operand.vmem [shape: f32[16], index: 0, kind: input, shape index: {}]   ;;  %s23_s1 = inlined_call_operand.vmem [shape: f32[8,16], index: 1, kind: output, shape index: {}]  }
   0x1   :  { %v4_v0 = vld [vmem:[%s22_s0] ss:$0 sm:$0xff] }
   0x2   :  { %5 = vst [vmem:[%s23_s1] sm:$0xff] %v4_v0 }

// kernel: tile.164
= control target key start
LH: loop header
LB: loop body
LE: loop exit
PB: predicated region body
PF: predicated region fallthrough
CT: control target
= control target key end

     0   :  { %s67_s10 = smov 112   ;;  %s68_s11 = smov 80   ;;  %vm3_vm0 = vcmask 130048   ;;  %vm9_vm1 = vcmask 1048448   ;;  %vm15_vm2 = vcmask 917248   ;;  %vm21_vm3 = vcmask 786048   ;;  %s111_s0 = inlined_call_operand.vmem [shape: f32[8,16], index: 0, kind: input, shape index: {}]   ;;  %s112_s1 = inlined_call_operand.vmem [shape: f32[1,128], index: 1, kind: output, shape index: {}]  }
   0x1   :  { %v53_v0 = vld [vmem:[%s111_s0 + $0x7] sm:$0x1]   ;;  %v55_v1 = vld [vmem:[%s111_s0 + $0x5] sm:$0x1]   ;;  %v54_v2 = vld [vmem:[%s111_s0 + $0x6] sm:$0x1]  }
   0x2   :  { %7 = vrot.lane.b32.xlu0 %v53_v0, %s67_s10  ;;  %19 = vrot.lane.b32.xlu1 %v55_v1, %s68_s11  ;;  %v56_v3 = vld [vmem:[%s111_s0 + $0x4] sm:$0x1]   ;;  %v2_v4 = vld [vmem:[%s111_s0] sm:$0x1]   ;;  %s69_s18 = smov 96   ;;  %s70_s19 = smov 64  }
   0x3   :  { %4 = vst.msk [vmem:[#allocation0] sm:$0x1] %vm3_vm0, %v2_v4   ;;  %v57_v5 = vld [vmem:[%s111_s0 + $0x3] sm:$0x1]   ;;  %v58_v6 = vld [vmem:[%s111_s0 + $0x2] sm:$0x1]  }
   0x4   :  { %s71_s24 = smov 48   ;;  %s72_s25 = smov 32   ;;  %v59_v7 = vld [vmem:[%s111_s0 + $0x1] sm:$0x1]   ;;  %vm27_vm4 = vcmask 654848   ;;  %vm33_vm5 = vcmask 523648  }
   0x5   :  { %s73_s0 = smov 16   ;;  %vm39_vm6 = vcmask 392448   ;;  %vm45_vm7 = vcmask 261248  }
   0x6   :  { %13 = vrot.lane.b32.xlu0 %v54_v2, %s69_s18  ;;  %25 = vrot.lane.b32.xlu1 %v56_v3, %s70_s19 }
   0xa   :  { %31 = vrot.lane.b32.xlu0 %v57_v5, %s71_s24  ;;  %37 = vrot.lane.b32.xlu1 %v58_v6, %s72_s25 }
   0xe   :  { %43 = vrot.lane.b32.xlu0 %v59_v7, %s73_s0 }
  0x74   :  { %v8_v8 = vpop.permute.xlu0 %7   ;;  %v20_v9 = vpop.permute.xlu1 %19  }
  0x75   :  { %10 = vst.msk [vmem:[#allocation0] sm:$0x1] %vm9_vm1, %v8_v8  }
  0x78   :  { %v14_v10 = vpop.permute.xlu0 %13   ;;  %v26_v11 = vpop.permute.xlu1 %25  }
  0x79   :  { %16 = vst.msk [vmem:[#allocation0] sm:$0x1] %vm15_vm2, %v14_v10  }
  0x7a   :  { %22 = vst.msk [vmem:[#allocation0] sm:$0x1] %vm21_vm3, %v20_v9  }
  0x7b   :  { %28 = vst.msk [vmem:[#allocation0] sm:$0x1] %vm27_vm4, %v26_v11  }
  0x7c   :  { %v32_v12 = vpop.permute.xlu0 %31   ;;  %v38_v13 = vpop.permute.xlu1 %37  }
  0x7d   :  { %34 = vst.msk [vmem:[#allocation0] sm:$0x1] %vm33_vm5, %v32_v12  }
  0x7e   :  { %40 = vst.msk [vmem:[#allocation0] sm:$0x1] %vm39_vm6, %v38_v13  }
  0x80   :  { %v44_v14 = vpop.permute.xlu0 %43  }
  0x81   :  { %46 = vst.msk [vmem:[#allocation0] sm:$0x1] %vm45_vm7, %v44_v14  }
  0x88   :  { %v50_v15 = vld [vmem:[#allocation0] sm:$0x1] }
  0x89   :  { %52 = vst [vmem:[%s112_s1] sm:$0x1] %v50_v15 }

// kernel: resnet_forward.32
= control target key start
LH: loop header
LB: loop body
LE: loop exit
PB: predicated region body
PF: predicated region fallthrough
CT: control target
= control target key end

     0   :  { %s86_s0 = inlined_call_operand.vmem [shape: f32[8,128], index: 0, kind: input, shape index: {}]   ;;  %s87_s1 = inlined_call_operand.vmem [shape: f32[1,128], index: 1, kind: input, shape index: {}]   ;;  %s88_s2 = inlined_call_operand.vmem [shape: f32[1,128], index: 2, kind: input, shape index: {}]   ;;  %s89_s3 = inlined_call_operand.vmem [shape: bf16[8,128], index: 3, kind: input, shape index: {}]   ;;  %s90_s4 = inlined_call_operand.vmem [shape: bf16[8,128], index: 4, kind: output, shape index: {}]  }
   0x1   :  { %v17_v0 = vld [vmem:[%s86_s0] sm:$0xff] }
   0x2   :  { %v44_v1 = vld [vmem:[%s87_s1] ss:$0 sm:$0xff] }
   0x3   :  { %v45_v2 = vld [vmem:[%s88_s2] ss:$0 sm:$0xff]  ;;  %v25_v3 = vmul.f32 %v44_v1, %v17_v0 }
   0x4   :  { %v34_v4 = vld [vmem:[%s89_s3] sm:$0xf] }
   0x5   :  { %v35_v5 = vunpack.c.l.bf16 %v34_v4  ;;  %v33_v6 = vadd.f32 %v45_v2, %v25_v3 }
   0x7   :  { %v36_v7 = vadd.f32 %v35_v5, %v33_v6 }
   0x9   :  { %v37_v8 = vmax.f32 %v36_v7, 0.0 }
   0xb   :  { %v38_v9 = vpack.c.bf16 %v37_v8, %v37_v8 }
   0xd   :  { %39 = vst [vmem:[%s90_s4] sm:$0xf] %v38_v9 }

// kernel: resnet_forward.35
= control target key start
LH: loop header
LB: loop body
LE: loop exit
PB: predicated region body
PF: predicated region fallthrough
CT: control target
= control target key end

     0   :  { %vm50_vm0 = vcmask 1043456   ;;  %vm43_vm1 = vcmask 64512   ;;  %vm19_vm2 = vcmask 130048   ;;  %v197_v1 = vmov 0.0   ;;  %s286_s1 = inlined_call_operand.vmem [shape: bf16[8,16], index: 1, kind: input, shape index: {}]   ;;  %s287_s0 = inlined_call_operand.vmem [shape: bf16[32,8], index: 0, kind: input, shape index: {}]   ;;  %s288_s3 = inlined_call_operand.vmem [shape: f32[1,16], index: 3, kind: output, shape index: {1}]   ;;  %s289_s4 = inlined_call_operand.vmem [shape: f32[1,16], index: 4, kind: output, shape index: {2}]   ;;  %s290_s2 = inlined_call_operand.vmem [shape: f32[32,16], index: 2, kind: output, shape index: {0}]  }
   0x1   :  { %v32_v0 = vld [vmem:[%s286_s1] sm:$0xf]  ;;  %22 = vst.msk [vmem:[#allocation2 + $0x10] sm:$0xff] %vm19_vm2, %v197_v1  ;;  %20 = vst.msk [vmem:[#allocation2] sm:$0xff] %vm19_vm2, %v197_v1  ;;  %v196_v4 = vld [vmem:[%s287_s0 + $0x8] sm:$0xff]   ;;  %vm117_vm3 = vcmask 122880  }
   0x2   :  { %21 = vst.msk [vmem:[#allocation2 + $0x8] sm:$0xff] %vm19_vm2, %v197_v1  ;;  %23 = vst.msk [vmem:[#allocation2 + $0x18] sm:$0xff] %vm19_vm2, %v197_v1  ;;  %193 = vmatprep.subr.msk.bf16.mxu0 %vm50_vm0, %v32_v0  ;;  %v52_v2 = vsel %vm50_vm0, %v32_v0, 0  ;;  %v195_v3 = vld [vmem:[%s287_s0] sm:$0xff]  }
   0x3   :  { %188 = vmatpush3.bf16.msra.mxu0 %v52_v2  ;;  %189 = vmatprep.mubr.msk.bf16.mxu0 %vm43_vm1, %v195_v3  ;;  %118 = vst.msk [vmem:[%s288_s3] sm:$0x1] %vm117_vm3, %v197_v1  ;;  %119 = vst.msk [vmem:[%s289_s4] sm:$0x1] %vm117_vm3, %v197_v1 }
   0x6   :  { %190 = vmatmul.mubr.msk.bf16.vlgmr.msra.gmra.mrb[0].mxu0 %vm43_vm1, %v196_v4 }
   0x8   :  { %v26_v5 = vld [vmem:[#allocation2 + $0x10] sm:$0xff]  ;;  %v24_v6 = vld [vmem:[#allocation2] sm:$0xff] }
   0x9   :  { %v27_v8 = vld [vmem:[#allocation2 + $0x18] sm:$0xff]  ;;  %v25_v11 = vld [vmem:[#allocation2 + $0x8] sm:$0xff] }
   0xa   :  { %v131_v48 = vld [vmem:[%s288_s3] sm:$0x1] }
   0xb   :  { %v148_v51 = vld [vmem:[%s289_s4] sm:$0x1] }
  0xd9   :  { %v191_v7 = vpop.f32.mrb[0].mxu0 }
  0xda   :  { %v105_v9 = vadd.f32 %v191_v7, %v26_v5  ;;  %v88_v10 = vpop.f32.mrb[1].mxu0 }
  0xdb   :  { %v103_v12 = vadd.f32 %v88_v10, %v24_v6  ;;  %v192_v13 = vpop.f32.mrb[2].mxu0 }
  0xdc   :  { %110 = vst.msk [vmem:[#allocation2 + $0x10] sm:$0xff] %vm19_vm2, %v105_v9  ;;  %v106_v14 = vadd.f32 %v192_v13, %v27_v8  ;;  %v91_v15 = vpop.f32.mrb[3].mxu0 }
  0xdd   :  { %108 = vst.msk [vmem:[#allocation2] sm:$0xff] %vm19_vm2, %v103_v12  ;;  %v104_v16 = vadd.f32 %v91_v15, %v25_v11 }
  0xde   :  { %111 = vst.msk [vmem:[#allocation2 + $0x18] sm:$0xff] %vm19_vm2, %v106_v14 }
  0xdf   :  { %109 = vst.msk [vmem:[#allocation2 + $0x8] sm:$0xff] %vm19_vm2, %v104_v16 }
  0xe3   :  { %v125_v17 = vld [vmem:[#allocation2 + $0x10] sm:$0xff] }
  0xe4   :  { %129 = vst.msk [vmem:[%s290_s2 + $0x10] sm:$0xff] %vm19_vm2, %v125_v17  ;;  %v123_v18 = vld [vmem:[#allocation2] sm:$0xff]  ;;  %v151_v22 = vmul.f32 %v125_v17, %v125_v17  ;;  %v135_v27 = vsel %vm19_vm2, %v125_v17, 0.0 }
  0xe5   :  { %127 = vst.msk [vmem:[%s290_s2] sm:$0xff] %vm19_vm2, %v123_v18  ;;  %v149_v19 = vmul.f32 %v123_v18, %v123_v18  ;;  %v126_v20 = vld [vmem:[#allocation2 + $0x18] sm:$0xff]  ;;  %v132_v23 = vsel %vm19_vm2, %v123_v18, 0.0 }
  0xe6   :  { %130 = vst.msk [vmem:[%s290_s2 + $0x18] sm:$0xff] %vm19_vm2, %v126_v20  ;;  %v124_v21 = vld [vmem:[#allocation2 + $0x8] sm:$0xff]  ;;  %v152_v29 = vmul.f32 %v126_v20, %v126_v20  ;;  %v156_v33 = vsel %vm19_vm2, %v151_v22, 0.0  ;;  %v137_v34 = vsel %vm19_vm2, %v126_v20, 0.0 }
  0xe7   :  { %128 = vst.msk [vmem:[%s290_s2 + $0x8] sm:$0xff] %vm19_vm2, %v124_v21  ;;  %v133_v24 = vsel %vm19_vm2, %v124_v21, 0.0  ;;  %v150_v25 = vmul.f32 %v124_v21, %v124_v21  ;;  %v153_v28 = vsel %vm19_vm2, %v149_v19, 0.0 }
  0xe8   :  { %v134_v26 = vadd.f32 %v133_v24, %v132_v23  ;;  %v158_v37 = vsel %vm19_vm2, %v152_v29, 0.0 }
  0xe9   :  { %v154_v30 = vsel %vm19_vm2, %v150_v25, 0.0 }
  0xea   :  { %v136_v31 = vadd.f32 %v135_v27, %v134_v26  ;;  %v155_v32 = vadd.f32 %v154_v30, %v153_v28 }
  0xec   :  { %v138_v35 = vadd.f32 %v137_v34, %v136_v31  ;;  %v157_v36 = vadd.f32 %v156_v33, %v155_v32 }
  0xee   :  { %v139_v38 = vrot.slane %v138_v35, 4  ;;  %v159_v39 = vadd.f32 %v158_v37, %v157_v36 }
  0xf0   :  { %v140_v40 = vadd.f32 %v139_v38, %v138_v35  ;;  %v160_v41 = vrot.slane %v159_v39, 4 }
  0xf2   :  { %v141_v42 = vrot.slane %v140_v40, 2  ;;  %v161_v43 = vadd.f32 %v160_v41, %v159_v39 }
  0xf4   :  { %v142_v44 = vadd.f32 %v141_v42, %v140_v40  ;;  %v162_v45 = vrot.slane %v161_v43, 2 }
  0xf6   :  { %v143_v46 = vrot.slane %v142_v44, 1  ;;  %v163_v47 = vadd.f32 %v162_v45, %v161_v43 }
  0xf8   :  { %v144_v49 = vadd.f32 %v143_v46, %v142_v44  ;;  %v164_v50 = vrot.slane %v163_v47, 1 }
  0xfa   :  { %v145_v52 = vadd.f32 %v144_v49, %v131_v48  ;;  %v165_v53 = vadd.f32 %v164_v50, %v163_v47 }
  0xfc   :  { %147 = vst.msk [vmem:[%s288_s3] sm:$0x1] %vm117_vm3, %v145_v52  ;;  %v166_v54 = vadd.f32 %v165_v53, %v148_v51 }
  0xfe   :  { %167 = vst.msk [vmem:[%s289_s4] sm:$0x1] %vm117_vm3, %v166_v54 }

// kernel: resnet_forward.36
= control target key start
LH: loop header
LB: loop body
LE: loop exit
PB: predicated region body
PF: predicated region fallthrough
CT: control target
= control target key end

     0   :  { %s71_s0 = inlined_call_operand.vmem [shape: f32[4,128], index: 0, kind: input, shape index: {}]   ;;  %s72_s1 = inlined_call_operand.vmem [shape: f32[1,128], index: 1, kind: input, shape index: {}]   ;;  %s73_s2 = inlined_call_operand.vmem [shape: f32[1,128], index: 2, kind: input, shape index: {}]   ;;  %s74_s3 = inlined_call_operand.vmem [shape: bf16[4,128], index: 3, kind: output, shape index: {}]  }
   0x1   :  { %v14_v0 = vld [vmem:[%s71_s0] sm:$0xf] }
   0x2   :  { %v37_v1 = vld [vmem:[%s72_s1] ss:$0 sm:$0xff] }
   0x3   :  { %v38_v2 = vld [vmem:[%s73_s2] ss:$0 sm:$0xff]  ;;  %v22_v3 = vmul.f32 %v37_v1, %v14_v0 }
   0x5   :  { %v30_v4 = vadd.f32 %v38_v2, %v22_v3 }
   0x7   :  { %v31_v5 = vpack.c.bf16 %v30_v4, %v30_v4 }
   0x9   :  { %32 = vst [vmem:[%s74_s3] sm:$0x3] %v31_v5 }

// kernel: resnet_forward.34
= control target key start
LH: loop header
LB: loop body
LE: loop exit
PB: predicated region body
PF: predicated region fallthrough
CT: control target
= control target key end

     0   :  { %s72_s0 = inlined_call_operand.vmem [shape: f32[4,128], index: 0, kind: input, shape index: {}]   ;;  %s73_s1 = inlined_call_operand.vmem [shape: f32[1,128], index: 1, kind: input, shape index: {}]   ;;  %s74_s2 = inlined_call_operand.vmem [shape: f32[1,128], index: 2, kind: input, shape index: {}]   ;;  %s75_s3 = inlined_call_operand.vmem [shape: bf16[4,128], index: 3, kind: output, shape index: {}]  }
   0x1   :  { %v14_v0 = vld [vmem:[%s72_s0] sm:$0xf] }
   0x2   :  { %v38_v1 = vld [vmem:[%s73_s1] ss:$0 sm:$0xff] }
   0x3   :  { %v39_v2 = vld [vmem:[%s74_s2] ss:$0 sm:$0xff]  ;;  %v22_v3 = vmul.f32 %v38_v1, %v14_v0 }
   0x5   :  { %v30_v4 = vadd.f32 %v39_v2, %v22_v3 }
   0x7   :  { %v31_v5 = vmax.f32 %v30_v4, 0.0 }
   0x9   :  { %v32_v6 = vpack.c.bf16 %v31_v5, %v31_v5 }
   0xb   :  { %33 = vst [vmem:[%s75_s3] sm:$0x3] %v32_v6 }

// kernel: resnet_forward.33
= control target key start
LH: loop header
LB: loop body
LE: loop exit
PB: predicated region body
PF: predicated region fallthrough
CT: control target
= control target key end

     0   :  { %vm19_vm0 = vcmask 130048   ;;  %v254_v1 = vmov 0.0   ;;  %vm78_vm1 = vcmask 588800   ;;  %vm85_vm2 = vcmask 1043456   ;;  %s355_s1 = inlined_call_operand.vmem [shape: bf16[72,16], index: 1, kind: input, shape index: {}]   ;;  %s356_s0 = inlined_call_operand.vmem [shape: bf16[32,72], index: 0, kind: input, shape index: {}]   ;;  %s357_s3 = inlined_call_operand.vmem [shape: f32[1,16], index: 3, kind: output, shape index: {1}]   ;;  %s358_s4 = inlined_call_operand.vmem [shape: f32[1,16], index: 4, kind: output, shape index: {2}]   ;;  %s359_s2 = inlined_call_operand.vmem [shape: f32[32,16], index: 2, kind: output, shape index: {0}]  }
   0x1   :  { %v247_v0 = vld [vmem:[%s355_s1] sm:$0xff]   ;;  %22 = vst.msk [vmem:[#allocation2 + $0x10] sm:$0xff] %vm19_vm0, %v254_v1  ;;  %20 = vst.msk [vmem:[#allocation2] sm:$0xff] %vm19_vm0, %v254_v1  ;;  %v248_v2 = vld [vmem:[%s355_s1 + $0x8] sm:$0xff]   ;;  %vm152_vm3 = vcmask 122880  }
   0x2   :  { %21 = vst.msk [vmem:[#allocation2 + $0x8] sm:$0xff] %vm19_vm0, %v254_v1  ;;  %23 = vst.msk [vmem:[#allocation2 + $0x18] sm:$0xff] %vm19_vm0, %v254_v1  ;;  %231 = vmatprep.subr.bf16.mxu0 %v247_v0  ;;  %v249_v3 = vld [vmem:[%s355_s1 + $0x10] sm:$0xff]   ;;  %v252_v4 = vld [vmem:[%s356_s0] sm:$0xff]  }
   0x3   :  { %232 = vmatpush3.bf16.msra.mxu0 %v247_v0  ;;  %241 = vmatprep.mubr.msk.bf16.mxu0 %vm78_vm1, %v252_v4  ;;  %v250_v5 = vld [vmem:[%s355_s1 + $0x18] sm:$0xff]   ;;  %v251_v6 = vld [vmem:[%s355_s1 + $0x20] ss:$0 sps:$4 sm:$0xff]   ;;  %v253_v8 = vld [vmem:[%s356_s0 + $0x8] sm:$0xff]   ;;  %153 = vst.msk [vmem:[%s357_s3] sm:$0x1] %vm152_vm3, %v254_v1 }
   0x4   :  { %233 = vmatprep.subr.bf16.mxu0 %v248_v2  ;;  %v87_v7 = vsel %vm85_vm2, %v251_v6, 0  ;;  %154 = vst.msk [vmem:[%s358_s4] sm:$0x1] %vm152_vm3, %v254_v1 }
   0x7   :  { %234 = vmatpush3.bf16.msra.mxu0 %v248_v2 }
   0x8   :  { %235 = vmatprep.subr.bf16.mxu0 %v249_v3  ;;  %v26_v9 = vld [vmem:[#allocation2 + $0x10] sm:$0xff]  ;;  %v24_v10 = vld [vmem:[#allocation2] sm:$0xff] }
   0x9   :  { %v27_v12 = vld [vmem:[#allocation2 + $0x18] sm:$0xff]  ;;  %v25_v15 = vld [vmem:[#allocation2 + $0x8] sm:$0xff] }
   0xa   :  { %v166_v52 = vld [vmem:[%s357_s3] sm:$0x1] }
   0xb   :  { %236 = vmatpush3.bf16.msra.mxu0 %v249_v3  ;;  %v183_v55 = vld [vmem:[%s358_s4] sm:$0x1] }
   0xc   :  { %237 = vmatprep.subr.bf16.mxu0 %v250_v5 }
   0xf   :  { %238 = vmatpush3.bf16.msra.mxu0 %v250_v5 }
  0x10   :  { %245 = vmatprep.subr.msk.bf16.mxu0 %vm85_vm2, %v251_v6 }
  0x13   :  { %240 = vmatpush3.bf16.msra.mxu0 %v87_v7 }
  0x16   :  { %242 = vmatmul.mubr.msk.bf16.vlgmr.msra.gmra.mrb[0].mxu0 %vm78_vm1, %v253_v8 }
  0xe9   :  { %v243_v11 = vpop.f32.mrb[0].mxu0 }
  0xea   :  { %v140_v13 = vadd.f32 %v243_v11, %v26_v9  ;;  %v123_v14 = vpop.f32.mrb[1].mxu0 }
  0xeb   :  { %v138_v16 = vadd.f32 %v123_v14, %v24_v10  ;;  %v244_v17 = vpop.f32.mrb[2].mxu0 }
  0xec   :  { %145 = vst.msk [vmem:[#allocation2 + $0x10] sm:$0xff] %vm19_vm0, %v140_v13  ;;  %v141_v18 = vadd.f32 %v244_v17, %v27_v12  ;;  %v126_v19 = vpop.f32.mrb[3].mxu0 }
  0xed   :  { %143 = vst.msk [vmem:[#allocation2] sm:$0xff] %vm19_vm0, %v138_v16  ;;  %v139_v20 = vadd.f32 %v126_v19, %v25_v15 }
  0xee   :  { %146 = vst.msk [vmem:[#allocation2 + $0x18] sm:$0xff] %vm19_vm0, %v141_v18 }
  0xef   :  { %144 = vst.msk [vmem:[#allocation2 + $0x8] sm:$0xff] %vm19_vm0, %v139_v20 }
  0xf3   :  { %v160_v21 = vld [vmem:[#allocation2 + $0x10] sm:$0xff] }
  0xf4   :  { %164 = vst.msk [vmem:[%s359_s2 + $0x10] sm:$0xff] %vm19_vm0, %v160_v21  ;;  %v158_v22 = vld [vmem:[#allocation2] sm:$0xff]  ;;  %v186_v26 = vmul.f32 %v160_v21, %v160_v21  ;;  %v170_v31 = vsel %vm19_vm0, %v160_v21, 0.0 }
  0xf5   :  { %162 = vst.msk [vmem:[%s359_s2] sm:$0xff] %vm19_vm0, %v158_v22  ;;  %v184_v23 = vmul.f32 %v158_v22, %v158_v22  ;;  %v161_v24 = vld [vmem:[#allocation2 + $0x18] sm:$0xff]  ;;  %v167_v27 = vsel %vm19_vm0, %v158_v22, 0.0 }
  0xf6   :  { %165 = vst.msk [vmem:[%s359_s2 + $0x18] sm:$0xff] %vm19_vm0, %v161_v24  ;;  %v159_v25 = vld [vmem:[#allocation2 + $0x8] sm:$0xff]  ;;  %v187_v33 = vmul.f32 %v161_v24, %v161_v24  ;;  %v191_v37 = vsel %vm19_vm0, %v186_v26, 0.0  ;;  %v172_v38 = vsel %vm19_vm0, %v161_v24, 0.0 }
  0xf7   :  { %163 = vst.msk [vmem:[%s359_s2 + $0x8] sm:$0xff] %vm19_vm0, %v159_v25  ;;  %v168_v28 = vsel %vm19_vm0, %v159_v25, 0.0  ;;  %v185_v29 = vmul.f32 %v159_v25, %v159_v25  ;;  %v188_v32 = vsel %vm19_vm0, %v184_v23, 0.0 }
  0xf8   :  { %v169_v30 = vadd.f32 %v168_v28, %v167_v27  ;;  %v193_v41 = vsel %vm19_vm0, %v187_v33, 0.0 }
  0xf9   :  { %v189_v34 = vsel %vm19_vm0, %v185_v29, 0.0 }
  0xfa   :  { %v171_v35 = vadd.f32 %v170_v31, %v169_v30  ;;  %v190_v36 = vadd.f32 %v189_v34, %v188_v32 }
  0xfc   :  { %v173_v39 = vadd.f32 %v172_v38, %v171_v35  ;;  %v192_v40 = vadd.f32 %v191_v37, %v190_v36 }
  0xfe   :  { %v174_v42 = vrot.slane %v173_v39, 4  ;;  %v194_v43 = vadd.f32 %v193_v41, %v192_v40 }
 0x100   :  { %v175_v44 = vadd.f32 %v174_v42, %v173_v39  ;;  %v195_v45 = vrot.slane %v194_v43, 4 }
 0x102   :  { %v176_v46 = vrot.slane %v175_v44, 2  ;;  %v196_v47 = vadd.f32 %v195_v45, %v194_v43 }
 0x104   :  { %v177_v48 = vadd.f32 %v176_v46, %v175_v44  ;;  %v197_v49 = vrot.slane %v196_v47, 2 }
 0x106   :  { %v178_v50 = vrot.slane %v177_v48, 1  ;;  %v198_v51 = vadd.f32 %v197_v49, %v196_v47 }
 0x108   :  { %v179_v53 = vadd.f32 %v178_v50, %v177_v48  ;;  %v199_v54 = vrot.slane %v198_v51, 1 }
 0x10a   :  { %v180_v56 = vadd.f32 %v179_v53, %v166_v52  ;;  %v200_v57 = vadd.f32 %v199_v54, %v198_v51 }
 0x10c   :  { %182 = vst.msk [vmem:[%s357_s3] sm:$0x1] %vm152_vm3, %v180_v56  ;;  %v201_v58 = vadd.f32 %v200_v57, %v183_v55 }
 0x10e   :  { %202 = vst.msk [vmem:[%s358_s4] sm:$0x1] %vm152_vm3, %v201_v58 }

// kernel: tile.193
= control target key start
LH: loop header
LB: loop body
LE: loop exit
PB: predicated region body
PF: predicated region fallthrough
CT: control target
= control target key end

     0   :  { %s22_s0 = inlined_call_operand.vmem [shape: f32[32], index: 0, kind: input, shape index: {}]   ;;  %s23_s1 = inlined_call_operand.vmem [shape: f32[4,32], index: 1, kind: output, shape index: {}]  }
   0x1   :  { %v4_v0 = vld [vmem:[%s22_s0] ss:$0 sm:$0xff] }
   0x2   :  { %5 = vst [vmem:[%s23_s1] sm:$0xf] %v4_v0 }

// kernel: tile.194
= control target key start
LH: loop header
LB: loop body
LE: loop exit
PB: predicated region body
PF: predicated region fallthrough
CT: control target
= control target key end

     0   :  { %vm7_vm0 = vcmask 261120   ;;  %s37_s8 = smov 32   ;;  %s38_s9 = smov 64   ;;  %vm13_vm1 = vcmask 1048320   ;;  %vm19_vm2 = vcmask 785920   ;;  %vm25_vm3 = vcmask 523520   ;;  %s55_s0 = inlined_call_operand.vmem [shape: f32[4,32], index: 0, kind: input, shape index: {}]   ;;  %s56_s1 = inlined_call_operand.vmem [shape: f32[1,128], index: 1, kind: output, shape index: {}]  }
   0x1   :  { %v4_v0 = vld [vmem:[%s55_s0] sm:$0xf]  ;;  %s36_s0 = smov 96  }
   0x2   :  { %5 = vst [vmem:[#allocation1] sm:$0xf] %v4_v0 }
   0x9   :  { %v10_v1 = vld [vmem:[#allocation1 + $0x3] sm:$0x1]   ;;  %v22_v2 = vld [vmem:[#allocation1 + $0x1] sm:$0x1]   ;;  %v6_v3 = vld [vmem:[#allocation1] sm:$0x1]  }
   0xa   :  { %11 = vrot.lane.b32.xlu0 %v10_v1, %s36_s0  ;;  %23 = vrot.lane.b32.xlu1 %v22_v2, %s37_s8  ;;  %v16_v4 = vld [vmem:[#allocation1 + $0x2] sm:$0x1]   ;;  %8 = vst.msk [vmem:[#allocation0] sm:$0x1] %vm7_vm0, %v6_v3  }
   0xe   :  { %17 = vrot.lane.b32.xlu0 %v16_v4, %s38_s9 }
  0x7c   :  { %v12_v5 = vpop.permute.xlu0 %11   ;;  %v24_v6 = vpop.permute.xlu1 %23  }
  0x7d   :  { %14 = vst.msk [vmem:[#allocation0] sm:$0x1] %vm13_vm1, %v12_v5  }
  0x80   :  { %v18_v7 = vpop.permute.xlu0 %17  }
  0x81   :  { %20 = vst.msk [vmem:[#allocation0] sm:$0x1] %vm19_vm2, %v18_v7  }
  0x82   :  { %26 = vst.msk [vmem:[#allocation0] sm:$0x1] %vm25_vm3, %v24_v6  }
  0x89   :  { %v30_v8 = vld [vmem:[#allocation0] sm:$0x1] }
  0x8a   :  { %32 = vst [vmem:[%s56_s1] sm:$0x1] %v30_v8 }

// kernel: resnet_forward.37
= control target key start
LH: loop header
LB: loop body
LE: loop exit
PB: predicated region body
PF: predicated region fallthrough
CT: control target
= control target key end

     0   :  { %vm19_vm0 = vcmask 130048   ;;  %v304_v0 = vmov 0   ;;  %v305_v2 = vmov 0.0   ;;  %vm191_vm1 = vcmask 122880   ;;  %s426_s1 = inlined_call_operand.vmem [shape: bf16[144,16], index: 1, kind: input, shape index: {}]   ;;  %s427_s0 = inlined_call_operand.vmem [shape: bf16[32,144], index: 0, kind: input, shape index: {}]   ;;  %s428_s3 = inlined_call_operand.vmem [shape: f32[1,16], index: 3, kind: output, shape index: {1}]   ;;  %s429_s4 = inlined_call_operand.vmem [shape: f32[1,16], index: 4, kind: output, shape index: {2}]   ;;  %s430_s2 = inlined_call_operand.vmem [shape: f32[32,16], index: 2, kind: output, shape index: {0}]  }
   0x1   :  { %129 = vmatprep.subr.bf16.mxu0 %v304_v0  ;;  %269 = vmatprep.subr.bf16.mxu1 %v304_v0  ;;  %v289_v1 = vld [vmem:[%s426_s1] sm:$0xff]   ;;  %20 = vst.msk [vmem:[#allocation2] sm:$0xff] %vm19_vm0, %v305_v2  ;;  %21 = vst.msk [vmem:[#allocation2 + $0x8] sm:$0xff] %vm19_vm0, %v305_v2  ;;  %v290_v3 = vld [vmem:[%s426_s1 + $0x8] sm:$0xff]  }
   0x2   :  { %22 = vst.msk [vmem:[#allocation2 + $0x10] sm:$0xff] %vm19_vm0, %v305_v2  ;;  %23 = vst.msk [vmem:[#allocation2 + $0x18] sm:$0xff] %vm19_vm0, %v305_v2  ;;  %130 = vmatpush1.bf16.msra.mxu0 %v289_v1  ;;  %278 = vmatpush1.bf16.msra.mxu1 %v289_v1  ;;  %v291_v4 = vld [vmem:[%s426_s1 + $0x10] sm:$0xff]   ;;  %v292_v5 = vld [vmem:[%s426_s1 + $0x18] sm:$0xff]  }
   0x3   :  { %131 = vmatprep.subr.bf16.mxu0 %v304_v0  ;;  %270 = vmatprep.subr.bf16.mxu1 %v304_v0  ;;  %v300_v6 = vld [vmem:[%s427_s0 + $0x4] ss:$8 sps:$4 sm:$0xff]   ;;  %v303_v7 = vld [vmem:[%s427_s0 + $0x14] ss:$8 sps:$4 sm:$0xff]   ;;  %v298_v13 = vld [vmem:[%s427_s0] ss:$8 sps:$4 sm:$0xff]  }
   0x4   :  { %267 = vmatprep.mubr.msk.bf16.mxu0 %vm19_vm0, %v300_v6  ;;  %268 = vmatprep.mubr.msk.bf16.mxu1 %vm19_vm0, %v303_v7  ;;  %v293_v8 = vld [vmem:[%s426_s1 + $0x20] sm:$0xff]   ;;  %v294_v9 = vld [vmem:[%s426_s1 + $0x28] sm:$0xff]   ;;  %v295_v10 = vld [vmem:[%s426_s1 + $0x30] sm:$0xff]   ;;  %192 = vst.msk [vmem:[%s428_s3] sm:$0x1] %vm191_vm1, %v305_v2 }
   0x5   :  { %v296_v11 = vld [vmem:[%s426_s1 + $0x38] sm:$0xff]   ;;  %v297_v12 = vld [vmem:[%s426_s1 + $0x40] sm:$0xff]   ;;  %193 = vst.msk [vmem:[%s429_s4] sm:$0x1] %vm191_vm1, %v305_v2 }
   0x6   :  { %132 = vmatpush1.bf16.msra.mxu0 %v290_v3  ;;  %279 = vmatpush1.bf16.msra.mxu1 %v290_v3  ;;  %v301_v14 = vld [vmem:[%s427_s0 + $0x10] ss:$8 sps:$4 sm:$0xff]  }
   0x7   :  { %133 = vmatprep.subr.bf16.mxu0 %v304_v0  ;;  %271 = vmatprep.subr.bf16.mxu1 %v304_v0 }
   0x8   :  { %v24_v15 = vld [vmem:[#allocation2] sm:$0xff]  ;;  %v25_v19 = vld [vmem:[#allocation2 + $0x8] sm:$0xff] }
   0x9   :  { %v26_v16 = vld [vmem:[#allocation2 + $0x10] sm:$0xff]  ;;  %v27_v20 = vld [vmem:[#allocation2 + $0x18] sm:$0xff] }
   0xa   :  { %134 = vmatpush1.bf16.msra.mxu0 %v291_v4  ;;  %280 = vmatpush1.bf16.msra.mxu1 %v291_v4 }
   0xb   :  { %135 = vmatprep.subr.bf16.mxu0 %v304_v0  ;;  %272 = vmatprep.subr.bf16.mxu1 %v304_v0  ;;  %v205_v62 = vld [vmem:[%s428_s3] sm:$0x1] }
   0xc   :  { %v222_v1 = vld [vmem:[%s429_s4] sm:$0x1] }
   0xe   :  { %136 = vmatpush1.bf16.msra.mxu0 %v292_v5  ;;  %281 = vmatpush1.bf16.msra.mxu1 %v292_v5 }
   0xf   :  { %137 = vmatprep.subr.bf16.mxu0 %v304_v0  ;;  %273 = vmatprep.subr.bf16.mxu1 %v304_v0 }
  0x12   :  { %138 = vmatpush1.bf16.msra.mxu0 %v293_v8  ;;  %282 = vmatpush1.bf16.msra.mxu1 %v293_v8 }
  0x13   :  { %139 = vmatprep.subr.bf16.mxu0 %v304_v0  ;;  %274 = vmatprep.subr.bf16.mxu1 %v304_v0 }
  0x16   :  { %140 = vmatpush1.bf16.msra.mxu0 %v294_v9  ;;  %283 = vmatpush1.bf16.msra.mxu1 %v294_v9 }
  0x17   :  { %141 = vmatprep.subr.bf16.mxu0 %v304_v0  ;;  %275 = vmatprep.subr.bf16.mxu1 %v304_v0 }
  0x1a   :  { %142 = vmatpush1.bf16.msra.mxu0 %v295_v10  ;;  %284 = vmatpush1.bf16.msra.mxu1 %v295_v10 }
  0x1b   :  { %143 = vmatprep.subr.bf16.mxu0 %v304_v0  ;;  %276 = vmatprep.subr.bf16.mxu1 %v304_v0 }
  0x1e   :  { %144 = vmatpush1.bf16.msra.mxu0 %v296_v11  ;;  %285 = vmatpush1.bf16.msra.mxu1 %v296_v11 }
  0x1f   :  { %145 = vmatprep.subr.bf16.mxu0 %v304_v0  ;;  %277 = vmatprep.subr.bf16.mxu1 %v304_v0 }
  0x22   :  { %146 = vmatpush1.bf16.msra.mxu0 %v297_v12  ;;  %286 = vmatpush1.bf16.msra.mxu1 %v297_v12 }
  0x25   :  { %162 = vmatmul.mubr.bf16.vlgmr.msra.gmra.mrb[0].mxu0 %v298_v13  ;;  %170 = vmatmul.mubr.bf16.vlgmr.msra.gmra.mrb[0].mxu1 %v301_v14 }
  0xf8   :  { %v163_v17 = vpop.f32.mrb[0].mxu0  ;;  %v171_v18 = vpop.f32.mrb[0].mxu1 }
  0xf9   :  { %v178_v21 = vadd.f32 %v163_v17, %v24_v15  ;;  %v165_v22 = vpop.f32.mrb[1].mxu0  ;;  %v180_v23 = vadd.f32 %v171_v18, %v26_v16  ;;  %v173_v24 = vpop.f32.mrb[1].mxu1 }
  0xfa   :  { %v166_v25 = vpop.f32.mrb[2].mxu0  ;;  %v174_v26 = vpop.f32.mrb[2].mxu1 }
  0xfb   :  { %182 = vst.msk [vmem:[#allocation2] sm:$0xff] %vm19_vm0, %v178_v21  ;;  %184 = vst.msk [vmem:[#allocation2 + $0x10] sm:$0xff] %vm19_vm0, %v180_v23  ;;  %v179_v27 = vadd.f32 %v166_v25, %v25_v19  ;;  %v168_v28 = vpop.f32.mrb[3].mxu0  ;;  %v181_v29 = vadd.f32 %v174_v26, %v27_v20  ;;  %v176_v30 = vpop.f32.mrb[3].mxu1 }
  0xfd   :  { %183 = vst.msk [vmem:[#allocation2 + $0x8] sm:$0xff] %vm19_vm0, %v179_v27  ;;  %185 = vst.msk [vmem:[#allocation2 + $0x18] sm:$0xff] %vm19_vm0, %v181_v29 }
 0x102   :  { %v197_v31 = vld [vmem:[#allocation2] sm:$0xff]  ;;  %v199_v32 = vld [vmem:[#allocation2 + $0x10] sm:$0xff] }
 0x103   :  { %201 = vst.msk [vmem:[%s430_s2] sm:$0xff] %vm19_vm0, %v197_v31  ;;  %v223_v33 = vmul.f32 %v197_v31, %v197_v31  ;;  %203 = vst.msk [vmem:[%s430_s2 + $0x10] sm:$0xff] %vm19_vm0, %v199_v32  ;;  %v225_v34 = vmul.f32 %v199_v32, %v199_v32  ;;  %v206_v37 = vsel %vm19_vm0, %v197_v31, 0.0  ;;  %v209_v38 = vsel %vm19_vm0, %v199_v32, 0.0 }
 0x104   :  { %v198_v35 = vld [vmem:[#allocation2 + $0x8] sm:$0xff]  ;;  %v200_v36 = vld [vmem:[#allocation2 + $0x18] sm:$0xff] }
 0x105   :  { %202 = vst.msk [vmem:[%s430_s2 + $0x8] sm:$0xff] %vm19_vm0, %v198_v35  ;;  %v207_v39 = vsel %vm19_vm0, %v198_v35, 0.0  ;;  %v224_v40 = vmul.f32 %v198_v35, %v198_v35  ;;  %204 = vst.msk [vmem:[%s430_s2 + $0x18] sm:$0xff] %vm19_vm0, %v200_v36  ;;  %v227_v42 = vsel %vm19_vm0, %v223_v33, 0.0  ;;  %v230_v43 = vsel %vm19_vm0, %v225_v34, 0.0 }
 0x106   :  { %v208_v41 = vadd.f32 %v207_v39, %v206_v37  ;;  %v226_v45 = vmul.f32 %v200_v36, %v200_v36  ;;  %v211_v48 = vsel %vm19_vm0, %v200_v36, 0.0 }
 0x107   :  { %v228_v44 = vsel %vm19_vm0, %v224_v40, 0.0 }
 0x108   :  { %v229_v46 = vadd.f32 %v228_v44, %v227_v42  ;;  %v210_v47 = vadd.f32 %v209_v38, %v208_v41  ;;  %v232_v51 = vsel %vm19_vm0, %v226_v45, 0.0 }
 0x10a   :  { %v212_v49 = vadd.f32 %v211_v48, %v210_v47  ;;  %v231_v50 = vadd.f32 %v230_v43, %v229_v46 }
 0x10c   :  { %v213_v52 = vrot.slane %v212_v49, 4  ;;  %v233_v53 = vadd.f32 %v232_v51, %v231_v50 }
 0x10e   :  { %v214_v54 = vadd.f32 %v213_v52, %v212_v49  ;;  %v234_v55 = vrot.slane %v233_v53, 4 }
 0x110   :  { %v215_v56 = vrot.slane %v214_v54, 2  ;;  %v235_v57 = vadd.f32 %v234_v55, %v233_v53 }
 0x112   :  { %v216_v58 = vadd.f32 %v215_v56, %v214_v54  ;;  %v236_v59 = vrot.slane %v235_v57, 2 }
 0x114   :  { %v217_v60 = vrot.slane %v216_v58, 1  ;;  %v237_v61 = vadd.f32 %v236_v59, %v235_v57 }
 0x116   :  { %v218_v63 = vadd.f32 %v217_v60, %v216_v58  ;;  %v238_v0 = vrot.slane %v237_v61, 1 }
 0x118   :  { %v219_v2 = vadd.f32 %v218_v63, %v205_v62  ;;  %v239_v3 = vadd.f32 %v238_v0, %v237_v61 }
 0x11a   :  { %221 = vst.msk [vmem:[%s428_s3] sm:$0x1] %vm191_vm1, %v219_v2  ;;  %v240_v4 = vadd.f32 %v239_v3, %v222_v1 }
 0x11c   :  { %241 = vst.msk [vmem:[%s429_s4] sm:$0x1] %vm191_vm1, %v240_v4 }

// kernel: resnet_forward.38
= control target key start
LH: loop header
LB: loop body
LE: loop exit
PB: predicated region body
PF: predicated region fallthrough
CT: control target
= control target key end

     0   :  { %s86_s0 = inlined_call_operand.vmem [shape: f32[4,128], index: 0, kind: input, shape index: {}]   ;;  %s87_s1 = inlined_call_operand.vmem [shape: f32[1,128], index: 1, kind: input, shape index: {}]   ;;  %s88_s2 = inlined_call_operand.vmem [shape: f32[1,128], index: 2, kind: input, shape index: {}]   ;;  %s89_s3 = inlined_call_operand.vmem [shape: bf16[4,128], index: 3, kind: input, shape index: {}]   ;;  %s90_s4 = inlined_call_operand.vmem [shape: bf16[4,128], index: 4, kind: output, shape index: {}]  }
   0x1   :  { %v17_v0 = vld [vmem:[%s86_s0] sm:$0xf] }
   0x2   :  { %v44_v1 = vld [vmem:[%s87_s1] ss:$0 sm:$0xff] }
   0x3   :  { %v45_v2 = vld [vmem:[%s88_s2] ss:$0 sm:$0xff]  ;;  %v25_v3 = vmul.f32 %v44_v1, %v17_v0 }
   0x4   :  { %v34_v4 = vld [vmem:[%s89_s3] sm:$0x3] }
   0x5   :  { %v35_v5 = vunpack.c.l.bf16 %v34_v4  ;;  %v33_v6 = vadd.f32 %v45_v2, %v25_v3 }
   0x7   :  { %v36_v7 = vadd.f32 %v35_v5, %v33_v6 }
   0x9   :  { %v37_v8 = vmax.f32 %v36_v7, 0.0 }
   0xb   :  { %v38_v9 = vpack.c.bf16 %v37_v8, %v37_v8 }
   0xd   :  { %39 = vst [vmem:[%s90_s4] sm:$0x3] %v38_v9 }

// kernel: resnet_forward.41
= control target key start
LH: loop header
LB: loop body
LE: loop exit
PB: predicated region body
PF: predicated region fallthrough
CT: control target
= control target key end

     0   :  { %vm83_vm0 = vcmask 253952   ;;  %v138_v0 = vmov 0.0   ;;  %vm139_vm1 = vmmov 0   ;;  %vm19_vm2 = vcmask 261120   ;;  %s201_s3 = inlined_call_operand.vmem [shape: f32[1,32], index: 3, kind: output, shape index: {1}]   ;;  %s202_s4 = inlined_call_operand.vmem [shape: f32[1,32], index: 4, kind: output, shape index: {2}]   ;;  %s203_s1 = inlined_call_operand.vmem [shape: bf16[16,32], index: 1, kind: input, shape index: {}]   ;;  %s204_s0 = inlined_call_operand.vmem [shape: bf16[8,16], index: 0, kind: input, shape index: {}]   ;;  %s205_s2 = inlined_call_operand.vmem [shape: f32[8,32], index: 2, kind: output, shape index: {0}]  }
   0x1   :  { %129 = vmatprep.subr.bf16.mxu0 %v138_v0  ;;  %84 = vst.msk [vmem:[%s201_s3] sm:$0x1] %vm83_vm0, %v138_v0  ;;  %85 = vst.msk [vmem:[%s202_s4] sm:$0x1] %vm83_vm0, %v138_v0  ;;  %v137_v1 = vld [vmem:[%s203_s1] sm:$0xff]   ;;  %131 = vmatprep.mubr.msk.bf16.mxu0 %vm139_vm1, %v138_v0  ;;  %vm31_vm3 = vcmask 130048  }
   0x2   :  { %20 = vst.msk [vmem:[#allocation2] sm:$0xff] %vm19_vm2, %v138_v0  ;;  %130 = vmatpush3.bf16.msra.mxu0 %v137_v1  ;;  %v22_v2 = vld [vmem:[%s204_s0] sm:$0xf] }
   0x5   :  { %132 = vmatmul.mubr.msk.bf16.vlgmr.msra.gmra.mrb[0].mxu0 %vm31_vm3, %v22_v2 }
   0x8   :  { %v91_v22 = vld [vmem:[%s201_s3] sm:$0x1] }
   0x9   :  { %v21_v3 = vld [vmem:[#allocation2] sm:$0xff] }
   0xa   :  { %v102_v25 = vld [vmem:[%s202_s4] sm:$0x1] }
  0xd8   :  { %v69_v4 = vpop.f32.mrb[0].mxu0 }
  0xd9   :  { %v75_v5 = vadd.f32 %v69_v4, %v21_v3  ;;  %v133_v6 = vpop.f32.mrb[1].mxu0 }
  0xda   :  { %v72_v7 = vpop.f32.mrb[2].mxu0 }
  0xdb   :  { %77 = vst.msk [vmem:[#allocation2] sm:$0xff] %vm19_vm2, %v75_v5  ;;  %v134_v8 = vpop.f32.mrb[3].mxu0 }
  0xe2   :  { %v89_v9 = vld [vmem:[#allocation2] sm:$0xff] }
  0xe3   :  { %90 = vst.msk [vmem:[%s205_s2] sm:$0xff] %vm19_vm2, %v89_v9  ;;  %v92_v10 = vsel %vm19_vm2, %v89_v9, 0.0  ;;  %v103_v11 = vmul.f32 %v89_v9, %v89_v9 }
  0xe4   :  { %v93_v12 = vrot.slane %v92_v10, 4 }
  0xe5   :  { %v104_v13 = vsel %vm19_vm2, %v103_v11, 0.0 }
  0xe6   :  { %v94_v14 = vadd.f32 %v93_v12, %v92_v10  ;;  %v105_v15 = vrot.slane %v104_v13, 4 }
  0xe8   :  { %v95_v16 = vrot.slane %v94_v14, 2  ;;  %v106_v17 = vadd.f32 %v105_v15, %v104_v13 }
  0xea   :  { %v96_v18 = vadd.f32 %v95_v16, %v94_v14  ;;  %v107_v19 = vrot.slane %v106_v17, 2 }
  0xec   :  { %v97_v20 = vrot.slane %v96_v18, 1  ;;  %v108_v21 = vadd.f32 %v107_v19, %v106_v17 }
  0xee   :  { %v98_v23 = vadd.f32 %v97_v20, %v96_v18  ;;  %v109_v24 = vrot.slane %v108_v21, 1 }
  0xf0   :  { %v99_v26 = vadd.f32 %v98_v23, %v91_v22  ;;  %v110_v27 = vadd.f32 %v109_v24, %v108_v21 }
  0xf2   :  { %101 = vst.msk [vmem:[%s201_s3] sm:$0x1] %vm83_vm0, %v99_v26  ;;  %v111_v28 = vadd.f32 %v110_v27, %v102_v25 }
  0xf4   :  { %112 = vst.msk [vmem:[%s202_s4] sm:$0x1] %vm83_vm0, %v111_v28 }

// kernel: resnet_forward.42
= control target key start
LH: loop header
LB: loop body
LE: loop exit
PB: predicated region body
PF: predicated region fallthrough
CT: control target
= control target key end

     0   :  { %s71_s0 = inlined_call_operand.vmem [shape: f32[2,128], index: 0, kind: input, shape index: {}]   ;;  %s72_s1 = inlined_call_operand.vmem [shape: f32[1,128], index: 1, kind: input, shape index: {}]   ;;  %s73_s2 = inlined_call_operand.vmem [shape: f32[1,128], index: 2, kind: input, shape index: {}]   ;;  %s74_s3 = inlined_call_operand.vmem [shape: bf16[2,128], index: 3, kind: output, shape index: {}]  }
   0x1   :  { %v14_v0 = vld [vmem:[%s71_s0] sm:$0x3] }
   0x2   :  { %v37_v1 = vld [vmem:[%s72_s1] ss:$0 sm:$0xff] }
   0x3   :  { %v38_v2 = vld [vmem:[%s73_s2] ss:$0 sm:$0xff]  ;;  %v22_v3 = vmul.f32 %v37_v1, %v14_v0 }
   0x5   :  { %v30_v4 = vadd.f32 %v38_v2, %v22_v3 }
   0x7   :  { %v31_v5 = vpack.c.bf16 %v30_v4, %v30_v4 }
   0x9   :  { %32 = vst [vmem:[%s74_s3] sm:$0x1] %v31_v5 }

// kernel: resnet_forward.40
= control target key start
LH: loop header
LB: loop body
LE: loop exit
PB: predicated region body
PF: predicated region fallthrough
CT: control target
= control target key end

     0   :  { %s72_s0 = inlined_call_operand.vmem [shape: f32[2,128], index: 0, kind: input, shape index: {}]   ;;  %s73_s1 = inlined_call_operand.vmem [shape: f32[1,128], index: 1, kind: input, shape index: {}]   ;;  %s74_s2 = inlined_call_operand.vmem [shape: f32[1,128], index: 2, kind: input, shape index: {}]   ;;  %s75_s3 = inlined_call_operand.vmem [shape: bf16[2,128], index: 3, kind: output, shape index: {}]  }
   0x1   :  { %v14_v0 = vld [vmem:[%s72_s0] sm:$0x3] }
   0x2   :  { %v38_v1 = vld [vmem:[%s73_s1] ss:$0 sm:$0xff] }
   0x3   :  { %v39_v2 = vld [vmem:[%s74_s2] ss:$0 sm:$0xff]  ;;  %v22_v3 = vmul.f32 %v38_v1, %v14_v0 }
   0x5   :  { %v30_v4 = vadd.f32 %v39_v2, %v22_v3 }
   0x7   :  { %v31_v5 = vmax.f32 %v30_v4, 0.0 }
   0x9   :  { %v32_v6 = vpack.c.bf16 %v31_v5, %v31_v5 }
   0xb   :  { %33 = vst [vmem:[%s75_s3] sm:$0x1] %v32_v6 }

// kernel: resnet_forward.39
= control target key start
LH: loop header
LB: loop body
LE: loop exit
PB: predicated region body
PF: predicated region fallthrough
CT: control target
= control target key end

     0   :  { %vm19_vm0 = vcmask 261120   ;;  %v220_v0 = vmov 0   ;;  %v221_v2 = vmov 0.0   ;;  %vm101_vm1 = vcmask 130048   ;;  %s307_s1 = inlined_call_operand.vmem [shape: bf16[144,32], index: 1, kind: input, shape index: {}]   ;;  %s308_s0 = inlined_call_operand.vmem [shape: bf16[8,144], index: 0, kind: input, shape index: {}]   ;;  %s309_s3 = inlined_call_operand.vmem [shape: f32[1,32], index: 3, kind: output, shape index: {1}]   ;;  %s310_s4 = inlined_call_operand.vmem [shape: f32[1,32], index: 4, kind: output, shape index: {2}]   ;;  %s311_s2 = inlined_call_operand.vmem [shape: f32[8,32], index: 2, kind: output, shape index: {0}]  }
   0x1   :  { %105 = vmatprep.subr.bf16.mxu0 %v220_v0  ;;  %v209_v1 = vld [vmem:[%s307_s1] sm:$0xff]   ;;  %20 = vst.msk [vmem:[#allocation2] sm:$0xff] %vm19_vm0, %v221_v2  ;;  %v210_v3 = vld [vmem:[%s307_s1 + $0x8] sm:$0xff]   ;;  %v211_v4 = vld [vmem:[%s307_s1 + $0x10] sm:$0xff]   ;;  %vm153_vm2 = vcmask 253952  }
   0x2   :  { %106 = vmatpush1.bf16.msra.mxu0 %v209_v1  ;;  %v22_v5 = vld [vmem:[%s308_s0] sm:$0xff]  ;;  %v212_v6 = vld [vmem:[%s307_s1 + $0x18] sm:$0xff]   ;;  %v214_v9 = vld [vmem:[%s307_s1 + $0x28] sm:$0xff]   ;;  %154 = vst.msk [vmem:[%s309_s3] sm:$0x1] %vm153_vm2, %v221_v2 }
   0x3   :  { %107 = vmatprep.subr.bf16.mxu0 %v220_v0  ;;  %v196_v7 = vcombine.high %v22_v5, %v22_v5  ;;  %v213_v8 = vld [vmem:[%s307_s1 + $0x20] sm:$0xff]   ;;  %v215_v10 = vld [vmem:[%s307_s1 + $0x30] sm:$0xff]   ;;  %v216_v11 = vld [vmem:[%s307_s1 + $0x38] sm:$0xff]   ;;  %v195_v13 = vcombine.low %v22_v5, %v22_v5  ;;  %155 = vst.msk [vmem:[%s310_s4] sm:$0x1] %vm153_vm2, %v221_v2 }
   0x4   :  { %v217_v12 = vld [vmem:[%s307_s1 + $0x40] sm:$0xff]  }
   0x5   :  { %206 = vmatprep.mubr.msk.bf16.mxu0 %vm101_vm1, %v196_v7 }
   0x6   :  { %108 = vmatpush1.bf16.msra.mxu0 %v210_v3 }
   0x7   :  { %109 = vmatprep.subr.bf16.mxu0 %v220_v0 }
   0x8   :  { %v21_v14 = vld [vmem:[#allocation2] sm:$0xff] }
   0x9   :  { %v161_v33 = vld [vmem:[%s309_s3] sm:$0x1] }
   0xa   :  { %110 = vmatpush1.bf16.msra.mxu0 %v211_v4  ;;  %v172_v36 = vld [vmem:[%s310_s4] sm:$0x1] }
   0xb   :  { %111 = vmatprep.subr.bf16.mxu0 %v220_v0 }
   0xe   :  { %112 = vmatpush1.bf16.msra.mxu0 %v212_v6 }
   0xf   :  { %113 = vmatprep.subr.bf16.mxu0 %v220_v0 }
  0x12   :  { %114 = vmatpush1.bf16.msra.mxu0 %v213_v8 }
  0x13   :  { %115 = vmatprep.subr.bf16.mxu0 %v220_v0 }
  0x16   :  { %116 = vmatpush1.bf16.msra.mxu0 %v214_v9 }
  0x17   :  { %117 = vmatprep.subr.bf16.mxu0 %v220_v0 }
  0x1a   :  { %118 = vmatpush1.bf16.msra.mxu0 %v215_v10 }
  0x1b   :  { %119 = vmatprep.subr.bf16.mxu0 %v220_v0 }
  0x1e   :  { %120 = vmatpush1.bf16.msra.mxu0 %v216_v11 }
  0x1f   :  { %121 = vmatprep.subr.bf16.mxu0 %v220_v0 }
  0x22   :  { %122 = vmatpush1.bf16.msra.mxu0 %v217_v12 }
  0x25   :  { %138 = vmatmul.mubr.bf16.vlgmr.msra.gmra.mrb[0].mxu0 %v195_v13 }
  0xf8   :  { %v139_v15 = vpop.f32.mrb[0].mxu0 }
  0xf9   :  { %v145_v16 = vadd.f32 %v139_v15, %v21_v14  ;;  %v141_v17 = vpop.f32.mrb[1].mxu0 }
  0xfa   :  { %v142_v18 = vpop.f32.mrb[2].mxu0 }
  0xfb   :  { %147 = vst.msk [vmem:[#allocation2] sm:$0xff] %vm19_vm0, %v145_v16  ;;  %v143_v19 = vpop.f32.mrb[3].mxu0 }
 0x102   :  { %v159_v20 = vld [vmem:[#allocation2] sm:$0xff] }
 0x103   :  { %160 = vst.msk [vmem:[%s311_s2] sm:$0xff] %vm19_vm0, %v159_v20  ;;  %v162_v21 = vsel %vm19_vm0, %v159_v20, 0.0  ;;  %v173_v22 = vmul.f32 %v159_v20, %v159_v20 }
 0x104   :  { %v163_v23 = vrot.slane %v162_v21, 4 }
 0x105   :  { %v174_v24 = vsel %vm19_vm0, %v173_v22, 0.0 }
 0x106   :  { %v164_v25 = vadd.f32 %v163_v23, %v162_v21  ;;  %v175_v26 = vrot.slane %v174_v24, 4 }
 0x108   :  { %v165_v27 = vrot.slane %v164_v25, 2  ;;  %v176_v28 = vadd.f32 %v175_v26, %v174_v24 }
 0x10a   :  { %v166_v29 = vadd.f32 %v165_v27, %v164_v25  ;;  %v177_v30 = vrot.slane %v176_v28, 2 }
 0x10c   :  { %v167_v31 = vrot.slane %v166_v29, 1  ;;  %v178_v32 = vadd.f32 %v177_v30, %v176_v28 }
 0x10e   :  { %v168_v34 = vadd.f32 %v167_v31, %v166_v29  ;;  %v179_v35 = vrot.slane %v178_v32, 1 }
 0x110   :  { %v169_v37 = vadd.f32 %v168_v34, %v161_v33  ;;  %v180_v38 = vadd.f32 %v179_v35, %v178_v32 }
 0x112   :  { %171 = vst.msk [vmem:[%s309_s3] sm:$0x1] %vm153_vm2, %v169_v37  ;;  %v181_v39 = vadd.f32 %v180_v38, %v172_v36 }
 0x114   :  { %182 = vst.msk [vmem:[%s310_s4] sm:$0x1] %vm153_vm2, %v181_v39 }

// kernel: tile.223
= control target key start
LH: loop header
LB: loop body
LE: loop exit
PB: predicated region body
PF: predicated region fallthrough
CT: control target
= control target key end

     0   :  { %s22_s0 = inlined_call_operand.vmem [shape: f32[64], index: 0, kind: input, shape index: {}]   ;;  %s23_s1 = inlined_call_operand.vmem [shape: f32[2,64], index: 1, kind: output, shape index: {}]  }
   0x1   :  { %v4_v0 = vld [vmem:[%s22_s0] ss:$0 sm:$0xff] }
   0x2   :  { %5 = vst [vmem:[%s23_s1] sm:$0x3] %v4_v0 }

// kernel: tile.224
= control target key start
LH: loop header
LB: loop body
LE: loop exit
PB: predicated region body
PF: predicated region fallthrough
CT: control target
= control target key end

     0   :  { %vm7_vm0 = vcmask 523264   ;;  %vm13_vm1 = vcmask 1048064   ;;  %s39_s0 = inlined_call_operand.vmem [shape: f32[2,64], index: 0, kind: input, shape index: {}]   ;;  %s40_s1 = inlined_call_operand.vmem [shape: f32[1,128], index: 1, kind: output, shape index: {}]  }
   0x1   :  { %v4_v0 = vld [vmem:[%s39_s0] sm:$0x3]  ;;  %s22_s0 = smov 64  }
   0x2   :  { %5 = vst [vmem:[#allocation1] sm:$0x3] %v4_v0 }
   0x9   :  { %v10_v1 = vld [vmem:[#allocation1 + $0x1] sm:$0x1]   ;;  %v6_v2 = vld [vmem:[#allocation1] sm:$0x1]  }
   0xa   :  { %11 = vrot.lane.b32.xlu0 %v10_v1, %s22_s0  ;;  %8 = vst.msk [vmem:[#allocation0] sm:$0x1] %vm7_vm0, %v6_v2  }
  0x7c   :  { %v12_v3 = vpop.permute.xlu0 %11  }
  0x7d   :  { %14 = vst.msk [vmem:[#allocation0] sm:$0x1] %vm13_vm1, %v12_v3  }
  0x84   :  { %v18_v4 = vld [vmem:[#allocation0] sm:$0x1] }
  0x85   :  { %20 = vst [vmem:[%s40_s1] sm:$0x1] %v18_v4 }

// kernel: resnet_forward.44
= control target key start
LH: loop header
LB: loop body
LE: loop exit
PB: predicated region body
PF: predicated region fallthrough
CT: control target
= control target key end

     0   :  { %s86_s0 = inlined_call_operand.vmem [shape: f32[2,128], index: 0, kind: input, shape index: {}]   ;;  %s87_s1 = inlined_call_operand.vmem [shape: f32[1,128], index: 1, kind: input, shape index: {}]   ;;  %s88_s2 = inlined_call_operand.vmem [shape: f32[1,128], index: 2, kind: input, shape index: {}]   ;;  %s89_s3 = inlined_call_operand.vmem [shape: bf16[2,128], index: 3, kind: input, shape index: {}]   ;;  %s90_s4 = inlined_call_operand.vmem [shape: bf16[2,128], index: 4, kind: output, shape index: {}]  }
   0x1   :  { %v17_v0 = vld [vmem:[%s86_s0] sm:$0x3] }
   0x2   :  { %v44_v1 = vld [vmem:[%s87_s1] ss:$0 sm:$0xff] }
   0x3   :  { %v45_v2 = vld [vmem:[%s88_s2] ss:$0 sm:$0xff]  ;;  %v25_v3 = vmul.f32 %v44_v1, %v17_v0 }
   0x4   :  { %v34_v4 = vld [vmem:[%s89_s3] sm:$0x1] }
   0x5   :  { %v35_v5 = vunpack.c.l.bf16 %v34_v4  ;;  %v33_v6 = vadd.f32 %v45_v2, %v25_v3 }
   0x7   :  { %v36_v7 = vadd.f32 %v35_v5, %v33_v6 }
   0x9   :  { %v37_v8 = vmax.f32 %v36_v7, 0.0 }
   0xb   :  { %v38_v9 = vpack.c.bf16 %v37_v8, %v37_v8 }
   0xd   :  { %39 = vst [vmem:[%s90_s4] sm:$0x1] %v38_v9 }

// kernel: resnet_forward.43
= control target key start
LH: loop header
LB: loop body
LE: loop exit
PB: predicated region body
PF: predicated region fallthrough
CT: control target
= control target key end

     0   :  { %vm269_vm0 = vcmask 253952   ;;  %vm19_vm1 = vcmask 261120   ;;  %v389_v1 = vmov 0.0   ;;  %vm390_vm2 = vmmov 0   ;;  %s507_s1 = inlined_call_operand.vmem [shape: bf16[288,32], index: 1, kind: input, shape index: {}]   ;;  %s508_s3 = inlined_call_operand.vmem [shape: f32[1,32], index: 3, kind: output, shape index: {1}]   ;;  %s509_s4 = inlined_call_operand.vmem [shape: f32[1,32], index: 4, kind: output, shape index: {2}]   ;;  %s510_s0 = inlined_call_operand.vmem [shape: bf16[8,288], index: 0, kind: input, shape index: {}]   ;;  %s511_s2 = inlined_call_operand.vmem [shape: f32[8,32], index: 2, kind: output, shape index: {0}]  }
   0x1   :  { %v368_v0 = vld [vmem:[%s507_s1 + $0x40] sm:$0xff]   ;;  %358 = vmatprep.subr.bf16.mxu1 %v389_v1  ;;  %270 = vst.msk [vmem:[%s508_s3] sm:$0x1] %vm269_vm0, %v389_v1  ;;  %271 = vst.msk [vmem:[%s509_s4] sm:$0x1] %vm269_vm0, %v389_v1  ;;  %362 = vmatprep.mubr.msk.bf16.mxu1 %vm390_vm2, %v389_v1  ;;  %v370_v3 = vld [vmem:[%s507_s1 + $0x48] sm:$0xff]  }
   0x2   :  { %20 = vst.msk [vmem:[#allocation2] sm:$0xff] %vm19_vm1, %v389_v1  ;;  %v369_v2 = vld [vmem:[%s507_s1] sm:$0xff]   ;;  %333 = vmatprep.subr.bf16.mxu0 %v368_v0  ;;  %v371_v4 = vld [vmem:[%s507_s1 + $0x8] sm:$0xff]   ;;  %v372_v5 = vld [vmem:[%s507_s1 + $0x50] sm:$0xff]  }
   0x3   :  { %334 = vmatpush3.bf16.msra.mxu0 %v369_v2  ;;  %v373_v6 = vld [vmem:[%s507_s1 + $0x10] sm:$0xff]   ;;  %v374_v7 = vld [vmem:[%s507_s1 + $0x58] sm:$0xff]   ;;  %v376_v9 = vld [vmem:[%s507_s1 + $0x60] sm:$0xff]  }
   0x4   :  { %335 = vmatprep.subr.bf16.mxu0 %v370_v3  ;;  %v375_v8 = vld [vmem:[%s507_s1 + $0x18] sm:$0xff]   ;;  %v377_v10 = vld [vmem:[%s507_s1 + $0x20] sm:$0xff]   ;;  %v378_v12 = vld [vmem:[%s507_s1 + $0x68] sm:$0xff]  }
   0x5   :  { %v382_v11 = vld [vmem:[%s507_s1 + $0x80] sm:$0xff]   ;;  %v385_v13 = vld [vmem:[%s507_s1 + $0x88] sm:$0xff]   ;;  %v380_v17 = vld [vmem:[%s507_s1 + $0x70] sm:$0xff]  }
   0x6   :  { %359 = vmatpush3.bf16.msra.mxu1 %v382_v11  ;;  %v22_v14 = vld [vmem:[%s510_s0] sm:$0xff]  ;;  %v379_v15 = vld [vmem:[%s507_s1 + $0x28] sm:$0xff]   ;;  %v381_v19 = vld [vmem:[%s507_s1 + $0x30] sm:$0xff]  }
   0x7   :  { %336 = vmatpush3.bf16.msra.mxu0 %v371_v4  ;;  %360 = vmatprep.subr.bf16.mxu1 %v389_v1  ;;  %v312_v16 = vcombine.high %v22_v14, %v22_v14  ;;  %v388_v18 = vld [vmem:[%s510_s0 + $0x8] ss:$0 sps:$4 sm:$0xff]   ;;  %v383_v20 = vld [vmem:[%s507_s1 + $0x78] sm:$0xff]   ;;  %v311_v22 = vcombine.low %v22_v14, %v22_v14 }
   0x8   :  { %337 = vmatprep.subr.bf16.mxu0 %v372_v5  ;;  %v384_v21 = vld [vmem:[%s507_s1 + $0x38] sm:$0xff]   ;;  %v277_v48 = vld [vmem:[%s508_s3] sm:$0x1] }
   0x9   :  { %214 = vmatprep.mubr.bf16.mxu0 %v312_v16  ;;  %v21_v31 = vld [vmem:[#allocation2] sm:$0xff] }
   0xa   :  { %361 = vmatpush3.bf16.msra.mxu1 %v385_v13  ;;  %v288_v51 = vld [vmem:[%s509_s4] sm:$0x1] }
   0xb   :  { %338 = vmatpush3.bf16.msra.mxu0 %v373_v6 }
   0xc   :  { %339 = vmatprep.subr.bf16.mxu0 %v374_v7 }
   0xd   :  { %363 = vmatmul.mubr.msk.bf16.vlgmr.msra.gmra.mrb[0].mxu1 %vm19_vm1, %v388_v18 }
   0xf   :  { %340 = vmatpush3.bf16.msra.mxu0 %v375_v8 }
  0x10   :  { %341 = vmatprep.subr.bf16.mxu0 %v376_v9 }
  0x13   :  { %342 = vmatpush3.bf16.msra.mxu0 %v377_v10 }
  0x14   :  { %343 = vmatprep.subr.bf16.mxu0 %v378_v12 }
  0x17   :  { %344 = vmatpush3.bf16.msra.mxu0 %v379_v15 }
  0x18   :  { %345 = vmatprep.subr.bf16.mxu0 %v380_v17 }
  0x1b   :  { %346 = vmatpush3.bf16.msra.mxu0 %v381_v19 }
  0x1c   :  { %347 = vmatprep.subr.bf16.mxu0 %v383_v20 }
  0x1f   :  { %348 = vmatpush3.bf16.msra.mxu0 %v384_v21 }
  0x22   :  { %215 = vmatmul.mubr.bf16.vlgmr.msra.gmra.mrb[0].mxu0 %v311_v22 }
  0xe0   :  { %v256_v23 = vpop.f32.mrb[0].mxu1 }
  0xe1   :  { %v364_v24 = vpop.f32.mrb[1].mxu1 }
  0xe2   :  { %v259_v25 = vpop.f32.mrb[2].mxu1 }
  0xe3   :  { %v365_v26 = vpop.f32.mrb[3].mxu1 }
  0xf5   :  { %v349_v27 = vpop.f32.mrb[0].mxu0 }
  0xf6   :  { %v350_v28 = vpop.f32.mrb[1].mxu0 }
  0xf7   :  { %v351_v29 = vadd.f32 %v350_v28, %v349_v27  ;;  %v352_v30 = vpop.f32.mrb[2].mxu0 }
  0xf8   :  { %v353_v32 = vpop.f32.mrb[3].mxu0 }
  0xf9   :  { %v257_v33 = vadd.f32 %v351_v29, %v256_v23 }
  0xfb   :  { %v262_v34 = vadd.f32 %v257_v33, %v21_v31 }
  0xfd   :  { %263 = vst.msk [vmem:[#allocation2] sm:$0xff] %vm19_vm1, %v262_v34 }
 0x104   :  { %v275_v35 = vld [vmem:[#allocation2] sm:$0xff] }
 0x105   :  { %276 = vst.msk [vmem:[%s511_s2] sm:$0xff] %vm19_vm1, %v275_v35  ;;  %v278_v36 = vsel %vm19_vm1, %v275_v35, 0.0  ;;  %v289_v37 = vmul.f32 %v275_v35, %v275_v35 }
 0x106   :  { %v279_v38 = vrot.slane %v278_v36, 4 }
 0x107   :  { %v290_v39 = vsel %vm19_vm1, %v289_v37, 0.0 }
 0x108   :  { %v280_v40 = vadd.f32 %v279_v38, %v278_v36  ;;  %v291_v41 = vrot.slane %v290_v39, 4 }
 0x10a   :  { %v281_v42 = vrot.slane %v280_v40, 2  ;;  %v292_v43 = vadd.f32 %v291_v41, %v290_v39 }
 0x10c   :  { %v282_v44 = vadd.f32 %v281_v42, %v280_v40  ;;  %v293_v45 = vrot.slane %v292_v43, 2 }
 0x10e   :  { %v283_v46 = vrot.slane %v282_v44, 1  ;;  %v294_v47 = vadd.f32 %v293_v45, %v292_v43 }
 0x110   :  { %v284_v49 = vadd.f32 %v283_v46, %v282_v44  ;;  %v295_v50 = vrot.slane %v294_v47, 1 }
 0x112   :  { %v285_v52 = vadd.f32 %v284_v49, %v277_v48  ;;  %v296_v53 = vadd.f32 %v295_v50, %v294_v47 }
 0x114   :  { %287 = vst.msk [vmem:[%s508_s3] sm:$0x1] %vm269_vm0, %v285_v52  ;;  %v297_v54 = vadd.f32 %v296_v53, %v288_v51 }
 0x116   :  { %298 = vst.msk [vmem:[%s509_s4] sm:$0x1] %vm269_vm0, %v297_v54 }

// kernel: resnet_forward.47
= control target key start
LH: loop header
LB: loop body
LE: loop exit
PB: predicated region body
PF: predicated region fallthrough
CT: control target
= control target key end

     0   :  { %vm91_vm0 = vcmask 516096   ;;  %v151_v0 = vmov 0.0   ;;  %vm152_vm1 = vmmov 0   ;;  %vm19_vm2 = vcmask 523264   ;;  %s217_s3 = inlined_call_operand.vmem [shape: f32[1,64], index: 3, kind: output, shape index: {1}]   ;;  %s218_s4 = inlined_call_operand.vmem [shape: f32[1,64], index: 4, kind: output, shape index: {2}]   ;;  %s219_s1 = inlined_call_operand.vmem [shape: bf16[32,64], index: 1, kind: input, shape index: {}]   ;;  %s220_s0 = inlined_call_operand.vmem [shape: bf16[8,32], index: 0, kind: input, shape index: {}]   ;;  %s221_s2 = inlined_call_operand.vmem [shape: f32[8,64], index: 2, kind: output, shape index: {0}]  }
   0x1   :  { %139 = vmatprep.subr.bf16.mxu0 %v151_v0  ;;  %92 = vst.msk [vmem:[%s217_s3] sm:$0x1] %vm91_vm0, %v151_v0  ;;  %93 = vst.msk [vmem:[%s218_s4] sm:$0x1] %vm91_vm0, %v151_v0  ;;  %v149_v1 = vld [vmem:[%s219_s1] sm:$0xff]   ;;  %143 = vmatprep.mubr.msk.bf16.mxu0 %vm152_vm1, %v151_v0  ;;  %v150_v2 = vld [vmem:[%s219_s1 + $0x8] sm:$0xff]  }
   0x2   :  { %20 = vst.msk [vmem:[#allocation2] sm:$0xff] %vm19_vm2, %v151_v0  ;;  %140 = vmatpush3.bf16.msra.mxu0 %v149_v1  ;;  %v22_v3 = vld [vmem:[%s220_s0] sm:$0xf]  ;;  %vm39_vm3 = vcmask 261120  }
   0x3   :  { %141 = vmatprep.subr.bf16.mxu0 %v151_v0 }
   0x6   :  { %142 = vmatpush3.bf16.msra.mxu0 %v150_v2 }
   0x8   :  { %v99_v23 = vld [vmem:[%s217_s3] sm:$0x1] }
   0x9   :  { %144 = vmatmul.mubr.msk.bf16.vlgmr.msra.gmra.mrb[0].mxu0 %vm39_vm3, %v22_v3  ;;  %v21_v4 = vld [vmem:[#allocation2] sm:$0xff] }
   0xa   :  { %v110_v26 = vld [vmem:[%s218_s4] sm:$0x1] }
  0xdc   :  { %v77_v5 = vpop.f32.mrb[0].mxu0 }
  0xdd   :  { %v83_v6 = vadd.f32 %v77_v5, %v21_v4  ;;  %v145_v7 = vpop.f32.mrb[1].mxu0 }
  0xde   :  { %v80_v8 = vpop.f32.mrb[2].mxu0 }
  0xdf   :  { %85 = vst.msk [vmem:[#allocation2] sm:$0xff] %vm19_vm2, %v83_v6  ;;  %v146_v9 = vpop.f32.mrb[3].mxu0 }
  0xe6   :  { %v97_v10 = vld [vmem:[#allocation2] sm:$0xff] }
  0xe7   :  { %98 = vst.msk [vmem:[%s221_s2] sm:$0xff] %vm19_vm2, %v97_v10  ;;  %v100_v11 = vsel %vm19_vm2, %v97_v10, 0.0  ;;  %v111_v12 = vmul.f32 %v97_v10, %v97_v10 }
  0xe8   :  { %v101_v13 = vrot.slane %v100_v11, 4 }
  0xe9   :  { %v112_v14 = vsel %vm19_vm2, %v111_v12, 0.0 }
  0xea   :  { %v102_v15 = vadd.f32 %v101_v13, %v100_v11  ;;  %v113_v16 = vrot.slane %v112_v14, 4 }
  0xec   :  { %v103_v17 = vrot.slane %v102_v15, 2  ;;  %v114_v18 = vadd.f32 %v113_v16, %v112_v14 }
  0xee   :  { %v104_v19 = vadd.f32 %v103_v17, %v102_v15  ;;  %v115_v20 = vrot.slane %v114_v18, 2 }
  0xf0   :  { %v105_v21 = vrot.slane %v104_v19, 1  ;;  %v116_v22 = vadd.f32 %v115_v20, %v114_v18 }
  0xf2   :  { %v106_v24 = vadd.f32 %v105_v21, %v104_v19  ;;  %v117_v25 = vrot.slane %v116_v22, 1 }
  0xf4   :  { %v107_v27 = vadd.f32 %v106_v24, %v99_v23  ;;  %v118_v28 = vadd.f32 %v117_v25, %v116_v22 }
  0xf6   :  { %109 = vst.msk [vmem:[%s217_s3] sm:$0x1] %vm91_vm0, %v107_v27  ;;  %v119_v29 = vadd.f32 %v118_v28, %v110_v26 }
  0xf8   :  { %120 = vst.msk [vmem:[%s218_s4] sm:$0x1] %vm91_vm0, %v119_v29 }

// kernel: resnet_forward.48
= control target key start
LH: loop header
LB: loop body
LE: loop exit
PB: predicated region body
PF: predicated region fallthrough
CT: control target
= control target key end

     0   :  { %vm20_vm0 = vcmask 1040384   ;;  %vm21_vm1 = vsmask.f32 256  ;;  %s65_s0 = inlined_call_operand.vmem [shape: f32[1,128], index: 0, kind: input, shape index: {}]   ;;  %s66_s1 = inlined_call_operand.vmem [shape: f32[1,128], index: 1, kind: input, shape index: {}]   ;;  %s67_s2 = inlined_call_operand.vmem [shape: f32[1,128], index: 2, kind: input, shape index: {}]   ;;  %s68_s3 = inlined_call_operand.vmem [shape: bf16[1,128], index: 3, kind: output, shape index: {}]  }
   0x1   :  { %v14_v0 = vld [vmem:[%s65_s0] sm:$0x1]  ;;  %vm22_vm2 = vmand %vm20_vm0, %vm21_vm1 }
   0x2   :  { %v15_v1 = vld [vmem:[%s66_s1] sm:$0x1] }
   0x3   :  { %v17_v2 = vld [vmem:[%s67_s2] sm:$0x1]  ;;  %v16_v3 = vmul.f32 %v15_v1, %v14_v0 }
   0x4   :  { %v23_v5 = vld [vmem:[%s68_s3] sm:$0x1] }
   0x5   :  { %v18_v4 = vadd.f32 %v17_v2, %v16_v3 }
   0x7   :  { %v19_v6 = vpack.c.bf16 %v18_v4, %v18_v4 }
   0x9   :  { %v24_v7 = vsel %vm22_vm2, %v19_v6, %v23_v5 }
   0xa   :  { %25 = vst [vmem:[%s68_s3] sm:$0x1] %v24_v7 }

// kernel: resnet_forward.46
= control target key start
LH: loop header
LB: loop body
LE: loop exit
PB: predicated region body
PF: predicated region fallthrough
CT: control target
= control target key end

     0   :  { %vm21_vm0 = vcmask 1040384   ;;  %vm22_vm1 = vsmask.f32 256  ;;  %s66_s0 = inlined_call_operand.vmem [shape: f32[1,128], index: 0, kind: input, shape index: {}]   ;;  %s67_s1 = inlined_call_operand.vmem [shape: f32[1,128], index: 1, kind: input, shape index: {}]   ;;  %s68_s2 = inlined_call_operand.vmem [shape: f32[1,128], index: 2, kind: input, shape index: {}]   ;;  %s69_s3 = inlined_call_operand.vmem [shape: bf16[1,128], index: 3, kind: output, shape index: {}]  }
   0x1   :  { %v14_v0 = vld [vmem:[%s66_s0] sm:$0x1]  ;;  %vm23_vm2 = vmand %vm21_vm0, %vm22_vm1 }
   0x2   :  { %v15_v1 = vld [vmem:[%s67_s1] sm:$0x1] }
   0x3   :  { %v17_v2 = vld [vmem:[%s68_s2] sm:$0x1]  ;;  %v16_v3 = vmul.f32 %v15_v1, %v14_v0 }
   0x4   :  { %v24_v6 = vld [vmem:[%s69_s3] sm:$0x1] }
   0x5   :  { %v18_v4 = vadd.f32 %v17_v2, %v16_v3 }
   0x7   :  { %v19_v5 = vmax.f32 %v18_v4, 0.0 }
   0x9   :  { %v20_v7 = vpack.c.bf16 %v19_v5, %v19_v5 }
   0xb   :  { %v25_v8 = vsel %vm23_vm2, %v20_v7, %v24_v6 }
   0xc   :  { %26 = vst [vmem:[%s69_s3] sm:$0x1] %v25_v8 }

// kernel: resnet_forward.45
= control target key start
LH: loop header
LB: loop body
LE: loop exit
PB: predicated region body
PF: predicated region fallthrough
CT: control target
= control target key end

     0   :  { %vm270_vm0 = vcmask 516096   ;;  %v390_v1 = vmov 0.0   ;;  %vm391_vm1 = vmmov 0   ;;  %vm178_vm2 = vcmask 261120   ;;  %s507_s1 = inlined_call_operand.vmem [shape: bf16[288,64], index: 1, kind: input, shape index: {}]   ;;  %s508_s3 = inlined_call_operand.vmem [shape: f32[1,64], index: 3, kind: output, shape index: {1}]   ;;  %s509_s4 = inlined_call_operand.vmem [shape: f32[1,64], index: 4, kind: output, shape index: {2}]   ;;  %s510_s0 = inlined_call_operand.vmem [shape: bf16[8,288], index: 0, kind: input, shape index: {}]   ;;  %s511_s2 = inlined_call_operand.vmem [shape: f32[8,64], index: 2, kind: output, shape index: {0}]  }
   0x1   :  { %v369_v0 = vld [vmem:[%s507_s1 + $0x40] sm:$0xff]   ;;  %359 = vmatprep.subr.bf16.mxu1 %v390_v1  ;;  %271 = vst.msk [vmem:[%s508_s3] sm:$0x1] %vm270_vm0, %v390_v1  ;;  %272 = vst.msk [vmem:[%s509_s4] sm:$0x1] %vm270_vm0, %v390_v1  ;;  %363 = vmatprep.mubr.msk.bf16.mxu1 %vm391_vm1, %v390_v1  ;;  %v371_v3 = vld [vmem:[%s507_s1 + $0x48] sm:$0xff]  }
   0x2   :  { %v370_v2 = vld [vmem:[%s507_s1] sm:$0xff]   ;;  %334 = vmatprep.subr.bf16.mxu0 %v369_v0  ;;  %v372_v4 = vld [vmem:[%s507_s1 + $0x8] sm:$0xff]   ;;  %v373_v5 = vld [vmem:[%s507_s1 + $0x50] sm:$0xff]   ;;  %vm19_vm3 = vcmask 523264  }
   0x3   :  { %335 = vmatpush3.bf16.msra.mxu0 %v370_v2  ;;  %v374_v6 = vld [vmem:[%s507_s1 + $0x10] sm:$0xff]   ;;  %v375_v7 = vld [vmem:[%s507_s1 + $0x58] sm:$0xff]   ;;  %v377_v9 = vld [vmem:[%s507_s1 + $0x60] sm:$0xff]   ;;  %20 = vst.msk [vmem:[#allocation2] sm:$0xff] %vm19_vm3, %v390_v1 }
   0x4   :  { %336 = vmatprep.subr.bf16.mxu0 %v371_v3  ;;  %v376_v8 = vld [vmem:[%s507_s1 + $0x18] sm:$0xff]   ;;  %v378_v10 = vld [vmem:[%s507_s1 + $0x20] sm:$0xff]   ;;  %v379_v12 = vld [vmem:[%s507_s1 + $0x68] sm:$0xff]  }
   0x5   :  { %v383_v11 = vld [vmem:[%s507_s1 + $0x80] sm:$0xff]   ;;  %v386_v13 = vld [vmem:[%s507_s1 + $0x88] sm:$0xff]   ;;  %v381_v17 = vld [vmem:[%s507_s1 + $0x70] sm:$0xff]  }
   0x6   :  { %360 = vmatpush3.bf16.msra.mxu1 %v383_v11  ;;  %v22_v14 = vld [vmem:[%s510_s0] sm:$0xff]  ;;  %v380_v15 = vld [vmem:[%s507_s1 + $0x28] sm:$0xff]   ;;  %v382_v19 = vld [vmem:[%s507_s1 + $0x30] sm:$0xff]  }
   0x7   :  { %337 = vmatpush3.bf16.msra.mxu0 %v372_v4  ;;  %361 = vmatprep.subr.bf16.mxu1 %v390_v1  ;;  %v313_v16 = vcombine.high %v22_v14, %v22_v14  ;;  %v389_v18 = vld [vmem:[%s510_s0 + $0x8] ss:$0 sps:$4 sm:$0xff]   ;;  %v384_v20 = vld [vmem:[%s507_s1 + $0x78] sm:$0xff]   ;;  %v312_v22 = vcombine.low %v22_v14, %v22_v14 }
   0x8   :  { %338 = vmatprep.subr.bf16.mxu0 %v373_v5  ;;  %v385_v21 = vld [vmem:[%s507_s1 + $0x38] sm:$0xff]   ;;  %v278_v48 = vld [vmem:[%s508_s3] sm:$0x1] }
   0x9   :  { %214 = vmatprep.mubr.bf16.mxu0 %v313_v16  ;;  %v289_v51 = vld [vmem:[%s509_s4] sm:$0x1] }
   0xa   :  { %362 = vmatpush3.bf16.msra.mxu1 %v386_v13  ;;  %v21_v31 = vld [vmem:[#allocation2] sm:$0xff] }
   0xb   :  { %339 = vmatpush3.bf16.msra.mxu0 %v374_v6 }
   0xc   :  { %340 = vmatprep.subr.bf16.mxu0 %v375_v7 }
   0xd   :  { %364 = vmatmul.mubr.msk.bf16.vlgmr.msra.gmra.mrb[0].mxu1 %vm178_vm2, %v389_v18 }
   0xf   :  { %341 = vmatpush3.bf16.msra.mxu0 %v376_v8 }
  0x10   :  { %342 = vmatprep.subr.bf16.mxu0 %v377_v9 }
  0x13   :  { %343 = vmatpush3.bf16.msra.mxu0 %v378_v10 }
  0x14   :  { %344 = vmatprep.subr.bf16.mxu0 %v379_v12 }
  0x17   :  { %345 = vmatpush3.bf16.msra.mxu0 %v380_v15 }
  0x18   :  { %346 = vmatprep.subr.bf16.mxu0 %v381_v17 }
  0x1b   :  { %347 = vmatpush3.bf16.msra.mxu0 %v382_v19 }
  0x1c   :  { %348 = vmatprep.subr.bf16.mxu0 %v384_v20 }
  0x1f   :  { %349 = vmatpush3.bf16.msra.mxu0 %v385_v21 }
  0x22   :  { %215 = vmatmul.mubr.bf16.vlgmr.msra.gmra.mrb[0].mxu0 %v312_v22 }
  0xe0   :  { %v256_v23 = vpop.f32.mrb[0].mxu1 }
  0xe1   :  { %v365_v24 = vpop.f32.mrb[1].mxu1 }
  0xe2   :  { %v259_v25 = vpop.f32.mrb[2].mxu1 }
  0xe3   :  { %v366_v26 = vpop.f32.mrb[3].mxu1 }
  0xf5   :  { %v350_v27 = vpop.f32.mrb[0].mxu0 }
  0xf6   :  { %v351_v28 = vpop.f32.mrb[1].mxu0 }
  0xf7   :  { %v352_v29 = vadd.f32 %v351_v28, %v350_v27  ;;  %v353_v30 = vpop.f32.mrb[2].mxu0 }
  0xf8   :  { %v354_v32 = vpop.f32.mrb[3].mxu0 }
  0xf9   :  { %v257_v33 = vadd.f32 %v352_v29, %v256_v23 }
  0xfb   :  { %v262_v34 = vadd.f32 %v257_v33, %v21_v31 }
  0xfd   :  { %264 = vst.msk [vmem:[#allocation2] sm:$0xff] %vm19_vm3, %v262_v34 }
 0x104   :  { %v276_v35 = vld [vmem:[#allocation2] sm:$0xff] }
 0x105   :  { %277 = vst.msk [vmem:[%s511_s2] sm:$0xff] %vm19_vm3, %v276_v35  ;;  %v279_v36 = vsel %vm19_vm3, %v276_v35, 0.0  ;;  %v290_v37 = vmul.f32 %v276_v35, %v276_v35 }
 0x106   :  { %v280_v38 = vrot.slane %v279_v36, 4 }
 0x107   :  { %v291_v39 = vsel %vm19_vm3, %v290_v37, 0.0 }
 0x108   :  { %v281_v40 = vadd.f32 %v280_v38, %v279_v36  ;;  %v292_v41 = vrot.slane %v291_v39, 4 }
 0x10a   :  { %v282_v42 = vrot.slane %v281_v40, 2  ;;  %v293_v43 = vadd.f32 %v292_v41, %v291_v39 }
 0x10c   :  { %v283_v44 = vadd.f32 %v282_v42, %v281_v40  ;;  %v294_v45 = vrot.slane %v293_v43, 2 }
 0x10e   :  { %v284_v46 = vrot.slane %v283_v44, 1  ;;  %v295_v47 = vadd.f32 %v294_v45, %v293_v43 }
 0x110   :  { %v285_v49 = vadd.f32 %v284_v46, %v283_v44  ;;  %v296_v50 = vrot.slane %v295_v47, 1 }
 0x112   :  { %v286_v52 = vadd.f32 %v285_v49, %v278_v48  ;;  %v297_v53 = vadd.f32 %v296_v50, %v295_v47 }
 0x114   :  { %288 = vst.msk [vmem:[%s508_s3] sm:$0x1] %vm270_vm0, %v286_v52  ;;  %v298_v54 = vadd.f32 %v297_v53, %v289_v51 }
 0x116   :  { %299 = vst.msk [vmem:[%s509_s4] sm:$0x1] %vm270_vm0, %v298_v54 }

// kernel: resnet_forward.50
= control target key start
LH: loop header
LB: loop body
LE: loop exit
PB: predicated region body
PF: predicated region fallthrough
CT: control target
= control target key end

     0   :  { %vm27_vm0 = vcmask 1040384   ;;  %vm28_vm1 = vsmask.f32 256  ;;  %s80_s0 = inlined_call_operand.vmem [shape: f32[1,128], index: 0, kind: input, shape index: {}]   ;;  %s81_s1 = inlined_call_operand.vmem [shape: f32[1,128], index: 1, kind: input, shape index: {}]   ;;  %s82_s2 = inlined_call_operand.vmem [shape: f32[1,128], index: 2, kind: input, shape index: {}]   ;;  %s83_s3 = inlined_call_operand.vmem [shape: bf16[1,128], index: 3, kind: input, shape index: {}]   ;;  %s84_s4 = inlined_call_operand.vmem [shape: bf16[1,128], index: 4, kind: output, shape index: {}]  }
   0x1   :  { %v17_v0 = vld [vmem:[%s80_s0] sm:$0x1]  ;;  %vm29_vm2 = vmand %vm27_vm0, %vm28_vm1 }
   0x2   :  { %v18_v1 = vld [vmem:[%s81_s1] sm:$0x1] }
   0x3   :  { %v20_v2 = vld [vmem:[%s82_s2] sm:$0x1]  ;;  %v19_v3 = vmul.f32 %v18_v1, %v17_v0 }
   0x4   :  { %v22_v4 = vld [vmem:[%s83_s3] sm:$0x1] }
   0x5   :  { %v23_v5 = vunpack.c.l.bf16 %v22_v4  ;;  %v21_v6 = vadd.f32 %v20_v2, %v19_v3  ;;  %v30_v9 = vld [vmem:[%s84_s4] sm:$0x1] }
   0x7   :  { %v24_v7 = vadd.f32 %v23_v5, %v21_v6 }
   0x9   :  { %v25_v8 = vmax.f32 %v24_v7, 0.0 }
   0xb   :  { %v26_v10 = vpack.c.bf16 %v25_v8, %v25_v8 }
   0xd   :  { %v31_v11 = vsel %vm29_vm2, %v26_v10, %v30_v9 }
   0xe   :  { %32 = vst [vmem:[%s84_s4] sm:$0x1] %v31_v11 }

// kernel: resnet_forward.49
= control target key start
LH: loop header
LB: loop body
LE: loop exit
PB: predicated region body
PF: predicated region fallthrough
CT: control target
= control target key end

     0   :  { %vm461_vm0 = vcmask 516096   ;;  %vm19_vm1 = vcmask 523264   ;;  %v649_v1 = vmov 0.0   ;;  %vm650_vm2 = vmmov 0   ;;  %s832_s1 = inlined_call_operand.vmem [shape: bf16[576,64], index: 1, kind: input, shape index: {}]   ;;  %s833_s3 = inlined_call_operand.vmem [shape: f32[1,64], index: 3, kind: output, shape index: {1}]   ;;  %s834_s4 = inlined_call_operand.vmem [shape: f32[1,64], index: 4, kind: output, shape index: {2}]   ;;  %s835_s0 = inlined_call_operand.vmem [shape: bf16[8,576], index: 0, kind: input, shape index: {}]   ;;  %s836_s2 = inlined_call_operand.vmem [shape: f32[8,64], index: 2, kind: output, shape index: {0}]  }
   0x1   :  { %v608_v0 = vld [vmem:[%s832_s1 + $0x40] sm:$0xff]   ;;  %462 = vst.msk [vmem:[%s833_s3] sm:$0x1] %vm461_vm0, %v649_v1  ;;  %463 = vst.msk [vmem:[%s834_s4] sm:$0x1] %vm461_vm0, %v649_v1  ;;  %v612_v5 = vld [vmem:[%s832_s1 + $0x48] sm:$0xff]  }
   0x2   :  { %20 = vst.msk [vmem:[#allocation2] sm:$0xff] %vm19_vm1, %v649_v1  ;;  %v609_v2 = vld [vmem:[%s832_s1 + $0xc0] sm:$0xff]   ;;  %545 = vmatprep.subr.bf16.mxu0 %v608_v0  ;;  %v613_v6 = vld [vmem:[%s832_s1 + $0xc8] sm:$0xff]   ;;  %v616_v9 = vld [vmem:[%s832_s1 + $0x50] sm:$0xff]  }
   0x3   :  { %v610_v3 = vld [vmem:[%s832_s1] sm:$0xff]   ;;  %567 = vmatprep.subr.bf16.mxu1 %v609_v2  ;;  %v614_v7 = vld [vmem:[%s832_s1 + $0x8] sm:$0xff]   ;;  %v617_v10 = vld [vmem:[%s832_s1 + $0xd0] sm:$0xff]  }
   0x4   :  { %v611_v4 = vld [vmem:[%s832_s1 + $0x80] sm:$0xff]   ;;  %546 = vmatpush3.bf16.msra.mxu0 %v610_v3  ;;  %v615_v8 = vld [vmem:[%s832_s1 + $0x88] sm:$0xff]   ;;  %v618_v11 = vld [vmem:[%s832_s1 + $0x10] sm:$0xff]  }
   0x5   :  { %568 = vmatpush3.bf16.msra.mxu1 %v611_v4  ;;  %547 = vmatprep.subr.bf16.mxu0 %v612_v5  ;;  %v619_v12 = vld [vmem:[%s832_s1 + $0x90] sm:$0xff]   ;;  %v620_v13 = vld [vmem:[%s832_s1 + $0x58] sm:$0xff]   ;;  %v624_v17 = vld [vmem:[%s832_s1 + $0x60] sm:$0xff]  }
   0x6   :  { %569 = vmatprep.subr.bf16.mxu1 %v613_v6  ;;  %v621_v14 = vld [vmem:[%s832_s1 + $0xd8] sm:$0xff]   ;;  %v625_v18 = vld [vmem:[%s832_s1 + $0xe0] sm:$0xff]   ;;  %v628_v21 = vld [vmem:[%s832_s1 + $0x68] sm:$0xff]  }
   0x7   :  { %v622_v15 = vld [vmem:[%s832_s1 + $0x18] sm:$0xff]   ;;  %v626_v19 = vld [vmem:[%s832_s1 + $0x20] sm:$0xff]   ;;  %v629_v22 = vld [vmem:[%s832_s1 + $0xe8] sm:$0xff]  }
   0x8   :  { %548 = vmatpush3.bf16.msra.mxu0 %v614_v7  ;;  %v623_v16 = vld [vmem:[%s832_s1 + $0x98] sm:$0xff]   ;;  %v627_v20 = vld [vmem:[%s832_s1 + $0xa0] sm:$0xff]   ;;  %v630_v23 = vld [vmem:[%s832_s1 + $0x28] sm:$0xff]  }
   0x9   :  { %570 = vmatpush3.bf16.msra.mxu1 %v615_v8  ;;  %549 = vmatprep.subr.bf16.mxu0 %v616_v9  ;;  %v631_v24 = vld [vmem:[%s832_s1 + $0xa8] sm:$0xff]   ;;  %v632_v25 = vld [vmem:[%s832_s1 + $0x70] sm:$0xff]   ;;  %v636_v29 = vld [vmem:[%s832_s1 + $0x78] sm:$0xff]  }
   0xa   :  { %571 = vmatprep.subr.bf16.mxu1 %v617_v10  ;;  %v633_v26 = vld [vmem:[%s832_s1 + $0xf0] sm:$0xff]   ;;  %v637_v30 = vld [vmem:[%s832_s1 + $0xf8] sm:$0xff]   ;;  %v22_v33 = vld [vmem:[%s835_s0] sm:$0xff] }
   0xb   :  { %v634_v27 = vld [vmem:[%s832_s1 + $0x30] sm:$0xff]   ;;  %v638_v31 = vld [vmem:[%s832_s1 + $0x38] sm:$0xff]   ;;  %v503_v34 = vcombine.low %v22_v33, %v22_v33  ;;  %v504_v35 = vcombine.high %v22_v33, %v22_v33  ;;  %v23_v36 = vld [vmem:[%s835_s0 + $0x8] sm:$0xff] }
   0xc   :  { %550 = vmatpush3.bf16.msra.mxu0 %v618_v11  ;;  %v635_v28 = vld [vmem:[%s832_s1 + $0xb0] sm:$0xff]   ;;  %v639_v32 = vld [vmem:[%s832_s1 + $0xb8] sm:$0xff]   ;;  %v505_v37 = vcombine.low %v23_v36, %v23_v36  ;;  %v506_v38 = vcombine.high %v23_v36, %v23_v36  ;;  %v645_v39 = vld [vmem:[%s832_s1 + $0x100] sm:$0xff]  }
   0xd   :  { %572 = vmatpush3.bf16.msra.mxu1 %v619_v12  ;;  %551 = vmatprep.subr.bf16.mxu0 %v620_v13  ;;  %v646_v40 = vld [vmem:[%s832_s1 + $0x108] sm:$0xff]   ;;  %v647_v41 = vld [vmem:[%s832_s1 + $0x110] sm:$0xff]   ;;  %v648_v42 = vld [vmem:[%s832_s1 + $0x118] sm:$0xff]  }
   0xe   :  { %573 = vmatprep.subr.bf16.mxu1 %v621_v14  ;;  %366 = vmatprep.mubr.bf16.mxu0 %v504_v35  ;;  %v642_v43 = vld [vmem:[%s835_s0 + $0x10] ss:$0 sps:$4 sm:$0xff]   ;;  %v21_v55 = vld [vmem:[#allocation2] sm:$0xff] }
   0xf   :  { %406 = vmatprep.mubr.bf16.mxu1 %v506_v38  ;;  %v469_v11 = vld [vmem:[%s833_s3] sm:$0x1] }
  0x10   :  { %552 = vmatpush3.bf16.msra.mxu0 %v622_v15  ;;  %v480_v14 = vld [vmem:[%s834_s4] sm:$0x1] }
  0x11   :  { %574 = vmatpush3.bf16.msra.mxu1 %v623_v16  ;;  %553 = vmatprep.subr.bf16.mxu0 %v624_v17 }
  0x12   :  { %575 = vmatprep.subr.bf16.mxu1 %v625_v18 }
  0x14   :  { %554 = vmatpush3.bf16.msra.mxu0 %v626_v19 }
  0x15   :  { %576 = vmatpush3.bf16.msra.mxu1 %v627_v20  ;;  %555 = vmatprep.subr.bf16.mxu0 %v628_v21 }
  0x16   :  { %577 = vmatprep.subr.bf16.mxu1 %v629_v22 }
  0x18   :  { %556 = vmatpush3.bf16.msra.mxu0 %v630_v23 }
  0x19   :  { %578 = vmatpush3.bf16.msra.mxu1 %v631_v24  ;;  %557 = vmatprep.subr.bf16.mxu0 %v632_v25 }
  0x1a   :  { %579 = vmatprep.subr.bf16.mxu1 %v633_v26 }
  0x1c   :  { %558 = vmatpush3.bf16.msra.mxu0 %v634_v27 }
  0x1d   :  { %580 = vmatpush3.bf16.msra.mxu1 %v635_v28  ;;  %559 = vmatprep.subr.bf16.mxu0 %v636_v29 }
  0x1e   :  { %581 = vmatprep.subr.bf16.mxu1 %v637_v30 }
  0x20   :  { %560 = vmatpush3.bf16.msra.mxu0 %v638_v31 }
  0x21   :  { %582 = vmatpush3.bf16.msra.mxu1 %v639_v32  ;;  %594 = vmatprep.subr.bf16.mxu0 %v649_v1 }
  0x23   :  { %367 = vmatmul.mubr.bf16.vlgmr.msra.gmra.mrb[0].mxu0 %v503_v34 }
  0x24   :  { %407 = vmatmul.mubr.bf16.vlgmr.msra.gmra.mrb[0].mxu1 %v505_v37  ;;  %595 = vmatpush3.bf16.msra.mxu0 %v645_v39 }
  0x25   :  { %596 = vmatprep.subr.bf16.mxu0 %v649_v1  ;;  %602 = vmatprep.mubr.msk.bf16.mxu0 %vm650_vm2, %v649_v1 }
  0x28   :  { %597 = vmatpush3.bf16.msra.mxu0 %v646_v40 }
  0x29   :  { %598 = vmatprep.subr.bf16.mxu0 %v649_v1 }
  0x2c   :  { %599 = vmatpush3.bf16.msra.mxu0 %v647_v41 }
  0x2d   :  { %600 = vmatprep.subr.bf16.mxu0 %v649_v1 }
  0x30   :  { %601 = vmatpush3.bf16.msra.mxu0 %v648_v42 }
  0x33   :  { %603 = vmatmul.mubr.msk.bf16.vlgmr.msra.gmra.mrb[4].mxu0 %vm19_vm1, %v642_v43 }
  0xf6   :  { %v561_v44 = vpop.f32.mrb[0].mxu0 }
  0xf7   :  { %v583_v45 = vpop.f32.mrb[0].mxu1  ;;  %v562_v46 = vpop.f32.mrb[1].mxu0 }
  0xf8   :  { %v563_v47 = vadd.f32 %v562_v46, %v561_v44  ;;  %v584_v48 = vpop.f32.mrb[1].mxu1  ;;  %v564_v49 = vpop.f32.mrb[2].mxu0 }
  0xf9   :  { %v585_v50 = vadd.f32 %v584_v48, %v583_v45  ;;  %v565_v51 = vpop.f32.mrb[3].mxu0  ;;  %v586_v52 = vpop.f32.mrb[2].mxu1 }
  0xfa   :  { %v587_v53 = vpop.f32.mrb[3].mxu1 }
  0xfb   :  { %v409_v54 = vadd.f32 %v585_v50, %v563_v47 }
 0x106   :  { %v448_v56 = vpop.f32.mrb[4].mxu0 }
 0x107   :  { %v449_v57 = vadd.f32 %v448_v56, %v409_v54  ;;  %v604_v58 = vpop.f32.mrb[5].mxu0 }
 0x108   :  { %v451_v59 = vpop.f32.mrb[6].mxu0 }
 0x109   :  { %v454_v60 = vadd.f32 %v449_v57, %v21_v55  ;;  %v605_v61 = vpop.f32.mrb[7].mxu0 }
 0x10b   :  { %455 = vst.msk [vmem:[#allocation2] sm:$0xff] %vm19_vm1, %v454_v60 }
 0x112   :  { %v467_v62 = vld [vmem:[#allocation2] sm:$0xff] }
 0x113   :  { %468 = vst.msk [vmem:[%s836_s2] sm:$0xff] %vm19_vm1, %v467_v62  ;;  %v470_v63 = vsel %vm19_vm1, %v467_v62, 0.0  ;;  %v481_v0 = vmul.f32 %v467_v62, %v467_v62 }
 0x114   :  { %v471_v1 = vrot.slane %v470_v63, 4 }
 0x115   :  { %v482_v2 = vsel %vm19_vm1, %v481_v0, 0.0 }
 0x116   :  { %v472_v3 = vadd.f32 %v471_v1, %v470_v63  ;;  %v483_v4 = vrot.slane %v482_v2, 4 }
 0x118   :  { %v473_v5 = vrot.slane %v472_v3, 2  ;;  %v484_v6 = vadd.f32 %v483_v4, %v482_v2 }
 0x11a   :  { %v474_v7 = vadd.f32 %v473_v5, %v472_v3  ;;  %v485_v8 = vrot.slane %v484_v6, 2 }
 0x11c   :  { %v475_v9 = vrot.slane %v474_v7, 1  ;;  %v486_v10 = vadd.f32 %v485_v8, %v484_v6 }
 0x11e   :  { %v476_v12 = vadd.f32 %v475_v9, %v474_v7  ;;  %v487_v13 = vrot.slane %v486_v10, 1 }
 0x120   :  { %v477_v15 = vadd.f32 %v476_v12, %v469_v11  ;;  %v488_v16 = vadd.f32 %v487_v13, %v486_v10 }
 0x122   :  { %479 = vst.msk [vmem:[%s833_s3] sm:$0x1] %vm461_vm0, %v477_v15  ;;  %v489_v17 = vadd.f32 %v488_v16, %v480_v14 }
 0x124   :  { %490 = vst.msk [vmem:[%s834_s4] sm:$0x1] %vm461_vm0, %v489_v17 }

// kernel: resnet_forward.51
= control target key start
LH: loop header
LB: loop body
LE: loop exit
PB: predicated region body
PF: predicated region fallthrough
CT: control target
= control target key end

     0   :  { %v45_v3 = vlaneseq  ;;  %v376_v8 = vmov 0.0   ;;  %vm65_vm0 = vcmask 1041409   ;;  %s585_s0 = inlined_call_operand.vmem [shape: bf16[2,1,64], index: 0, kind: input, shape index: {}]   ;;  %s586_s1 = inlined_call_operand.vmem [shape: f32[64,256], index: 1, kind: input, shape index: {}]   ;;  %s587_s2 = inlined_call_operand.vmem [shape: f32[1,256], index: 2, kind: input, shape index: {}]   ;;  %s588_s3 = inlined_call_operand.vmem [shape: f32[256,128], index: 3, kind: input, shape index: {}]   ;;  %s589_s4 = inlined_call_operand.vmem [shape: f32[1,128], index: 4, kind: input, shape index: {}]   ;;  %s590_s5 = inlined_call_operand.hbm [shape: f32[2,128], index: 5, kind: output, shape index: {}]  }
   0x1   :  { %v28_v0 = vld [vmem:[%s586_s1 + $0x8] sm:$0xff]  ;;  %v30_v1 = vld [vmem:[%s586_s1 + $0x18] sm:$0xff]  ;;  %v27_v2 = vld [vmem:[%s586_s1] sm:$0xff]  ;;  %134 = vmatprep.mubr.f32.mxu0 %v376_v8 }
   0x2   :  { %v302_v4 = vpack.c.bf16 %v30_v1, %v28_v0  ;;  %v29_v5 = vld [vmem:[%s586_s1 + $0x10] sm:$0xff]  ;;  %v32_v6 = vld [vmem:[%s586_s1 + $0x28] sm:$0xff]  ;;  %v34_v7 = vld [vmem:[%s586_s1 + $0x38] sm:$0xff]  ;;  %v438_v15 = vshrl.u32 %v45_v3, 7 }
   0x3   :  { %v304_v9 = vpack.c.bf16 %v29_v5, %v27_v2  ;;  %v306_v10 = vpack.c.bf16 %v34_v7, %v32_v6  ;;  %v31_v11 = vld [vmem:[%s586_s1 + $0x20] sm:$0xff]  ;;  %v33_v12 = vld [vmem:[%s586_s1 + $0x30] sm:$0xff]  ;;  %v36_v13 = vld [vmem:[%s586_s1 + $0x48] sm:$0xff] }
   0x4   :  { %303 = vmatprep.subr.bf16.mxu0 %v302_v4  ;;  %v38_v14 = vld [vmem:[%s586_s1 + $0x58] sm:$0xff]  ;;  %v308_v16 = vpack.c.bf16 %v33_v12, %v31_v11  ;;  %v35_v17 = vld [vmem:[%s586_s1 + $0x40] sm:$0xff]  ;;  %v37_v18 = vld [vmem:[%s586_s1 + $0x50] sm:$0xff]  ;;  %v468_v28 = vsub.s32 0, %v438_v15 }
   0x5   :  { %305 = vmatpush1.bf16.msra.mxu0 %v304_v9  ;;  %v40_v19 = vld [vmem:[%s586_s1 + $0x68] sm:$0xff]  ;;  %v310_v20 = vpack.c.bf16 %v38_v14, %v36_v13  ;;  %v42_v21 = vld [vmem:[%s586_s1 + $0x78] sm:$0xff]  ;;  %v21_v22 = vld [vmem:[%s585_s0] sm:$0x1]  ;;  %v312_v27 = vpack.c.bf16 %v37_v18, %v35_v17 }
   0x6   :  { %307 = vmatprep.subr.bf16.mxu0 %v306_v10  ;;  %v22_v23 = vld [vmem:[%s585_s0 + $0x1] sm:$0x1]  ;;  %v158_v25 = vld [vmem:[%s588_s3 + $0x88] sm:$0xff]  ;;  %v159_v31 = vld [vmem:[%s588_s3 + $0x90] sm:$0xff]  ;;  %v23_v33 = vunpack.c.l.bf16 %v21_v22  ;;  %v314_v40 = vpack.c.bf16 %v42_v21, %v40_v19 }
   0x7   :  { %v157_v24 = vld [vmem:[%s588_s3 + $0x80] sm:$0xff]  ;;  %v142_v30 = vld [vmem:[%s588_s3 + $0x8] sm:$0xff]  ;;  %v160_v32 = vld [vmem:[%s588_s3 + $0x98] sm:$0xff]  ;;  %v24_v34 = vunpack.c.l.bf16 %v22_v23 }
   0x8   :  { %v141_v26 = vld [vmem:[%s588_s3] sm:$0xff]  ;;  %v318_v29 = vpack.c.bf16 %v158_v25, %v157_v24  ;;  %v322_v36 = vpack.c.bf16 %v160_v32, %v159_v31  ;;  %v143_v37 = vld [vmem:[%s588_s3 + $0x10] sm:$0xff]  ;;  %v144_v38 = vld [vmem:[%s588_s3 + $0x18] sm:$0xff]  ;;  %v60_v49 = vrot.slane %v23_v33, %v468_v28 }
   0x9   :  { %309 = vmatpush1.bf16.msra.mxu0 %v308_v16  ;;  %v320_v35 = vpack.c.bf16 %v142_v30, %v141_v26  ;;  %v161_v39 = vld [vmem:[%s588_s3 + $0xa0] sm:$0xff]  ;;  %v41_v42 = vld [vmem:[%s586_s1 + $0x70] sm:$0xff]  ;;  %v162_v43 = vld [vmem:[%s588_s3 + $0xa8] sm:$0xff]  ;;  %v324_v44 = vpack.c.bf16 %v144_v38, %v143_v37  ;;  %v64_v50 = vrot.slane %v24_v34, %v468_v28 }
   0xa   :  { %311 = vmatprep.subr.bf16.mxu0 %v310_v20  ;;  %v39_v41 = vld [vmem:[%s586_s1 + $0x60] sm:$0xff]  ;;  %319 = vmatprep.subr.bf16.mxu1 %v318_v29  ;;  %v326_v45 = vpack.c.bf16 %v162_v43, %v161_v39  ;;  %v146_v47 = vld [vmem:[%s588_s3 + $0x28] sm:$0xff]  ;;  %v163_v51 = vld [vmem:[%s588_s3 + $0xb0] sm:$0xff] }
   0xb   :  { %321 = vmatpush3.bf16.msra.mxu1 %v320_v35  ;;  %v145_v46 = vld [vmem:[%s588_s3 + $0x20] sm:$0xff]  ;;  %v316_v48 = vpack.c.bf16 %v41_v42, %v39_v41  ;;  %v164_v52 = vld [vmem:[%s588_s3 + $0xb8] sm:$0xff]  ;;  %v147_v55 = vld [vmem:[%s588_s3 + $0x30] sm:$0xff] }
   0xc   :  { %323 = vmatprep.subr.bf16.mxu1 %v322_v36  ;;  %v328_v53 = vpack.c.bf16 %v146_v47, %v145_v46  ;;  %v330_v54 = vpack.c.bf16 %v164_v52, %v163_v51  ;;  %v148_v56 = vld [vmem:[%s588_s3 + $0x38] sm:$0xff] }
   0xd   :  { %313 = vmatpush1.bf16.msra.mxu0 %v312_v27 }
   0xe   :  { %315 = vmatprep.subr.bf16.mxu0 %v314_v40 }
   0xf   :  { %325 = vmatpush3.bf16.msra.mxu1 %v324_v44 }
  0x10   :  { %327 = vmatprep.subr.bf16.mxu1 %v326_v45 }
  0x11   :  { %10 = vsyncpa [#allocation3], 0  ;;  %317 = vmatpush1.bf16.msra.mxu0 %v316_v48  ;;  %v66_v57 = vsel %vm65_vm0, %v64_v50, %v60_v49  ;;  %vm67_vm1 = vcmask 523264   ;;  %v165_v58 = vld [vmem:[%s588_s3 + $0xc0] sm:$0xff]  ;;  %v166_v59 = vld [vmem:[%s588_s3 + $0xc8] sm:$0xff]  ;;  %v332_v60 = vpack.c.bf16 %v148_v56, %v147_v55  ;;  %v51_v21 = vsub.s32 1, %v438_v15 }
  0x12   :  { %v334_v61 = vpack.c.bf16 %v166_v59, %v165_v58  ;;  %v149_v62 = vld [vmem:[%s588_s3 + $0x40] sm:$0xff]  ;;  %v150_v63 = vld [vmem:[%s588_s3 + $0x48] sm:$0xff]  ;;  %v167_v0 = vld [vmem:[%s588_s3 + $0xd0] sm:$0xff]  ;;  %s377_s16 = smov [#allocation2]  }
  0x13   :  { %329 = vmatpush3.bf16.msra.mxu1 %v328_v53  ;;  %v168_v1 = vld [vmem:[%s588_s3 + $0xd8] sm:$0xff]  ;;  %v336_v2 = vpack.c.bf16 %v150_v63, %v149_v62  ;;  %v151_v4 = vld [vmem:[%s588_s3 + $0x50] sm:$0xff]  ;;  %v169_v6 = vld [vmem:[%s588_s3 + $0xe0] sm:$0xff]  ;;  %s257_s17 = sshll.u32 %s377_s16, 4  ;;  %s258_s17 = int_to_ptr.vmem [resolvable:$true] %s257_s17 }
  0x14   :  { %265 = vmatmul.mubr.msk.f32.vlgmr.msra.gmra.mrb[0].mxu0 %vm67_vm1, %v66_v57  ;;  %331 = vmatprep.subr.bf16.mxu1 %v330_v54  ;;  %v338_v3 = vpack.c.bf16 %v168_v1, %v167_v0  ;;  %v152_v5 = vld [vmem:[%s588_s3 + $0x58] sm:$0xff]  ;;  %v170_v7 = vld [vmem:[%s588_s3 + $0xe8] sm:$0xff]  ;;  %v153_v10 = vld [vmem:[%s588_s3 + $0x60] sm:$0xff]  ;;  %p357_p1 = scmp.lt.s32.totalorder %s258_s17, %s258_s17 }
  0x15   :  { %v340_v8 = vpack.c.bf16 %v152_v5, %v151_v4  ;;  %v342_v9 = vpack.c.bf16 %v170_v7, %v169_v6  ;;  %v154_v11 = vld [vmem:[%s588_s3 + $0x68] sm:$0xff]  ;;  %v171_v13 = vld [vmem:[%s588_s3 + $0xf0] sm:$0xff]  ;;  %v172_v14 = vld [vmem:[%s588_s3 + $0xf8] sm:$0xff] }
  0x16   :  { %v344_v12 = vpack.c.bf16 %v154_v11, %v153_v10  ;;  %v346_v16 = vpack.c.bf16 %v172_v14, %v171_v13  ;;  %v155_v17 = vld [vmem:[%s588_s3 + $0x70] sm:$0xff]  ;;  %v156_v18 = vld [vmem:[%s588_s3 + $0x78] sm:$0xff]  ;;  %v43_v20 = vld [vmem:[%s587_s2] sm:$0x3]  ;;  %s352_s2 = scalar_lea.vmem %s258_s17, 32 }
  0x17   :  { %333 = vmatpush3.bf16.msra.mxu1 %v332_v60  ;;  %v348_v19 = vpack.c.bf16 %v156_v18, %v155_v17  ;;  %v48_v22 = vrot.slane %v43_v20, %v468_v28  ;;  %v52_v23 = vrot.slane %v43_v20, %v51_v21  ;;  %v266_v31 = vld [vmem:[%s589_s4] ss:$0 sm:$0xff]  ;;  %p353_p0 = scmp.ne.s32.totalorder %s258_s17, %s352_s2  ;;  %p358_p2 = scmp.lt.s32.totalorder %s352_s2, %s352_s2 }
  0x18   :  { %335 = vmatprep.subr.bf16.mxu1 %v334_v61 }
  0x19   :  { %p359_p3 = por %p358_p2, %p357_p1 }
  0x1b   :  { %337 = vmatpush3.bf16.msra.mxu1 %v336_v2  ;;  %p360_p4 = pnand %p359_p3, %p353_p0 }
  0x1c   :  { %339 = vmatprep.subr.bf16.mxu1 %v338_v3 }
  0x1f   :  { %341 = vmatpush3.bf16.msra.mxu1 %v340_v8 }
  0x20   :  { %343 = vmatprep.subr.bf16.mxu1 %v342_v9 }
  0x23   :  { %345 = vmatpush3.bf16.msra.mxu1 %v344_v12 }
  0x24   :  { %347 = vmatprep.subr.bf16.mxu1 %v346_v16 }
  0x27   :  { %349 = vmatpush3.bf16.msra.mxu1 %v348_v19 }
  0xe7   :  { %v136_v24 = vpop.f32.mrb[0].mxu0 }
  0xe8   :  { %v137_v25 = vadd.f32 %v136_v24, %v48_v22  ;;  %v138_v26 = vpop.f32.mrb[1].mxu0 }
  0xe9   :  { %v139_v27 = vadd.f32 %v138_v26, %v52_v23 }
  0xeb   :  { %244 = vmatprep.mubr.f32.mxu1 %v139_v27 }
  0xec   :  { %245 = vmatmul.mubr.f32.vlgmr.msra.gmra.mrb[0].mxu1 %v137_v25 }
 0x1bf   :  { %v299_v29 = vpop.f32.mrb[0].mxu1 }
 0x1c0   :  { %v300_v30 = vpop.f32.mrb[1].mxu1 }
 0x1c1   :  { %v301_v32 = vadd.f32 %v300_v30, %v299_v29 }
 0x1c3   :  { %v247_v33 = vadd.f32 %v301_v32, %v266_v31 }
 0x1c5   :  { %250 = vst [vmem:[#allocation2] sm:$0x3] %v247_v33 }
 0x1c6   :  { %363 = shalt.err (!%p360_p4)
}
 0x1c7   :  { %s364_s20 = scalar_lea.hbm %s590_s5, 32 }
 0x1c8   :  { %p365_p5 = scmp.ne.s32.totalorder %s590_s5, %s364_s20  ;;  %p368_p6 = scmp.lt.u32.totalorder %s364_s20, %s590_s5 }
 0x1ca   :  { %p370_p7 = pnand %p368_p6, %p365_p5 }
 0x1cc   :  { %373 = shalt.err (!%p370_p7)
}
 0x1cd   :  { %260 = dma.vmem_to_hbm [thread:$0]  %s258_s17, 32, %s590_s5, [#allocation3]  }
 0x1ce   :  { %374 = dma.done.wait [#allocation3], 32  }
 0x1cf   :  { %375 = vsyncadd [#allocation3], 4294967264 }
 0x1d0   :  { %264 = vsyncpa [#allocation3], 1 }

</bundles_post_ra>
